<compile_context>
chip_gen: v5e
topology: v5e:2x2
jax: 0.10.0
libtpu: 0.0.40
codegen_flags: <defaults>
</compile_context>

<pallas_src>
import functools
import math

import jax
import jax.numpy as jnp
from jax.experimental import pallas as pl
from jax.experimental.pallas import tpu as pltpu


# ----------------------------------------------------------------------------
# Fused kernel: both MHA passes for a tile of Bt batch elements per grid step
# ----------------------------------------------------------------------------
def _fused_mha2_kernel(q_ref, k_ref, v_ref,
                       wq_ref, wk_ref, wv_ref, wo_ref,
                       bq_ref, bk_ref, bv_ref, bo_ref,
                       q_out, k_out, v_out, dq_out, dk_out, dv_out,
                       o_scr, *, H, Bt, scale):
    S = q_ref.shape[0]
    E = wo_ref.shape[0]
    Dh = E // H
    bf16 = jnp.bfloat16

    # weights are pre-transposed + bf16 in the wrapper (x @ W == x @ Worig.T)
    wq = wq_ref[...]
    wk = wk_ref[...]
    wv = wv_ref[...]
    wo = wo_ref[...]
    bq = bq_ref[...]          # (1, E) f32
    bk = bk_ref[...]
    bv = bv_ref[...]
    bo = bo_ref[...]

    # causal mask built once per grid step (shared by all batches/heads)
    row = jax.lax.broadcasted_iota(jnp.int32, (S, S), 0)
    col = jax.lax.broadcasted_iota(jnp.int32, (S, S), 1)
    keep = col <= row

    def attn_pass(xq, xk, xv, causal):
        # xq/xk/xv: (S, E) f32 -> bf16 operands, f32 accumulation on the MXU
        q_p = jnp.dot(xq.astype(bf16), wq, preferred_element_type=jnp.float32) + bq
        k_p = jnp.dot(xk.astype(bf16), wk, preferred_element_type=jnp.float32) + bk
        v_p = jnp.dot(xv.astype(bf16), wv, preferred_element_type=jnp.float32) + bv

        def one_head(h):
            sl = slice(h * Dh, (h + 1) * Dh)
            # scale q (SxDh) instead of the SxS score matrix
            qh = (q_p[:, sl] * scale).astype(bf16)
            kh = k_p[:, sl].astype(bf16)
            vh = v_p[:, sl].astype(bf16)
            # q . k^T without an in-kernel transpose: contract last dims of both
            s = jax.lax.dot_general(qh, kh, (((1,), (1,)), ((), ())),
                                    preferred_element_type=jnp.float32)
            if causal:
                s = jnp.where(keep, s, jnp.float32(-1e30))
            m = jnp.max(s, axis=-1, keepdims=True)
            p = jnp.exp(s - m)
            p = p * pl.reciprocal(jnp.sum(p, axis=-1, keepdims=True), approx=True)
            return jnp.dot(p.astype(bf16), vh, preferred_element_type=jnp.float32)

        if H == 1:
            o = one_head(0)
        else:
            for h in range(H):                      # static loop; H known at trace time
                o_scr[:, h * Dh:(h + 1) * Dh] = one_head(h)
            o = o_scr[...]
        out = jnp.dot(o.astype(bf16), wo, preferred_element_type=jnp.float32) + bo
        return out, k_p, v_p

    for b in range(Bt):                             # static unroll over the batch tile
        xq = q_ref[:, b, :]
        xk = k_ref[:, b, :]
        xv = v_ref[:, b, :]

        # pass 1 (encoder): standard MHA over (q, k, v)
        query, key_p, value_p = attn_pass(xq, xk, xv, causal=False)
        # pass 2 (decoder): self-attention over (query, query, value_p), causal
        dq, dk, dv = attn_pass(query, query, value_p, causal=True)

        q_out[:, b, :] = query.astype(q_out.dtype)
        k_out[:, b, :] = key_p.astype(k_out.dtype)
        v_out[:, b, :] = value_p.astype(v_out.dtype)
        dq_out[:, b, :] = dq.astype(dq_out.dtype)
        dk_out[:, b, :] = dk.astype(dk_out.dtype)
        dv_out[:, b, :] = dv.astype(dv_out.dtype)


# ----------------------------------------------------------------------------
# Wrapper: single pallas_call, native (S, B, E) layout on both sides
# ----------------------------------------------------------------------------
@functools.partial(jax.jit, static_argnames=("nhead",))
def fused_forward(q, k, v, params, *, nhead):
    """q, k, v: (S, B, E) seq-first.  Returns 6 arrays of shape (S, B, E)."""
    S, B, E = q.shape
    H = nhead
    assert E % H == 0
    Dh = E // H
    scale = 1.0 / math.sqrt(Dh)

    # batch tile: full batch if it is small or not divisible by the sublane
    # granule (keeps the second-minor block dim legal), otherwise 8 per step.
    Bt = B if (B < 8 or B % 8 != 0) else 8
    grid = (B // Bt,)

    # pre-transposed bf16 weights (x @ W^T == x @ W_t), f32 biases
    wq_t = params["wq"].T.astype(jnp.bfloat16)
    wk_t = params["wk"].T.astype(jnp.bfloat16)
    wv_t = params["wv"].T.astype(jnp.bfloat16)
    wo_t = params["wo"].T.astype(jnp.bfloat16)
    bq = params["bq"].reshape(1, E)
    bk = params["bk"].reshape(1, E)
    bv = params["bv"].reshape(1, E)
    bo = params["bo"].reshape(1, E)

    kernel = functools.partial(_fused_mha2_kernel, H=H, Bt=Bt, scale=scale)

    x_spec = pl.BlockSpec((S, Bt, E), lambda b: (0, b, 0))
    w_spec = pl.BlockSpec((E, E), lambda b: (0, 0))
    b_spec = pl.BlockSpec((1, E), lambda b: (0, 0))

    # VMEM budget: in/out blocks (double-buffered) + weights + live intermediates
    io_bytes = (3 + 6) * S * Bt * E * 4 * 2
    w_bytes = 4 * E * E * 2 * 2 + 4 * E * 4 * 2
    work_bytes = (16 * S * E + 2 * H * S * S + S * E) * 4
    est = io_bytes + w_bytes + work_bytes + (2 << 20)
    vmem_limit = int(min(64 * 1024 * 1024, max(16 * 1024 * 1024, 2 * est)))

    outs = pl.pallas_call(
        kernel,
        grid=grid,
        in_specs=[
            x_spec, x_spec, x_spec,                 # q, k, v  (S, B, E)
            w_spec, w_spec, w_spec, w_spec,         # WqT, WkT, WvT, WoT (bf16)
            b_spec, b_spec, b_spec, b_spec,         # bq, bk, bv, bo
        ],
        out_specs=[x_spec] * 6,
        out_shape=[jax.ShapeDtypeStruct((S, B, E), jnp.float32)] * 6,
        scratch_shapes=[pltpu.VMEM((S, E), jnp.float32)],   # head-output assembly
        compiler_params=pltpu.CompilerParams(
            dimension_semantics=("parallel",),      # batch tiles across TCs (v7x)
            vmem_limit_bytes=vmem_limit,
        ),
    )(q, k, v, wq_t, wk_t, wv_t, wo_t, bq, bk, bv, bo)

    return tuple(outs)   # already (S, B, E) seq-first; no post-transpose


# ----------------------------------------------------------------------------
# Positional encoding (deterministic; dropout skipped -> eval-mode behavior)
# ----------------------------------------------------------------------------
def positional_encoding(num_pos, d_model):
    pos = jnp.arange(num_pos, dtype=jnp.float32).reshape(num_pos, 1, 1, 1)
    denom = jnp.exp(jnp.arange(0.0, d_model, 2.0) * -(math.log(10000.0) / d_model))
    enc = jnp.zeros((num_pos, 1, 1, d_model), dtype=jnp.float32)
    enc = enc.at[:, :, 0, 0::2].set(jnp.sin(pos[:, :, 0, :] / denom))
    enc = enc.at[:, :, 0, 1::2].set(jnp.cos(pos[:, :, 0, :] / denom))
    # TODO(synk): training-mode Dropout(p=0.5) on the encoding table omitted for determinism.
    return enc


# ----------------------------------------------------------------------------
# Model forward
# ----------------------------------------------------------------------------
def model_forward(q, k, v, pos_seq_len, params, *, nhead, num_enc=1, num_dec=1):
    S, B, E = q.shape
    pe = positional_encoding(num_enc * 2 + num_dec, E)
    # NOTE: int() on the array is fine eagerly; do not jit model_forward itself.
    _encoding_pos = pe[: 2 * int(pos_seq_len[0]) + 1]
    # TODO(synk): torch.nn.MultiheadAttention has no `pos_encoding` kwarg; the
    # encoder_pos tensors are constructed in the reference but their interaction
    # with attention is undefined, so they do not influence the outputs.
    return fused_forward(q, k, v, params, nhead=nhead)


# ----------------------------------------------------------------------------
# Deterministic parameter init (MultiheadAttention-style projections)
# ----------------------------------------------------------------------------
def init_params(rng, d_model):
    E = d_model
    ks = jax.random.split(rng, 4)
    scale = 1.0 / math.sqrt(E)
    return {
        "wq": jax.random.normal(ks[0], (E, E), jnp.float32) * scale,
        "wk": jax.random.normal(ks[1], (E, E), jnp.float32) * scale,
        "wv": jax.random.normal(ks[2], (E, E), jnp.float32) * scale,
        "wo": jax.random.normal(ks[3], (E, E), jnp.float32) * scale,
        "bq": jnp.zeros((E,), jnp.float32),
        "bk": jnp.zeros((E,), jnp.float32),
        "bv": jnp.zeros((E,), jnp.float32),
        "bo": jnp.zeros((E,), jnp.float32),
    }


# ----------------------------------------------------------------------------
# Pure-JAX f32 reference (for correctness check)
# ----------------------------------------------------------------------------
def _ref_forward(q, k, v, params, nhead):
    def mha_ref(qq, kk, vv, causal):
        S, B, E = qq.shape
        H = nhead
        Dh = E // H

        def proj(x, w, b):
            return (x.reshape(S * B, E) @ w.T + b).reshape(S, B, E)

        q_p = proj(qq, params["wq"], params["bq"])
        k_p = proj(kk, params["wk"], params["bk"])
        v_p = proj(vv, params["wv"], params["bv"])

        def heads(x):
            return x.reshape(S, B, H, Dh).transpose(1, 2, 0, 3)   # (B,H,S,Dh)

        qh, kh, vh = heads(q_p), heads(k_p), heads(v_p)
        s = jnp.einsum("bhqd,bhkd->bhqk", qh, kh) / math.sqrt(Dh)
        if causal:
            mask = jnp.tril(jnp.ones((S, S), bool))
            s = jnp.where(mask, s, -1e30)
        p = jax.nn.softmax(s, axis=-1)
        o = jnp.einsum("bhqk,bhkd->bhqd", p, vh)
        o = o.transpose(2, 0, 1, 3).reshape(S, B, E)
        out = (o.reshape(S * B, E) @ params["wo"].T + params["bo"]).reshape(S, B, E)
        return out, k_p, v_p

    query, key_p, value_p = mha_ref(q, k, v, False)
    dq, dk, dv = mha_ref(query, query, value_p, True)
    return query, key_p, value_p, dq, dk, dv


if __name__ == "__main__":
    # small shapes consistent with the module's seq-first MHA usage;
    # B=16 exercises the batch-tiled grid (Bt=8, two grid steps).
    S, B, E, H = 8, 16, 64, 1

    root = jax.random.PRNGKey(0)
    kq, kk, kv, kp = jax.random.split(root, 4)
    q = jax.random.normal(kq, (S, B, E), jnp.float32)
    k = jax.random.normal(kk, (S, B, E), jnp.float32)
    v = jax.random.normal(kv, (S, B, E), jnp.float32)
    pos_seq_len = jnp.array([3], dtype=jnp.int32)

    params = init_params(kp, E)

    outs = model_forward(q, k, v, pos_seq_len, params, nhead=H)
    outs = jax.block_until_ready(outs)

    refs = _ref_forward(q, k, v, params, H)
    names = ["query", "key", "value", "dec_query", "dec_key", "dec_value"]
    for name, got, want in zip(names, outs, refs):
        err = float(jnp.max(jnp.abs(got - want)))
        # bf16 MXU operands (f32 accumulate) + approx reciprocal vs f32 reference
        tol = 3e-2 + 2e-2 * float(jnp.max(jnp.abs(want)))
        if not (err <= tol):
            raise AssertionError(f"{name}: max abs err {err} > tol {tol}")

    print("KERNEL_OK")
</pallas_src>

<mosaic_0001>
module attributes {stable_mosaic.version = 11 : i64} {
  func.func @_fused_mha2_kernel(%arg0: i32, %arg1: memref<8x8x64xf32, #tpu.memory_space<vmem>>, %arg2: memref<8x8x64xf32, #tpu.memory_space<vmem>>, %arg3: memref<8x8x64xf32, #tpu.memory_space<vmem>>, %arg4: memref<64x64xbf16, #tpu.memory_space<vmem>>, %arg5: memref<64x64xbf16, #tpu.memory_space<vmem>>, %arg6: memref<64x64xbf16, #tpu.memory_space<vmem>>, %arg7: memref<64x64xbf16, #tpu.memory_space<vmem>>, %arg8: memref<1x64xf32, #tpu.memory_space<vmem>>, %arg9: memref<1x64xf32, #tpu.memory_space<vmem>>, %arg10: memref<1x64xf32, #tpu.memory_space<vmem>>, %arg11: memref<1x64xf32, #tpu.memory_space<vmem>>, %arg12: memref<8x8x64xf32, #tpu.memory_space<vmem>>, %arg13: memref<8x8x64xf32, #tpu.memory_space<vmem>>, %arg14: memref<8x8x64xf32, #tpu.memory_space<vmem>>, %arg15: memref<8x8x64xf32, #tpu.memory_space<vmem>>, %arg16: memref<8x8x64xf32, #tpu.memory_space<vmem>>, %arg17: memref<8x8x64xf32, #tpu.memory_space<vmem>>, %arg18: memref<8x64xf32, #tpu.memory_space<vmem>>) attributes {dimension_semantics = [#tpu.dimension_semantics<parallel>], iteration_bounds = array<i64: 2>, scalar_prefetch = 0 : i64, scratch_operands = 1 : i64, tpu.core_type = #tpu.core_type<tc>, window_params = [{transform_indices = @transform_0, window_bounds = array<i64: 8, 8, 64>}, {transform_indices = @transform_1, window_bounds = array<i64: 8, 8, 64>}, {transform_indices = @transform_2, window_bounds = array<i64: 8, 8, 64>}, {pipeline_mode = #tpu.pipeline_mode<synchronous>, transform_indices = @transform_3, window_bounds = array<i64: 64, 64>}, {pipeline_mode = #tpu.pipeline_mode<synchronous>, transform_indices = @transform_4, window_bounds = array<i64: 64, 64>}, {pipeline_mode = #tpu.pipeline_mode<synchronous>, transform_indices = @transform_5, window_bounds = array<i64: 64, 64>}, {pipeline_mode = #tpu.pipeline_mode<synchronous>, transform_indices = @transform_6, window_bounds = array<i64: 64, 64>}, {pipeline_mode = #tpu.pipeline_mode<synchronous>, transform_indices = @transform_7, window_bounds = array<i64: 1, 64>}, {pipeline_mode = #tpu.pipeline_mode<synchronous>, transform_indices = @transform_8, window_bounds = array<i64: 1, 64>}, {pipeline_mode = #tpu.pipeline_mode<synchronous>, transform_indices = @transform_9, window_bounds = array<i64: 1, 64>}, {pipeline_mode = #tpu.pipeline_mode<synchronous>, transform_indices = @transform_10, window_bounds = array<i64: 1, 64>}, {transform_indices = @transform_11, window_bounds = array<i64: 8, 8, 64>}, {transform_indices = @transform_12, window_bounds = array<i64: 8, 8, 64>}, {transform_indices = @transform_13, window_bounds = array<i64: 8, 8, 64>}, {transform_indices = @transform_14, window_bounds = array<i64: 8, 8, 64>}, {transform_indices = @transform_15, window_bounds = array<i64: 8, 8, 64>}, {transform_indices = @transform_16, window_bounds = array<i64: 8, 8, 64>}]} {
    %c0 = arith.constant 0 : index
    %c0_0 = arith.constant 0 : index
    %0 = vector.load %arg4[%c0, %c0_0] : memref<64x64xbf16, #tpu.memory_space<vmem>>, vector<64x64xbf16>
    %c0_1 = arith.constant 0 : index
    %c0_2 = arith.constant 0 : index
    %1 = vector.load %arg5[%c0_1, %c0_2] : memref<64x64xbf16, #tpu.memory_space<vmem>>, vector<64x64xbf16>
    %c0_3 = arith.constant 0 : index
    %c0_4 = arith.constant 0 : index
    %2 = vector.load %arg6[%c0_3, %c0_4] : memref<64x64xbf16, #tpu.memory_space<vmem>>, vector<64x64xbf16>
    %c0_5 = arith.constant 0 : index
    %c0_6 = arith.constant 0 : index
    %3 = vector.load %arg7[%c0_5, %c0_6] : memref<64x64xbf16, #tpu.memory_space<vmem>>, vector<64x64xbf16>
    %c0_7 = arith.constant 0 : index
    %c0_8 = arith.constant 0 : index
    %4 = vector.load %arg8[%c0_7, %c0_8] : memref<1x64xf32, #tpu.memory_space<vmem>>, vector<1x64xf32>
    %c0_9 = arith.constant 0 : index
    %c0_10 = arith.constant 0 : index
    %5 = vector.load %arg9[%c0_9, %c0_10] : memref<1x64xf32, #tpu.memory_space<vmem>>, vector<1x64xf32>
    %c0_11 = arith.constant 0 : index
    %c0_12 = arith.constant 0 : index
    %6 = vector.load %arg10[%c0_11, %c0_12] : memref<1x64xf32, #tpu.memory_space<vmem>>, vector<1x64xf32>
    %c0_13 = arith.constant 0 : index
    %c0_14 = arith.constant 0 : index
    %7 = vector.load %arg11[%c0_13, %c0_14] : memref<1x64xf32, #tpu.memory_space<vmem>>, vector<1x64xf32>
    %8 = tpu.iota {dimensions = array<i32: 0>} : vector<8x8xi32>
    %9 = tpu.iota {dimensions = array<i32: 1>} : vector<8x8xi32>
    %10 = arith.cmpi sle, %9, %8 : vector<8x8xi32>
    %c0_15 = arith.constant 0 : index
    %c0_16 = arith.constant 0 : index
    %c0_17 = arith.constant 0 : index
    %11 = vector.load %arg1[%c0_15, %c0_16, %c0_17] : memref<8x8x64xf32, #tpu.memory_space<vmem>>, vector<8x1x64xf32>
    %12 = vector.shape_cast %11 : vector<8x1x64xf32> to vector<8x64xf32>
    %c0_18 = arith.constant 0 : index
    %c0_19 = arith.constant 0 : index
    %c0_20 = arith.constant 0 : index
    %13 = vector.load %arg2[%c0_18, %c0_19, %c0_20] : memref<8x8x64xf32, #tpu.memory_space<vmem>>, vector<8x1x64xf32>
    %14 = vector.shape_cast %13 : vector<8x1x64xf32> to vector<8x64xf32>
    %c0_21 = arith.constant 0 : index
    %c0_22 = arith.constant 0 : index
    %c0_23 = arith.constant 0 : index
    %15 = vector.load %arg3[%c0_21, %c0_22, %c0_23] : memref<8x8x64xf32, #tpu.memory_space<vmem>>, vector<8x1x64xf32>
    %16 = vector.shape_cast %15 : vector<8x1x64xf32> to vector<8x64xf32>
    %17 = arith.truncf %12 : vector<8x64xf32> to vector<8x64xbf16>
    %cst = arith.constant dense<0.000000e+00> : vector<8x64xf32>
    %18 = tpu.matmul %17, %0, %cst {dimension_numbers = #tpu.dot_dimension_numbers<[1], [0], [0], [1], [0, 0, 1, 1], [], []>} : vector<8x64xbf16>, vector<64x64xbf16>, vector<8x64xf32> -> vector<8x64xf32>
    %19 = vector.broadcast %4 : vector<1x64xf32> to vector<8x64xf32>
    %20 = arith.addf %18, %19 : vector<8x64xf32>
    %21 = arith.truncf %14 : vector<8x64xf32> to vector<8x64xbf16>
    %cst_24 = arith.constant dense<0.000000e+00> : vector<8x64xf32>
    %22 = tpu.matmul %21, %1, %cst_24 {dimension_numbers = #tpu.dot_dimension_numbers<[1], [0], [0], [1], [0, 0, 1, 1], [], []>} : vector<8x64xbf16>, vector<64x64xbf16>, vector<8x64xf32> -> vector<8x64xf32>
    %23 = vector.broadcast %5 : vector<1x64xf32> to vector<8x64xf32>
    %24 = arith.addf %22, %23 : vector<8x64xf32>
    %25 = arith.truncf %16 : vector<8x64xf32> to vector<8x64xbf16>
    %cst_25 = arith.constant dense<0.000000e+00> : vector<8x64xf32>
    %26 = tpu.matmul %25, %2, %cst_25 {dimension_numbers = #tpu.dot_dimension_numbers<[1], [0], [0], [1], [0, 0, 1, 1], [], []>} : vector<8x64xbf16>, vector<64x64xbf16>, vector<8x64xf32> -> vector<8x64xf32>
    %27 = vector.broadcast %6 : vector<1x64xf32> to vector<8x64xf32>
    %28 = arith.addf %26, %27 : vector<8x64xf32>
    %cst_26 = arith.constant 1.250000e-01 : f32
    %29 = vector.broadcast %cst_26 : f32 to vector<8x64xf32>
    %30 = arith.mulf %20, %29 : vector<8x64xf32>
    %31 = arith.truncf %30 : vector<8x64xf32> to vector<8x64xbf16>
    %32 = arith.truncf %24 : vector<8x64xf32> to vector<8x64xbf16>
    %33 = arith.truncf %28 : vector<8x64xf32> to vector<8x64xbf16>
    %cst_27 = arith.constant dense<0.000000e+00> : vector<8x8xf32>
    %34 = tpu.matmul %31, %32, %cst_27 {dimension_numbers = #tpu.dot_dimension_numbers<[1], [1], [0], [0], [0, 0, 1, 0], [], []>} : vector<8x64xbf16>, vector<8x64xbf16>, vector<8x8xf32> -> vector<8x8xf32>
    %cst_28 = arith.constant dense<0xFF800000> : vector<8xf32>
    %35 = vector.multi_reduction <maximumf>, %34, %cst_28 [1] : vector<8x8xf32> to vector<8xf32>
    %36 = vector.shape_cast %35 : vector<8xf32> to vector<8x1xf32>
    %37 = vector.broadcast %36 : vector<8x1xf32> to vector<8x8xf32>
    %38 = arith.subf %34, %37 : vector<8x8xf32>
    %39 = math.exp %38 : vector<8x8xf32>
    %cst_29 = arith.constant dense<0.000000e+00> : vector<8xf32>
    %40 = vector.multi_reduction <add>, %39, %cst_29 [1] : vector<8x8xf32> to vector<8xf32>
    %41 = vector.shape_cast %40 : vector<8xf32> to vector<8x1xf32>
    %42 = tpu.reciprocal %41 {approx = true} : vector<8x1xf32> -> vector<8x1xf32>
    %43 = vector.broadcast %42 : vector<8x1xf32> to vector<8x8xf32>
    %44 = arith.mulf %39, %43 : vector<8x8xf32>
    %45 = arith.truncf %44 : vector<8x8xf32> to vector<8x8xbf16>
    %cst_30 = arith.constant dense<0.000000e+00> : vector<8x64xf32>
    %46 = tpu.matmul %45, %33, %cst_30 {dimension_numbers = #tpu.dot_dimension_numbers<[1], [0], [0], [1], [0, 0, 1, 1], [], []>} : vector<8x8xbf16>, vector<8x64xbf16>, vector<8x64xf32> -> vector<8x64xf32>
    %47 = arith.truncf %46 : vector<8x64xf32> to vector<8x64xbf16>
    %cst_31 = arith.constant dense<0.000000e+00> : vector<8x64xf32>
    %48 = tpu.matmul %47, %3, %cst_31 {dimension_numbers = #tpu.dot_dimension_numbers<[1], [0], [0], [1], [0, 0, 1, 1], [], []>} : vector<8x64xbf16>, vector<64x64xbf16>, vector<8x64xf32> -> vector<8x64xf32>
    %49 = vector.broadcast %7 : vector<1x64xf32> to vector<8x64xf32>
    %50 = arith.addf %48, %49 : vector<8x64xf32>
    %51 = arith.truncf %50 : vector<8x64xf32> to vector<8x64xbf16>
    %cst_32 = arith.constant dense<0.000000e+00> : vector<8x64xf32>
    %52 = tpu.matmul %51, %0, %cst_32 {dimension_numbers = #tpu.dot_dimension_numbers<[1], [0], [0], [1], [0, 0, 1, 1], [], []>} : vector<8x64xbf16>, vector<64x64xbf16>, vector<8x64xf32> -> vector<8x64xf32>
    %53 = vector.broadcast %4 : vector<1x64xf32> to vector<8x64xf32>
    %54 = arith.addf %52, %53 : vector<8x64xf32>
    %55 = arith.truncf %50 : vector<8x64xf32> to vector<8x64xbf16>
    %cst_33 = arith.constant dense<0.000000e+00> : vector<8x64xf32>
    %56 = tpu.matmul %55, %1, %cst_33 {dimension_numbers = #tpu.dot_dimension_numbers<[1], [0], [0], [1], [0, 0, 1, 1], [], []>} : vector<8x64xbf16>, vector<64x64xbf16>, vector<8x64xf32> -> vector<8x64xf32>
    %57 = vector.broadcast %5 : vector<1x64xf32> to vector<8x64xf32>
    %58 = arith.addf %56, %57 : vector<8x64xf32>
    %59 = arith.truncf %28 : vector<8x64xf32> to vector<8x64xbf16>
    %cst_34 = arith.constant dense<0.000000e+00> : vector<8x64xf32>
    %60 = tpu.matmul %59, %2, %cst_34 {dimension_numbers = #tpu.dot_dimension_numbers<[1], [0], [0], [1], [0, 0, 1, 1], [], []>} : vector<8x64xbf16>, vector<64x64xbf16>, vector<8x64xf32> -> vector<8x64xf32>
    %61 = vector.broadcast %6 : vector<1x64xf32> to vector<8x64xf32>
    %62 = arith.addf %60, %61 : vector<8x64xf32>
    %cst_35 = arith.constant 1.250000e-01 : f32
    %63 = vector.broadcast %cst_35 : f32 to vector<8x64xf32>
    %64 = arith.mulf %54, %63 : vector<8x64xf32>
    %65 = arith.truncf %64 : vector<8x64xf32> to vector<8x64xbf16>
    %66 = arith.truncf %58 : vector<8x64xf32> to vector<8x64xbf16>
    %67 = arith.truncf %62 : vector<8x64xf32> to vector<8x64xbf16>
    %cst_36 = arith.constant dense<0.000000e+00> : vector<8x8xf32>
    %68 = tpu.matmul %65, %66, %cst_36 {dimension_numbers = #tpu.dot_dimension_numbers<[1], [1], [0], [0], [0, 0, 1, 0], [], []>} : vector<8x64xbf16>, vector<8x64xbf16>, vector<8x8xf32> -> vector<8x8xf32>
    %cst_37 = arith.constant -1.000000e+30 : f32
    %69 = vector.broadcast %cst_37 : f32 to vector<8x8xf32>
    %70 = arith.select %10, %68, %69 : vector<8x8xi1>, vector<8x8xf32>
    %cst_38 = arith.constant dense<0xFF800000> : vector<8xf32>
    %71 = vector.multi_reduction <maximumf>, %70, %cst_38 [1] : vector<8x8xf32> to vector<8xf32>
    %72 = vector.shape_cast %71 : vector<8xf32> to vector<8x1xf32>
    %73 = vector.broadcast %72 : vector<8x1xf32> to vector<8x8xf32>
    %74 = arith.subf %70, %73 : vector<8x8xf32>
    %75 = math.exp %74 : vector<8x8xf32>
    %cst_39 = arith.constant dense<0.000000e+00> : vector<8xf32>
    %76 = vector.multi_reduction <add>, %75, %cst_39 [1] : vector<8x8xf32> to vector<8xf32>
    %77 = vector.shape_cast %76 : vector<8xf32> to vector<8x1xf32>
    %78 = tpu.reciprocal %77 {approx = true} : vector<8x1xf32> -> vector<8x1xf32>
    %79 = vector.broadcast %78 : vector<8x1xf32> to vector<8x8xf32>
    %80 = arith.mulf %75, %79 : vector<8x8xf32>
    %81 = arith.truncf %80 : vector<8x8xf32> to vector<8x8xbf16>
    %cst_40 = arith.constant dense<0.000000e+00> : vector<8x64xf32>
    %82 = tpu.matmul %81, %67, %cst_40 {dimension_numbers = #tpu.dot_dimension_numbers<[1], [0], [0], [1], [0, 0, 1, 1], [], []>} : vector<8x8xbf16>, vector<8x64xbf16>, vector<8x64xf32> -> vector<8x64xf32>
    %83 = arith.truncf %82 : vector<8x64xf32> to vector<8x64xbf16>
    %cst_41 = arith.constant dense<0.000000e+00> : vector<8x64xf32>
    %84 = tpu.matmul %83, %3, %cst_41 {dimension_numbers = #tpu.dot_dimension_numbers<[1], [0], [0], [1], [0, 0, 1, 1], [], []>} : vector<8x64xbf16>, vector<64x64xbf16>, vector<8x64xf32> -> vector<8x64xf32>
    %85 = vector.broadcast %7 : vector<1x64xf32> to vector<8x64xf32>
    %86 = arith.addf %84, %85 : vector<8x64xf32>
    %c0_42 = arith.constant 0 : index
    %c0_43 = arith.constant 0 : index
    %c0_44 = arith.constant 0 : index
    %87 = vector.load %arg12[%c0_42, %c0_43, %c0_44] : memref<8x8x64xf32, #tpu.memory_space<vmem>>, vector<8x1x64xf32>
    %88 = vector.shape_cast %87 : vector<8x1x64xf32> to vector<8x64xf32>
    %89 = vector.shape_cast %50 : vector<8x64xf32> to vector<8x1x64xf32>
    tpu.vector_store %arg12[%c0_42, %c0_43, %c0_44], %89 {strides = array<i32>} : memref<8x8x64xf32, #tpu.memory_space<vmem>>, vector<8x1x64xf32>,
    %c0_45 = arith.constant 0 : index
    %c0_46 = arith.constant 0 : index
    %c0_47 = arith.constant 0 : index
    %90 = vector.load %arg13[%c0_45, %c0_46, %c0_47] : memref<8x8x64xf32, #tpu.memory_space<vmem>>, vector<8x1x64xf32>
    %91 = vector.shape_cast %90 : vector<8x1x64xf32> to vector<8x64xf32>
    %92 = vector.shape_cast %24 : vector<8x64xf32> to vector<8x1x64xf32>
    tpu.vector_store %arg13[%c0_45, %c0_46, %c0_47], %92 {strides = array<i32>} : memref<8x8x64xf32, #tpu.memory_space<vmem>>, vector<8x1x64xf32>,
    %c0_48 = arith.constant 0 : index
    %c0_49 = arith.constant 0 : index
    %c0_50 = arith.constant 0 : index
    %93 = vector.load %arg14[%c0_48, %c0_49, %c0_50] : memref<8x8x64xf32, #tpu.memory_space<vmem>>, vector<8x1x64xf32>
    %94 = vector.shape_cast %93 : vector<8x1x64xf32> to vector<8x64xf32>
    %95 = vector.shape_cast %28 : vector<8x64xf32> to vector<8x1x64xf32>
    tpu.vector_store %arg14[%c0_48, %c0_49, %c0_50], %95 {strides = array<i32>} : memref<8x8x64xf32, #tpu.memory_space<vmem>>, vector<8x1x64xf32>,
    %c0_51 = arith.constant 0 : index
    %c0_52 = arith.constant 0 : index
    %c0_53 = arith.constant 0 : index
    %96 = vector.load %arg15[%c0_51, %c0_52, %c0_53] : memref<8x8x64xf32, #tpu.memory_space<vmem>>, vector<8x1x64xf32>
    %97 = vector.shape_cast %96 : vector<8x1x64xf32> to vector<8x64xf32>
    %98 = vector.shape_cast %86 : vector<8x64xf32> to vector<8x1x64xf32>
    tpu.vector_store %arg15[%c0_51, %c0_52, %c0_53], %98 {strides = array<i32>} : memref<8x8x64xf32, #tpu.memory_space<vmem>>, vector<8x1x64xf32>,
    %c0_54 = arith.constant 0 : index
    %c0_55 = arith.constant 0 : index
    %c0_56 = arith.constant 0 : index
    %99 = vector.load %arg16[%c0_54, %c0_55, %c0_56] : memref<8x8x64xf32, #tpu.memory_space<vmem>>, vector<8x1x64xf32>
    %100 = vector.shape_cast %99 : vector<8x1x64xf32> to vector<8x64xf32>
    %101 = vector.shape_cast %58 : vector<8x64xf32> to vector<8x1x64xf32>
    tpu.vector_store %arg16[%c0_54, %c0_55, %c0_56], %101 {strides = array<i32>} : memref<8x8x64xf32, #tpu.memory_space<vmem>>, vector<8x1x64xf32>,
    %c0_57 = arith.constant 0 : index
    %c0_58 = arith.constant 0 : index
    %c0_59 = arith.constant 0 : index
    %102 = vector.load %arg17[%c0_57, %c0_58, %c0_59] : memref<8x8x64xf32, #tpu.memory_space<vmem>>, vector<8x1x64xf32>
    %103 = vector.shape_cast %102 : vector<8x1x64xf32> to vector<8x64xf32>
    %104 = vector.shape_cast %62 : vector<8x64xf32> to vector<8x1x64xf32>
    tpu.vector_store %arg17[%c0_57, %c0_58, %c0_59], %104 {strides = array<i32>} : memref<8x8x64xf32, #tpu.memory_space<vmem>>, vector<8x1x64xf32>,
    %c0_60 = arith.constant 0 : index
    %c1 = arith.constant 1 : index
    %c0_61 = arith.constant 0 : index
    %105 = vector.load %arg1[%c0_60, %c1, %c0_61] : memref<8x8x64xf32, #tpu.memory_space<vmem>>, vector<8x1x64xf32>
    %106 = vector.shape_cast %105 : vector<8x1x64xf32> to vector<8x64xf32>
    %c0_62 = arith.constant 0 : index
    %c1_63 = arith.constant 1 : index
    %c0_64 = arith.constant 0 : index
    %107 = vector.load %arg2[%c0_62, %c1_63, %c0_64] : memref<8x8x64xf32, #tpu.memory_space<vmem>>, vector<8x1x64xf32>
    %108 = vector.shape_cast %107 : vector<8x1x64xf32> to vector<8x64xf32>
    %c0_65 = arith.constant 0 : index
    %c1_66 = arith.constant 1 : index
    %c0_67 = arith.constant 0 : index
    %109 = vector.load %arg3[%c0_65, %c1_66, %c0_67] : memref<8x8x64xf32, #tpu.memory_space<vmem>>, vector<8x1x64xf32>
    %110 = vector.shape_cast %109 : vector<8x1x64xf32> to vector<8x64xf32>
    %111 = arith.truncf %106 : vector<8x64xf32> to vector<8x64xbf16>
    %cst_68 = arith.constant dense<0.000000e+00> : vector<8x64xf32>
    %112 = tpu.matmul %111, %0, %cst_68 {dimension_numbers = #tpu.dot_dimension_numbers<[1], [0], [0], [1], [0, 0, 1, 1], [], []>} : vector<8x64xbf16>, vector<64x64xbf16>, vector<8x64xf32> -> vector<8x64xf32>
    %113 = vector.broadcast %4 : vector<1x64xf32> to vector<8x64xf32>
    %114 = arith.addf %112, %113 : vector<8x64xf32>
    %115 = arith.truncf %108 : vector<8x64xf32> to vector<8x64xbf16>
    %cst_69 = arith.constant dense<0.000000e+00> : vector<8x64xf32>
    %116 = tpu.matmul %115, %1, %cst_69 {dimension_numbers = #tpu.dot_dimension_numbers<[1], [0], [0], [1], [0, 0, 1, 1], [], []>} : vector<8x64xbf16>, vector<64x64xbf16>, vector<8x64xf32> -> vector<8x64xf32>
    %117 = vector.broadcast %5 : vector<1x64xf32> to vector<8x64xf32>
    %118 = arith.addf %116, %117 : vector<8x64xf32>
    %119 = arith.truncf %110 : vector<8x64xf32> to vector<8x64xbf16>
    %cst_70 = arith.constant dense<0.000000e+00> : vector<8x64xf32>
    %120 = tpu.matmul %119, %2, %cst_70 {dimension_numbers = #tpu.dot_dimension_numbers<[1], [0], [0], [1], [0, 0, 1, 1], [], []>} : vector<8x64xbf16>, vector<64x64xbf16>, vector<8x64xf32> -> vector<8x64xf32>
    %121 = vector.broadcast %6 : vector<1x64xf32> to vector<8x64xf32>
    %122 = arith.addf %120, %121 : vector<8x64xf32>
    %cst_71 = arith.constant 1.250000e-01 : f32
    %123 = vector.broadcast %cst_71 : f32 to vector<8x64xf32>
    %124 = arith.mulf %114, %123 : vector<8x64xf32>
    %125 = arith.truncf %124 : vector<8x64xf32> to vector<8x64xbf16>
    %126 = arith.truncf %118 : vector<8x64xf32> to vector<8x64xbf16>
    %127 = arith.truncf %122 : vector<8x64xf32> to vector<8x64xbf16>
    %cst_72 = arith.constant dense<0.000000e+00> : vector<8x8xf32>
    %128 = tpu.matmul %125, %126, %cst_72 {dimension_numbers = #tpu.dot_dimension_numbers<[1], [1], [0], [0], [0, 0, 1, 0], [], []>} : vector<8x64xbf16>, vector<8x64xbf16>, vector<8x8xf32> -> vector<8x8xf32>
    %cst_73 = arith.constant dense<0xFF800000> : vector<8xf32>
    %129 = vector.multi_reduction <maximumf>, %128, %cst_73 [1] : vector<8x8xf32> to vector<8xf32>
    %130 = vector.shape_cast %129 : vector<8xf32> to vector<8x1xf32>
    %131 = vector.broadcast %130 : vector<8x1xf32> to vector<8x8xf32>
    %132 = arith.subf %128, %131 : vector<8x8xf32>
    %133 = math.exp %132 : vector<8x8xf32>
    %cst_74 = arith.constant dense<0.000000e+00> : vector<8xf32>
    %134 = vector.multi_reduction <add>, %133, %cst_74 [1] : vector<8x8xf32> to vector<8xf32>
    %135 = vector.shape_cast %134 : vector<8xf32> to vector<8x1xf32>
    %136 = tpu.reciprocal %135 {approx = true} : vector<8x1xf32> -> vector<8x1xf32>
    %137 = vector.broadcast %136 : vector<8x1xf32> to vector<8x8xf32>
    %138 = arith.mulf %133, %137 : vector<8x8xf32>
    %139 = arith.truncf %138 : vector<8x8xf32> to vector<8x8xbf16>
    %cst_75 = arith.constant dense<0.000000e+00> : vector<8x64xf32>
    %140 = tpu.matmul %139, %127, %cst_75 {dimension_numbers = #tpu.dot_dimension_numbers<[1], [0], [0], [1], [0, 0, 1, 1], [], []>} : vector<8x8xbf16>, vector<8x64xbf16>, vector<8x64xf32> -> vector<8x64xf32>
    %141 = arith.truncf %140 : vector<8x64xf32> to vector<8x64xbf16>
    %cst_76 = arith.constant dense<0.000000e+00> : vector<8x64xf32>
    %142 = tpu.matmul %141, %3, %cst_76 {dimension_numbers = #tpu.dot_dimension_numbers<[1], [0], [0], [1], [0, 0, 1, 1], [], []>} : vector<8x64xbf16>, vector<64x64xbf16>, vector<8x64xf32> -> vector<8x64xf32>
    %143 = vector.broadcast %7 : vector<1x64xf32> to vector<8x64xf32>
    %144 = arith.addf %142, %143 : vector<8x64xf32>
    %145 = arith.truncf %144 : vector<8x64xf32> to vector<8x64xbf16>
    %cst_77 = arith.constant dense<0.000000e+00> : vector<8x64xf32>
    %146 = tpu.matmul %145, %0, %cst_77 {dimension_numbers = #tpu.dot_dimension_numbers<[1], [0], [0], [1], [0, 0, 1, 1], [], []>} : vector<8x64xbf16>, vector<64x64xbf16>, vector<8x64xf32> -> vector<8x64xf32>
    %147 = vector.broadcast %4 : vector<1x64xf32> to vector<8x64xf32>
    %148 = arith.addf %146, %147 : vector<8x64xf32>
    %149 = arith.truncf %144 : vector<8x64xf32> to vector<8x64xbf16>
    %cst_78 = arith.constant dense<0.000000e+00> : vector<8x64xf32>
    %150 = tpu.matmul %149, %1, %cst_78 {dimension_numbers = #tpu.dot_dimension_numbers<[1], [0], [0], [1], [0, 0, 1, 1], [], []>} : vector<8x64xbf16>, vector<64x64xbf16>, vector<8x64xf32> -> vector<8x64xf32>
    %151 = vector.broadcast %5 : vector<1x64xf32> to vector<8x64xf32>
    %152 = arith.addf %150, %151 : vector<8x64xf32>
    %153 = arith.truncf %122 : vector<8x64xf32> to vector<8x64xbf16>
    %cst_79 = arith.constant dense<0.000000e+00> : vector<8x64xf32>
    %154 = tpu.matmul %153, %2, %cst_79 {dimension_numbers = #tpu.dot_dimension_numbers<[1], [0], [0], [1], [0, 0, 1, 1], [], []>} : vector<8x64xbf16>, vector<64x64xbf16>, vector<8x64xf32> -> vector<8x64xf32>
    %155 = vector.broadcast %6 : vector<1x64xf32> to vector<8x64xf32>
    %156 = arith.addf %154, %155 : vector<8x64xf32>
    %cst_80 = arith.constant 1.250000e-01 : f32
    %157 = vector.broadcast %cst_80 : f32 to vector<8x64xf32>
    %158 = arith.mulf %148, %157 : vector<8x64xf32>
    %159 = arith.truncf %158 : vector<8x64xf32> to vector<8x64xbf16>
    %160 = arith.truncf %152 : vector<8x64xf32> to vector<8x64xbf16>
    %161 = arith.truncf %156 : vector<8x64xf32> to vector<8x64xbf16>
    %cst_81 = arith.constant dense<0.000000e+00> : vector<8x8xf32>
    %162 = tpu.matmul %159, %160, %cst_81 {dimension_numbers = #tpu.dot_dimension_numbers<[1], [1], [0], [0], [0, 0, 1, 0], [], []>} : vector<8x64xbf16>, vector<8x64xbf16>, vector<8x8xf32> -> vector<8x8xf32>
    %cst_82 = arith.constant -1.000000e+30 : f32
    %163 = vector.broadcast %cst_82 : f32 to vector<8x8xf32>
    %164 = arith.select %10, %162, %163 : vector<8x8xi1>, vector<8x8xf32>
    %cst_83 = arith.constant dense<0xFF800000> : vector<8xf32>
    %165 = vector.multi_reduction <maximumf>, %164, %cst_83 [1] : vector<8x8xf32> to vector<8xf32>
    %166 = vector.shape_cast %165 : vector<8xf32> to vector<8x1xf32>
    %167 = vector.broadcast %166 : vector<8x1xf32> to vector<8x8xf32>
    %168 = arith.subf %164, %167 : vector<8x8xf32>
    %169 = math.exp %168 : vector<8x8xf32>
    %cst_84 = arith.constant dense<0.000000e+00> : vector<8xf32>
    %170 = vector.multi_reduction <add>, %169, %cst_84 [1] : vector<8x8xf32> to vector<8xf32>
    %171 = vector.shape_cast %170 : vector<8xf32> to vector<8x1xf32>
    %172 = tpu.reciprocal %171 {approx = true} : vector<8x1xf32> -> vector<8x1xf32>
    %173 = vector.broadcast %172 : vector<8x1xf32> to vector<8x8xf32>
    %174 = arith.mulf %169, %173 : vector<8x8xf32>
    %175 = arith.truncf %174 : vector<8x8xf32> to vector<8x8xbf16>
    %cst_85 = arith.constant dense<0.000000e+00> : vector<8x64xf32>
    %176 = tpu.matmul %175, %161, %cst_85 {dimension_numbers = #tpu.dot_dimension_numbers<[1], [0], [0], [1], [0, 0, 1, 1], [], []>} : vector<8x8xbf16>, vector<8x64xbf16>, vector<8x64xf32> -> vector<8x64xf32>
    %177 = arith.truncf %176 : vector<8x64xf32> to vector<8x64xbf16>
    %cst_86 = arith.constant dense<0.000000e+00> : vector<8x64xf32>
    %178 = tpu.matmul %177, %3, %cst_86 {dimension_numbers = #tpu.dot_dimension_numbers<[1], [0], [0], [1], [0, 0, 1, 1], [], []>} : vector<8x64xbf16>, vector<64x64xbf16>, vector<8x64xf32> -> vector<8x64xf32>
    %179 = vector.broadcast %7 : vector<1x64xf32> to vector<8x64xf32>
    %180 = arith.addf %178, %179 : vector<8x64xf32>
    %c0_87 = arith.constant 0 : index
    %c1_88 = arith.constant 1 : index
    %c0_89 = arith.constant 0 : index
    %181 = vector.load %arg12[%c0_87, %c1_88, %c0_89] : memref<8x8x64xf32, #tpu.memory_space<vmem>>, vector<8x1x64xf32>
    %182 = vector.shape_cast %181 : vector<8x1x64xf32> to vector<8x64xf32>
    %183 = vector.shape_cast %144 : vector<8x64xf32> to vector<8x1x64xf32>
    tpu.vector_store %arg12[%c0_87, %c1_88, %c0_89], %183 {strides = array<i32>} : memref<8x8x64xf32, #tpu.memory_space<vmem>>, vector<8x1x64xf32>,
    %c0_90 = arith.constant 0 : index
    %c1_91 = arith.constant 1 : index
    %c0_92 = arith.constant 0 : index
    %184 = vector.load %arg13[%c0_90, %c1_91, %c0_92] : memref<8x8x64xf32, #tpu.memory_space<vmem>>, vector<8x1x64xf32>
    %185 = vector.shape_cast %184 : vector<8x1x64xf32> to vector<8x64xf32>
    %186 = vector.shape_cast %118 : vector<8x64xf32> to vector<8x1x64xf32>
    tpu.vector_store %arg13[%c0_90, %c1_91, %c0_92], %186 {strides = array<i32>} : memref<8x8x64xf32, #tpu.memory_space<vmem>>, vector<8x1x64xf32>,
    %c0_93 = arith.constant 0 : index
    %c1_94 = arith.constant 1 : index
    %c0_95 = arith.constant 0 : index
    %187 = vector.load %arg14[%c0_93, %c1_94, %c0_95] : memref<8x8x64xf32, #tpu.memory_space<vmem>>, vector<8x1x64xf32>
    %188 = vector.shape_cast %187 : vector<8x1x64xf32> to vector<8x64xf32>
    %189 = vector.shape_cast %122 : vector<8x64xf32> to vector<8x1x64xf32>
    tpu.vector_store %arg14[%c0_93, %c1_94, %c0_95], %189 {strides = array<i32>} : memref<8x8x64xf32, #tpu.memory_space<vmem>>, vector<8x1x64xf32>,
    %c0_96 = arith.constant 0 : index
    %c1_97 = arith.constant 1 : index
    %c0_98 = arith.constant 0 : index
    %190 = vector.load %arg15[%c0_96, %c1_97, %c0_98] : memref<8x8x64xf32, #tpu.memory_space<vmem>>, vector<8x1x64xf32>
    %191 = vector.shape_cast %190 : vector<8x1x64xf32> to vector<8x64xf32>
    %192 = vector.shape_cast %180 : vector<8x64xf32> to vector<8x1x64xf32>
    tpu.vector_store %arg15[%c0_96, %c1_97, %c0_98], %192 {strides = array<i32>} : memref<8x8x64xf32, #tpu.memory_space<vmem>>, vector<8x1x64xf32>,
    %c0_99 = arith.constant 0 : index
    %c1_100 = arith.constant 1 : index
    %c0_101 = arith.constant 0 : index
    %193 = vector.load %arg16[%c0_99, %c1_100, %c0_101] : memref<8x8x64xf32, #tpu.memory_space<vmem>>, vector<8x1x64xf32>
    %194 = vector.shape_cast %193 : vector<8x1x64xf32> to vector<8x64xf32>
    %195 = vector.shape_cast %152 : vector<8x64xf32> to vector<8x1x64xf32>
    tpu.vector_store %arg16[%c0_99, %c1_100, %c0_101], %195 {strides = array<i32>} : memref<8x8x64xf32, #tpu.memory_space<vmem>>, vector<8x1x64xf32>,
    %c0_102 = arith.constant 0 : index
    %c1_103 = arith.constant 1 : index
    %c0_104 = arith.constant 0 : index
    %196 = vector.load %arg17[%c0_102, %c1_103, %c0_104] : memref<8x8x64xf32, #tpu.memory_space<vmem>>, vector<8x1x64xf32>
    %197 = vector.shape_cast %196 : vector<8x1x64xf32> to vector<8x64xf32>
    %198 = vector.shape_cast %156 : vector<8x64xf32> to vector<8x1x64xf32>
    tpu.vector_store %arg17[%c0_102, %c1_103, %c0_104], %198 {strides = array<i32>} : memref<8x8x64xf32, #tpu.memory_space<vmem>>, vector<8x1x64xf32>,
    %c0_105 = arith.constant 0 : index
    %c2 = arith.constant 2 : index
    %c0_106 = arith.constant 0 : index
    %199 = vector.load %arg1[%c0_105, %c2, %c0_106] : memref<8x8x64xf32, #tpu.memory_space<vmem>>, vector<8x1x64xf32>
    %200 = vector.shape_cast %199 : vector<8x1x64xf32> to vector<8x64xf32>
    %c0_107 = arith.constant 0 : index
    %c2_108 = arith.constant 2 : index
    %c0_109 = arith.constant 0 : index
    %201 = vector.load %arg2[%c0_107, %c2_108, %c0_109] : memref<8x8x64xf32, #tpu.memory_space<vmem>>, vector<8x1x64xf32>
    %202 = vector.shape_cast %201 : vector<8x1x64xf32> to vector<8x64xf32>
    %c0_110 = arith.constant 0 : index
    %c2_111 = arith.constant 2 : index
    %c0_112 = arith.constant 0 : index
    %203 = vector.load %arg3[%c0_110, %c2_111, %c0_112] : memref<8x8x64xf32, #tpu.memory_space<vmem>>, vector<8x1x64xf32>
    %204 = vector.shape_cast %203 : vector<8x1x64xf32> to vector<8x64xf32>
    %205 = arith.truncf %200 : vector<8x64xf32> to vector<8x64xbf16>
    %cst_113 = arith.constant dense<0.000000e+00> : vector<8x64xf32>
    %206 = tpu.matmul %205, %0, %cst_113 {dimension_numbers = #tpu.dot_dimension_numbers<[1], [0], [0], [1], [0, 0, 1, 1], [], []>} : vector<8x64xbf16>, vector<64x64xbf16>, vector<8x64xf32> -> vector<8x64xf32>
    %207 = vector.broadcast %4 : vector<1x64xf32> to vector<8x64xf32>
    %208 = arith.addf %206, %207 : vector<8x64xf32>
    %209 = arith.truncf %202 : vector<8x64xf32> to vector<8x64xbf16>
    %cst_114 = arith.constant dense<0.000000e+00> : vector<8x64xf32>
    %210 = tpu.matmul %209, %1, %cst_114 {dimension_numbers = #tpu.dot_dimension_numbers<[1], [0], [0], [1], [0, 0, 1, 1], [], []>} : vector<8x64xbf16>, vector<64x64xbf16>, vector<8x64xf32> -> vector<8x64xf32>
    %211 = vector.broadcast %5 : vector<1x64xf32> to vector<8x64xf32>
    %212 = arith.addf %210, %211 : vector<8x64xf32>
    %213 = arith.truncf %204 : vector<8x64xf32> to vector<8x64xbf16>
    %cst_115 = arith.constant dense<0.000000e+00> : vector<8x64xf32>
    %214 = tpu.matmul %213, %2, %cst_115 {dimension_numbers = #tpu.dot_dimension_numbers<[1], [0], [0], [1], [0, 0, 1, 1], [], []>} : vector<8x64xbf16>, vector<64x64xbf16>, vector<8x64xf32> -> vector<8x64xf32>
    %215 = vector.broadcast %6 : vector<1x64xf32> to vector<8x64xf32>
    %216 = arith.addf %214, %215 : vector<8x64xf32>
    %cst_116 = arith.constant 1.250000e-01 : f32
    %217 = vector.broadcast %cst_116 : f32 to vector<8x64xf32>
    %218 = arith.mulf %208, %217 : vector<8x64xf32>
    %219 = arith.truncf %218 : vector<8x64xf32> to vector<8x64xbf16>
    %220 = arith.truncf %212 : vector<8x64xf32> to vector<8x64xbf16>
    %221 = arith.truncf %216 : vector<8x64xf32> to vector<8x64xbf16>
    %cst_117 = arith.constant dense<0.000000e+00> : vector<8x8xf32>
    %222 = tpu.matmul %219, %220, %cst_117 {dimension_numbers = #tpu.dot_dimension_numbers<[1], [1], [0], [0], [0, 0, 1, 0], [], []>} : vector<8x64xbf16>, vector<8x64xbf16>, vector<8x8xf32> -> vector<8x8xf32>
    %cst_118 = arith.constant dense<0xFF800000> : vector<8xf32>
    %223 = vector.multi_reduction <maximumf>, %222, %cst_118 [1] : vector<8x8xf32> to vector<8xf32>
    %224 = vector.shape_cast %223 : vector<8xf32> to vector<8x1xf32>
    %225 = vector.broadcast %224 : vector<8x1xf32> to vector<8x8xf32>
    %226 = arith.subf %222, %225 : vector<8x8xf32>
    %227 = math.exp %226 : vector<8x8xf32>
    %cst_119 = arith.constant dense<0.000000e+00> : vector<8xf32>
    %228 = vector.multi_reduction <add>, %227, %cst_119 [1] : vector<8x8xf32> to vector<8xf32>
    %229 = vector.shape_cast %228 : vector<8xf32> to vector<8x1xf32>
    %230 = tpu.reciprocal %229 {approx = true} : vector<8x1xf32> -> vector<8x1xf32>
    %231 = vector.broadcast %230 : vector<8x1xf32> to vector<8x8xf32>
    %232 = arith.mulf %227, %231 : vector<8x8xf32>
    %233 = arith.truncf %232 : vector<8x8xf32> to vector<8x8xbf16>
    %cst_120 = arith.constant dense<0.000000e+00> : vector<8x64xf32>
    %234 = tpu.matmul %233, %221, %cst_120 {dimension_numbers = #tpu.dot_dimension_numbers<[1], [0], [0], [1], [0, 0, 1, 1], [], []>} : vector<8x8xbf16>, vector<8x64xbf16>, vector<8x64xf32> -> vector<8x64xf32>
    %235 = arith.truncf %234 : vector<8x64xf32> to vector<8x64xbf16>
    %cst_121 = arith.constant dense<0.000000e+00> : vector<8x64xf32>
    %236 = tpu.matmul %235, %3, %cst_121 {dimension_numbers = #tpu.dot_dimension_numbers<[1], [0], [0], [1], [0, 0, 1, 1], [], []>} : vector<8x64xbf16>, vector<64x64xbf16>, vector<8x64xf32> -> vector<8x64xf32>
    %237 = vector.broadcast %7 : vector<1x64xf32> to vector<8x64xf32>
    %238 = arith.addf %236, %237 : vector<8x64xf32>
    %239 = arith.truncf %238 : vector<8x64xf32> to vector<8x64xbf16>
    %cst_122 = arith.constant dense<0.000000e+00> : vector<8x64xf32>
    %240 = tpu.matmul %239, %0, %cst_122 {dimension_numbers = #tpu.dot_dimension_numbers<[1], [0], [0], [1], [0, 0, 1, 1], [], []>} : vector<8x64xbf16>, vector<64x64xbf16>, vector<8x64xf32> -> vector<8x64xf32>
    %241 = vector.broadcast %4 : vector<1x64xf32> to vector<8x64xf32>
    %242 = arith.addf %240, %241 : vector<8x64xf32>
    %243 = arith.truncf %238 : vector<8x64xf32> to vector<8x64xbf16>
    %cst_123 = arith.constant dense<0.000000e+00> : vector<8x64xf32>
    %244 = tpu.matmul %243, %1, %cst_123 {dimension_numbers = #tpu.dot_dimension_numbers<[1], [0], [0], [1], [0, 0, 1, 1], [], []>} : vector<8x64xbf16>, vector<64x64xbf16>, vector<8x64xf32> -> vector<8x64xf32>
    %245 = vector.broadcast %5 : vector<1x64xf32> to vector<8x64xf32>
    %246 = arith.addf %244, %245 : vector<8x64xf32>
    %247 = arith.truncf %216 : vector<8x64xf32> to vector<8x64xbf16>
    %cst_124 = arith.constant dense<0.000000e+00> : vector<8x64xf32>
    %248 = tpu.matmul %247, %2, %cst_124 {dimension_numbers = #tpu.dot_dimension_numbers<[1], [0], [0], [1], [0, 0, 1, 1], [], []>} : vector<8x64xbf16>, vector<64x64xbf16>, vector<8x64xf32> -> vector<8x64xf32>
    %249 = vector.broadcast %6 : vector<1x64xf32> to vector<8x64xf32>
    %250 = arith.addf %248, %249 : vector<8x64xf32>
    %cst_125 = arith.constant 1.250000e-01 : f32
    %251 = vector.broadcast %cst_125 : f32 to vector<8x64xf32>
    %252 = arith.mulf %242, %251 : vector<8x64xf32>
    %253 = arith.truncf %252 : vector<8x64xf32> to vector<8x64xbf16>
    %254 = arith.truncf %246 : vector<8x64xf32> to vector<8x64xbf16>
    %255 = arith.truncf %250 : vector<8x64xf32> to vector<8x64xbf16>
    %cst_126 = arith.constant dense<0.000000e+00> : vector<8x8xf32>
    %256 = tpu.matmul %253, %254, %cst_126 {dimension_numbers = #tpu.dot_dimension_numbers<[1], [1], [0], [0], [0, 0, 1, 0], [], []>} : vector<8x64xbf16>, vector<8x64xbf16>, vector<8x8xf32> -> vector<8x8xf32>
    %cst_127 = arith.constant -1.000000e+30 : f32
    %257 = vector.broadcast %cst_127 : f32 to vector<8x8xf32>
    %258 = arith.select %10, %256, %257 : vector<8x8xi1>, vector<8x8xf32>
    %cst_128 = arith.constant dense<0xFF800000> : vector<8xf32>
    %259 = vector.multi_reduction <maximumf>, %258, %cst_128 [1] : vector<8x8xf32> to vector<8xf32>
    %260 = vector.shape_cast %259 : vector<8xf32> to vector<8x1xf32>
    %261 = vector.broadcast %260 : vector<8x1xf32> to vector<8x8xf32>
    %262 = arith.subf %258, %261 : vector<8x8xf32>
    %263 = math.exp %262 : vector<8x8xf32>
    %cst_129 = arith.constant dense<0.000000e+00> : vector<8xf32>
    %264 = vector.multi_reduction <add>, %263, %cst_129 [1] : vector<8x8xf32> to vector<8xf32>
    %265 = vector.shape_cast %264 : vector<8xf32> to vector<8x1xf32>
    %266 = tpu.reciprocal %265 {approx = true} : vector<8x1xf32> -> vector<8x1xf32>
    %267 = vector.broadcast %266 : vector<8x1xf32> to vector<8x8xf32>
    %268 = arith.mulf %263, %267 : vector<8x8xf32>
    %269 = arith.truncf %268 : vector<8x8xf32> to vector<8x8xbf16>
    %cst_130 = arith.constant dense<0.000000e+00> : vector<8x64xf32>
    %270 = tpu.matmul %269, %255, %cst_130 {dimension_numbers = #tpu.dot_dimension_numbers<[1], [0], [0], [1], [0, 0, 1, 1], [], []>} : vector<8x8xbf16>, vector<8x64xbf16>, vector<8x64xf32> -> vector<8x64xf32>
    %271 = arith.truncf %270 : vector<8x64xf32> to vector<8x64xbf16>
    %cst_131 = arith.constant dense<0.000000e+00> : vector<8x64xf32>
    %272 = tpu.matmul %271, %3, %cst_131 {dimension_numbers = #tpu.dot_dimension_numbers<[1], [0], [0], [1], [0, 0, 1, 1], [], []>} : vector<8x64xbf16>, vector<64x64xbf16>, vector<8x64xf32> -> vector<8x64xf32>
    %273 = vector.broadcast %7 : vector<1x64xf32> to vector<8x64xf32>
    %274 = arith.addf %272, %273 : vector<8x64xf32>
    %c0_132 = arith.constant 0 : index
    %c2_133 = arith.constant 2 : index
    %c0_134 = arith.constant 0 : index
    %275 = vector.load %arg12[%c0_132, %c2_133, %c0_134] : memref<8x8x64xf32, #tpu.memory_space<vmem>>, vector<8x1x64xf32>
    %276 = vector.shape_cast %275 : vector<8x1x64xf32> to vector<8x64xf32>
    %277 = vector.shape_cast %238 : vector<8x64xf32> to vector<8x1x64xf32>
    tpu.vector_store %arg12[%c0_132, %c2_133, %c0_134], %277 {strides = array<i32>} : memref<8x8x64xf32, #tpu.memory_space<vmem>>, vector<8x1x64xf32>,
    %c0_135 = arith.constant 0 : index
    %c2_136 = arith.constant 2 : index
    %c0_137 = arith.constant 0 : index
    %278 = vector.load %arg13[%c0_135, %c2_136, %c0_137] : memref<8x8x64xf32, #tpu.memory_space<vmem>>, vector<8x1x64xf32>
    %279 = vector.shape_cast %278 : vector<8x1x64xf32> to vector<8x64xf32>
    %280 = vector.shape_cast %212 : vector<8x64xf32> to vector<8x1x64xf32>
    tpu.vector_store %arg13[%c0_135, %c2_136, %c0_137], %280 {strides = array<i32>} : memref<8x8x64xf32, #tpu.memory_space<vmem>>, vector<8x1x64xf32>,
    %c0_138 = arith.constant 0 : index
    %c2_139 = arith.constant 2 : index
    %c0_140 = arith.constant 0 : index
    %281 = vector.load %arg14[%c0_138, %c2_139, %c0_140] : memref<8x8x64xf32, #tpu.memory_space<vmem>>, vector<8x1x64xf32>
    %282 = vector.shape_cast %281 : vector<8x1x64xf32> to vector<8x64xf32>
    %283 = vector.shape_cast %216 : vector<8x64xf32> to vector<8x1x64xf32>
    tpu.vector_store %arg14[%c0_138, %c2_139, %c0_140], %283 {strides = array<i32>} : memref<8x8x64xf32, #tpu.memory_space<vmem>>, vector<8x1x64xf32>,
    %c0_141 = arith.constant 0 : index
    %c2_142 = arith.constant 2 : index
    %c0_143 = arith.constant 0 : index
    %284 = vector.load %arg15[%c0_141, %c2_142, %c0_143] : memref<8x8x64xf32, #tpu.memory_space<vmem>>, vector<8x1x64xf32>
    %285 = vector.shape_cast %284 : vector<8x1x64xf32> to vector<8x64xf32>
    %286 = vector.shape_cast %274 : vector<8x64xf32> to vector<8x1x64xf32>
    tpu.vector_store %arg15[%c0_141, %c2_142, %c0_143], %286 {strides = array<i32>} : memref<8x8x64xf32, #tpu.memory_space<vmem>>, vector<8x1x64xf32>,
    %c0_144 = arith.constant 0 : index
    %c2_145 = arith.constant 2 : index
    %c0_146 = arith.constant 0 : index
    %287 = vector.load %arg16[%c0_144, %c2_145, %c0_146] : memref<8x8x64xf32, #tpu.memory_space<vmem>>, vector<8x1x64xf32>
    %288 = vector.shape_cast %287 : vector<8x1x64xf32> to vector<8x64xf32>
    %289 = vector.shape_cast %246 : vector<8x64xf32> to vector<8x1x64xf32>
    tpu.vector_store %arg16[%c0_144, %c2_145, %c0_146], %289 {strides = array<i32>} : memref<8x8x64xf32, #tpu.memory_space<vmem>>, vector<8x1x64xf32>,
    %c0_147 = arith.constant 0 : index
    %c2_148 = arith.constant 2 : index
    %c0_149 = arith.constant 0 : index
    %290 = vector.load %arg17[%c0_147, %c2_148, %c0_149] : memref<8x8x64xf32, #tpu.memory_space<vmem>>, vector<8x1x64xf32>
    %291 = vector.shape_cast %290 : vector<8x1x64xf32> to vector<8x64xf32>
    %292 = vector.shape_cast %250 : vector<8x64xf32> to vector<8x1x64xf32>
    tpu.vector_store %arg17[%c0_147, %c2_148, %c0_149], %292 {strides = array<i32>} : memref<8x8x64xf32, #tpu.memory_space<vmem>>, vector<8x1x64xf32>,
    %c0_150 = arith.constant 0 : index
    %c3 = arith.constant 3 : index
    %c0_151 = arith.constant 0 : index
    %293 = vector.load %arg1[%c0_150, %c3, %c0_151] : memref<8x8x64xf32, #tpu.memory_space<vmem>>, vector<8x1x64xf32>
    %294 = vector.shape_cast %293 : vector<8x1x64xf32> to vector<8x64xf32>
    %c0_152 = arith.constant 0 : index
    %c3_153 = arith.constant 3 : index
    %c0_154 = arith.constant 0 : index
    %295 = vector.load %arg2[%c0_152, %c3_153, %c0_154] : memref<8x8x64xf32, #tpu.memory_space<vmem>>, vector<8x1x64xf32>
    %296 = vector.shape_cast %295 : vector<8x1x64xf32> to vector<8x64xf32>
    %c0_155 = arith.constant 0 : index
    %c3_156 = arith.constant 3 : index
    %c0_157 = arith.constant 0 : index
    %297 = vector.load %arg3[%c0_155, %c3_156, %c0_157] : memref<8x8x64xf32, #tpu.memory_space<vmem>>, vector<8x1x64xf32>
    %298 = vector.shape_cast %297 : vector<8x1x64xf32> to vector<8x64xf32>
    %299 = arith.truncf %294 : vector<8x64xf32> to vector<8x64xbf16>
    %cst_158 = arith.constant dense<0.000000e+00> : vector<8x64xf32>
    %300 = tpu.matmul %299, %0, %cst_158 {dimension_numbers = #tpu.dot_dimension_numbers<[1], [0], [0], [1], [0, 0, 1, 1], [], []>} : vector<8x64xbf16>, vector<64x64xbf16>, vector<8x64xf32> -> vector<8x64xf32>
    %301 = vector.broadcast %4 : vector<1x64xf32> to vector<8x64xf32>
    %302 = arith.addf %300, %301 : vector<8x64xf32>
    %303 = arith.truncf %296 : vector<8x64xf32> to vector<8x64xbf16>
    %cst_159 = arith.constant dense<0.000000e+00> : vector<8x64xf32>
    %304 = tpu.matmul %303, %1, %cst_159 {dimension_numbers = #tpu.dot_dimension_numbers<[1], [0], [0], [1], [0, 0, 1, 1], [], []>} : vector<8x64xbf16>, vector<64x64xbf16>, vector<8x64xf32> -> vector<8x64xf32>
    %305 = vector.broadcast %5 : vector<1x64xf32> to vector<8x64xf32>
    %306 = arith.addf %304, %305 : vector<8x64xf32>
    %307 = arith.truncf %298 : vector<8x64xf32> to vector<8x64xbf16>
    %cst_160 = arith.constant dense<0.000000e+00> : vector<8x64xf32>
    %308 = tpu.matmul %307, %2, %cst_160 {dimension_numbers = #tpu.dot_dimension_numbers<[1], [0], [0], [1], [0, 0, 1, 1], [], []>} : vector<8x64xbf16>, vector<64x64xbf16>, vector<8x64xf32> -> vector<8x64xf32>
    %309 = vector.broadcast %6 : vector<1x64xf32> to vector<8x64xf32>
    %310 = arith.addf %308, %309 : vector<8x64xf32>
    %cst_161 = arith.constant 1.250000e-01 : f32
    %311 = vector.broadcast %cst_161 : f32 to vector<8x64xf32>
    %312 = arith.mulf %302, %311 : vector<8x64xf32>
    %313 = arith.truncf %312 : vector<8x64xf32> to vector<8x64xbf16>
    %314 = arith.truncf %306 : vector<8x64xf32> to vector<8x64xbf16>
    %315 = arith.truncf %310 : vector<8x64xf32> to vector<8x64xbf16>
    %cst_162 = arith.constant dense<0.000000e+00> : vector<8x8xf32>
    %316 = tpu.matmul %313, %314, %cst_162 {dimension_numbers = #tpu.dot_dimension_numbers<[1], [1], [0], [0], [0, 0, 1, 0], [], []>} : vector<8x64xbf16>, vector<8x64xbf16>, vector<8x8xf32> -> vector<8x8xf32>
    %cst_163 = arith.constant dense<0xFF800000> : vector<8xf32>
    %317 = vector.multi_reduction <maximumf>, %316, %cst_163 [1] : vector<8x8xf32> to vector<8xf32>
    %318 = vector.shape_cast %317 : vector<8xf32> to vector<8x1xf32>
    %319 = vector.broadcast %318 : vector<8x1xf32> to vector<8x8xf32>
    %320 = arith.subf %316, %319 : vector<8x8xf32>
    %321 = math.exp %320 : vector<8x8xf32>
    %cst_164 = arith.constant dense<0.000000e+00> : vector<8xf32>
    %322 = vector.multi_reduction <add>, %321, %cst_164 [1] : vector<8x8xf32> to vector<8xf32>
    %323 = vector.shape_cast %322 : vector<8xf32> to vector<8x1xf32>
    %324 = tpu.reciprocal %323 {approx = true} : vector<8x1xf32> -> vector<8x1xf32>
    %325 = vector.broadcast %324 : vector<8x1xf32> to vector<8x8xf32>
    %326 = arith.mulf %321, %325 : vector<8x8xf32>
    %327 = arith.truncf %326 : vector<8x8xf32> to vector<8x8xbf16>
    %cst_165 = arith.constant dense<0.000000e+00> : vector<8x64xf32>
    %328 = tpu.matmul %327, %315, %cst_165 {dimension_numbers = #tpu.dot_dimension_numbers<[1], [0], [0], [1], [0, 0, 1, 1], [], []>} : vector<8x8xbf16>, vector<8x64xbf16>, vector<8x64xf32> -> vector<8x64xf32>
    %329 = arith.truncf %328 : vector<8x64xf32> to vector<8x64xbf16>
    %cst_166 = arith.constant dense<0.000000e+00> : vector<8x64xf32>
    %330 = tpu.matmul %329, %3, %cst_166 {dimension_numbers = #tpu.dot_dimension_numbers<[1], [0], [0], [1], [0, 0, 1, 1], [], []>} : vector<8x64xbf16>, vector<64x64xbf16>, vector<8x64xf32> -> vector<8x64xf32>
    %331 = vector.broadcast %7 : vector<1x64xf32> to vector<8x64xf32>
    %332 = arith.addf %330, %331 : vector<8x64xf32>
    %333 = arith.truncf %332 : vector<8x64xf32> to vector<8x64xbf16>
    %cst_167 = arith.constant dense<0.000000e+00> : vector<8x64xf32>
    %334 = tpu.matmul %333, %0, %cst_167 {dimension_numbers = #tpu.dot_dimension_numbers<[1], [0], [0], [1], [0, 0, 1, 1], [], []>} : vector<8x64xbf16>, vector<64x64xbf16>, vector<8x64xf32> -> vector<8x64xf32>
    %335 = vector.broadcast %4 : vector<1x64xf32> to vector<8x64xf32>
    %336 = arith.addf %334, %335 : vector<8x64xf32>
    %337 = arith.truncf %332 : vector<8x64xf32> to vector<8x64xbf16>
    %cst_168 = arith.constant dense<0.000000e+00> : vector<8x64xf32>
    %338 = tpu.matmul %337, %1, %cst_168 {dimension_numbers = #tpu.dot_dimension_numbers<[1], [0], [0], [1], [0, 0, 1, 1], [], []>} : vector<8x64xbf16>, vector<64x64xbf16>, vector<8x64xf32> -> vector<8x64xf32>
    %339 = vector.broadcast %5 : vector<1x64xf32> to vector<8x64xf32>
    %340 = arith.addf %338, %339 : vector<8x64xf32>
    %341 = arith.truncf %310 : vector<8x64xf32> to vector<8x64xbf16>
    %cst_169 = arith.constant dense<0.000000e+00> : vector<8x64xf32>
    %342 = tpu.matmul %341, %2, %cst_169 {dimension_numbers = #tpu.dot_dimension_numbers<[1], [0], [0], [1], [0, 0, 1, 1], [], []>} : vector<8x64xbf16>, vector<64x64xbf16>, vector<8x64xf32> -> vector<8x64xf32>
    %343 = vector.broadcast %6 : vector<1x64xf32> to vector<8x64xf32>
    %344 = arith.addf %342, %343 : vector<8x64xf32>
    %cst_170 = arith.constant 1.250000e-01 : f32
    %345 = vector.broadcast %cst_170 : f32 to vector<8x64xf32>
    %346 = arith.mulf %336, %345 : vector<8x64xf32>
    %347 = arith.truncf %346 : vector<8x64xf32> to vector<8x64xbf16>
    %348 = arith.truncf %340 : vector<8x64xf32> to vector<8x64xbf16>
    %349 = arith.truncf %344 : vector<8x64xf32> to vector<8x64xbf16>
    %cst_171 = arith.constant dense<0.000000e+00> : vector<8x8xf32>
    %350 = tpu.matmul %347, %348, %cst_171 {dimension_numbers = #tpu.dot_dimension_numbers<[1], [1], [0], [0], [0, 0, 1, 0], [], []>} : vector<8x64xbf16>, vector<8x64xbf16>, vector<8x8xf32> -> vector<8x8xf32>
    %cst_172 = arith.constant -1.000000e+30 : f32
    %351 = vector.broadcast %cst_172 : f32 to vector<8x8xf32>
    %352 = arith.select %10, %350, %351 : vector<8x8xi1>, vector<8x8xf32>
    %cst_173 = arith.constant dense<0xFF800000> : vector<8xf32>
    %353 = vector.multi_reduction <maximumf>, %352, %cst_173 [1] : vector<8x8xf32> to vector<8xf32>
    %354 = vector.shape_cast %353 : vector<8xf32> to vector<8x1xf32>
    %355 = vector.broadcast %354 : vector<8x1xf32> to vector<8x8xf32>
    %356 = arith.subf %352, %355 : vector<8x8xf32>
    %357 = math.exp %356 : vector<8x8xf32>
    %cst_174 = arith.constant dense<0.000000e+00> : vector<8xf32>
    %358 = vector.multi_reduction <add>, %357, %cst_174 [1] : vector<8x8xf32> to vector<8xf32>
    %359 = vector.shape_cast %358 : vector<8xf32> to vector<8x1xf32>
    %360 = tpu.reciprocal %359 {approx = true} : vector<8x1xf32> -> vector<8x1xf32>
    %361 = vector.broadcast %360 : vector<8x1xf32> to vector<8x8xf32>
    %362 = arith.mulf %357, %361 : vector<8x8xf32>
    %363 = arith.truncf %362 : vector<8x8xf32> to vector<8x8xbf16>
    %cst_175 = arith.constant dense<0.000000e+00> : vector<8x64xf32>
    %364 = tpu.matmul %363, %349, %cst_175 {dimension_numbers = #tpu.dot_dimension_numbers<[1], [0], [0], [1], [0, 0, 1, 1], [], []>} : vector<8x8xbf16>, vector<8x64xbf16>, vector<8x64xf32> -> vector<8x64xf32>
    %365 = arith.truncf %364 : vector<8x64xf32> to vector<8x64xbf16>
    %cst_176 = arith.constant dense<0.000000e+00> : vector<8x64xf32>
    %366 = tpu.matmul %365, %3, %cst_176 {dimension_numbers = #tpu.dot_dimension_numbers<[1], [0], [0], [1], [0, 0, 1, 1], [], []>} : vector<8x64xbf16>, vector<64x64xbf16>, vector<8x64xf32> -> vector<8x64xf32>
    %367 = vector.broadcast %7 : vector<1x64xf32> to vector<8x64xf32>
    %368 = arith.addf %366, %367 : vector<8x64xf32>
    %c0_177 = arith.constant 0 : index
    %c3_178 = arith.constant 3 : index
    %c0_179 = arith.constant 0 : index
    %369 = vector.load %arg12[%c0_177, %c3_178, %c0_179] : memref<8x8x64xf32, #tpu.memory_space<vmem>>, vector<8x1x64xf32>
    %370 = vector.shape_cast %369 : vector<8x1x64xf32> to vector<8x64xf32>
    %371 = vector.shape_cast %332 : vector<8x64xf32> to vector<8x1x64xf32>
    tpu.vector_store %arg12[%c0_177, %c3_178, %c0_179], %371 {strides = array<i32>} : memref<8x8x64xf32, #tpu.memory_space<vmem>>, vector<8x1x64xf32>,
    %c0_180 = arith.constant 0 : index
    %c3_181 = arith.constant 3 : index
    %c0_182 = arith.constant 0 : index
    %372 = vector.load %arg13[%c0_180, %c3_181, %c0_182] : memref<8x8x64xf32, #tpu.memory_space<vmem>>, vector<8x1x64xf32>
    %373 = vector.shape_cast %372 : vector<8x1x64xf32> to vector<8x64xf32>
    %374 = vector.shape_cast %306 : vector<8x64xf32> to vector<8x1x64xf32>
    tpu.vector_store %arg13[%c0_180, %c3_181, %c0_182], %374 {strides = array<i32>} : memref<8x8x64xf32, #tpu.memory_space<vmem>>, vector<8x1x64xf32>,
    %c0_183 = arith.constant 0 : index
    %c3_184 = arith.constant 3 : index
    %c0_185 = arith.constant 0 : index
    %375 = vector.load %arg14[%c0_183, %c3_184, %c0_185] : memref<8x8x64xf32, #tpu.memory_space<vmem>>, vector<8x1x64xf32>
    %376 = vector.shape_cast %375 : vector<8x1x64xf32> to vector<8x64xf32>
    %377 = vector.shape_cast %310 : vector<8x64xf32> to vector<8x1x64xf32>
    tpu.vector_store %arg14[%c0_183, %c3_184, %c0_185], %377 {strides = array<i32>} : memref<8x8x64xf32, #tpu.memory_space<vmem>>, vector<8x1x64xf32>,
    %c0_186 = arith.constant 0 : index
    %c3_187 = arith.constant 3 : index
    %c0_188 = arith.constant 0 : index
    %378 = vector.load %arg15[%c0_186, %c3_187, %c0_188] : memref<8x8x64xf32, #tpu.memory_space<vmem>>, vector<8x1x64xf32>
    %379 = vector.shape_cast %378 : vector<8x1x64xf32> to vector<8x64xf32>
    %380 = vector.shape_cast %368 : vector<8x64xf32> to vector<8x1x64xf32>
    tpu.vector_store %arg15[%c0_186, %c3_187, %c0_188], %380 {strides = array<i32>} : memref<8x8x64xf32, #tpu.memory_space<vmem>>, vector<8x1x64xf32>,
    %c0_189 = arith.constant 0 : index
    %c3_190 = arith.constant 3 : index
    %c0_191 = arith.constant 0 : index
    %381 = vector.load %arg16[%c0_189, %c3_190, %c0_191] : memref<8x8x64xf32, #tpu.memory_space<vmem>>, vector<8x1x64xf32>
    %382 = vector.shape_cast %381 : vector<8x1x64xf32> to vector<8x64xf32>
    %383 = vector.shape_cast %340 : vector<8x64xf32> to vector<8x1x64xf32>
    tpu.vector_store %arg16[%c0_189, %c3_190, %c0_191], %383 {strides = array<i32>} : memref<8x8x64xf32, #tpu.memory_space<vmem>>, vector<8x1x64xf32>,
    %c0_192 = arith.constant 0 : index
    %c3_193 = arith.constant 3 : index
    %c0_194 = arith.constant 0 : index
    %384 = vector.load %arg17[%c0_192, %c3_193, %c0_194] : memref<8x8x64xf32, #tpu.memory_space<vmem>>, vector<8x1x64xf32>
    %385 = vector.shape_cast %384 : vector<8x1x64xf32> to vector<8x64xf32>
    %386 = vector.shape_cast %344 : vector<8x64xf32> to vector<8x1x64xf32>
    tpu.vector_store %arg17[%c0_192, %c3_193, %c0_194], %386 {strides = array<i32>} : memref<8x8x64xf32, #tpu.memory_space<vmem>>, vector<8x1x64xf32>,
    %c0_195 = arith.constant 0 : index
    %c4 = arith.constant 4 : index
    %c0_196 = arith.constant 0 : index
    %387 = vector.load %arg1[%c0_195, %c4, %c0_196] : memref<8x8x64xf32, #tpu.memory_space<vmem>>, vector<8x1x64xf32>
    %388 = vector.shape_cast %387 : vector<8x1x64xf32> to vector<8x64xf32>
    %c0_197 = arith.constant 0 : index
    %c4_198 = arith.constant 4 : index
    %c0_199 = arith.constant 0 : index
    %389 = vector.load %arg2[%c0_197, %c4_198, %c0_199] : memref<8x8x64xf32, #tpu.memory_space<vmem>>, vector<8x1x64xf32>
    %390 = vector.shape_cast %389 : vector<8x1x64xf32> to vector<8x64xf32>
    %c0_200 = arith.constant 0 : index
    %c4_201 = arith.constant 4 : index
    %c0_202 = arith.constant 0 : index
    %391 = vector.load %arg3[%c0_200, %c4_201, %c0_202] : memref<8x8x64xf32, #tpu.memory_space<vmem>>, vector<8x1x64xf32>
    %392 = vector.shape_cast %391 : vector<8x1x64xf32> to vector<8x64xf32>
    %393 = arith.truncf %388 : vector<8x64xf32> to vector<8x64xbf16>
    %cst_203 = arith.constant dense<0.000000e+00> : vector<8x64xf32>
    %394 = tpu.matmul %393, %0, %cst_203 {dimension_numbers = #tpu.dot_dimension_numbers<[1], [0], [0], [1], [0, 0, 1, 1], [], []>} : vector<8x64xbf16>, vector<64x64xbf16>, vector<8x64xf32> -> vector<8x64xf32>
    %395 = vector.broadcast %4 : vector<1x64xf32> to vector<8x64xf32>
    %396 = arith.addf %394, %395 : vector<8x64xf32>
    %397 = arith.truncf %390 : vector<8x64xf32> to vector<8x64xbf16>
    %cst_204 = arith.constant dense<0.000000e+00> : vector<8x64xf32>
    %398 = tpu.matmul %397, %1, %cst_204 {dimension_numbers = #tpu.dot_dimension_numbers<[1], [0], [0], [1], [0, 0, 1, 1], [], []>} : vector<8x64xbf16>, vector<64x64xbf16>, vector<8x64xf32> -> vector<8x64xf32>
    %399 = vector.broadcast %5 : vector<1x64xf32> to vector<8x64xf32>
    %400 = arith.addf %398, %399 : vector<8x64xf32>
    %401 = arith.truncf %392 : vector<8x64xf32> to vector<8x64xbf16>
    %cst_205 = arith.constant dense<0.000000e+00> : vector<8x64xf32>
    %402 = tpu.matmul %401, %2, %cst_205 {dimension_numbers = #tpu.dot_dimension_numbers<[1], [0], [0], [1], [0, 0, 1, 1], [], []>} : vector<8x64xbf16>, vector<64x64xbf16>, vector<8x64xf32> -> vector<8x64xf32>
    %403 = vector.broadcast %6 : vector<1x64xf32> to vector<8x64xf32>
    %404 = arith.addf %402, %403 : vector<8x64xf32>
    %cst_206 = arith.constant 1.250000e-01 : f32
    %405 = vector.broadcast %cst_206 : f32 to vector<8x64xf32>
    %406 = arith.mulf %396, %405 : vector<8x64xf32>
    %407 = arith.truncf %406 : vector<8x64xf32> to vector<8x64xbf16>
    %408 = arith.truncf %400 : vector<8x64xf32> to vector<8x64xbf16>
    %409 = arith.truncf %404 : vector<8x64xf32> to vector<8x64xbf16>
    %cst_207 = arith.constant dense<0.000000e+00> : vector<8x8xf32>
    %410 = tpu.matmul %407, %408, %cst_207 {dimension_numbers = #tpu.dot_dimension_numbers<[1], [1], [0], [0], [0, 0, 1, 0], [], []>} : vector<8x64xbf16>, vector<8x64xbf16>, vector<8x8xf32> -> vector<8x8xf32>
    %cst_208 = arith.constant dense<0xFF800000> : vector<8xf32>
    %411 = vector.multi_reduction <maximumf>, %410, %cst_208 [1] : vector<8x8xf32> to vector<8xf32>
    %412 = vector.shape_cast %411 : vector<8xf32> to vector<8x1xf32>
    %413 = vector.broadcast %412 : vector<8x1xf32> to vector<8x8xf32>
    %414 = arith.subf %410, %413 : vector<8x8xf32>
    %415 = math.exp %414 : vector<8x8xf32>
    %cst_209 = arith.constant dense<0.000000e+00> : vector<8xf32>
    %416 = vector.multi_reduction <add>, %415, %cst_209 [1] : vector<8x8xf32> to vector<8xf32>
    %417 = vector.shape_cast %416 : vector<8xf32> to vector<8x1xf32>
    %418 = tpu.reciprocal %417 {approx = true} : vector<8x1xf32> -> vector<8x1xf32>
    %419 = vector.broadcast %418 : vector<8x1xf32> to vector<8x8xf32>
    %420 = arith.mulf %415, %419 : vector<8x8xf32>
    %421 = arith.truncf %420 : vector<8x8xf32> to vector<8x8xbf16>
    %cst_210 = arith.constant dense<0.000000e+00> : vector<8x64xf32>
    %422 = tpu.matmul %421, %409, %cst_210 {dimension_numbers = #tpu.dot_dimension_numbers<[1], [0], [0], [1], [0, 0, 1, 1], [], []>} : vector<8x8xbf16>, vector<8x64xbf16>, vector<8x64xf32> -> vector<8x64xf32>
    %423 = arith.truncf %422 : vector<8x64xf32> to vector<8x64xbf16>
    %cst_211 = arith.constant dense<0.000000e+00> : vector<8x64xf32>
    %424 = tpu.matmul %423, %3, %cst_211 {dimension_numbers = #tpu.dot_dimension_numbers<[1], [0], [0], [1], [0, 0, 1, 1], [], []>} : vector<8x64xbf16>, vector<64x64xbf16>, vector<8x64xf32> -> vector<8x64xf32>
    %425 = vector.broadcast %7 : vector<1x64xf32> to vector<8x64xf32>
    %426 = arith.addf %424, %425 : vector<8x64xf32>
    %427 = arith.truncf %426 : vector<8x64xf32> to vector<8x64xbf16>
    %cst_212 = arith.constant dense<0.000000e+00> : vector<8x64xf32>
    %428 = tpu.matmul %427, %0, %cst_212 {dimension_numbers = #tpu.dot_dimension_numbers<[1], [0], [0], [1], [0, 0, 1, 1], [], []>} : vector<8x64xbf16>, vector<64x64xbf16>, vector<8x64xf32> -> vector<8x64xf32>
    %429 = vector.broadcast %4 : vector<1x64xf32> to vector<8x64xf32>
    %430 = arith.addf %428, %429 : vector<8x64xf32>
    %431 = arith.truncf %426 : vector<8x64xf32> to vector<8x64xbf16>
    %cst_213 = arith.constant dense<0.000000e+00> : vector<8x64xf32>
    %432 = tpu.matmul %431, %1, %cst_213 {dimension_numbers = #tpu.dot_dimension_numbers<[1], [0], [0], [1], [0, 0, 1, 1], [], []>} : vector<8x64xbf16>, vector<64x64xbf16>, vector<8x64xf32> -> vector<8x64xf32>
    %433 = vector.broadcast %5 : vector<1x64xf32> to vector<8x64xf32>
    %434 = arith.addf %432, %433 : vector<8x64xf32>
    %435 = arith.truncf %404 : vector<8x64xf32> to vector<8x64xbf16>
    %cst_214 = arith.constant dense<0.000000e+00> : vector<8x64xf32>
    %436 = tpu.matmul %435, %2, %cst_214 {dimension_numbers = #tpu.dot_dimension_numbers<[1], [0], [0], [1], [0, 0, 1, 1], [], []>} : vector<8x64xbf16>, vector<64x64xbf16>, vector<8x64xf32> -> vector<8x64xf32>
    %437 = vector.broadcast %6 : vector<1x64xf32> to vector<8x64xf32>
    %438 = arith.addf %436, %437 : vector<8x64xf32>
    %cst_215 = arith.constant 1.250000e-01 : f32
    %439 = vector.broadcast %cst_215 : f32 to vector<8x64xf32>
    %440 = arith.mulf %430, %439 : vector<8x64xf32>
    %441 = arith.truncf %440 : vector<8x64xf32> to vector<8x64xbf16>
    %442 = arith.truncf %434 : vector<8x64xf32> to vector<8x64xbf16>
    %443 = arith.truncf %438 : vector<8x64xf32> to vector<8x64xbf16>
    %cst_216 = arith.constant dense<0.000000e+00> : vector<8x8xf32>
    %444 = tpu.matmul %441, %442, %cst_216 {dimension_numbers = #tpu.dot_dimension_numbers<[1], [1], [0], [0], [0, 0, 1, 0], [], []>} : vector<8x64xbf16>, vector<8x64xbf16>, vector<8x8xf32> -> vector<8x8xf32>
    %cst_217 = arith.constant -1.000000e+30 : f32
    %445 = vector.broadcast %cst_217 : f32 to vector<8x8xf32>
    %446 = arith.select %10, %444, %445 : vector<8x8xi1>, vector<8x8xf32>
    %cst_218 = arith.constant dense<0xFF800000> : vector<8xf32>
    %447 = vector.multi_reduction <maximumf>, %446, %cst_218 [1] : vector<8x8xf32> to vector<8xf32>
    %448 = vector.shape_cast %447 : vector<8xf32> to vector<8x1xf32>
    %449 = vector.broadcast %448 : vector<8x1xf32> to vector<8x8xf32>
    %450 = arith.subf %446, %449 : vector<8x8xf32>
    %451 = math.exp %450 : vector<8x8xf32>
    %cst_219 = arith.constant dense<0.000000e+00> : vector<8xf32>
    %452 = vector.multi_reduction <add>, %451, %cst_219 [1] : vector<8x8xf32> to vector<8xf32>
    %453 = vector.shape_cast %452 : vector<8xf32> to vector<8x1xf32>
    %454 = tpu.reciprocal %453 {approx = true} : vector<8x1xf32> -> vector<8x1xf32>
    %455 = vector.broadcast %454 : vector<8x1xf32> to vector<8x8xf32>
    %456 = arith.mulf %451, %455 : vector<8x8xf32>
    %457 = arith.truncf %456 : vector<8x8xf32> to vector<8x8xbf16>
    %cst_220 = arith.constant dense<0.000000e+00> : vector<8x64xf32>
    %458 = tpu.matmul %457, %443, %cst_220 {dimension_numbers = #tpu.dot_dimension_numbers<[1], [0], [0], [1], [0, 0, 1, 1], [], []>} : vector<8x8xbf16>, vector<8x64xbf16>, vector<8x64xf32> -> vector<8x64xf32>
    %459 = arith.truncf %458 : vector<8x64xf32> to vector<8x64xbf16>
    %cst_221 = arith.constant dense<0.000000e+00> : vector<8x64xf32>
    %460 = tpu.matmul %459, %3, %cst_221 {dimension_numbers = #tpu.dot_dimension_numbers<[1], [0], [0], [1], [0, 0, 1, 1], [], []>} : vector<8x64xbf16>, vector<64x64xbf16>, vector<8x64xf32> -> vector<8x64xf32>
    %461 = vector.broadcast %7 : vector<1x64xf32> to vector<8x64xf32>
    %462 = arith.addf %460, %461 : vector<8x64xf32>
    %c0_222 = arith.constant 0 : index
    %c4_223 = arith.constant 4 : index
    %c0_224 = arith.constant 0 : index
    %463 = vector.load %arg12[%c0_222, %c4_223, %c0_224] : memref<8x8x64xf32, #tpu.memory_space<vmem>>, vector<8x1x64xf32>
    %464 = vector.shape_cast %463 : vector<8x1x64xf32> to vector<8x64xf32>
    %465 = vector.shape_cast %426 : vector<8x64xf32> to vector<8x1x64xf32>
    tpu.vector_store %arg12[%c0_222, %c4_223, %c0_224], %465 {strides = array<i32>} : memref<8x8x64xf32, #tpu.memory_space<vmem>>, vector<8x1x64xf32>,
    %c0_225 = arith.constant 0 : index
    %c4_226 = arith.constant 4 : index
    %c0_227 = arith.constant 0 : index
    %466 = vector.load %arg13[%c0_225, %c4_226, %c0_227] : memref<8x8x64xf32, #tpu.memory_space<vmem>>, vector<8x1x64xf32>
    %467 = vector.shape_cast %466 : vector<8x1x64xf32> to vector<8x64xf32>
    %468 = vector.shape_cast %400 : vector<8x64xf32> to vector<8x1x64xf32>
    tpu.vector_store %arg13[%c0_225, %c4_226, %c0_227], %468 {strides = array<i32>} : memref<8x8x64xf32, #tpu.memory_space<vmem>>, vector<8x1x64xf32>,
    %c0_228 = arith.constant 0 : index
    %c4_229 = arith.constant 4 : index
    %c0_230 = arith.constant 0 : index
    %469 = vector.load %arg14[%c0_228, %c4_229, %c0_230] : memref<8x8x64xf32, #tpu.memory_space<vmem>>, vector<8x1x64xf32>
    %470 = vector.shape_cast %469 : vector<8x1x64xf32> to vector<8x64xf32>
    %471 = vector.shape_cast %404 : vector<8x64xf32> to vector<8x1x64xf32>
    tpu.vector_store %arg14[%c0_228, %c4_229, %c0_230], %471 {strides = array<i32>} : memref<8x8x64xf32, #tpu.memory_space<vmem>>, vector<8x1x64xf32>,
    %c0_231 = arith.constant 0 : index
    %c4_232 = arith.constant 4 : index
    %c0_233 = arith.constant 0 : index
    %472 = vector.load %arg15[%c0_231, %c4_232, %c0_233] : memref<8x8x64xf32, #tpu.memory_space<vmem>>, vector<8x1x64xf32>
    %473 = vector.shape_cast %472 : vector<8x1x64xf32> to vector<8x64xf32>
    %474 = vector.shape_cast %462 : vector<8x64xf32> to vector<8x1x64xf32>
    tpu.vector_store %arg15[%c0_231, %c4_232, %c0_233], %474 {strides = array<i32>} : memref<8x8x64xf32, #tpu.memory_space<vmem>>, vector<8x1x64xf32>,
    %c0_234 = arith.constant 0 : index
    %c4_235 = arith.constant 4 : index
    %c0_236 = arith.constant 0 : index
    %475 = vector.load %arg16[%c0_234, %c4_235, %c0_236] : memref<8x8x64xf32, #tpu.memory_space<vmem>>, vector<8x1x64xf32>
    %476 = vector.shape_cast %475 : vector<8x1x64xf32> to vector<8x64xf32>
    %477 = vector.shape_cast %434 : vector<8x64xf32> to vector<8x1x64xf32>
    tpu.vector_store %arg16[%c0_234, %c4_235, %c0_236], %477 {strides = array<i32>} : memref<8x8x64xf32, #tpu.memory_space<vmem>>, vector<8x1x64xf32>,
    %c0_237 = arith.constant 0 : index
    %c4_238 = arith.constant 4 : index
    %c0_239 = arith.constant 0 : index
    %478 = vector.load %arg17[%c0_237, %c4_238, %c0_239] : memref<8x8x64xf32, #tpu.memory_space<vmem>>, vector<8x1x64xf32>
    %479 = vector.shape_cast %478 : vector<8x1x64xf32> to vector<8x64xf32>
    %480 = vector.shape_cast %438 : vector<8x64xf32> to vector<8x1x64xf32>
    tpu.vector_store %arg17[%c0_237, %c4_238, %c0_239], %480 {strides = array<i32>} : memref<8x8x64xf32, #tpu.memory_space<vmem>>, vector<8x1x64xf32>,
    %c0_240 = arith.constant 0 : index
    %c5 = arith.constant 5 : index
    %c0_241 = arith.constant 0 : index
    %481 = vector.load %arg1[%c0_240, %c5, %c0_241] : memref<8x8x64xf32, #tpu.memory_space<vmem>>, vector<8x1x64xf32>
    %482 = vector.shape_cast %481 : vector<8x1x64xf32> to vector<8x64xf32>
    %c0_242 = arith.constant 0 : index
    %c5_243 = arith.constant 5 : index
    %c0_244 = arith.constant 0 : index
    %483 = vector.load %arg2[%c0_242, %c5_243, %c0_244] : memref<8x8x64xf32, #tpu.memory_space<vmem>>, vector<8x1x64xf32>
    %484 = vector.shape_cast %483 : vector<8x1x64xf32> to vector<8x64xf32>
    %c0_245 = arith.constant 0 : index
    %c5_246 = arith.constant 5 : index
    %c0_247 = arith.constant 0 : index
    %485 = vector.load %arg3[%c0_245, %c5_246, %c0_247] : memref<8x8x64xf32, #tpu.memory_space<vmem>>, vector<8x1x64xf32>
    %486 = vector.shape_cast %485 : vector<8x1x64xf32> to vector<8x64xf32>
    %487 = arith.truncf %482 : vector<8x64xf32> to vector<8x64xbf16>
    %cst_248 = arith.constant dense<0.000000e+00> : vector<8x64xf32>
    %488 = tpu.matmul %487, %0, %cst_248 {dimension_numbers = #tpu.dot_dimension_numbers<[1], [0], [0], [1], [0, 0, 1, 1], [], []>} : vector<8x64xbf16>, vector<64x64xbf16>, vector<8x64xf32> -> vector<8x64xf32>
    %489 = vector.broadcast %4 : vector<1x64xf32> to vector<8x64xf32>
    %490 = arith.addf %488, %489 : vector<8x64xf32>
    %491 = arith.truncf %484 : vector<8x64xf32> to vector<8x64xbf16>
    %cst_249 = arith.constant dense<0.000000e+00> : vector<8x64xf32>
    %492 = tpu.matmul %491, %1, %cst_249 {dimension_numbers = #tpu.dot_dimension_numbers<[1], [0], [0], [1], [0, 0, 1, 1], [], []>} : vector<8x64xbf16>, vector<64x64xbf16>, vector<8x64xf32> -> vector<8x64xf32>
    %493 = vector.broadcast %5 : vector<1x64xf32> to vector<8x64xf32>
    %494 = arith.addf %492, %493 : vector<8x64xf32>
    %495 = arith.truncf %486 : vector<8x64xf32> to vector<8x64xbf16>
    %cst_250 = arith.constant dense<0.000000e+00> : vector<8x64xf32>
    %496 = tpu.matmul %495, %2, %cst_250 {dimension_numbers = #tpu.dot_dimension_numbers<[1], [0], [0], [1], [0, 0, 1, 1], [], []>} : vector<8x64xbf16>, vector<64x64xbf16>, vector<8x64xf32> -> vector<8x64xf32>
    %497 = vector.broadcast %6 : vector<1x64xf32> to vector<8x64xf32>
    %498 = arith.addf %496, %497 : vector<8x64xf32>
    %cst_251 = arith.constant 1.250000e-01 : f32
    %499 = vector.broadcast %cst_251 : f32 to vector<8x64xf32>
    %500 = arith.mulf %490, %499 : vector<8x64xf32>
    %501 = arith.truncf %500 : vector<8x64xf32> to vector<8x64xbf16>
    %502 = arith.truncf %494 : vector<8x64xf32> to vector<8x64xbf16>
    %503 = arith.truncf %498 : vector<8x64xf32> to vector<8x64xbf16>
    %cst_252 = arith.constant dense<0.000000e+00> : vector<8x8xf32>
    %504 = tpu.matmul %501, %502, %cst_252 {dimension_numbers = #tpu.dot_dimension_numbers<[1], [1], [0], [0], [0, 0, 1, 0], [], []>} : vector<8x64xbf16>, vector<8x64xbf16>, vector<8x8xf32> -> vector<8x8xf32>
    %cst_253 = arith.constant dense<0xFF800000> : vector<8xf32>
    %505 = vector.multi_reduction <maximumf>, %504, %cst_253 [1] : vector<8x8xf32> to vector<8xf32>
    %506 = vector.shape_cast %505 : vector<8xf32> to vector<8x1xf32>
    %507 = vector.broadcast %506 : vector<8x1xf32> to vector<8x8xf32>
    %508 = arith.subf %504, %507 : vector<8x8xf32>
    %509 = math.exp %508 : vector<8x8xf32>
    %cst_254 = arith.constant dense<0.000000e+00> : vector<8xf32>
    %510 = vector.multi_reduction <add>, %509, %cst_254 [1] : vector<8x8xf32> to vector<8xf32>
    %511 = vector.shape_cast %510 : vector<8xf32> to vector<8x1xf32>
    %512 = tpu.reciprocal %511 {approx = true} : vector<8x1xf32> -> vector<8x1xf32>
    %513 = vector.broadcast %512 : vector<8x1xf32> to vector<8x8xf32>
    %514 = arith.mulf %509, %513 : vector<8x8xf32>
    %515 = arith.truncf %514 : vector<8x8xf32> to vector<8x8xbf16>
    %cst_255 = arith.constant dense<0.000000e+00> : vector<8x64xf32>
    %516 = tpu.matmul %515, %503, %cst_255 {dimension_numbers = #tpu.dot_dimension_numbers<[1], [0], [0], [1], [0, 0, 1, 1], [], []>} : vector<8x8xbf16>, vector<8x64xbf16>, vector<8x64xf32> -> vector<8x64xf32>
    %517 = arith.truncf %516 : vector<8x64xf32> to vector<8x64xbf16>
    %cst_256 = arith.constant dense<0.000000e+00> : vector<8x64xf32>
    %518 = tpu.matmul %517, %3, %cst_256 {dimension_numbers = #tpu.dot_dimension_numbers<[1], [0], [0], [1], [0, 0, 1, 1], [], []>} : vector<8x64xbf16>, vector<64x64xbf16>, vector<8x64xf32> -> vector<8x64xf32>
    %519 = vector.broadcast %7 : vector<1x64xf32> to vector<8x64xf32>
    %520 = arith.addf %518, %519 : vector<8x64xf32>
    %521 = arith.truncf %520 : vector<8x64xf32> to vector<8x64xbf16>
    %cst_257 = arith.constant dense<0.000000e+00> : vector<8x64xf32>
    %522 = tpu.matmul %521, %0, %cst_257 {dimension_numbers = #tpu.dot_dimension_numbers<[1], [0], [0], [1], [0, 0, 1, 1], [], []>} : vector<8x64xbf16>, vector<64x64xbf16>, vector<8x64xf32> -> vector<8x64xf32>
    %523 = vector.broadcast %4 : vector<1x64xf32> to vector<8x64xf32>
    %524 = arith.addf %522, %523 : vector<8x64xf32>
    %525 = arith.truncf %520 : vector<8x64xf32> to vector<8x64xbf16>
    %cst_258 = arith.constant dense<0.000000e+00> : vector<8x64xf32>
    %526 = tpu.matmul %525, %1, %cst_258 {dimension_numbers = #tpu.dot_dimension_numbers<[1], [0], [0], [1], [0, 0, 1, 1], [], []>} : vector<8x64xbf16>, vector<64x64xbf16>, vector<8x64xf32> -> vector<8x64xf32>
    %527 = vector.broadcast %5 : vector<1x64xf32> to vector<8x64xf32>
    %528 = arith.addf %526, %527 : vector<8x64xf32>
    %529 = arith.truncf %498 : vector<8x64xf32> to vector<8x64xbf16>
    %cst_259 = arith.constant dense<0.000000e+00> : vector<8x64xf32>
    %530 = tpu.matmul %529, %2, %cst_259 {dimension_numbers = #tpu.dot_dimension_numbers<[1], [0], [0], [1], [0, 0, 1, 1], [], []>} : vector<8x64xbf16>, vector<64x64xbf16>, vector<8x64xf32> -> vector<8x64xf32>
    %531 = vector.broadcast %6 : vector<1x64xf32> to vector<8x64xf32>
    %532 = arith.addf %530, %531 : vector<8x64xf32>
    %cst_260 = arith.constant 1.250000e-01 : f32
    %533 = vector.broadcast %cst_260 : f32 to vector<8x64xf32>
    %534 = arith.mulf %524, %533 : vector<8x64xf32>
    %535 = arith.truncf %534 : vector<8x64xf32> to vector<8x64xbf16>
    %536 = arith.truncf %528 : vector<8x64xf32> to vector<8x64xbf16>
    %537 = arith.truncf %532 : vector<8x64xf32> to vector<8x64xbf16>
    %cst_261 = arith.constant dense<0.000000e+00> : vector<8x8xf32>
    %538 = tpu.matmul %535, %536, %cst_261 {dimension_numbers = #tpu.dot_dimension_numbers<[1], [1], [0], [0], [0, 0, 1, 0], [], []>} : vector<8x64xbf16>, vector<8x64xbf16>, vector<8x8xf32> -> vector<8x8xf32>
    %cst_262 = arith.constant -1.000000e+30 : f32
    %539 = vector.broadcast %cst_262 : f32 to vector<8x8xf32>
    %540 = arith.select %10, %538, %539 : vector<8x8xi1>, vector<8x8xf32>
    %cst_263 = arith.constant dense<0xFF800000> : vector<8xf32>
    %541 = vector.multi_reduction <maximumf>, %540, %cst_263 [1] : vector<8x8xf32> to vector<8xf32>
    %542 = vector.shape_cast %541 : vector<8xf32> to vector<8x1xf32>
    %543 = vector.broadcast %542 : vector<8x1xf32> to vector<8x8xf32>
    %544 = arith.subf %540, %543 : vector<8x8xf32>
    %545 = math.exp %544 : vector<8x8xf32>
    %cst_264 = arith.constant dense<0.000000e+00> : vector<8xf32>
    %546 = vector.multi_reduction <add>, %545, %cst_264 [1] : vector<8x8xf32> to vector<8xf32>
    %547 = vector.shape_cast %546 : vector<8xf32> to vector<8x1xf32>
    %548 = tpu.reciprocal %547 {approx = true} : vector<8x1xf32> -> vector<8x1xf32>
    %549 = vector.broadcast %548 : vector<8x1xf32> to vector<8x8xf32>
    %550 = arith.mulf %545, %549 : vector<8x8xf32>
    %551 = arith.truncf %550 : vector<8x8xf32> to vector<8x8xbf16>
    %cst_265 = arith.constant dense<0.000000e+00> : vector<8x64xf32>
    %552 = tpu.matmul %551, %537, %cst_265 {dimension_numbers = #tpu.dot_dimension_numbers<[1], [0], [0], [1], [0, 0, 1, 1], [], []>} : vector<8x8xbf16>, vector<8x64xbf16>, vector<8x64xf32> -> vector<8x64xf32>
    %553 = arith.truncf %552 : vector<8x64xf32> to vector<8x64xbf16>
    %cst_266 = arith.constant dense<0.000000e+00> : vector<8x64xf32>
    %554 = tpu.matmul %553, %3, %cst_266 {dimension_numbers = #tpu.dot_dimension_numbers<[1], [0], [0], [1], [0, 0, 1, 1], [], []>} : vector<8x64xbf16>, vector<64x64xbf16>, vector<8x64xf32> -> vector<8x64xf32>
    %555 = vector.broadcast %7 : vector<1x64xf32> to vector<8x64xf32>
    %556 = arith.addf %554, %555 : vector<8x64xf32>
    %c0_267 = arith.constant 0 : index
    %c5_268 = arith.constant 5 : index
    %c0_269 = arith.constant 0 : index
    %557 = vector.load %arg12[%c0_267, %c5_268, %c0_269] : memref<8x8x64xf32, #tpu.memory_space<vmem>>, vector<8x1x64xf32>
    %558 = vector.shape_cast %557 : vector<8x1x64xf32> to vector<8x64xf32>
    %559 = vector.shape_cast %520 : vector<8x64xf32> to vector<8x1x64xf32>
    tpu.vector_store %arg12[%c0_267, %c5_268, %c0_269], %559 {strides = array<i32>} : memref<8x8x64xf32, #tpu.memory_space<vmem>>, vector<8x1x64xf32>,
    %c0_270 = arith.constant 0 : index
    %c5_271 = arith.constant 5 : index
    %c0_272 = arith.constant 0 : index
    %560 = vector.load %arg13[%c0_270, %c5_271, %c0_272] : memref<8x8x64xf32, #tpu.memory_space<vmem>>, vector<8x1x64xf32>
    %561 = vector.shape_cast %560 : vector<8x1x64xf32> to vector<8x64xf32>
    %562 = vector.shape_cast %494 : vector<8x64xf32> to vector<8x1x64xf32>
    tpu.vector_store %arg13[%c0_270, %c5_271, %c0_272], %562 {strides = array<i32>} : memref<8x8x64xf32, #tpu.memory_space<vmem>>, vector<8x1x64xf32>,
    %c0_273 = arith.constant 0 : index
    %c5_274 = arith.constant 5 : index
    %c0_275 = arith.constant 0 : index
    %563 = vector.load %arg14[%c0_273, %c5_274, %c0_275] : memref<8x8x64xf32, #tpu.memory_space<vmem>>, vector<8x1x64xf32>
    %564 = vector.shape_cast %563 : vector<8x1x64xf32> to vector<8x64xf32>
    %565 = vector.shape_cast %498 : vector<8x64xf32> to vector<8x1x64xf32>
    tpu.vector_store %arg14[%c0_273, %c5_274, %c0_275], %565 {strides = array<i32>} : memref<8x8x64xf32, #tpu.memory_space<vmem>>, vector<8x1x64xf32>,
    %c0_276 = arith.constant 0 : index
    %c5_277 = arith.constant 5 : index
    %c0_278 = arith.constant 0 : index
    %566 = vector.load %arg15[%c0_276, %c5_277, %c0_278] : memref<8x8x64xf32, #tpu.memory_space<vmem>>, vector<8x1x64xf32>
    %567 = vector.shape_cast %566 : vector<8x1x64xf32> to vector<8x64xf32>
    %568 = vector.shape_cast %556 : vector<8x64xf32> to vector<8x1x64xf32>
    tpu.vector_store %arg15[%c0_276, %c5_277, %c0_278], %568 {strides = array<i32>} : memref<8x8x64xf32, #tpu.memory_space<vmem>>, vector<8x1x64xf32>,
    %c0_279 = arith.constant 0 : index
    %c5_280 = arith.constant 5 : index
    %c0_281 = arith.constant 0 : index
    %569 = vector.load %arg16[%c0_279, %c5_280, %c0_281] : memref<8x8x64xf32, #tpu.memory_space<vmem>>, vector<8x1x64xf32>
    %570 = vector.shape_cast %569 : vector<8x1x64xf32> to vector<8x64xf32>
    %571 = vector.shape_cast %528 : vector<8x64xf32> to vector<8x1x64xf32>
    tpu.vector_store %arg16[%c0_279, %c5_280, %c0_281], %571 {strides = array<i32>} : memref<8x8x64xf32, #tpu.memory_space<vmem>>, vector<8x1x64xf32>,
    %c0_282 = arith.constant 0 : index
    %c5_283 = arith.constant 5 : index
    %c0_284 = arith.constant 0 : index
    %572 = vector.load %arg17[%c0_282, %c5_283, %c0_284] : memref<8x8x64xf32, #tpu.memory_space<vmem>>, vector<8x1x64xf32>
    %573 = vector.shape_cast %572 : vector<8x1x64xf32> to vector<8x64xf32>
    %574 = vector.shape_cast %532 : vector<8x64xf32> to vector<8x1x64xf32>
    tpu.vector_store %arg17[%c0_282, %c5_283, %c0_284], %574 {strides = array<i32>} : memref<8x8x64xf32, #tpu.memory_space<vmem>>, vector<8x1x64xf32>,
    %c0_285 = arith.constant 0 : index
    %c6 = arith.constant 6 : index
    %c0_286 = arith.constant 0 : index
    %575 = vector.load %arg1[%c0_285, %c6, %c0_286] : memref<8x8x64xf32, #tpu.memory_space<vmem>>, vector<8x1x64xf32>
    %576 = vector.shape_cast %575 : vector<8x1x64xf32> to vector<8x64xf32>
    %c0_287 = arith.constant 0 : index
    %c6_288 = arith.constant 6 : index
    %c0_289 = arith.constant 0 : index
    %577 = vector.load %arg2[%c0_287, %c6_288, %c0_289] : memref<8x8x64xf32, #tpu.memory_space<vmem>>, vector<8x1x64xf32>
    %578 = vector.shape_cast %577 : vector<8x1x64xf32> to vector<8x64xf32>
    %c0_290 = arith.constant 0 : index
    %c6_291 = arith.constant 6 : index
    %c0_292 = arith.constant 0 : index
    %579 = vector.load %arg3[%c0_290, %c6_291, %c0_292] : memref<8x8x64xf32, #tpu.memory_space<vmem>>, vector<8x1x64xf32>
    %580 = vector.shape_cast %579 : vector<8x1x64xf32> to vector<8x64xf32>
    %581 = arith.truncf %576 : vector<8x64xf32> to vector<8x64xbf16>
    %cst_293 = arith.constant dense<0.000000e+00> : vector<8x64xf32>
    %582 = tpu.matmul %581, %0, %cst_293 {dimension_numbers = #tpu.dot_dimension_numbers<[1], [0], [0], [1], [0, 0, 1, 1], [], []>} : vector<8x64xbf16>, vector<64x64xbf16>, vector<8x64xf32> -> vector<8x64xf32>
    %583 = vector.broadcast %4 : vector<1x64xf32> to vector<8x64xf32>
    %584 = arith.addf %582, %583 : vector<8x64xf32>
    %585 = arith.truncf %578 : vector<8x64xf32> to vector<8x64xbf16>
    %cst_294 = arith.constant dense<0.000000e+00> : vector<8x64xf32>
    %586 = tpu.matmul %585, %1, %cst_294 {dimension_numbers = #tpu.dot_dimension_numbers<[1], [0], [0], [1], [0, 0, 1, 1], [], []>} : vector<8x64xbf16>, vector<64x64xbf16>, vector<8x64xf32> -> vector<8x64xf32>
    %587 = vector.broadcast %5 : vector<1x64xf32> to vector<8x64xf32>
    %588 = arith.addf %586, %587 : vector<8x64xf32>
    %589 = arith.truncf %580 : vector<8x64xf32> to vector<8x64xbf16>
    %cst_295 = arith.constant dense<0.000000e+00> : vector<8x64xf32>
    %590 = tpu.matmul %589, %2, %cst_295 {dimension_numbers = #tpu.dot_dimension_numbers<[1], [0], [0], [1], [0, 0, 1, 1], [], []>} : vector<8x64xbf16>, vector<64x64xbf16>, vector<8x64xf32> -> vector<8x64xf32>
    %591 = vector.broadcast %6 : vector<1x64xf32> to vector<8x64xf32>
    %592 = arith.addf %590, %591 : vector<8x64xf32>
    %cst_296 = arith.constant 1.250000e-01 : f32
    %593 = vector.broadcast %cst_296 : f32 to vector<8x64xf32>
    %594 = arith.mulf %584, %593 : vector<8x64xf32>
    %595 = arith.truncf %594 : vector<8x64xf32> to vector<8x64xbf16>
    %596 = arith.truncf %588 : vector<8x64xf32> to vector<8x64xbf16>
    %597 = arith.truncf %592 : vector<8x64xf32> to vector<8x64xbf16>
    %cst_297 = arith.constant dense<0.000000e+00> : vector<8x8xf32>
    %598 = tpu.matmul %595, %596, %cst_297 {dimension_numbers = #tpu.dot_dimension_numbers<[1], [1], [0], [0], [0, 0, 1, 0], [], []>} : vector<8x64xbf16>, vector<8x64xbf16>, vector<8x8xf32> -> vector<8x8xf32>
    %cst_298 = arith.constant dense<0xFF800000> : vector<8xf32>
    %599 = vector.multi_reduction <maximumf>, %598, %cst_298 [1] : vector<8x8xf32> to vector<8xf32>
    %600 = vector.shape_cast %599 : vector<8xf32> to vector<8x1xf32>
    %601 = vector.broadcast %600 : vector<8x1xf32> to vector<8x8xf32>
    %602 = arith.subf %598, %601 : vector<8x8xf32>
    %603 = math.exp %602 : vector<8x8xf32>
    %cst_299 = arith.constant dense<0.000000e+00> : vector<8xf32>
    %604 = vector.multi_reduction <add>, %603, %cst_299 [1] : vector<8x8xf32> to vector<8xf32>
    %605 = vector.shape_cast %604 : vector<8xf32> to vector<8x1xf32>
    %606 = tpu.reciprocal %605 {approx = true} : vector<8x1xf32> -> vector<8x1xf32>
    %607 = vector.broadcast %606 : vector<8x1xf32> to vector<8x8xf32>
    %608 = arith.mulf %603, %607 : vector<8x8xf32>
    %609 = arith.truncf %608 : vector<8x8xf32> to vector<8x8xbf16>
    %cst_300 = arith.constant dense<0.000000e+00> : vector<8x64xf32>
    %610 = tpu.matmul %609, %597, %cst_300 {dimension_numbers = #tpu.dot_dimension_numbers<[1], [0], [0], [1], [0, 0, 1, 1], [], []>} : vector<8x8xbf16>, vector<8x64xbf16>, vector<8x64xf32> -> vector<8x64xf32>
    %611 = arith.truncf %610 : vector<8x64xf32> to vector<8x64xbf16>
    %cst_301 = arith.constant dense<0.000000e+00> : vector<8x64xf32>
    %612 = tpu.matmul %611, %3, %cst_301 {dimension_numbers = #tpu.dot_dimension_numbers<[1], [0], [0], [1], [0, 0, 1, 1], [], []>} : vector<8x64xbf16>, vector<64x64xbf16>, vector<8x64xf32> -> vector<8x64xf32>
    %613 = vector.broadcast %7 : vector<1x64xf32> to vector<8x64xf32>
    %614 = arith.addf %612, %613 : vector<8x64xf32>
    %615 = arith.truncf %614 : vector<8x64xf32> to vector<8x64xbf16>
    %cst_302 = arith.constant dense<0.000000e+00> : vector<8x64xf32>
    %616 = tpu.matmul %615, %0, %cst_302 {dimension_numbers = #tpu.dot_dimension_numbers<[1], [0], [0], [1], [0, 0, 1, 1], [], []>} : vector<8x64xbf16>, vector<64x64xbf16>, vector<8x64xf32> -> vector<8x64xf32>
    %617 = vector.broadcast %4 : vector<1x64xf32> to vector<8x64xf32>
    %618 = arith.addf %616, %617 : vector<8x64xf32>
    %619 = arith.truncf %614 : vector<8x64xf32> to vector<8x64xbf16>
    %cst_303 = arith.constant dense<0.000000e+00> : vector<8x64xf32>
    %620 = tpu.matmul %619, %1, %cst_303 {dimension_numbers = #tpu.dot_dimension_numbers<[1], [0], [0], [1], [0, 0, 1, 1], [], []>} : vector<8x64xbf16>, vector<64x64xbf16>, vector<8x64xf32> -> vector<8x64xf32>
    %621 = vector.broadcast %5 : vector<1x64xf32> to vector<8x64xf32>
    %622 = arith.addf %620, %621 : vector<8x64xf32>
    %623 = arith.truncf %592 : vector<8x64xf32> to vector<8x64xbf16>
    %cst_304 = arith.constant dense<0.000000e+00> : vector<8x64xf32>
    %624 = tpu.matmul %623, %2, %cst_304 {dimension_numbers = #tpu.dot_dimension_numbers<[1], [0], [0], [1], [0, 0, 1, 1], [], []>} : vector<8x64xbf16>, vector<64x64xbf16>, vector<8x64xf32> -> vector<8x64xf32>
    %625 = vector.broadcast %6 : vector<1x64xf32> to vector<8x64xf32>
    %626 = arith.addf %624, %625 : vector<8x64xf32>
    %cst_305 = arith.constant 1.250000e-01 : f32
    %627 = vector.broadcast %cst_305 : f32 to vector<8x64xf32>
    %628 = arith.mulf %618, %627 : vector<8x64xf32>
    %629 = arith.truncf %628 : vector<8x64xf32> to vector<8x64xbf16>
    %630 = arith.truncf %622 : vector<8x64xf32> to vector<8x64xbf16>
    %631 = arith.truncf %626 : vector<8x64xf32> to vector<8x64xbf16>
    %cst_306 = arith.constant dense<0.000000e+00> : vector<8x8xf32>
    %632 = tpu.matmul %629, %630, %cst_306 {dimension_numbers = #tpu.dot_dimension_numbers<[1], [1], [0], [0], [0, 0, 1, 0], [], []>} : vector<8x64xbf16>, vector<8x64xbf16>, vector<8x8xf32> -> vector<8x8xf32>
    %cst_307 = arith.constant -1.000000e+30 : f32
    %633 = vector.broadcast %cst_307 : f32 to vector<8x8xf32>
    %634 = arith.select %10, %632, %633 : vector<8x8xi1>, vector<8x8xf32>
    %cst_308 = arith.constant dense<0xFF800000> : vector<8xf32>
    %635 = vector.multi_reduction <maximumf>, %634, %cst_308 [1] : vector<8x8xf32> to vector<8xf32>
    %636 = vector.shape_cast %635 : vector<8xf32> to vector<8x1xf32>
    %637 = vector.broadcast %636 : vector<8x1xf32> to vector<8x8xf32>
    %638 = arith.subf %634, %637 : vector<8x8xf32>
    %639 = math.exp %638 : vector<8x8xf32>
    %cst_309 = arith.constant dense<0.000000e+00> : vector<8xf32>
    %640 = vector.multi_reduction <add>, %639, %cst_309 [1] : vector<8x8xf32> to vector<8xf32>
    %641 = vector.shape_cast %640 : vector<8xf32> to vector<8x1xf32>
    %642 = tpu.reciprocal %641 {approx = true} : vector<8x1xf32> -> vector<8x1xf32>
    %643 = vector.broadcast %642 : vector<8x1xf32> to vector<8x8xf32>
    %644 = arith.mulf %639, %643 : vector<8x8xf32>
    %645 = arith.truncf %644 : vector<8x8xf32> to vector<8x8xbf16>
    %cst_310 = arith.constant dense<0.000000e+00> : vector<8x64xf32>
    %646 = tpu.matmul %645, %631, %cst_310 {dimension_numbers = #tpu.dot_dimension_numbers<[1], [0], [0], [1], [0, 0, 1, 1], [], []>} : vector<8x8xbf16>, vector<8x64xbf16>, vector<8x64xf32> -> vector<8x64xf32>
    %647 = arith.truncf %646 : vector<8x64xf32> to vector<8x64xbf16>
    %cst_311 = arith.constant dense<0.000000e+00> : vector<8x64xf32>
    %648 = tpu.matmul %647, %3, %cst_311 {dimension_numbers = #tpu.dot_dimension_numbers<[1], [0], [0], [1], [0, 0, 1, 1], [], []>} : vector<8x64xbf16>, vector<64x64xbf16>, vector<8x64xf32> -> vector<8x64xf32>
    %649 = vector.broadcast %7 : vector<1x64xf32> to vector<8x64xf32>
    %650 = arith.addf %648, %649 : vector<8x64xf32>
    %c0_312 = arith.constant 0 : index
    %c6_313 = arith.constant 6 : index
    %c0_314 = arith.constant 0 : index
    %651 = vector.load %arg12[%c0_312, %c6_313, %c0_314] : memref<8x8x64xf32, #tpu.memory_space<vmem>>, vector<8x1x64xf32>
    %652 = vector.shape_cast %651 : vector<8x1x64xf32> to vector<8x64xf32>
    %653 = vector.shape_cast %614 : vector<8x64xf32> to vector<8x1x64xf32>
    tpu.vector_store %arg12[%c0_312, %c6_313, %c0_314], %653 {strides = array<i32>} : memref<8x8x64xf32, #tpu.memory_space<vmem>>, vector<8x1x64xf32>,
    %c0_315 = arith.constant 0 : index
    %c6_316 = arith.constant 6 : index
    %c0_317 = arith.constant 0 : index
    %654 = vector.load %arg13[%c0_315, %c6_316, %c0_317] : memref<8x8x64xf32, #tpu.memory_space<vmem>>, vector<8x1x64xf32>
    %655 = vector.shape_cast %654 : vector<8x1x64xf32> to vector<8x64xf32>
    %656 = vector.shape_cast %588 : vector<8x64xf32> to vector<8x1x64xf32>
    tpu.vector_store %arg13[%c0_315, %c6_316, %c0_317], %656 {strides = array<i32>} : memref<8x8x64xf32, #tpu.memory_space<vmem>>, vector<8x1x64xf32>,
    %c0_318 = arith.constant 0 : index
    %c6_319 = arith.constant 6 : index
    %c0_320 = arith.constant 0 : index
    %657 = vector.load %arg14[%c0_318, %c6_319, %c0_320] : memref<8x8x64xf32, #tpu.memory_space<vmem>>, vector<8x1x64xf32>
    %658 = vector.shape_cast %657 : vector<8x1x64xf32> to vector<8x64xf32>
    %659 = vector.shape_cast %592 : vector<8x64xf32> to vector<8x1x64xf32>
    tpu.vector_store %arg14[%c0_318, %c6_319, %c0_320], %659 {strides = array<i32>} : memref<8x8x64xf32, #tpu.memory_space<vmem>>, vector<8x1x64xf32>,
    %c0_321 = arith.constant 0 : index
    %c6_322 = arith.constant 6 : index
    %c0_323 = arith.constant 0 : index
    %660 = vector.load %arg15[%c0_321, %c6_322, %c0_323] : memref<8x8x64xf32, #tpu.memory_space<vmem>>, vector<8x1x64xf32>
    %661 = vector.shape_cast %660 : vector<8x1x64xf32> to vector<8x64xf32>
    %662 = vector.shape_cast %650 : vector<8x64xf32> to vector<8x1x64xf32>
    tpu.vector_store %arg15[%c0_321, %c6_322, %c0_323], %662 {strides = array<i32>} : memref<8x8x64xf32, #tpu.memory_space<vmem>>, vector<8x1x64xf32>,
    %c0_324 = arith.constant 0 : index
    %c6_325 = arith.constant 6 : index
    %c0_326 = arith.constant 0 : index
    %663 = vector.load %arg16[%c0_324, %c6_325, %c0_326] : memref<8x8x64xf32, #tpu.memory_space<vmem>>, vector<8x1x64xf32>
    %664 = vector.shape_cast %663 : vector<8x1x64xf32> to vector<8x64xf32>
    %665 = vector.shape_cast %622 : vector<8x64xf32> to vector<8x1x64xf32>
    tpu.vector_store %arg16[%c0_324, %c6_325, %c0_326], %665 {strides = array<i32>} : memref<8x8x64xf32, #tpu.memory_space<vmem>>, vector<8x1x64xf32>,
    %c0_327 = arith.constant 0 : index
    %c6_328 = arith.constant 6 : index
    %c0_329 = arith.constant 0 : index
    %666 = vector.load %arg17[%c0_327, %c6_328, %c0_329] : memref<8x8x64xf32, #tpu.memory_space<vmem>>, vector<8x1x64xf32>
    %667 = vector.shape_cast %666 : vector<8x1x64xf32> to vector<8x64xf32>
    %668 = vector.shape_cast %626 : vector<8x64xf32> to vector<8x1x64xf32>
    tpu.vector_store %arg17[%c0_327, %c6_328, %c0_329], %668 {strides = array<i32>} : memref<8x8x64xf32, #tpu.memory_space<vmem>>, vector<8x1x64xf32>,
    %c0_330 = arith.constant 0 : index
    %c7 = arith.constant 7 : index
    %c0_331 = arith.constant 0 : index
    %669 = vector.load %arg1[%c0_330, %c7, %c0_331] : memref<8x8x64xf32, #tpu.memory_space<vmem>>, vector<8x1x64xf32>
    %670 = vector.shape_cast %669 : vector<8x1x64xf32> to vector<8x64xf32>
    %c0_332 = arith.constant 0 : index
    %c7_333 = arith.constant 7 : index
    %c0_334 = arith.constant 0 : index
    %671 = vector.load %arg2[%c0_332, %c7_333, %c0_334] : memref<8x8x64xf32, #tpu.memory_space<vmem>>, vector<8x1x64xf32>
    %672 = vector.shape_cast %671 : vector<8x1x64xf32> to vector<8x64xf32>
    %c0_335 = arith.constant 0 : index
    %c7_336 = arith.constant 7 : index
    %c0_337 = arith.constant 0 : index
    %673 = vector.load %arg3[%c0_335, %c7_336, %c0_337] : memref<8x8x64xf32, #tpu.memory_space<vmem>>, vector<8x1x64xf32>
    %674 = vector.shape_cast %673 : vector<8x1x64xf32> to vector<8x64xf32>
    %675 = arith.truncf %670 : vector<8x64xf32> to vector<8x64xbf16>
    %cst_338 = arith.constant dense<0.000000e+00> : vector<8x64xf32>
    %676 = tpu.matmul %675, %0, %cst_338 {dimension_numbers = #tpu.dot_dimension_numbers<[1], [0], [0], [1], [0, 0, 1, 1], [], []>} : vector<8x64xbf16>, vector<64x64xbf16>, vector<8x64xf32> -> vector<8x64xf32>
    %677 = vector.broadcast %4 : vector<1x64xf32> to vector<8x64xf32>
    %678 = arith.addf %676, %677 : vector<8x64xf32>
    %679 = arith.truncf %672 : vector<8x64xf32> to vector<8x64xbf16>
    %cst_339 = arith.constant dense<0.000000e+00> : vector<8x64xf32>
    %680 = tpu.matmul %679, %1, %cst_339 {dimension_numbers = #tpu.dot_dimension_numbers<[1], [0], [0], [1], [0, 0, 1, 1], [], []>} : vector<8x64xbf16>, vector<64x64xbf16>, vector<8x64xf32> -> vector<8x64xf32>
    %681 = vector.broadcast %5 : vector<1x64xf32> to vector<8x64xf32>
    %682 = arith.addf %680, %681 : vector<8x64xf32>
    %683 = arith.truncf %674 : vector<8x64xf32> to vector<8x64xbf16>
    %cst_340 = arith.constant dense<0.000000e+00> : vector<8x64xf32>
    %684 = tpu.matmul %683, %2, %cst_340 {dimension_numbers = #tpu.dot_dimension_numbers<[1], [0], [0], [1], [0, 0, 1, 1], [], []>} : vector<8x64xbf16>, vector<64x64xbf16>, vector<8x64xf32> -> vector<8x64xf32>
    %685 = vector.broadcast %6 : vector<1x64xf32> to vector<8x64xf32>
    %686 = arith.addf %684, %685 : vector<8x64xf32>
    %cst_341 = arith.constant 1.250000e-01 : f32
    %687 = vector.broadcast %cst_341 : f32 to vector<8x64xf32>
    %688 = arith.mulf %678, %687 : vector<8x64xf32>
    %689 = arith.truncf %688 : vector<8x64xf32> to vector<8x64xbf16>
    %690 = arith.truncf %682 : vector<8x64xf32> to vector<8x64xbf16>
    %691 = arith.truncf %686 : vector<8x64xf32> to vector<8x64xbf16>
    %cst_342 = arith.constant dense<0.000000e+00> : vector<8x8xf32>
    %692 = tpu.matmul %689, %690, %cst_342 {dimension_numbers = #tpu.dot_dimension_numbers<[1], [1], [0], [0], [0, 0, 1, 0], [], []>} : vector<8x64xbf16>, vector<8x64xbf16>, vector<8x8xf32> -> vector<8x8xf32>
    %cst_343 = arith.constant dense<0xFF800000> : vector<8xf32>
    %693 = vector.multi_reduction <maximumf>, %692, %cst_343 [1] : vector<8x8xf32> to vector<8xf32>
    %694 = vector.shape_cast %693 : vector<8xf32> to vector<8x1xf32>
    %695 = vector.broadcast %694 : vector<8x1xf32> to vector<8x8xf32>
    %696 = arith.subf %692, %695 : vector<8x8xf32>
    %697 = math.exp %696 : vector<8x8xf32>
    %cst_344 = arith.constant dense<0.000000e+00> : vector<8xf32>
    %698 = vector.multi_reduction <add>, %697, %cst_344 [1] : vector<8x8xf32> to vector<8xf32>
    %699 = vector.shape_cast %698 : vector<8xf32> to vector<8x1xf32>
    %700 = tpu.reciprocal %699 {approx = true} : vector<8x1xf32> -> vector<8x1xf32>
    %701 = vector.broadcast %700 : vector<8x1xf32> to vector<8x8xf32>
    %702 = arith.mulf %697, %701 : vector<8x8xf32>
    %703 = arith.truncf %702 : vector<8x8xf32> to vector<8x8xbf16>
    %cst_345 = arith.constant dense<0.000000e+00> : vector<8x64xf32>
    %704 = tpu.matmul %703, %691, %cst_345 {dimension_numbers = #tpu.dot_dimension_numbers<[1], [0], [0], [1], [0, 0, 1, 1], [], []>} : vector<8x8xbf16>, vector<8x64xbf16>, vector<8x64xf32> -> vector<8x64xf32>
    %705 = arith.truncf %704 : vector<8x64xf32> to vector<8x64xbf16>
    %cst_346 = arith.constant dense<0.000000e+00> : vector<8x64xf32>
    %706 = tpu.matmul %705, %3, %cst_346 {dimension_numbers = #tpu.dot_dimension_numbers<[1], [0], [0], [1], [0, 0, 1, 1], [], []>} : vector<8x64xbf16>, vector<64x64xbf16>, vector<8x64xf32> -> vector<8x64xf32>
    %707 = vector.broadcast %7 : vector<1x64xf32> to vector<8x64xf32>
    %708 = arith.addf %706, %707 : vector<8x64xf32>
    %709 = arith.truncf %708 : vector<8x64xf32> to vector<8x64xbf16>
    %cst_347 = arith.constant dense<0.000000e+00> : vector<8x64xf32>
    %710 = tpu.matmul %709, %0, %cst_347 {dimension_numbers = #tpu.dot_dimension_numbers<[1], [0], [0], [1], [0, 0, 1, 1], [], []>} : vector<8x64xbf16>, vector<64x64xbf16>, vector<8x64xf32> -> vector<8x64xf32>
    %711 = vector.broadcast %4 : vector<1x64xf32> to vector<8x64xf32>
    %712 = arith.addf %710, %711 : vector<8x64xf32>
    %713 = arith.truncf %708 : vector<8x64xf32> to vector<8x64xbf16>
    %cst_348 = arith.constant dense<0.000000e+00> : vector<8x64xf32>
    %714 = tpu.matmul %713, %1, %cst_348 {dimension_numbers = #tpu.dot_dimension_numbers<[1], [0], [0], [1], [0, 0, 1, 1], [], []>} : vector<8x64xbf16>, vector<64x64xbf16>, vector<8x64xf32> -> vector<8x64xf32>
    %715 = vector.broadcast %5 : vector<1x64xf32> to vector<8x64xf32>
    %716 = arith.addf %714, %715 : vector<8x64xf32>
    %717 = arith.truncf %686 : vector<8x64xf32> to vector<8x64xbf16>
    %cst_349 = arith.constant dense<0.000000e+00> : vector<8x64xf32>
    %718 = tpu.matmul %717, %2, %cst_349 {dimension_numbers = #tpu.dot_dimension_numbers<[1], [0], [0], [1], [0, 0, 1, 1], [], []>} : vector<8x64xbf16>, vector<64x64xbf16>, vector<8x64xf32> -> vector<8x64xf32>
    %719 = vector.broadcast %6 : vector<1x64xf32> to vector<8x64xf32>
    %720 = arith.addf %718, %719 : vector<8x64xf32>
    %cst_350 = arith.constant 1.250000e-01 : f32
    %721 = vector.broadcast %cst_350 : f32 to vector<8x64xf32>
    %722 = arith.mulf %712, %721 : vector<8x64xf32>
    %723 = arith.truncf %722 : vector<8x64xf32> to vector<8x64xbf16>
    %724 = arith.truncf %716 : vector<8x64xf32> to vector<8x64xbf16>
    %725 = arith.truncf %720 : vector<8x64xf32> to vector<8x64xbf16>
    %cst_351 = arith.constant dense<0.000000e+00> : vector<8x8xf32>
    %726 = tpu.matmul %723, %724, %cst_351 {dimension_numbers = #tpu.dot_dimension_numbers<[1], [1], [0], [0], [0, 0, 1, 0], [], []>} : vector<8x64xbf16>, vector<8x64xbf16>, vector<8x8xf32> -> vector<8x8xf32>
    %cst_352 = arith.constant -1.000000e+30 : f32
    %727 = vector.broadcast %cst_352 : f32 to vector<8x8xf32>
    %728 = arith.select %10, %726, %727 : vector<8x8xi1>, vector<8x8xf32>
    %cst_353 = arith.constant dense<0xFF800000> : vector<8xf32>
    %729 = vector.multi_reduction <maximumf>, %728, %cst_353 [1] : vector<8x8xf32> to vector<8xf32>
    %730 = vector.shape_cast %729 : vector<8xf32> to vector<8x1xf32>
    %731 = vector.broadcast %730 : vector<8x1xf32> to vector<8x8xf32>
    %732 = arith.subf %728, %731 : vector<8x8xf32>
    %733 = math.exp %732 : vector<8x8xf32>
    %cst_354 = arith.constant dense<0.000000e+00> : vector<8xf32>
    %734 = vector.multi_reduction <add>, %733, %cst_354 [1] : vector<8x8xf32> to vector<8xf32>
    %735 = vector.shape_cast %734 : vector<8xf32> to vector<8x1xf32>
    %736 = tpu.reciprocal %735 {approx = true} : vector<8x1xf32> -> vector<8x1xf32>
    %737 = vector.broadcast %736 : vector<8x1xf32> to vector<8x8xf32>
    %738 = arith.mulf %733, %737 : vector<8x8xf32>
    %739 = arith.truncf %738 : vector<8x8xf32> to vector<8x8xbf16>
    %cst_355 = arith.constant dense<0.000000e+00> : vector<8x64xf32>
    %740 = tpu.matmul %739, %725, %cst_355 {dimension_numbers = #tpu.dot_dimension_numbers<[1], [0], [0], [1], [0, 0, 1, 1], [], []>} : vector<8x8xbf16>, vector<8x64xbf16>, vector<8x64xf32> -> vector<8x64xf32>
    %741 = arith.truncf %740 : vector<8x64xf32> to vector<8x64xbf16>
    %cst_356 = arith.constant dense<0.000000e+00> : vector<8x64xf32>
    %742 = tpu.matmul %741, %3, %cst_356 {dimension_numbers = #tpu.dot_dimension_numbers<[1], [0], [0], [1], [0, 0, 1, 1], [], []>} : vector<8x64xbf16>, vector<64x64xbf16>, vector<8x64xf32> -> vector<8x64xf32>
    %743 = vector.broadcast %7 : vector<1x64xf32> to vector<8x64xf32>
    %744 = arith.addf %742, %743 : vector<8x64xf32>
    %c0_357 = arith.constant 0 : index
    %c7_358 = arith.constant 7 : index
    %c0_359 = arith.constant 0 : index
    %745 = vector.load %arg12[%c0_357, %c7_358, %c0_359] : memref<8x8x64xf32, #tpu.memory_space<vmem>>, vector<8x1x64xf32>
    %746 = vector.shape_cast %745 : vector<8x1x64xf32> to vector<8x64xf32>
    %747 = vector.shape_cast %708 : vector<8x64xf32> to vector<8x1x64xf32>
    tpu.vector_store %arg12[%c0_357, %c7_358, %c0_359], %747 {strides = array<i32>} : memref<8x8x64xf32, #tpu.memory_space<vmem>>, vector<8x1x64xf32>,
    %c0_360 = arith.constant 0 : index
    %c7_361 = arith.constant 7 : index
    %c0_362 = arith.constant 0 : index
    %748 = vector.load %arg13[%c0_360, %c7_361, %c0_362] : memref<8x8x64xf32, #tpu.memory_space<vmem>>, vector<8x1x64xf32>
    %749 = vector.shape_cast %748 : vector<8x1x64xf32> to vector<8x64xf32>
    %750 = vector.shape_cast %682 : vector<8x64xf32> to vector<8x1x64xf32>
    tpu.vector_store %arg13[%c0_360, %c7_361, %c0_362], %750 {strides = array<i32>} : memref<8x8x64xf32, #tpu.memory_space<vmem>>, vector<8x1x64xf32>,
    %c0_363 = arith.constant 0 : index
    %c7_364 = arith.constant 7 : index
    %c0_365 = arith.constant 0 : index
    %751 = vector.load %arg14[%c0_363, %c7_364, %c0_365] : memref<8x8x64xf32, #tpu.memory_space<vmem>>, vector<8x1x64xf32>
    %752 = vector.shape_cast %751 : vector<8x1x64xf32> to vector<8x64xf32>
    %753 = vector.shape_cast %686 : vector<8x64xf32> to vector<8x1x64xf32>
    tpu.vector_store %arg14[%c0_363, %c7_364, %c0_365], %753 {strides = array<i32>} : memref<8x8x64xf32, #tpu.memory_space<vmem>>, vector<8x1x64xf32>,
    %c0_366 = arith.constant 0 : index
    %c7_367 = arith.constant 7 : index
    %c0_368 = arith.constant 0 : index
    %754 = vector.load %arg15[%c0_366, %c7_367, %c0_368] : memref<8x8x64xf32, #tpu.memory_space<vmem>>, vector<8x1x64xf32>
    %755 = vector.shape_cast %754 : vector<8x1x64xf32> to vector<8x64xf32>
    %756 = vector.shape_cast %744 : vector<8x64xf32> to vector<8x1x64xf32>
    tpu.vector_store %arg15[%c0_366, %c7_367, %c0_368], %756 {strides = array<i32>} : memref<8x8x64xf32, #tpu.memory_space<vmem>>, vector<8x1x64xf32>,
    %c0_369 = arith.constant 0 : index
    %c7_370 = arith.constant 7 : index
    %c0_371 = arith.constant 0 : index
    %757 = vector.load %arg16[%c0_369, %c7_370, %c0_371] : memref<8x8x64xf32, #tpu.memory_space<vmem>>, vector<8x1x64xf32>
    %758 = vector.shape_cast %757 : vector<8x1x64xf32> to vector<8x64xf32>
    %759 = vector.shape_cast %716 : vector<8x64xf32> to vector<8x1x64xf32>
    tpu.vector_store %arg16[%c0_369, %c7_370, %c0_371], %759 {strides = array<i32>} : memref<8x8x64xf32, #tpu.memory_space<vmem>>, vector<8x1x64xf32>,
    %c0_372 = arith.constant 0 : index
    %c7_373 = arith.constant 7 : index
    %c0_374 = arith.constant 0 : index
    %760 = vector.load %arg17[%c0_372, %c7_373, %c0_374] : memref<8x8x64xf32, #tpu.memory_space<vmem>>, vector<8x1x64xf32>
    %761 = vector.shape_cast %760 : vector<8x1x64xf32> to vector<8x64xf32>
    %762 = vector.shape_cast %720 : vector<8x64xf32> to vector<8x1x64xf32>
    tpu.vector_store %arg17[%c0_372, %c7_373, %c0_374], %762 {strides = array<i32>} : memref<8x8x64xf32, #tpu.memory_space<vmem>>, vector<8x1x64xf32>,
    return
  }
  func.func @transform_0(%arg0: i32) -> (i32, i32, i32) {
    %c0_i32 = arith.constant 0 : i32
    %c0_i32_0 = arith.constant 0 : i32
    %c0_i32_1 = arith.constant 0 : i32
    return %c0_i32, %arg0, %c0_i32_0 : i32, i32, i32
  }
  func.func @transform_1(%arg0: i32) -> (i32, i32, i32) {
    %c0_i32 = arith.constant 0 : i32
    %c0_i32_0 = arith.constant 0 : i32
    %c0_i32_1 = arith.constant 0 : i32
    return %c0_i32, %arg0, %c0_i32_0 : i32, i32, i32
  }
  func.func @transform_2(%arg0: i32) -> (i32, i32, i32) {
    %c0_i32 = arith.constant 0 : i32
    %c0_i32_0 = arith.constant 0 : i32
    %c0_i32_1 = arith.constant 0 : i32
    return %c0_i32, %arg0, %c0_i32_0 : i32, i32, i32
  }
  func.func @transform_3(%arg0: i32) -> (i32, i32) {
    %c0_i32 = arith.constant 0 : i32
    %c0_i32_0 = arith.constant 0 : i32
    %c0_i32_1 = arith.constant 0 : i32
    return %c0_i32, %c0_i32_0 : i32, i32
  }
  func.func @transform_4(%arg0: i32) -> (i32, i32) {
    %c0_i32 = arith.constant 0 : i32
    %c0_i32_0 = arith.constant 0 : i32
    %c0_i32_1 = arith.constant 0 : i32
    return %c0_i32, %c0_i32_0 : i32, i32
  }
  func.func @transform_5(%arg0: i32) -> (i32, i32) {
    %c0_i32 = arith.constant 0 : i32
    %c0_i32_0 = arith.constant 0 : i32
    %c0_i32_1 = arith.constant 0 : i32
    return %c0_i32, %c0_i32_0 : i32, i32
  }
  func.func @transform_6(%arg0: i32) -> (i32, i32) {
    %c0_i32 = arith.constant 0 : i32
    %c0_i32_0 = arith.constant 0 : i32
    %c0_i32_1 = arith.constant 0 : i32
    return %c0_i32, %c0_i32_0 : i32, i32
  }
  func.func @transform_7(%arg0: i32) -> (i32, i32) {
    %c0_i32 = arith.constant 0 : i32
    %c0_i32_0 = arith.constant 0 : i32
    %c0_i32_1 = arith.constant 0 : i32
    return %c0_i32, %c0_i32_0 : i32, i32
  }
  func.func @transform_8(%arg0: i32) -> (i32, i32) {
    %c0_i32 = arith.constant 0 : i32
    %c0_i32_0 = arith.constant 0 : i32
    %c0_i32_1 = arith.constant 0 : i32
    return %c0_i32, %c0_i32_0 : i32, i32
  }
  func.func @transform_9(%arg0: i32) -> (i32, i32) {
    %c0_i32 = arith.constant 0 : i32
    %c0_i32_0 = arith.constant 0 : i32
    %c0_i32_1 = arith.constant 0 : i32
    return %c0_i32, %c0_i32_0 : i32, i32
  }
  func.func @transform_10(%arg0: i32) -> (i32, i32) {
    %c0_i32 = arith.constant 0 : i32
    %c0_i32_0 = arith.constant 0 : i32
    %c0_i32_1 = arith.constant 0 : i32
    return %c0_i32, %c0_i32_0 : i32, i32
  }
  func.func @transform_11(%arg0: i32) -> (i32, i32, i32) {
    %c0_i32 = arith.constant 0 : i32
    %c0_i32_0 = arith.constant 0 : i32
    %c0_i32_1 = arith.constant 0 : i32
    return %c0_i32, %arg0, %c0_i32_0 : i32, i32, i32
  }
  func.func @transform_12(%arg0: i32) -> (i32, i32, i32) {
    %c0_i32 = arith.constant 0 : i32
    %c0_i32_0 = arith.constant 0 : i32
    %c0_i32_1 = arith.constant 0 : i32
    return %c0_i32, %arg0, %c0_i32_0 : i32, i32, i32
  }
  func.func @transform_13(%arg0: i32) -> (i32, i32, i32) {
    %c0_i32 = arith.constant 0 : i32
    %c0_i32_0 = arith.constant 0 : i32
    %c0_i32_1 = arith.constant 0 : i32
    return %c0_i32, %arg0, %c0_i32_0 : i32, i32, i32
  }
  func.func @transform_14(%arg0: i32) -> (i32, i32, i32) {
    %c0_i32 = arith.constant 0 : i32
    %c0_i32_0 = arith.constant 0 : i32
    %c0_i32_1 = arith.constant 0 : i32
    return %c0_i32, %arg0, %c0_i32_0 : i32, i32, i32
  }
  func.func @transform_15(%arg0: i32) -> (i32, i32, i32) {
    %c0_i32 = arith.constant 0 : i32
    %c0_i32_0 = arith.constant 0 : i32
    %c0_i32_1 = arith.constant 0 : i32
    return %c0_i32, %arg0, %c0_i32_0 : i32, i32, i32
  }
  func.func @transform_16(%arg0: i32) -> (i32, i32, i32) {
    %c0_i32 = arith.constant 0 : i32
    %c0_i32_0 = arith.constant 0 : i32
    %c0_i32_1 = arith.constant 0 : i32
    return %c0_i32, %arg0, %c0_i32_0 : i32, i32, i32
  }
}

</mosaic_0001>

<bundles_post_ra>
// kernel: fused_forward.1
= control target key start
LH: loop header
LB: loop body
LE: loop exit
PB: predicated region body
PF: predicated region fallthrough
CT: control target
= control target key end

     0   :  { %s8559_s0 = inlined_call_operand.vmem [shape: f32[8,16,64], index: 0, kind: input, shape index: {}]   ;;  %s8560_s1 = inlined_call_operand.hbm [shape: f32[8,16,64], index: 1, kind: input, shape index: {}]   ;;  %s8561_s2 = inlined_call_operand.hbm [shape: f32[8,16,64], index: 2, kind: input, shape index: {}]   ;;  %s8562_s3 = inlined_call_operand.vmem [shape: bf16[64,64], index: 3, kind: input, shape index: {}]   ;;  %s8563_s4 = inlined_call_operand.vmem [shape: bf16[64,64], index: 4, kind: input, shape index: {}]   ;;  %s8564_s5 = inlined_call_operand.vmem [shape: bf16[64,64], index: 5, kind: input, shape index: {}]   ;;  %s8565_s6 = inlined_call_operand.vmem [shape: bf16[64,64], index: 6, kind: input, shape index: {}]   ;;  %s8566_s7 = inlined_call_operand.vmem [shape: f32[1,64], index: 7, kind: input, shape index: {}]   ;;  %s8567_s8 = inlined_call_operand.vmem [shape: f32[1,64], index: 8, kind: input, shape index: {}]   ;;  %s8568_s9 = inlined_call_operand.vmem [shape: f32[1,64], index: 9, kind: input, shape index: {}]   ;;  %s8569_s10 = inlined_call_operand.vmem [shape: f32[1,64], index: 10, kind: input, shape index: {}]   ;;  %s8570_s11 = inlined_call_operand.hbm [shape: f32[8,16,64], index: 11, kind: output, shape index: {0}]   ;;  %s8571_s12 = inlined_call_operand.hbm [shape: f32[8,16,64], index: 12, kind: output, shape index: {1}]   ;;  %s8572_s13 = inlined_call_operand.hbm [shape: f32[8,16,64], index: 13, kind: output, shape index: {2}]   ;;  %s8573_s14 = inlined_call_operand.hbm [shape: f32[8,16,64], index: 14, kind: output, shape index: {3}]   ;;  %s8574_s15 = inlined_call_operand.hbm [shape: f32[8,16,64], index: 15, kind: output, shape index: {4}]   ;;  %s8575_s16 = inlined_call_operand.hbm [shape: f32[8,16,64], index: 16, kind: output, shape index: {5}]  }
   0x1   :  { %8598 = sst [smem:[#allocation32_spill]] %s8559_s0 }
   0x2   :  { %8599 = sst [smem:[#allocation33_spill]] %s8560_s1 }
   0x3   :  { %8600 = sst [smem:[#allocation34_spill]] %s8561_s2 }
   0x4   :  { %8601 = sst [smem:[#allocation35_spill]] %s8562_s3 }
   0x5   :  { %8602 = sst [smem:[#allocation36_spill]] %s8563_s4 }
   0x6   :  { %8603 = sst [smem:[#allocation37_spill]] %s8564_s5 }
   0x7   :  { %8604 = sst [smem:[#allocation38_spill]] %s8565_s6 }
   0x8   :  { %8605 = sst [smem:[#allocation39_spill]] %s8566_s7 }
   0x9   :  { %8606 = sst [smem:[#allocation40_spill]] %s8567_s8 }
   0xa   :  { %8607 = sst [smem:[#allocation41_spill]] %s8568_s9 }
   0xb   :  { %8608 = sst [smem:[#allocation42_spill]] %s8569_s10 }
   0xc   :  { %8609 = sst [smem:[#allocation43_spill]] %s8570_s11 }
   0xd   :  { %8610 = sst [smem:[#allocation44_spill]] %s8571_s12 }
   0xe   :  { %8611 = sst [smem:[#allocation45_spill]] %s8572_s13 }
   0xf   :  { %8612 = sst [smem:[#allocation46_spill]] %s8573_s14 }
  0x10   :  { %8613 = sst [smem:[#allocation47_spill]] %s8574_s15 }
  0x11   :  { %8614 = sst [smem:[#allocation48_spill]] %s8575_s16 }
  0x12   :  { %22 = vsyncpa [#allocation5], 0 }
  0x13   :  { %24 = vsyncpa [#allocation5 + $0x1], 0 }
  0x14   :  { %25 = vsyncpa [#allocation8], 0 }
  0x15   :  { %27 = vsyncpa [#allocation8 + $0x1], 0 }
  0x16   :  { %28 = vsyncpa [#allocation6], 0 }
  0x17   :  { %30 = vsyncpa [#allocation6 + $0x1], 0 }
  0x18   :  { %31 = vsyncpa [#allocation11], 0 }
  0x19   :  { %33 = vsyncpa [#allocation11 + $0x1], 0 }
  0x1a   :  { %34 = vsyncpa [#allocation14], 0 }
  0x1b   :  { %36 = vsyncpa [#allocation14 + $0x1], 0 }
  0x1c   :  { %37 = vsyncpa [#allocation17], 0 }
  0x1d   :  { %39 = vsyncpa [#allocation17 + $0x1], 0  ;;  %s6173_s21 = smov 0   ;;  %s6175_s22 = smov 0  }
  0x1e   :  { %s6177_s23 = smov 0   ;;  %s6179_s24 = smov 0  }
  0x1f LB: > { %8615 = sst [smem:[#allocation24_spill]] %s6068_s21  ;;  %s6194_s25 = sadd.s32 4294967295, %s6080_s24   ;;  %s6080_s24 = sphi %s6179_s24, %s8658_s24   ;;  %s6076_s23 = sphi %s6177_s23, %s8660_s23   ;;  %s6072_s22 = sphi %s6175_s22, %s8662_s22   ;;  %s6068_s21 = sphi %s6173_s21, %s8661_s21  }
  0x20   : > { %8616 = sst [smem:[#allocation25_spill]] %s6076_s23  ;;  %s8576_s26 = sadd.s32 4294967294, %s6080_s24  }
  0x21   : > { %8617 = sst [smem:[#allocation26_spill]] %s6194_s25  ;;  %s6198_s27 = sadd.s32 1, %s6080_s24  }
  0x22   : > { %8618 = sst [smem:[#allocation27_spill]] %s6198_s27  ;;  %s52_s28 = sadd.s32 1, %s6076_s23 }
  0x23   : > { %s49_s29 = ssub.s32 %s6080_s24, %s6198_s27  ;;  %p59_p0 = scmp.ne.s32.totalorder %s6076_s23, %s6072_s22 }
  0x24   : > { %p50_p1 = scmp.eq.s32.totalorder %s49_s29, 0  ;;  %p60_p2 = scmp.eq.s32.totalorder %s6080_s24, 0 }
  0x25   : > { %p91_p3 = scmp.ne.s32.totalorder %s6072_s22, %s6068_s21  ;;  %p92_p4 = scmp.eq.s32.totalorder %s6194_s25, 0 }
  0x26   : > { %s6210_s30 = scalar_select %p50_p1, %s6076_s23, %s52_s28  }
  0x27   : > { %p6212_p5 = por %p60_p2, %p59_p0  ;;  %p6216_p6 = por %p92_p4, %p91_p3 }
  0x28   : > { %8619 = sst [smem:[#allocation28_spill]] %s6210_s30  ;;  %p309_p7 = scmp.eq.s32.totalorder %s6194_s25, 1 }
  0x29   : > { %p315_p8 = scmp.eq.s32.totalorder %s8576_s26, 1  ;;  %p5386_p11 = scmp.ge.s32.totalorder %s6080_s24, 2 }
  0x2a   : > { %p6223_p9 = por %p309_p7, %p59_p0 }
  0x2b   : > { %p6227_p10 = por %p315_p8, %p91_p3  ;;  %485 = sbr.rel (%p5386_p11) target bundleno = 107 (0x6b), region = 48 }
  0x2c   : > { %s8622_s18 = scalar_select %p6223_p9, 1, 0 }
  0x2d   : > { %s8624_s19 = scalar_select %p6227_p10, 1, 0 }
  0x2e   : > { %8623 = sst [smem:[#allocation29_spill]] %s8622_s18 }
  0x2f   : > { %8625 = sst [smem:[#allocation30_spill]] %s8624_s19 }
  0x30   : > { %488 = sbr.rel (!%p6212_p5) target bundleno = 66 (0x42), region = 52  ;;  %s490_s20 = sand.u32 (%p6212_p5), 1, %s6076_s23  }
  0x31   : > { %s5388_s28 = sshll.u32 (%p6212_p5), %s6080_s24, 3  ;;  %s5387_s29 = sshll.u32 (%p6212_p5), %s490_s20, 6 }
  0x32   : > { %s8626_s27 = sld [smem:[#allocation32_spill]] (%p6212_p5)  ;;  %s492_s19 = scalar_lea.vmem (%p6212_p5), [#allocation3], %s5387_s29 }
  0x38   : > { %s494_s21 = scalar_lea.vmem %s8626_s27, %s5388_s28 }
  0x39   : > { %v537_v0 = vld [vmem:[%s494_s21] sm:$0xff]  ;;  %v539_v1 = vld [vmem:[%s494_s21 + $0x10] sm:$0xff] }
  0x3a   : > { %v541_v2 = vld [vmem:[%s494_s21 + $0x20] sm:$0xff]  ;;  %538 = vst [vmem:[%s492_s19] sm:$0xff] %v537_v0  ;;  %v543_v3 = vld [vmem:[%s494_s21 + $0x30] sm:$0xff] }
  0x3b   : > { %540 = vst [vmem:[%s492_s19 + $0x8] sm:$0xff] %v539_v1  ;;  %v545_v4 = vld [vmem:[%s494_s21 + $0x40] sm:$0xff]  ;;  %v547_v5 = vld [vmem:[%s494_s21 + $0x50] sm:$0xff] }
  0x3c   : > { %542 = vst [vmem:[%s492_s19 + $0x10] sm:$0xff] %v541_v2  ;;  %v549_v6 = vld [vmem:[%s494_s21 + $0x60] sm:$0xff]  ;;  %v551_v7 = vld [vmem:[%s494_s21 + $0x70] sm:$0xff] }
  0x3d   : > { %544 = vst [vmem:[%s492_s19 + $0x18] sm:$0xff] %v543_v3 }
  0x3e   : > { %546 = vst [vmem:[%s492_s19 + $0x20] sm:$0xff] %v545_v4 }
  0x3f   : > { %548 = vst [vmem:[%s492_s19 + $0x28] sm:$0xff] %v547_v5 }
  0x40   : > { %550 = vst [vmem:[%s492_s19 + $0x30] sm:$0xff] %v549_v6 }
  0x41   : > { %552 = vst [vmem:[%s492_s19 + $0x38] sm:$0xff] %v551_v7 }
  0x42 PF: > { %s6242_s26 = sand.u32 1, %s6076_s23   ;;  %s5390_s27 = sshll.u32 %s6080_s24, 3 }
  0x43   : > { %s5389_s30 = sshll.u32 %s6242_s26, 6  ;;  %s8627_s1 = sld [smem:[#allocation33_spill]] }
  0x44   : > { %s563_s15 = scalar_lea.vmem [#allocation4], %s5389_s30  ;;  %s560_s19 = scalar_lea.sflag [#allocation5], %s6242_s26 }
  0x45   : > { %s570_s14 = sshll.u32 %s563_s15, 4  ;;  %s571_s14 = int_to_ptr.vmem [resolvable:$true] %s570_s14 }
  0x49   : > { %s567_s29 = scalar_lea.hbm %s8627_s1, %s5390_s27  ;;  %s5808_s12 = scalar_lea.hbm %s8627_s1, 128 }
  0x4a   : > { %s568_s21 = sshll.u32 %s567_s29, 4  ;;  %s569_s21 = int_to_ptr.hbm [resolvable:$true] %s568_s21 }
  0x4b   : > { %s5802_s16 = sshra.s32 %s569_s21, 4  ;;  %s5803_s16 = int_to_ptr.hbm [resolvable:$true] %s5802_s16 }
  0x4c   : > { %s5804_s11 = scalar_lea.hbm %s5803_s16, 64  ;;  %p5809_p1 = scmp.lt.s32.totalorder %s5803_s16, %s8627_s1 }
  0x4d   : > { %p5805_p12 = scmp.ne.s32.totalorder %s5803_s16, %s5804_s11  ;;  %p5810_p2 = scmp.lt.s32.totalorder %s5808_s12, %s5804_s11 }
  0x4f   : > { %p5806_p13 = pnand %p5805_p12, %p6212_p5  ;;  %p5811_p3 = por %p5810_p2, %p5809_p1 }
  0x51   : > { %p5807_p0 = pneg %p5806_p13 }
  0x53   : > { %p5812_p4 = pnand %p5811_p3, %p5807_p0 }
  0x55   : > { %5815 = shalt.err (!%p5812_p4)
}
  0x56   : > { %s6082_s15 = smov 256   ;;  %s6083_s28 = smov 128  }
  0x57   : > { %s6084_s29 = smov 8   ;;  %s8628_s2 = sld [smem:[#allocation34_spill]] }
  0x58   : > { %5593 = dma.hbm_to_vmem [thread:$0]  (%p6212_p5), %s569_s21, 1024, %s571_s14, %s560_s19, %s6082_s15, %s6083_s28, %s6084_s29  }
  0x59   : > { %s584_s16 = scalar_lea.vmem [#allocation7], %s5389_s30  ;;  %s581_s12 = scalar_lea.sflag [#allocation8], %s6242_s26 }
  0x5a   : > { %s591_s11 = sshll.u32 %s584_s16, 4  ;;  %s592_s11 = int_to_ptr.vmem [resolvable:$true] %s591_s11 }
  0x5d   : > { %s588_s25 = scalar_lea.hbm %s8628_s2, %s5390_s27  ;;  %s5836_s21 = scalar_lea.hbm %s8628_s2, 128 }
  0x5e   : > { %s589_s18 = sshll.u32 %s588_s25, 4  ;;  %s590_s18 = int_to_ptr.hbm [resolvable:$true] %s589_s18 }
  0x5f   : > { %s5830_s20 = sshra.s32 %s590_s18, 4  ;;  %s5831_s20 = int_to_ptr.hbm [resolvable:$true] %s5830_s20 }
  0x60   : > { %s5832_s1 = scalar_lea.hbm %s5831_s20, 64  ;;  %p5837_p13 = scmp.lt.s32.totalorder %s5831_s20, %s8628_s2 }
  0x61   : > { %p5833_p7 = scmp.ne.s32.totalorder %s5831_s20, %s5832_s1  ;;  %p5838_p0 = scmp.lt.s32.totalorder %s5836_s21, %s5832_s1 }
  0x63   : > { %p5834_p8 = pnand %p5833_p7, %p6212_p5  ;;  %p5839_p1 = por %p5838_p0, %p5837_p13 }
  0x65   : > { %p5835_p12 = pneg %p5834_p8 }
  0x67   : > { %p5840_p2 = pnand %p5839_p1, %p5835_p12 }
  0x69   : > { %5843 = shalt.err (!%p5840_p2)
}
  0x6a   : > { %5594 = dma.hbm_to_vmem [thread:$0]  (%p6212_p5), %s590_s18, 1024, %s592_s11, %s581_s12, %s6082_s15, %s6083_s28, %s6084_s29  }
  0x6b PF: > { %p5393_p3 = scmp.ge.s32.totalorder %s6080_s24, 1  ;;  %p599_p4 = scmp.lt.s32.totalorder %s6080_s24, 3 }
  0x6d   : > { %p600_p7 = pnand %p5393_p3, %p599_p4 }
  0x6f   : > { %603 = sbr.rel (%p600_p7) target bundleno = 11027 (0x2b13), region = 98 }
  0x74   : > { %s6281_s10 = sand.u32 1, %s6072_s22  }
  0x75   : > { %s6284_s1 = sshll.u32 %s6281_s10, 6  ;;  %s613_s0 = scalar_lea.sflag [#allocation5], %s6281_s10 }
  0x76   : > { %s6287_s25 = scalar_lea.vmem [#allocation3], %s6284_s1  ;;  %s6291_s26 = scalar_lea.vmem [#allocation4], %s6284_s1 }
  0x77   : > { %6043 = dma.done.wait (%p6216_p6), %s613_s0, 1024  }
  0x78   : > { %6045 = vsyncadd (%p6216_p6), %s613_s0, 4294966272  ;;  %s623_s27 = scalar_lea.sflag [#allocation8], %s6281_s10  ;;  %s6299_s30 = scalar_lea.vmem [#allocation7], %s6284_s1 }
  0x79   : > { %6047 = dma.done.wait (%p6216_p6), %s623_s27, 1024  }
  0x7a   : > { %6049 = vsyncadd (%p6216_p6), %s623_s27, 4294966272  ;;  %s8629_s3 = sld [smem:[#allocation35_spill]]  ;;  %vm804_vm0 = vcmask 1041409   ;;  %vm807_vm1 = vcmask 1042434   ;;  %v752_v12 = vld [vmem:[%s6287_s25] sm:$0x1] }
  0x7b   : > { %s8630_s4 = sld [smem:[#allocation36_spill]]  ;;  %vm810_vm2 = vcmask 1043459   ;;  %vm813_vm3 = vcmask 1044484   ;;  %v753_v13 = vld [vmem:[%s6287_s25 + $0x8] sm:$0x1]  ;;  %v776_v16 = vpack.c.bf16 %v752_v12, %v752_v12  ;;  %vm816_vm4 = vcmask 1045509  }
  0x7c   : > { %v754_v14 = vld [vmem:[%s6287_s25 + $0x10] sm:$0x1]  ;;  %v755_v15 = vld [vmem:[%s6287_s25 + $0x18] sm:$0x1]  ;;  %v756_v18 = vld [vmem:[%s6287_s25 + $0x20] sm:$0x1]  ;;  %v777_v21 = vpack.c.bf16 %v753_v13, %v753_v13 }
  0x7d   : > { %v757_v19 = vld [vmem:[%s6287_s25 + $0x28] sm:$0x1]  ;;  %v758_v20 = vld [vmem:[%s6287_s25 + $0x30] sm:$0x1]  ;;  %v778_v22 = vpack.c.bf16 %v754_v14, %v754_v14  ;;  %v779_v23 = vpack.c.bf16 %v755_v15, %v755_v15  ;;  %vm819_vm5 = vcmask 1046534   ;;  %v780_v26 = vpack.c.bf16 %v756_v18, %v756_v18  ;;  %s8631_s8 = sld [smem:[#allocation40_spill]] }
  0x7e   : > { %v759_v25 = vld [vmem:[%s6287_s25 + $0x38] sm:$0x1]  ;;  %v781_v27 = vpack.c.bf16 %v757_v19, %v757_v19  ;;  %v782_v28 = vpack.c.bf16 %v758_v20, %v758_v20  ;;  %v795_v29 = vunpack.c.l.b16 %v776_v16  ;;  %vm822_vm6 = vcmask 1047559   ;;  %v760_v30 = vld [vmem:[%s6291_s26] sm:$0x1]  ;;  %s8632_s7 = sld [smem:[#allocation39_spill]] }
  0x7f   : > { %v783_v31 = vpack.c.bf16 %v759_v25, %v759_v25  ;;  %v796_v32 = vunpack.c.l.b16 %v777_v21  ;;  %v797_v33 = vunpack.c.l.b16 %v778_v22  ;;  %v798_v34 = vunpack.c.l.b16 %v779_v23  ;;  %v761_v35 = vld [vmem:[%s6291_s26 + $0x8] sm:$0x1]  ;;  %v762_v36 = vld [vmem:[%s6291_s26 + $0x10] sm:$0x1]  ;;  %v763_v37 = vld [vmem:[%s6291_s26 + $0x18] sm:$0x1] }
  0x80   : > { %v6308_v8 = vld [vmem:[%s8629_s3 + $0x18] sm:$0xff]  ;;  %v6320_v10 = vld [vmem:[%s8629_s3 + $0x10] sm:$0xff]  ;;  %v6334_v17 = vld [vmem:[%s8629_s3 + $0x8] sm:$0xff]  ;;  %v799_v38 = vunpack.c.l.b16 %v780_v26  ;;  %v800_v39 = vunpack.c.l.b16 %v781_v27  ;;  %v801_v40 = vunpack.c.l.b16 %v782_v28  ;;  %v866_v44 = vpack.c.bf16 %v760_v30, %v760_v30  ;;  %s6402_s17 = scalar_lea.vmem [#allocation10], %s6284_s1  ;;  %s8633_s5 = sld [smem:[#allocation37_spill]] }
  0x81   : > { %v6313_v9 = vld [vmem:[%s8630_s4 + $0x18] sm:$0xff]  ;;  %857 = vmatpush.bf16.msra.mxu0 %v6308_v8  ;;  %v6325_v11 = vld [vmem:[%s8630_s4 + $0x10] sm:$0xff]  ;;  %v6342_v24 = vld [vmem:[%s8630_s4 + $0x8] sm:$0xff]  ;;  %v802_v45 = vunpack.c.l.b16 %v783_v31  ;;  %v803_v46 = vrot.slane %v796_v32, 7  ;;  %v806_v47 = vrot.slane %v797_v33, 6  ;;  %v809_v48 = vrot.slane %v798_v34, 5 }
  0x82   : > { %939 = vmatpush.bf16.msra.mxu1 %v6313_v9  ;;  %v764_v41 = vld [vmem:[%s6291_s26 + $0x20] sm:$0x1]  ;;  %v765_v42 = vld [vmem:[%s6291_s26 + $0x28] sm:$0x1]  ;;  %v766_v43 = vld [vmem:[%s6291_s26 + $0x30] sm:$0x1]  ;;  %v867_v54 = vpack.c.bf16 %v761_v35, %v761_v35  ;;  %v868_v58 = vpack.c.bf16 %v762_v36, %v762_v36  ;;  %v869_v59 = vpack.c.bf16 %v763_v37, %v763_v37  ;;  %v885_v2 = vunpack.c.l.b16 %v866_v44 }
  0x83   : > { %v6357_v49 = vld [vmem:[%s8629_s3] sm:$0xff]  ;;  %v812_v50 = vrot.slane %v799_v38, 4  ;;  %v815_v51 = vrot.slane %v800_v39, 3  ;;  %v818_v52 = vrot.slane %v801_v40, 2  ;;  %v767_v53 = vld [vmem:[%s6291_s26 + $0x38] sm:$0x1]  ;;  %v805_v56 = vsel %vm804_vm0, %v803_v46, %v795_v29 }
  0x84   : > { %v6365_v55 = vld [vmem:[%s8630_s4] sm:$0xff]  ;;  %v821_v57 = vrot.slane %v802_v45, 1  ;;  %v808_v60 = vsel %vm807_vm1, %v806_v47, %v805_v56  ;;  %v870_v61 = vpack.c.bf16 %v764_v41, %v764_v41  ;;  %v871_v62 = vpack.c.bf16 %v765_v42, %v765_v42  ;;  %s8634_s9 = sld [smem:[#allocation41_spill]]  ;;  %s6474_s27 = scalar_lea.vmem [#allocation12], %s6284_s1 }
  0x85   : > { %858 = vmatpush.bf16.msra.mxu0 %v6320_v10  ;;  %v872_v63 = vpack.c.bf16 %v766_v43, %v766_v43  ;;  %v811_v0 = vsel %vm810_vm2, %v809_v48, %v808_v60  ;;  %v873_v1 = vpack.c.bf16 %v767_v53, %v767_v53  ;;  %v886_v3 = vunpack.c.l.b16 %v867_v54  ;;  %v6392_v37 = vld [vmem:[%s8631_s8] ss:$0 sm:$0xff]  ;;  %v769_v60 = vld [vmem:[%s6299_s30 + $0x8] sm:$0x1]  ;;  %s8635_s6 = sld [smem:[#allocation38_spill]]  ;;  %s6535_s20 = scalar_lea.vmem [#allocation16], %s6284_s1 }
  0x86   : > { %940 = vmatpush.bf16.msra.mxu1 %v6325_v11  ;;  %v814_v4 = vsel %vm813_vm3, %v812_v50, %v811_v0  ;;  %v887_v5 = vunpack.c.l.b16 %v868_v58  ;;  %v888_v6 = vunpack.c.l.b16 %v869_v59  ;;  %v889_v7 = vunpack.c.l.b16 %v870_v61  ;;  %v6397_v38 = vld [vmem:[%s8632_s7] ss:$0 sm:$0xff]  ;;  %v6430_v58 = vld [vmem:[%s8633_s5 + $0x10] sm:$0xff]  ;;  %s8636_s19 = sld [smem:[#allocation42_spill]]  ;;  %s6561_s13 = scalar_lea.vmem [#allocation9], %s6284_s1 }
  0x87   : > { %v817_v12 = vsel %vm816_vm4, %v815_v51, %v814_v4  ;;  %v890_v13 = vunpack.c.l.b16 %v871_v62  ;;  %v891_v14 = vunpack.c.l.b16 %v872_v63  ;;  %v892_v15 = vunpack.c.l.b16 %v873_v1  ;;  %v768_v59 = vld [vmem:[%s6299_s30] sm:$0x1]  ;;  %v770_v61 = vld [vmem:[%s6299_s30 + $0x10] sm:$0x1]  ;;  %v771_v62 = vld [vmem:[%s6299_s30 + $0x18] sm:$0x1] }
  0x88   : > { %v820_v16 = vsel %vm819_vm5, %v818_v52, %v817_v12  ;;  %v893_v18 = vrot.slane %v886_v3, 7  ;;  %v895_v19 = vrot.slane %v887_v5, 6  ;;  %v897_v20 = vrot.slane %v888_v6, 5  ;;  %v772_v63 = vld [vmem:[%s6299_s30 + $0x20] sm:$0x1]  ;;  %s6587_s0 = scalar_lea.vmem [#allocation15], %s6284_s1 }
  0x89   : > { %859 = vmatpush.bf16.msra.mxu0 %v6334_v17  ;;  %v823_v21 = vsel %vm822_vm6, %v821_v57, %v820_v16  ;;  %vm849_vm7 = vcmask 523264   ;;  %v899_v22 = vrot.slane %v889_v7, 4  ;;  %v901_v26 = vrot.slane %v890_v13, 3  ;;  %v6425_v57 = vld [vmem:[%s8633_s5 + $0x18] sm:$0xff]  ;;  %v774_v3 = vld [vmem:[%s6299_s30 + $0x30] sm:$0x1] }
  0x8a   : > { %941 = vmatpush.bf16.msra.mxu1 %v6342_v24  ;;  %v824_v23 = vpack.c.b16 %v823_v21, %v823_v21  ;;  %v894_v25 = vsel %vm804_vm0, %v893_v18, %v885_v2  ;;  %v903_v28 = vrot.slane %v891_v14, 2  ;;  %v905_v30 = vrot.slane %v892_v15, 1  ;;  %1021 = vmatpush.bf16.msra.mxu2 %v6425_v57  ;;  %v773_v2 = vld [vmem:[%s6299_s30 + $0x28] sm:$0x1]  ;;  %v775_v4 = vld [vmem:[%s6299_s30 + $0x38] sm:$0x1] }
  0x8b   : > { %v896_v27 = vsel %vm807_vm1, %v895_v19, %v894_v25  ;;  %vm1262_vm8 = vcmask 516096   ;;  %v948_v0 = vpack.c.bf16 %v768_v59, %v768_v59  ;;  %v949_v1 = vpack.c.bf16 %v769_v60, %v769_v60  ;;  %v6445_v21 = vld [vmem:[%s8633_s5 + $0x8] sm:$0xff]  ;;  %s6708_s15 = scalar_lea.vmem [#allocation13], %s6284_s1  ;;  %s8639_s21 = sld [smem:[#allocation26_spill]] }
  0x8c   : > { %v898_v29 = vsel %vm810_vm2, %v897_v20, %v896_v27  ;;  %v950_v5 = vpack.c.bf16 %v770_v61, %v770_v61  ;;  %v951_v6 = vpack.c.bf16 %v771_v62, %v771_v62  ;;  %v952_v7 = vpack.c.bf16 %v772_v63, %v772_v63  ;;  %s8641_s29 = sld [smem:[#allocation44_spill]]  ;;  %s5044_s16 = sshll.u32 %s6402_s17, 4  ;;  %s5045_s16 = int_to_ptr.vmem [resolvable:$true] %s5044_s16 }
  0x8d   : > { %860 = vmatpush.bf16.msra.mxu0 %v6357_v49  ;;  %v900_v31 = vsel %vm813_vm3, %v899_v22, %v898_v29  ;;  %v953_v12 = vpack.c.bf16 %v773_v2, %v773_v2  ;;  %v954_v13 = vpack.c.bf16 %v774_v3, %v774_v3  ;;  %v955_v14 = vpack.c.bf16 %v775_v4, %v775_v4  ;;  %s8642_s14 = sld [smem:[#allocation45_spill]] }
  0x8e   : > { %942 = vmatpush.bf16.msra.mxu1 %v6365_v55  ;;  %v902_v32 = vsel %vm816_vm4, %v901_v26, %v900_v31  ;;  %v967_v15 = vunpack.c.l.b16 %v948_v0  ;;  %v968_v16 = vunpack.c.l.b16 %v949_v1  ;;  %v969_v18 = vunpack.c.l.b16 %v950_v5  ;;  %1022 = vmatpush.bf16.msra.mxu2 %v6430_v58  ;;  %v6501_v5 = vld [vmem:[%s8635_s6 + $0x18] sm:$0xff] }
  0x8f   : > { %v904_v33 = vsel %vm819_vm5, %v903_v28, %v902_v32  ;;  %v970_v19 = vunpack.c.l.b16 %v951_v6  ;;  %v971_v20 = vunpack.c.l.b16 %v952_v7  ;;  %v972_v22 = vunpack.c.l.b16 %v953_v12  ;;  %v6452_v32 = vld [vmem:[%s8633_s5] sm:$0xff]  ;;  %v6507_v6 = vld [vmem:[%s8635_s6 + $0x10] sm:$0xff]  ;;  %v6514_v12 = vld [vmem:[%s8635_s6 + $0x8] sm:$0xff] }
  0x90   : > { %5419 = vmatmul.msk.bf16.vlgmr.msra.gmra.mxu0 %vm849_vm7, %v824_v23  ;;  %v906_v34 = vsel %vm822_vm6, %v905_v30, %v904_v33  ;;  %v973_v23 = vunpack.c.l.b16 %v954_v13  ;;  %v974_v25 = vunpack.c.l.b16 %v955_v14  ;;  %v975_v26 = vrot.slane %v968_v16, 7  ;;  %v6528_v16 = vld [vmem:[%s8635_s6] sm:$0xff] }
  0x91   : > { %v907_v35 = vpack.c.b16 %v906_v34, %v906_v34  ;;  %v977_v27 = vrot.slane %v969_v18, 6  ;;  %v979_v28 = vrot.slane %v970_v19, 5  ;;  %v981_v29 = vrot.slane %v971_v20, 4  ;;  %1121 = vmatpush.bf16.msrb.mxu0 %v6501_v5  ;;  %s8593_s18 = sand.u32 1, %s8639_s21  }
  0x92   : > { %1138 = vmatpush.bf16.msrb.mxu1 %v6308_v8  ;;  %v976_v30 = vsel %vm804_vm0, %v975_v26, %v967_v15  ;;  %v983_v31 = vrot.slane %v972_v22, 3  ;;  %1023 = vmatpush.bf16.msra.mxu2 %v6445_v21  ;;  %v985_v34 = vrot.slane %v973_v23, 2  ;;  %vm1053_vm9 = vcmask 64512  }
  0x93   : > { %5436 = vmatmul.msk.bf16.vlgmr.msra.gmra.mxu1 %vm849_vm7, %v907_v35  ;;  %v978_v33 = vsel %vm807_vm1, %v977_v27, %v976_v30  ;;  %vm1069_vm10 = vcmask 1043456  }
  0x94   : > { %v980_v35 = vsel %vm810_vm2, %v979_v28, %v978_v33 }
  0x95   : > { %1122 = vmatpush.bf16.msrb.mxu0 %v6507_v6 }
  0x96   : > { %1139 = vmatpush.bf16.msrb.mxu1 %v6320_v10  ;;  %1024 = vmatpush.bf16.msra.mxu2 %v6452_v32 }
  0x99   : > { %1123 = vmatpush.bf16.msrb.mxu0 %v6514_v12 }
  0x9a   : > { %1140 = vmatpush.bf16.msrb.mxu1 %v6334_v17  ;;  %1151 = vmatpush.bf16.msrb.mxu2 %v6313_v9 }
  0x9d   : > { %1124 = vmatpush.bf16.msrb.mxu0 %v6528_v16 }
  0x9e   : > { %1141 = vmatpush.bf16.msrb.mxu1 %v6357_v49  ;;  %1152 = vmatpush.bf16.msrb.mxu2 %v6325_v11 }
  0xa2   : > { %1153 = vmatpush.bf16.msrb.mxu2 %v6342_v24 }
  0xa6   : > { %1154 = vmatpush.bf16.msrb.mxu2 %v6365_v55 }
 0x10d   : > { %v862_v36 = vpop.f32.mrf.mxu0 }
 0x10e   : > { %v863_v42 = vadd.f32 %v6397_v38, %v862_v36  ;;  %v987_v36 = vrot.slane %v974_v25, 1 }
 0x110   : > { %v944_v39 = vpop.f32.mrf.mxu1  ;;  %v1030_v50 = vmul.f32 0.125, %v863_v42 }
 0x111   : > { %v945_v40 = vadd.f32 %v6392_v37, %v944_v39  ;;  %v982_v39 = vsel %vm813_vm3, %v981_v29, %v980_v35 }
 0x112   : > { %v1031_v56 = vpack.c.bf16 %v1030_v50, %v1030_v50 }
 0x113   : > { %v1272_v43 = vrot.slane %v945_v40, 1  ;;  %v1273_v44 = vrot.slane %v945_v40, 2  ;;  %v1274_v45 = vrot.slane %v945_v40, 3  ;;  %1286 = vst.msk [vmem:[%s6402_s17] sm:$0x1] %vm1262_vm8, %v945_v40  ;;  %v1275_v46 = vrot.slane %v945_v40, 4 }
 0x114   : > { %v1032_v47 = vpack.c.bf16 %v945_v40, %v945_v40  ;;  %v1276_v48 = vrot.slane %v945_v40, 5  ;;  %v1277_v51 = vrot.slane %v945_v40, 6  ;;  %v1278_v53 = vrot.slane %v945_v40, 7 }
 0x115   : > { %v864_v41 = vpop.f32.mrf.mxu0  ;;  %1287 = vst.msk [vmem:[%s6402_s17 + $0x8] sm:$0x1] %vm1262_vm8, %v1272_v43  ;;  %v984_v40 = vsel %vm816_vm4, %v983_v31, %v982_v39 }
 0x116   : > { %1288 = vst.msk [vmem:[%s6402_s17 + $0x10] sm:$0x1] %vm1262_vm8, %v1273_v44  ;;  %v1038_v52 = vsel %vm849_vm7, %v1032_v47, 0  ;;  %v986_v41 = vsel %vm819_vm5, %v985_v34, %v984_v40 }
 0x117   : > { %1289 = vst.msk [vmem:[%s6402_s17 + $0x18] sm:$0x1] %vm1262_vm8, %v1274_v45  ;;  %1047 = vmatpush.bf16.xpose.msra.mxu3 %v1038_v52  ;;  %v988_v42 = vsel %vm822_vm6, %v987_v36, %v986_v41  ;;  %v6557_v36 = vld [vmem:[%s8636_s19] ss:$0 sm:$0xff] }
 0x118   : > { %1290 = vst.msk [vmem:[%s6402_s17 + $0x20] sm:$0x1] %vm1262_vm8, %v1275_v46  ;;  %v946_v54 = vpop.f32.mrf.mxu1  ;;  %v989_v43 = vpack.c.b16 %v988_v42, %v988_v42 }
 0x119   : > { %1291 = vst.msk [vmem:[%s6402_s17 + $0x28] sm:$0x1] %vm1262_vm8, %v1276_v48 }
 0x11a   : > { %1292 = vst.msk [vmem:[%s6402_s17 + $0x30] sm:$0x1] %vm1262_vm8, %v1277_v51  ;;  %5453 = vmatmul.msk.bf16.vlgmr.msra.gmra.mxu2 %vm849_vm7, %v989_v43  ;;  %v6470_v51 = vld [vmem:[%s8634_s9] ss:$0 sm:$0xff] }
 0x11b   : > { %1293 = vst.msk [vmem:[%s6402_s17 + $0x38] sm:$0x1] %vm1262_vm8, %v1278_v53  ;;  %1238 = vmatpush.bf16.msra.mxu2 %v6501_v5 }
 0x11e   : > { %5454 = vmatmul.msk.bf16.vlgmr.msra.gmra.mxu3 %vm849_vm7, %v1031_v56 }
 0x11f   : > { %1239 = vmatpush.bf16.msra.mxu2 %v6507_v6 }
 0x123   : > { %1240 = vmatpush.bf16.msra.mxu2 %v6514_v12 }
 0x127   : > { %1241 = vmatpush.bf16.msra.mxu2 %v6528_v16 }
 0x19d   : > { %v1026_v52 = vpop.f32.mrf.mxu2 }
 0x19e   : > { %v1027_v53 = vadd.f32 %v6470_v51, %v1026_v52 }
 0x1a0   : > { %v1295_v56 = vrot.slane %v1027_v53, 1  ;;  %v1296_v59 = vrot.slane %v1027_v53, 2  ;;  %v1297_v60 = vrot.slane %v1027_v53, 3  ;;  %1309 = vst.msk [vmem:[%s6474_s27] sm:$0x1] %vm1262_vm8, %v1027_v53  ;;  %v1298_v62 = vrot.slane %v1027_v53, 4 }
 0x1a1   : > { %v1049_v44 = vpop.f32.mrf.mxu3  ;;  %v1299_v63 = vrot.slane %v1027_v53, 5  ;;  %v1300_v0 = vrot.slane %v1027_v53, 6  ;;  %v1301_v1 = vrot.slane %v1027_v53, 7  ;;  %v1033_v3 = vpack.c.bf16 %v1027_v53, %v1027_v53 }
 0x1a2   : > { %v1054_v45 = vsel %vm1053_vm9, %v1049_v44, -inf  ;;  %1310 = vst.msk [vmem:[%s6474_s27 + $0x8] sm:$0x1] %vm1262_vm8, %v1295_v56 }
 0x1a3   : > { %1055 = vmax.xlane.f32.xlu0 %v1054_v45  ;;  %1311 = vst.msk [vmem:[%s6474_s27 + $0x10] sm:$0x1] %vm1262_vm8, %v1296_v59  ;;  %v1071_v4 = vsel %vm1069_vm10, %v1033_v3, 0 }
 0x1a4   : > { %1312 = vst.msk [vmem:[%s6474_s27 + $0x18] sm:$0x1] %vm1262_vm8, %v1297_v60  ;;  %1080 = vmatpush.bf16.msrb.mxu3 %v1071_v4 }
 0x1a5   : > { %1313 = vst.msk [vmem:[%s6474_s27 + $0x20] sm:$0x1] %vm1262_vm8, %v1298_v62  ;;  %v1028_v2 = vpop.f32.mrf.mxu2 }
 0x1a6   : > { %1314 = vst.msk [vmem:[%s6474_s27 + $0x28] sm:$0x1] %vm1262_vm8, %v1299_v63 }
 0x1a7   : > { %1315 = vst.msk [vmem:[%s6474_s27 + $0x30] sm:$0x1] %vm1262_vm8, %v1300_v0 }
 0x1a8   : > { %1316 = vst.msk [vmem:[%s6474_s27 + $0x38] sm:$0x1] %vm1262_vm8, %v1301_v1  ;;  %1166 = vmatpush.bf16.msra.mxu3 %v6425_v57 }
 0x1a9   : > { %v1051_v46 = vpop.f32.mrf.mxu3 }
 0x1ac   : > { %1167 = vmatpush.bf16.msra.mxu3 %v6430_v58 }
 0x1b0   : > { %1168 = vmatpush.bf16.msra.mxu3 %v6445_v21 }
 0x1b4   : > { %1169 = vmatpush.bf16.msra.mxu3 %v6452_v32 }
 0x216   : > { %v1056_v47 = vpop.xlane.xlu0 %1055 }
 0x217   : > { %v1057_v48 = vsub.f32 %v1049_v44, %v1056_v47 }
 0x219   : > { %v1058_v50 = vmul.f32 1.442695, %v1057_v48 }
 0x21b   : > { %5671 = vpow2.f32 %v1058_v50 }
 0x221   : > { %v5672_v54 = vpop.eup %5671 }
 0x222   : > { %v1060_v61 = vsel %vm1053_vm9, %v5672_v54, 0.0 }
 0x223   : > { %1061 = vadd.xlane.f32.xlu0 %v1060_v61 }
 0x296   : > { %v1062_v7 = vpop.xlane.xlu0 %1061 }
 0x297   : > { %5673 = vrcp.f32 %v1062_v7 }
 0x29d   : > { %v5674_v13 = vpop.eup %5673 }
 0x29e   : > { %v1064_v14 = vmul.f32 %v5674_v13, %v5672_v54 }
 0x2a0   : > { %v1065_v15 = vpack.c.bf16 %v1064_v14, %v1064_v14 }
 0x2a2   : > { %5455 = vmatmul.msk.bf16.vlgmr.msrb.gmra.mxu3 %vm1053_vm9, %v1065_v15  ;;  %v747_v15 = vlaneseq }
 0x2a3   : > { %1456 = vmatpush.bf16.msrb.mxu3 %v6308_v8 }
 0x2a7   : > { %1457 = vmatpush.bf16.msrb.mxu3 %v6320_v10 }
 0x2ab   : > { %1458 = vmatpush.bf16.msrb.mxu3 %v6334_v17 }
 0x2af   : > { %1459 = vmatpush.bf16.msrb.mxu3 %v6357_v49 }
 0x2b2   : > { %5475 = vmatmul.msk.bf16.vlgmr.msra.gmra.mxu3 %vm849_vm7, %v1033_v3 }
 0x325   : > { %v1082_v18 = vpop.f32.mrf.mxu3 }
 0x326   : > { %v1086_v19 = vpack.c.bf16 %v1082_v18, %v1082_v18  ;;  %v748_v18 = vshrl.u32 %v747_v15, 7 }
 0x328   : > { %5472 = vmatmul.msk.bf16.vlgmr.msrb.gmra.mxu0 %vm849_vm7, %v1086_v19  ;;  %v750_v19 = vand.u32 127, %v747_v15 }
 0x32a   : > { %vm6616_vm11 = vcmp.le.s32.totalorder %v750_v19, %v748_v18 }
 0x32d   : > { %v1084_v20 = vpop.f32.mrf.mxu3 }
 0x335   : > { %v1171_v22 = vpop.f32.mrf.mxu3 }
 0x336   : > { %v1172_v23 = vadd.f32 %v6470_v51, %v1171_v22 }
 0x338   : > { %v1364_v25 = vrot.slane %v1172_v23, 1  ;;  %v1365_v26 = vrot.slane %v1172_v23, 2  ;;  %v1366_v27 = vrot.slane %v1172_v23, 3  ;;  %1378 = vst.msk [vmem:[%s6535_s20] sm:$0x1] %vm1262_vm8, %v1172_v23  ;;  %v1367_v28 = vrot.slane %v1172_v23, 4 }
 0x339   : > { %v1178_v29 = vpack.c.bf16 %v1172_v23, %v1172_v23  ;;  %v1368_v30 = vrot.slane %v1172_v23, 5  ;;  %v1369_v31 = vrot.slane %v1172_v23, 6  ;;  %v1370_v34 = vrot.slane %v1172_v23, 7 }
 0x33a   : > { %1379 = vst.msk [vmem:[%s6535_s20 + $0x8] sm:$0x1] %vm1262_vm8, %v1364_v25 }
 0x33b   : > { %1380 = vst.msk [vmem:[%s6535_s20 + $0x10] sm:$0x1] %vm1262_vm8, %v1365_v26  ;;  %v1215_v33 = vsel %vm1069_vm10, %v1178_v29, 0 }
 0x33c   : > { %1381 = vst.msk [vmem:[%s6535_s20 + $0x18] sm:$0x1] %vm1262_vm8, %v1366_v27  ;;  %1224 = vmatpush.bf16.msra.mxu1 %v1215_v33  ;;  %v1387_v33 = vld [vmem:[%s6287_s25 + $0x9] sm:$0x1] }
 0x33d   : > { %1382 = vst.msk [vmem:[%s6535_s20 + $0x20] sm:$0x1] %vm1262_vm8, %v1367_v28  ;;  %v1173_v35 = vpop.f32.mrf.mxu3 }
 0x33e   : > { %1383 = vst.msk [vmem:[%s6535_s20 + $0x28] sm:$0x1] %vm1262_vm8, %v1368_v30  ;;  %v1388_v35 = vld [vmem:[%s6287_s25 + $0x11] sm:$0x1] }
 0x33f   : > { %1384 = vst.msk [vmem:[%s6535_s20 + $0x30] sm:$0x1] %vm1262_vm8, %v1369_v31 }
 0x340   : > { %1385 = vst.msk [vmem:[%s6535_s20 + $0x38] sm:$0x1] %vm1262_vm8, %v1370_v34  ;;  %v1395_v34 = vld [vmem:[%s6291_s26 + $0x9] sm:$0x1] }
 0x3a5   : > { %v1126_v39 = vpop.f32.mrf.mxu0 }
 0x3a6   : > { %v1127_v40 = vadd.f32 %v6557_v36, %v1126_v39  ;;  %v1411_v39 = vpack.c.bf16 %v1387_v33, %v1387_v33 }
 0x3a8   : > { %v1248_v41 = vrot.slane %v1127_v40, 1  ;;  %v1249_v42 = vrot.slane %v1127_v40, 2  ;;  %v1250_v43 = vrot.slane %v1127_v40, 3  ;;  %1263 = vst.msk [vmem:[%s6561_s13] sm:$0x1] %vm1262_vm8, %v1127_v40  ;;  %v1251_v44 = vrot.slane %v1127_v40, 4 }
 0x3a9   : > { %v1130_v45 = vpack.c.bf16 %v1127_v40, %v1127_v40  ;;  %v1252_v46 = vrot.slane %v1127_v40, 5  ;;  %v1253_v47 = vrot.slane %v1127_v40, 6  ;;  %v1254_v48 = vrot.slane %v1127_v40, 7  ;;  %v1396_v40 = vld [vmem:[%s6291_s26 + $0x11] sm:$0x1] }
 0x3aa   : > { %1264 = vst.msk [vmem:[%s6561_s13 + $0x8] sm:$0x1] %vm1262_vm8, %v1248_v41  ;;  %v1386_v41 = vld [vmem:[%s6287_s25 + $0x1] sm:$0x1] }
 0x3ab   : > { %1265 = vst.msk [vmem:[%s6561_s13 + $0x10] sm:$0x1] %vm1262_vm8, %v1249_v42  ;;  %5473 = vmatmul.msk.bf16.vlgmr.msrb.gmra.mxu1 %vm849_vm7, %v1130_v45  ;;  %5474 = vmatmul.msk.bf16.vlgmr.msrb.gmra.mxu2 %vm849_vm7, %v1130_v45  ;;  %v1389_v42 = vld [vmem:[%s6287_s25 + $0x19] sm:$0x1]  ;;  %v1466_v45 = vpack.c.bf16 %v1395_v34, %v1395_v34 }
 0x3ac   : > { %1266 = vst.msk [vmem:[%s6561_s13 + $0x18] sm:$0x1] %vm1262_vm8, %v1250_v43  ;;  %1566 = vmatpush.bf16.msrb.mxu1 %v6425_v57  ;;  %v1412_v43 = vpack.c.bf16 %v1388_v35, %v1388_v35 }
 0x3ad   : > { %1267 = vst.msk [vmem:[%s6561_s13 + $0x20] sm:$0x1] %vm1262_vm8, %v1251_v44  ;;  %v1128_v50 = vpop.f32.mrf.mxu0  ;;  %v1394_v44 = vld [vmem:[%s6291_s26 + $0x1] sm:$0x1] }
 0x3ae   : > { %1268 = vst.msk [vmem:[%s6561_s13 + $0x28] sm:$0x1] %vm1262_vm8, %v1252_v46  ;;  %v1467_v46 = vpack.c.bf16 %v1396_v40, %v1396_v40  ;;  %v1413_v50 = vpack.c.bf16 %v1389_v42, %v1389_v42 }
 0x3af   : > { %1269 = vst.msk [vmem:[%s6561_s13 + $0x30] sm:$0x1] %vm1262_vm8, %v1253_v47  ;;  %v1390_v47 = vld [vmem:[%s6287_s25 + $0x21] sm:$0x1] }
 0x3b0   : > { %1270 = vst.msk [vmem:[%s6561_s13 + $0x38] sm:$0x1] %vm1262_vm8, %v1254_v48  ;;  %1567 = vmatpush.bf16.msrb.mxu1 %v6430_v58  ;;  %v1410_v48 = vpack.c.bf16 %v1386_v41, %v1386_v41 }
 0x3b4   : > { %1568 = vmatpush.bf16.msrb.mxu1 %v6445_v21 }
 0x3b8   : > { %1569 = vmatpush.bf16.msrb.mxu1 %v6452_v32 }
 0x428   : > { %v1143_v52 = vpop.f32.mrf.mxu1 }
 0x429   : > { %v1144_v62 = vadd.f32 %v6397_v38, %v1143_v52  ;;  %v1427_v52 = vunpack.c.l.b16 %v1411_v39 }
 0x42b   : > { %v1175_v7 = vmul.f32 0.125, %v1144_v62  ;;  %v1399_v62 = vld [vmem:[%s6291_s26 + $0x29] sm:$0x1] }
 0x42d   : > { %v1176_v14 = vpack.c.bf16 %v1175_v7, %v1175_v7  ;;  %v1434_v7 = vrot.slane %v1427_v52, 7  ;;  %v1483_v52 = vunpack.c.l.b16 %v1467_v46 }
 0x42e   : > { %v1156_v53 = vpop.f32.mrf.mxu2 }
 0x42f   : > { %v1157_v54 = vadd.f32 %v6392_v37, %v1156_v53  ;;  %v1397_v53 = vld [vmem:[%s6291_s26 + $0x19] sm:$0x1] }
 0x430   : > { %v1145_v56 = vpop.f32.mrf.mxu1 }
 0x431   : > { %v1341_v59 = vrot.slane %v1157_v54, 1  ;;  %v1342_v60 = vrot.slane %v1157_v54, 2  ;;  %v1343_v61 = vrot.slane %v1157_v54, 3  ;;  %1355 = vst.msk [vmem:[%s6587_s0] sm:$0x1] %vm1262_vm8, %v1157_v54  ;;  %v1344_v63 = vrot.slane %v1157_v54, 4 }
 0x432   : > { %v1177_v0 = vpack.c.bf16 %v1157_v54, %v1157_v54  ;;  %v1345_v1 = vrot.slane %v1157_v54, 5  ;;  %v1346_v2 = vrot.slane %v1157_v54, 6  ;;  %v1347_v4 = vrot.slane %v1157_v54, 7  ;;  %v1398_v54 = vld [vmem:[%s6291_s26 + $0x21] sm:$0x1] }
 0x433   : > { %1356 = vst.msk [vmem:[%s6587_s0 + $0x8] sm:$0x1] %vm1262_vm8, %v1341_v59  ;;  %v1465_v56 = vpack.c.bf16 %v1394_v44, %v1394_v44  ;;  %v1391_v59 = vld [vmem:[%s6287_s25 + $0x29] sm:$0x1] }
 0x434   : > { %1357 = vst.msk [vmem:[%s6587_s0 + $0x10] sm:$0x1] %vm1262_vm8, %v1342_v60  ;;  %v1183_v3 = vsel %vm849_vm7, %v1177_v0, 0  ;;  %v1414_v60 = vpack.c.bf16 %v1390_v47, %v1390_v47  ;;  %v1469_v0 = vpack.c.bf16 %v1398_v54, %v1398_v54  ;;  %v1482_v47 = vunpack.c.l.b16 %v1466_v45 }
 0x435   : > { %1358 = vst.msk [vmem:[%s6587_s0 + $0x18] sm:$0x1] %vm1262_vm8, %v1343_v61  ;;  %1192 = vmatpush.bf16.xpose.msra.mxu0 %v1183_v3  ;;  %v1428_v61 = vunpack.c.l.b16 %v1412_v43  ;;  %v1426_v3 = vunpack.c.l.b16 %v1410_v48  ;;  %v1481_v44 = vunpack.c.l.b16 %v1465_v56 }
 0x436   : > { %1359 = vst.msk [vmem:[%s6587_s0 + $0x20] sm:$0x1] %vm1262_vm8, %v1344_v63  ;;  %v1158_v13 = vpop.f32.mrf.mxu2  ;;  %v1468_v63 = vpack.c.bf16 %v1397_v53, %v1397_v53  ;;  %v1430_v18 = vunpack.c.l.b16 %v1414_v60 }
 0x437   : > { %1360 = vst.msk [vmem:[%s6587_s0 + $0x28] sm:$0x1] %vm1262_vm8, %v1345_v1  ;;  %v1392_v1 = vld [vmem:[%s6287_s25 + $0x31] sm:$0x1]  ;;  %v1436_v19 = vrot.slane %v1428_v61, 6 }
 0x438   : > { %1361 = vst.msk [vmem:[%s6587_s0 + $0x30] sm:$0x1] %vm1262_vm8, %v1346_v2  ;;  %v1415_v2 = vpack.c.bf16 %v1391_v59, %v1391_v59  ;;  %v1400_v13 = vld [vmem:[%s6291_s26 + $0x31] sm:$0x1]  ;;  %v1416_v15 = vpack.c.bf16 %v1392_v1, %v1392_v1  ;;  %v1440_v33 = vrot.slane %v1430_v18, 4  ;;  %v1484_v53 = vunpack.c.l.b16 %v1468_v63 }
 0x439   : > { %1362 = vst.msk [vmem:[%s6587_s0 + $0x38] sm:$0x1] %vm1262_vm8, %v1347_v4  ;;  %v1429_v4 = vunpack.c.l.b16 %v1413_v50  ;;  %v1471_v34 = vpack.c.bf16 %v1400_v13, %v1400_v13  ;;  %v1485_v59 = vunpack.c.l.b16 %v1469_v0 }
 0x43b   : > { %v1487_v61 = vunpack.c.l.b16 %v1471_v34  ;;  %v1495_v13 = vrot.slane %v1485_v59, 4 }
 0x43c   : > { %5476 = vmatmul.msk.bf16.vlgmr.msra.gmra.mxu0 %vm849_vm7, %v1176_v14  ;;  %v1393_v14 = vld [vmem:[%s6287_s25 + $0x39] sm:$0x1] }
 0x43d   : > { %1511 = vmatpush.bf16.msrb.mxu0 %v6313_v9  ;;  %v1499_v63 = vrot.slane %v1487_v61, 2  ;;  %v1409_v61 = vld [vmem:[%s6299_s30 + $0x39] sm:$0x1] }
 0x441   : > { %1512 = vmatpush.bf16.msrb.mxu0 %v6325_v11 }
 0x445   : > { %1513 = vmatpush.bf16.msrb.mxu0 %v6342_v24 }
 0x449   : > { %1514 = vmatpush.bf16.msrb.mxu0 %v6365_v55 }
 0x44d   : > { %1637 = vmatpush.bf16.msra.mxu0 %v6501_v5 }
 0x451   : > { %1638 = vmatpush.bf16.msra.mxu0 %v6507_v6 }
 0x455   : > { %1639 = vmatpush.bf16.msra.mxu0 %v6514_v12 }
 0x459   : > { %1640 = vmatpush.bf16.msra.mxu0 %v6528_v16 }
 0x4b9   : > { %v1194_v22 = vpop.f32.mrf.mxu0 }
 0x4ba   : > { %v1198_v23 = vsel %vm6616_vm11, %v1194_v22, -1e+30  ;;  %v1401_v22 = vld [vmem:[%s6291_s26 + $0x39] sm:$0x1] }
 0x4bb   : > { %v1199_v25 = vsel %vm1053_vm9, %v1198_v23, -inf  ;;  %v1472_v41 = vpack.c.bf16 %v1401_v22, %v1401_v22 }
 0x4bc   : > { %1200 = vmax.xlane.f32.xlu1 %v1199_v25  ;;  %v1417_v25 = vpack.c.bf16 %v1393_v14, %v1393_v14 }
 0x4bd   : > { %v1488_v1 = vunpack.c.l.b16 %v1472_v41 }
 0x4be   : > { %v1433_v35 = vunpack.c.l.b16 %v1417_v25 }
 0x4bf   : > { %v1501_v14 = vrot.slane %v1488_v1, 1 }
 0x4c0   : > { %v1446_v50 = vrot.slane %v1433_v35, 1 }
 0x4c1   : > { %v1196_v26 = vpop.f32.mrf.mxu0 }
 0x4c2   : > { %v1431_v26 = vunpack.c.l.b16 %v1415_v2  ;;  %v1489_v2 = vrot.slane %v1482_v47, 7 }
 0x4c4   : > { %v1442_v40 = vrot.slane %v1431_v26, 3  ;;  %v1490_v45 = vsel %vm804_vm0, %v1489_v2, %v1481_v44 }
 0x52f   : > { %v1201_v27 = vpop.xlane.xlu1 %1200 }
 0x530   : > { %v1202_v28 = vsub.f32 %v1198_v23, %v1201_v27  ;;  %v1470_v23 = vpack.c.bf16 %v1399_v62, %v1399_v62  ;;  %v1435_v27 = vsel %vm804_vm0, %v1434_v7, %v1426_v3  ;;  %v1491_v3 = vrot.slane %v1483_v52, 6  ;;  %v1405_v52 = vld [vmem:[%s6299_s30 + $0x19] sm:$0x1] }
 0x531   : > { %v1493_v7 = vrot.slane %v1484_v53, 5  ;;  %v1407_v53 = vld [vmem:[%s6299_s30 + $0x29] sm:$0x1] }
 0x532   : > { %v1203_v29 = vmul.f32 1.442695, %v1202_v28  ;;  %v1438_v28 = vrot.slane %v1429_v4, 5  ;;  %v1486_v60 = vunpack.c.l.b16 %v1470_v23  ;;  %v1492_v46 = vsel %vm807_vm1, %v1491_v3, %v1490_v45 }
 0x533   : > { %v1494_v0 = vsel %vm810_vm2, %v1493_v7, %v1492_v46  ;;  %v1525_v2 = vpack.c.bf16 %v1407_v53, %v1407_v53 }
 0x534   : > { %5675 = vpow2.f32 %v1203_v29  ;;  %v1432_v29 = vunpack.c.l.b16 %v1416_v15  ;;  %v1497_v56 = vrot.slane %v1486_v60, 3  ;;  %v1496_v15 = vsel %vm813_vm3, %v1495_v13, %v1494_v0  ;;  %v1408_v60 = vld [vmem:[%s6299_s30 + $0x31] sm:$0x1] }
 0x535   : > { %v1526_v3 = vpack.c.bf16 %v1408_v60, %v1408_v60 }
 0x536   : > { %v1444_v43 = vrot.slane %v1432_v29, 2  ;;  %v1498_v18 = vsel %vm816_vm4, %v1497_v56, %v1496_v15 }
 0x537   : > { %v1542_v0 = vunpack.c.l.b16 %v1526_v3 }
 0x53a   : > { %v6623_v30 = vpop.eup %5675 }
 0x53b   : > { %v1205_v31 = vsel %vm1053_vm9, %v6623_v30, 0.0 }
 0x53c   : > { %1206 = vadd.xlane.f32.xlu1 %v1205_v31  ;;  %v1437_v31 = vsel %vm807_vm1, %v1436_v19, %v1435_v27  ;;  %v1500_v19 = vsel %vm819_vm5, %v1499_v63, %v1498_v18  ;;  %v1541_v63 = vunpack.c.l.b16 %v1525_v2 }
 0x53d   : > { %v1439_v39 = vsel %vm810_vm2, %v1438_v28, %v1437_v31  ;;  %v1502_v22 = vsel %vm822_vm6, %v1501_v14, %v1500_v19 }
 0x53e   : > { %v1441_v42 = vsel %vm813_vm3, %v1440_v33, %v1439_v39  ;;  %v1503_v23 = vpack.c.b16 %v1502_v22, %v1502_v22 }
 0x53f   : > { %v1443_v48 = vsel %vm816_vm4, %v1442_v40, %v1441_v42 }
 0x540   : > { %v1445_v54 = vsel %vm819_vm5, %v1444_v43, %v1443_v48  ;;  %5480 = vmatmul.msk.bf16.vlgmr.msrb.gmra.mxu0 %vm849_vm7, %v1503_v23 }
 0x541   : > { %v1447_v62 = vsel %vm822_vm6, %v1446_v50, %v1445_v54 }
 0x542   : > { %v1448_v4 = vpack.c.b16 %v1447_v62, %v1447_v62  ;;  %v1523_v62 = vpack.c.bf16 %v1405_v52, %v1405_v52 }
 0x544   : > { %5479 = vmatmul.msk.bf16.vlgmr.msrb.gmra.mxu3 %vm849_vm7, %v1448_v4  ;;  %v1527_v4 = vpack.c.bf16 %v1409_v61, %v1409_v61  ;;  %v1539_v56 = vunpack.c.l.b16 %v1523_v62 }
 0x546   : > { %v1543_v15 = vunpack.c.l.b16 %v1527_v4  ;;  %v1548_v19 = vrot.slane %v1539_v56, 5 }
 0x5af   : > { %v1207_v25 = vpop.xlane.xlu1 %1206 }
 0x5b0   : > { %5677 = vrcp.f32 %v1207_v25 }
 0x5b6   : > { %v5678_v26 = vpop.eup %5677 }
 0x5b7   : > { %v1209_v27 = vmul.f32 %v5678_v26, %v6623_v30 }
 0x5b9   : > { %v1210_v28 = vpack.c.bf16 %v1209_v27, %v1209_v27  ;;  %v1552_v27 = vrot.slane %v1541_v63, 3  ;;  %v6764_v63 = vld [vmem:[%s8629_s3 + $0x10] sm:$0xff] }
 0x5bb   : > { %5477 = vmatmul.msk.bf16.vlgmr.msra.gmra.mxu1 %vm1053_vm9, %v1210_v28 }
 0x5bc   : > { %1654 = vmatpush.bf16.msra.mxu1 %v6308_v8 }
 0x5bd   : > { %v1516_v31 = vpop.f32.mrf.mxu0 }
 0x5be   : > { %v1517_v33 = vadd.f32 %v6392_v37, %v1516_v31  ;;  %v1554_v31 = vrot.slane %v1542_v0, 2  ;;  %v6770_v0 = vld [vmem:[%s8629_s3 + $0x8] sm:$0xff] }
 0x5c0   : > { %1655 = vmatpush.bf16.msra.mxu1 %v6320_v10  ;;  %v1787_v30 = vrot.slane %v1517_v33, 1  ;;  %v1788_v34 = vrot.slane %v1517_v33, 2  ;;  %v1789_v35 = vrot.slane %v1517_v33, 3  ;;  %1801 = vst.msk [vmem:[%s6402_s17 + $0x1] sm:$0x1] %vm1262_vm8, %v1517_v33  ;;  %v1790_v8 = vrot.slane %v1517_v33, 4 }
 0x5c1   : > { %v1791_v10 = vrot.slane %v1517_v33, 5  ;;  %v1793_v40 = vrot.slane %v1517_v33, 7 }
 0x5c2   : > { %1802 = vst.msk [vmem:[%s6402_s17 + $0x9] sm:$0x1] %vm1262_vm8, %v1787_v30  ;;  %v1556_v30 = vrot.slane %v1543_v15, 1 }
 0x5c3   : > { %1803 = vst.msk [vmem:[%s6402_s17 + $0x11] sm:$0x1] %vm1262_vm8, %v1788_v34 }
 0x5c4   : > { %1656 = vmatpush.bf16.msra.mxu1 %v6334_v17  ;;  %v1577_v17 = vpack.c.bf16 %v1517_v33, %v1517_v33  ;;  %1804 = vst.msk [vmem:[%s6402_s17 + $0x19] sm:$0x1] %vm1262_vm8, %v1789_v35 }
 0x5c5   : > { %1805 = vst.msk [vmem:[%s6402_s17 + $0x21] sm:$0x1] %vm1262_vm8, %v1790_v8  ;;  %v1518_v41 = vpop.f32.mrf.mxu0 }
 0x5c6   : > { %v1583_v37 = vsel %vm849_vm7, %v1577_v17, 0  ;;  %1806 = vst.msk [vmem:[%s6402_s17 + $0x29] sm:$0x1] %vm1262_vm8, %v1791_v10 }
 0x5c7   : > { %v1461_v29 = vpop.f32.mrf.mxu3  ;;  %1592 = vmatpush.bf16.xpose.msrb.mxu2 %v1583_v37  ;;  %1808 = vst.msk [vmem:[%s6402_s17 + $0x39] sm:$0x1] %vm1262_vm8, %v1793_v40 }
 0x5c8   : > { %1657 = vmatpush.bf16.msra.mxu1 %v6357_v49  ;;  %v1792_v49 = vrot.slane %v1517_v33, 6  ;;  %v1462_v44 = vadd.f32 %v6397_v38, %v1461_v29  ;;  %v1404_v38 = vld [vmem:[%s6299_s30 + $0x11] sm:$0x1] }
 0x5ca   : > { %1807 = vst.msk [vmem:[%s6402_s17 + $0x31] sm:$0x1] %vm1262_vm8, %v1792_v49  ;;  %v1575_v48 = vmul.f32 0.125, %v1462_v44 }
 0x5cc   : > { %v1576_v50 = vpack.c.bf16 %v1575_v48, %v1575_v48 }
 0x5cf   : > { %v1463_v39 = vpop.f32.mrf.mxu3 }
 0x638   : > { %v1226_v42 = vpop.f32.mrf.mxu1 }
 0x639   : > { %v1230_v43 = vpack.c.bf16 %v1226_v42, %v1226_v42 }
 0x63b   : > { %5478 = vmatmul.msk.bf16.vlgmr.msra.gmra.mxu2 %vm849_vm7, %v1230_v43 }
 0x63c   : > { %1667 = vmatpush.bf16.msra.mxu2 %v6313_v9  ;;  %v1402_v9 = vld [vmem:[%s6299_s30 + $0x1] sm:$0x1] }
 0x63d   : > { %v1520_v54 = vpack.c.bf16 %v1402_v9, %v1402_v9 }
 0x63f   : > { %v1536_v7 = vunpack.c.l.b16 %v1520_v54 }
 0x640   : > { %v1228_v47 = vpop.f32.mrf.mxu1  ;;  %1668 = vmatpush.bf16.msra.mxu2 %v6325_v11  ;;  %v1403_v11 = vld [vmem:[%s6299_s30 + $0x9] sm:$0x1] }
 0x641   : > { %v1521_v59 = vpack.c.bf16 %v1403_v11, %v1403_v11 }
 0x643   : > { %v1537_v13 = vunpack.c.l.b16 %v1521_v59 }
 0x644   : > { %1669 = vmatpush.bf16.msra.mxu2 %v6342_v24  ;;  %v1406_v24 = vld [vmem:[%s6299_s30 + $0x21] sm:$0x1] }
 0x645   : > { %v1524_v1 = vpack.c.bf16 %v1406_v24, %v1406_v24  ;;  %v1544_v14 = vrot.slane %v1537_v13, 7 }
 0x647   : > { %v1540_v46 = vunpack.c.l.b16 %v1524_v1  ;;  %v1545_v23 = vsel %vm804_vm0, %v1544_v14, %v1536_v7  ;;  %v6776_v14 = vld [vmem:[%s8629_s3] sm:$0xff] }
 0x648   : > { %1670 = vmatpush.bf16.msra.mxu2 %v6365_v55  ;;  %v1522_v55 = vpack.c.bf16 %v1404_v38, %v1404_v38 }
 0x649   : > { %v1550_v22 = vrot.slane %v1540_v46, 4  ;;  %v6758_v46 = vld [vmem:[%s8629_s3 + $0x18] sm:$0xff] }
 0x64a   : > { %v1538_v45 = vunpack.c.l.b16 %v1522_v55 }
 0x64b   : > { %5482 = vmatmul.msk.bf16.vlgmr.msrb.gmra.mxu2 %vm849_vm7, %v1576_v50 }
 0x64c   : > { %1754 = vmatpush.bf16.msrb.mxu2 %v6501_v5  ;;  %v1546_v18 = vrot.slane %v1538_v45, 6 }
 0x64e   : > { %v1547_v26 = vsel %vm807_vm1, %v1546_v18, %v1545_v23 }
 0x64f   : > { %v1549_v29 = vsel %vm810_vm2, %v1548_v19, %v1547_v26 }
 0x650   : > { %1755 = vmatpush.bf16.msrb.mxu2 %v6507_v6  ;;  %v1551_v33 = vsel %vm813_vm3, %v1550_v22, %v1549_v29 }
 0x651   : > { %v1553_v17 = vsel %vm816_vm4, %v1552_v27, %v1551_v33 }
 0x652   : > { %v1555_v39 = vsel %vm819_vm5, %v1554_v31, %v1553_v17 }
 0x653   : > { %v1557_v37 = vsel %vm822_vm6, %v1556_v30, %v1555_v39 }
 0x654   : > { %1756 = vmatpush.bf16.msrb.mxu2 %v6514_v12  ;;  %v1558_v42 = vpack.c.b16 %v1557_v37, %v1557_v37 }
 0x656   : > { %5481 = vmatmul.msk.bf16.vlgmr.msrb.gmra.mxu1 %vm849_vm7, %v1558_v42 }
 0x658   : > { %1757 = vmatpush.bf16.msrb.mxu2 %v6528_v16 }
 0x6be   : > { %v1243_v25 = vpop.f32.mrf.mxu2 }
 0x6bf   : > { %v1244_v28 = vadd.f32 %v6557_v36, %v1243_v25 }
 0x6c1   : > { %v1318_v34 = vrot.slane %v1244_v28, 1  ;;  %v1319_v35 = vrot.slane %v1244_v28, 2  ;;  %v1320_v8 = vrot.slane %v1244_v28, 3  ;;  %1332 = vst.msk [vmem:[%s6708_s15] sm:$0x1] %vm1262_vm8, %v1244_v28  ;;  %v1321_v10 = vrot.slane %v1244_v28, 4 }
 0x6c2   : > { %v1322_v49 = vrot.slane %v1244_v28, 5  ;;  %v1323_v40 = vrot.slane %v1244_v28, 6  ;;  %v1324_v41 = vrot.slane %v1244_v28, 7 }
 0x6c3   : > { %1333 = vst.msk [vmem:[%s6708_s15 + $0x8] sm:$0x1] %vm1262_vm8, %v1318_v34 }
 0x6c4   : > { %1334 = vst.msk [vmem:[%s6708_s15 + $0x10] sm:$0x1] %vm1262_vm8, %v1319_v35 }
 0x6c5   : > { %1335 = vst.msk [vmem:[%s6708_s15 + $0x18] sm:$0x1] %vm1262_vm8, %v1320_v8 }
 0x6c6   : > { %1336 = vst.msk [vmem:[%s6708_s15 + $0x20] sm:$0x1] %vm1262_vm8, %v1321_v10  ;;  %v1245_v43 = vpop.f32.mrf.mxu2 }
 0x6c7   : > { %1337 = vst.msk [vmem:[%s6708_s15 + $0x28] sm:$0x1] %vm1262_vm8, %v1322_v49 }
 0x6c8   : > { %1338 = vst.msk [vmem:[%s6708_s15 + $0x30] sm:$0x1] %vm1262_vm8, %v1323_v40 }
 0x6c9   : > { %1339 = vst.msk [vmem:[%s6708_s15 + $0x38] sm:$0x1] %vm1262_vm8, %v1324_v41 }
 0x6ce   : > { %v1594_v44 = vpop.f32.mrf.mxu2 }
 0x6cf   : > { %v1598_v47 = vsel %vm1053_vm9, %v1594_v44, -inf }
 0x6d0   : > { %1599 = vmax.xlane.f32.xlu2 %v1598_v47 }
 0x6d3   : > { %v1571_v11 = vpop.f32.mrf.mxu1 }
 0x6d4   : > { %v1572_v38 = vadd.f32 %v6470_v51, %v1571_v11 }
 0x6d6   : > { %v1596_v48 = vpop.f32.mrf.mxu2  ;;  %v1810_v24 = vrot.slane %v1572_v38, 1  ;;  %v1811_v53 = vrot.slane %v1572_v38, 2  ;;  %v1812_v54 = vrot.slane %v1572_v38, 3  ;;  %1824 = vst.msk [vmem:[%s6474_s27 + $0x1] sm:$0x1] %vm1262_vm8, %v1572_v38  ;;  %v1813_v59 = vrot.slane %v1572_v38, 4 }
 0x6d7   : > { %v1814_v55 = vrot.slane %v1572_v38, 5  ;;  %v1815_v60 = vrot.slane %v1572_v38, 6  ;;  %v1816_v61 = vrot.slane %v1572_v38, 7  ;;  %v1578_v3 = vpack.c.bf16 %v1572_v38, %v1572_v38 }
 0x6d8   : > { %1825 = vst.msk [vmem:[%s6474_s27 + $0x9] sm:$0x1] %vm1262_vm8, %v1810_v24 }
 0x6d9   : > { %1826 = vst.msk [vmem:[%s6474_s27 + $0x11] sm:$0x1] %vm1262_vm8, %v1811_v53  ;;  %v1614_v4 = vsel %vm1069_vm10, %v1578_v3, 0 }
 0x6da   : > { %1827 = vst.msk [vmem:[%s6474_s27 + $0x19] sm:$0x1] %vm1262_vm8, %v1812_v54  ;;  %1623 = vmatpush.bf16.msra.mxu3 %v1614_v4 }
 0x6db   : > { %1828 = vst.msk [vmem:[%s6474_s27 + $0x21] sm:$0x1] %vm1262_vm8, %v1813_v59  ;;  %v1573_v62 = vpop.f32.mrf.mxu1 }
 0x6dc   : > { %1829 = vst.msk [vmem:[%s6474_s27 + $0x29] sm:$0x1] %vm1262_vm8, %v1814_v55  ;;  %v6860_v62 = vld [vmem:[%s8630_s4 + $0x10] sm:$0xff] }
 0x6dd   : > { %1830 = vst.msk [vmem:[%s6474_s27 + $0x31] sm:$0x1] %vm1262_vm8, %v1815_v60  ;;  %v6848_v60 = vld [vmem:[%s8630_s4 + $0x18] sm:$0xff] }
 0x6de   : > { %1831 = vst.msk [vmem:[%s6474_s27 + $0x39] sm:$0x1] %vm1262_vm8, %v1816_v61  ;;  %1682 = vmatpush.bf16.msrb.mxu3 %v6425_v57 }
 0x6e2   : > { %1683 = vmatpush.bf16.msrb.mxu3 %v6430_v58 }
 0x6e6   : > { %1684 = vmatpush.bf16.msrb.mxu3 %v6445_v21 }
 0x6ea   : > { %1685 = vmatpush.bf16.msrb.mxu3 %v6452_v32 }
 0x743   : > { %v1600_v50 = vpop.xlane.xlu2 %1599 }
 0x744   : > { %v1601_v9 = vsub.f32 %v1594_v44, %v1600_v50  ;;  %v6825_v44 = vld [vmem:[%s8631_s8] ss:$0 sm:$0xff] }
 0x746   : > { %v1602_v52 = vmul.f32 1.442695, %v1601_v9 }
 0x748   : > { %5679 = vpow2.f32 %v1602_v52 }
 0x74e   : > { %v5680_v1 = vpop.eup %5679 }
 0x74f   : > { %v1604_v2 = vsel %vm1053_vm9, %v5680_v1, 0.0 }
 0x750   : > { %1605 = vadd.xlane.f32.xlu2 %v1604_v2  ;;  %v6873_v2 = vld [vmem:[%s8630_s4] sm:$0xff] }
 0x7c3   : > { %v1606_v7 = vpop.xlane.xlu2 %1605 }
 0x7c4   : > { %5681 = vrcp.f32 %v1606_v7 }
 0x7ca   : > { %v5682_v13 = vpop.eup %5681 }
 0x7cb   : > { %v1608_v45 = vmul.f32 %v5682_v13, %v5680_v1  ;;  %v6867_v1 = vld [vmem:[%s8630_s4 + $0x8] sm:$0xff] }
 0x7cd   : > { %v1609_v56 = vpack.c.bf16 %v1608_v45, %v1608_v45 }
 0x7cf   : > { %5483 = vmatmul.msk.bf16.vlgmr.msra.gmra.mxu3 %vm1053_vm9, %v1609_v56  ;;  %v1902_v56 = vld [vmem:[%s6287_s25 + $0xa] sm:$0x1] }
 0x7d0   : > { %1971 = vmatpush.bf16.msra.mxu3 %v6758_v46 }
 0x7d4   : > { %1972 = vmatpush.bf16.msra.mxu3 %v6764_v63 }
 0x7d8   : > { %1973 = vmatpush.bf16.msra.mxu3 %v6770_v0 }
 0x7dc   : > { %1974 = vmatpush.bf16.msra.mxu3 %v6776_v14 }
 0x7df   : > { %5487 = vmatmul.msk.bf16.vlgmr.msrb.gmra.mxu3 %vm849_vm7, %v1578_v3 }
 0x852   : > { %v1625_v15 = vpop.f32.mrf.mxu3 }
 0x853   : > { %v1629_v18 = vpack.c.bf16 %v1625_v15, %v1625_v15  ;;  %v1910_v15 = vld [vmem:[%s6291_s26 + $0xa] sm:$0x1] }
 0x855   : > { %5484 = vmatmul.msk.bf16.vlgmr.msra.gmra.mxu0 %vm849_vm7, %v1629_v18  ;;  %v1903_v18 = vld [vmem:[%s6287_s25 + $0x12] sm:$0x1] }
 0x85a   : > { %v1627_v19 = vpop.f32.mrf.mxu3 }
 0x85b   : > { %v1926_v19 = vpack.c.bf16 %v1902_v56, %v1902_v56 }
 0x862   : > { %v1687_v22 = vpop.f32.mrf.mxu3 }
 0x863   : > { %v1688_v23 = vadd.f32 %v6470_v51, %v1687_v22  ;;  %v1911_v22 = vld [vmem:[%s6291_s26 + $0x12] sm:$0x1] }
 0x865   : > { %v1879_v25 = vrot.slane %v1688_v23, 1  ;;  %v1880_v26 = vrot.slane %v1688_v23, 2  ;;  %v1881_v27 = vrot.slane %v1688_v23, 3  ;;  %1893 = vst.msk [vmem:[%s6535_s20 + $0x1] sm:$0x1] %vm1262_vm8, %v1688_v23  ;;  %v1882_v28 = vrot.slane %v1688_v23, 4 }
 0x866   : > { %v1694_v29 = vpack.c.bf16 %v1688_v23, %v1688_v23  ;;  %v1883_v31 = vrot.slane %v1688_v23, 5  ;;  %v1884_v33 = vrot.slane %v1688_v23, 6  ;;  %v1885_v51 = vrot.slane %v1688_v23, 7  ;;  %v1901_v23 = vld [vmem:[%s6287_s25 + $0x2] sm:$0x1] }
 0x867   : > { %1894 = vst.msk [vmem:[%s6535_s20 + $0x9] sm:$0x1] %vm1262_vm8, %v1879_v25  ;;  %v1904_v25 = vld [vmem:[%s6287_s25 + $0x1a] sm:$0x1] }
 0x868   : > { %1895 = vst.msk [vmem:[%s6535_s20 + $0x11] sm:$0x1] %vm1262_vm8, %v1880_v26  ;;  %v1731_v30 = vsel %vm1069_vm10, %v1694_v29, 0  ;;  %v1927_v26 = vpack.c.bf16 %v1903_v18, %v1903_v18  ;;  %v1982_v29 = vpack.c.bf16 %v1911_v22, %v1911_v22 }
 0x869   : > { %1896 = vst.msk [vmem:[%s6535_s20 + $0x19] sm:$0x1] %vm1262_vm8, %v1881_v27  ;;  %1740 = vmatpush.bf16.msrb.mxu1 %v1731_v30  ;;  %v1909_v27 = vld [vmem:[%s6291_s26 + $0x2] sm:$0x1]  ;;  %v1928_v30 = vpack.c.bf16 %v1904_v25, %v1904_v25 }
 0x86a   : > { %1897 = vst.msk [vmem:[%s6535_s20 + $0x21] sm:$0x1] %vm1262_vm8, %v1882_v28  ;;  %v1689_v34 = vpop.f32.mrf.mxu3  ;;  %v1981_v28 = vpack.c.bf16 %v1910_v15, %v1910_v15  ;;  %v1998_v18 = vunpack.c.l.b16 %v1982_v29 }
 0x86b   : > { %1898 = vst.msk [vmem:[%s6535_s20 + $0x29] sm:$0x1] %vm1262_vm8, %v1883_v31  ;;  %v1905_v31 = vld [vmem:[%s6287_s25 + $0x22] sm:$0x1]  ;;  %v1912_v34 = vld [vmem:[%s6291_s26 + $0x1a] sm:$0x1] }
 0x86c   : > { %1899 = vst.msk [vmem:[%s6535_s20 + $0x31] sm:$0x1] %vm1262_vm8, %v1884_v33  ;;  %v1925_v33 = vpack.c.bf16 %v1901_v23, %v1901_v23 }
 0x86d   : > { %1900 = vst.msk [vmem:[%s6535_s20 + $0x39] sm:$0x1] %vm1262_vm8, %v1885_v51  ;;  %v1942_v51 = vunpack.c.l.b16 %v1926_v19 }
 0x8d2   : > { %v1642_v35 = vpop.f32.mrf.mxu0 }
 0x8d3   : > { %v1643_v8 = vadd.f32 %v6557_v36, %v1642_v35  ;;  %v1913_v35 = vld [vmem:[%s6291_s26 + $0x22] sm:$0x1] }
 0x8d5   : > { %v1764_v10 = vrot.slane %v1643_v8, 1  ;;  %v1765_v17 = vrot.slane %v1643_v8, 2  ;;  %v1766_v49 = vrot.slane %v1643_v8, 3  ;;  %1778 = vst.msk [vmem:[%s6561_s13 + $0x1] sm:$0x1] %vm1262_vm8, %v1643_v8  ;;  %v1767_v39 = vrot.slane %v1643_v8, 4 }
 0x8d6   : > { %v1646_v40 = vpack.c.bf16 %v1643_v8, %v1643_v8  ;;  %v1768_v37 = vrot.slane %v1643_v8, 5  ;;  %v1769_v41 = vrot.slane %v1643_v8, 6  ;;  %v1770_v36 = vrot.slane %v1643_v8, 7 }
 0x8d7   : > { %1779 = vst.msk [vmem:[%s6561_s13 + $0x9] sm:$0x1] %vm1262_vm8, %v1764_v10  ;;  %v1980_v8 = vpack.c.bf16 %v1909_v27, %v1909_v27  ;;  %v1906_v10 = vld [vmem:[%s6287_s25 + $0x2a] sm:$0x1] }
 0x8d8   : > { %1780 = vst.msk [vmem:[%s6561_s13 + $0x11] sm:$0x1] %vm1262_vm8, %v1765_v17  ;;  %5485 = vmatmul.msk.bf16.vlgmr.msra.gmra.mxu1 %vm849_vm7, %v1646_v40  ;;  %5486 = vmatmul.msk.bf16.vlgmr.msra.gmra.mxu2 %vm849_vm7, %v1646_v40  ;;  %v1929_v17 = vpack.c.bf16 %v1905_v31, %v1905_v31  ;;  %v1983_v40 = vpack.c.bf16 %v1912_v34, %v1912_v34 }
 0x8d9   : > { %1781 = vst.msk [vmem:[%s6561_s13 + $0x19] sm:$0x1] %vm1262_vm8, %v1766_v49  ;;  %2081 = vmatpush.bf16.msra.mxu1 %v6425_v57  ;;  %v1943_v49 = vunpack.c.l.b16 %v1927_v26 }
 0x8da   : > { %1782 = vst.msk [vmem:[%s6561_s13 + $0x21] sm:$0x1] %vm1262_vm8, %v1767_v39  ;;  %v1644_v42 = vpop.f32.mrf.mxu0  ;;  %v1914_v39 = vld [vmem:[%s6291_s26 + $0x2a] sm:$0x1]  ;;  %v1999_v19 = vunpack.c.l.b16 %v1983_v40 }
 0x8db   : > { %1783 = vst.msk [vmem:[%s6561_s13 + $0x29] sm:$0x1] %vm1262_vm8, %v1768_v37  ;;  %v1984_v37 = vpack.c.bf16 %v1913_v35, %v1913_v35  ;;  %v1941_v42 = vunpack.c.l.b16 %v1925_v33 }
 0x8dc   : > { %1784 = vst.msk [vmem:[%s6561_s13 + $0x31] sm:$0x1] %vm1262_vm8, %v1769_v41  ;;  %v1907_v41 = vld [vmem:[%s6287_s25 + $0x32] sm:$0x1]  ;;  %v2008_v34 = vrot.slane %v1999_v19, 5 }
 0x8dd   : > { %1785 = vst.msk [vmem:[%s6561_s13 + $0x39] sm:$0x1] %vm1262_vm8, %v1770_v36  ;;  %2082 = vmatpush.bf16.msra.mxu1 %v6430_v58  ;;  %v1930_v36 = vpack.c.bf16 %v1906_v10, %v1906_v10  ;;  %v2000_v23 = vunpack.c.l.b16 %v1984_v37  ;;  %v1919_v19 = vld [vmem:[%s6299_s30 + $0x12] sm:$0x1] }
 0x8df   : > { %v2010_v35 = vrot.slane %v2000_v23, 4  ;;  %v1921_v23 = vld [vmem:[%s6299_s30 + $0x22] sm:$0x1] }
 0x8e1   : > { %2083 = vmatpush.bf16.msra.mxu1 %v6445_v21  ;;  %v6833_v21 = vld [vmem:[%s8632_s7] ss:$0 sm:$0xff] }
 0x8e5   : > { %2084 = vmatpush.bf16.msra.mxu1 %v6452_v32 }
 0x955   : > { %v1659_v43 = vpop.f32.mrf.mxu1 }
 0x956   : > { %v1660_v32 = vadd.f32 %v6833_v21, %v1659_v43  ;;  %v1944_v43 = vunpack.c.l.b16 %v1928_v30  ;;  %v2006_v30 = vrot.slane %v1998_v18, 6  ;;  %v1918_v18 = vld [vmem:[%s6299_s30 + $0xa] sm:$0x1] }
 0x958   : > { %v1691_v59 = vmul.f32 0.125, %v1660_v32  ;;  %v1916_v32 = vld [vmem:[%s6291_s26 + $0x3a] sm:$0x1] }
 0x95a   : > { %v1692_v61 = vpack.c.bf16 %v1691_v59, %v1691_v59 }
 0x95b   : > { %v1672_v57 = vpop.f32.mrf.mxu2 }
 0x95c   : > { %v1673_v47 = vadd.f32 %v6825_v44, %v1672_v57  ;;  %v1949_v57 = vrot.slane %v1942_v51, 7 }
 0x95d   : > { %v1661_v48 = vpop.f32.mrf.mxu1 }
 0x95e   : > { %v1856_v50 = vrot.slane %v1673_v47, 1  ;;  %v1857_v9 = vrot.slane %v1673_v47, 2  ;;  %v1858_v58 = vrot.slane %v1673_v47, 3  ;;  %1870 = vst.msk [vmem:[%s6587_s0 + $0x1] sm:$0x1] %vm1262_vm8, %v1673_v47  ;;  %v1859_v11 = vrot.slane %v1673_v47, 4 }
 0x95f   : > { %v1693_v38 = vpack.c.bf16 %v1673_v47, %v1673_v47  ;;  %v1860_v52 = vrot.slane %v1673_v47, 5  ;;  %v1861_v24 = vrot.slane %v1673_v47, 6  ;;  %v1862_v54 = vrot.slane %v1673_v47, 7  ;;  %v1915_v47 = vld [vmem:[%s6291_s26 + $0x32] sm:$0x1] }
 0x960   : > { %1871 = vst.msk [vmem:[%s6587_s0 + $0x9] sm:$0x1] %vm1262_vm8, %v1856_v50  ;;  %v1908_v48 = vld [vmem:[%s6287_s25 + $0x3a] sm:$0x1]  ;;  %v1931_v50 = vpack.c.bf16 %v1907_v41, %v1907_v41 }
 0x961   : > { %1872 = vst.msk [vmem:[%s6587_s0 + $0x11] sm:$0x1] %vm1262_vm8, %v1857_v9  ;;  %v1699_v53 = vsel %vm849_vm7, %v1693_v38, 0  ;;  %v1945_v9 = vunpack.c.l.b16 %v1929_v17  ;;  %v1932_v38 = vpack.c.bf16 %v1908_v48, %v1908_v48 }
 0x962   : > { %1873 = vst.msk [vmem:[%s6587_s0 + $0x19] sm:$0x1] %vm1262_vm8, %v1858_v58  ;;  %1708 = vmatpush.bf16.xpose.msrb.mxu0 %v1699_v53  ;;  %v1951_v58 = vrot.slane %v1943_v49, 6  ;;  %v1953_v53 = vrot.slane %v1944_v43, 5 }
 0x963   : > { %1874 = vst.msk [vmem:[%s6587_s0 + $0x21] sm:$0x1] %vm1262_vm8, %v1859_v11  ;;  %v1674_v55 = vpop.f32.mrf.mxu2  ;;  %v1985_v11 = vpack.c.bf16 %v1914_v39, %v1914_v39 }
 0x964   : > { %1875 = vst.msk [vmem:[%s6587_s0 + $0x29] sm:$0x1] %vm1262_vm8, %v1860_v52  ;;  %v1946_v52 = vunpack.c.l.b16 %v1930_v36  ;;  %v1955_v55 = vrot.slane %v1945_v9, 4 }
 0x965   : > { %1876 = vst.msk [vmem:[%s6587_s0 + $0x31] sm:$0x1] %vm1262_vm8, %v1861_v24  ;;  %v1950_v24 = vsel %vm804_vm0, %v1949_v57, %v1941_v42  ;;  %v2001_v25 = vunpack.c.l.b16 %v1985_v11 }
 0x966   : > { %1877 = vst.msk [vmem:[%s6587_s0 + $0x39] sm:$0x1] %vm1262_vm8, %v1862_v54  ;;  %v1947_v54 = vunpack.c.l.b16 %v1931_v50  ;;  %v1952_v59 = vsel %vm807_vm1, %v1951_v58, %v1950_v24 }
 0x969   : > { %5488 = vmatmul.msk.bf16.vlgmr.msrb.gmra.mxu0 %vm849_vm7, %v1692_v61  ;;  %v1986_v61 = vpack.c.bf16 %v1915_v47, %v1915_v47 }
 0x96a   : > { %2026 = vmatpush.bf16.msra.mxu0 %v6848_v60 }
 0x96b   : > { %v2002_v26 = vunpack.c.l.b16 %v1986_v61 }
 0x96d   : > { %v2014_v10 = vrot.slane %v2002_v26, 2 }
 0x96e   : > { %2027 = vmatpush.bf16.msra.mxu0 %v6860_v62 }
 0x972   : > { %2028 = vmatpush.bf16.msra.mxu0 %v6867_v1 }
 0x976   : > { %2029 = vmatpush.bf16.msra.mxu0 %v6873_v2 }
 0x97a   : > { %2152 = vmatpush.bf16.msrb.mxu0 %v6501_v5 }
 0x97e   : > { %2153 = vmatpush.bf16.msrb.mxu0 %v6507_v6 }
 0x982   : > { %2154 = vmatpush.bf16.msrb.mxu0 %v6514_v12 }
 0x986   : > { %2155 = vmatpush.bf16.msrb.mxu0 %v6528_v16 }
 0x9e6   : > { %v1710_v3 = vpop.f32.mrf.mxu0 }
 0x9e7   : > { %v1714_v4 = vsel %vm6616_vm11, %v1710_v3, -1e+30  ;;  %v1948_v3 = vunpack.c.l.b16 %v1932_v38 }
 0x9e8   : > { %v1715_v7 = vsel %vm1053_vm9, %v1714_v4, -inf }
 0x9e9   : > { %1716 = vmax.xlane.f32.xlu0 %v1715_v7  ;;  %v1957_v7 = vrot.slane %v1946_v52, 3  ;;  %v1961_v15 = vrot.slane %v1948_v3, 1 }
 0x9ee   : > { %v1712_v5 = vpop.f32.mrf.mxu0 }
 0x9ef   : > { %v1987_v5 = vpack.c.bf16 %v1916_v32, %v1916_v32 }
 0x9f1   : > { %v2003_v31 = vunpack.c.l.b16 %v1987_v5 }
 0x9f3   : > { %v2016_v49 = vrot.slane %v2003_v31, 1  ;;  %v2037_v31 = vpack.c.bf16 %v1919_v19, %v1919_v19 }
 0xa5c   : > { %v1717_v13 = vpop.xlane.xlu0 %1716 }
 0xa5d   : > { %v1718_v6 = vsub.f32 %v1714_v4, %v1717_v13  ;;  %v1954_v4 = vsel %vm810_vm2, %v1953_v53, %v1952_v59 }
 0xa5e   : > { %v1956_v13 = vsel %vm813_vm3, %v1955_v55, %v1954_v4 }
 0xa5f   : > { %v1719_v45 = vmul.f32 1.442695, %v1718_v6  ;;  %v1959_v6 = vrot.slane %v1947_v54, 2  ;;  %v1958_v56 = vsel %vm816_vm4, %v1957_v7, %v1956_v13 }
 0xa61   : > { %5683 = vpow2.f32 %v1719_v45  ;;  %v1996_v45 = vunpack.c.l.b16 %v1980_v8  ;;  %v1960_v22 = vsel %vm819_vm5, %v1959_v6, %v1958_v56  ;;  %v2012_v8 = vrot.slane %v2001_v25, 3  ;;  %v6953_v6 = vld [vmem:[%s8635_s6 + $0x18] sm:$0xff]  ;;  %v6971_v56 = vld [vmem:[%s8635_s6] sm:$0xff]  ;;  %v1922_v25 = vld [vmem:[%s6299_s30 + $0x2a] sm:$0x1] }
 0xa62   : > { %v1962_v27 = vsel %vm822_vm6, %v1961_v15, %v1960_v22  ;;  %v1917_v15 = vld [vmem:[%s6299_s30 + $0x2] sm:$0x1]  ;;  %v1920_v22 = vld [vmem:[%s6299_s30 + $0x1a] sm:$0x1] }
 0xa63   : > { %v1963_v51 = vpack.c.b16 %v1962_v27, %v1962_v27  ;;  %v2035_v26 = vpack.c.bf16 %v1917_v15, %v1917_v15  ;;  %v2036_v27 = vpack.c.bf16 %v1918_v18, %v1918_v18 }
 0xa65   : > { %5491 = vmatmul.msk.bf16.vlgmr.msra.gmra.mxu3 %vm849_vm7, %v1963_v51  ;;  %v2038_v51 = vpack.c.bf16 %v1920_v22, %v1920_v22 }
 0xa67   : > { %v6883_v12 = vpop.eup %5683 }
 0xa68   : > { %v1721_v16 = vsel %vm1053_vm9, %v6883_v12, 0.0 }
 0xa69   : > { %1722 = vadd.xlane.f32.xlu1 %v1721_v16  ;;  %v1997_v16 = vunpack.c.l.b16 %v1981_v28 }
 0xa6b   : > { %v2004_v33 = vrot.slane %v1997_v16, 7  ;;  %v6965_v16 = vld [vmem:[%s8635_s6 + $0x8] sm:$0xff] }
 0xa6d   : > { %v2005_v28 = vsel %vm804_vm0, %v2004_v33, %v1996_v45  ;;  %v6959_v45 = vld [vmem:[%s8635_s6 + $0x10] sm:$0xff] }
 0xa6e   : > { %v2007_v29 = vsel %vm807_vm1, %v2006_v30, %v2005_v28  ;;  %v1923_v33 = vld [vmem:[%s6299_s30 + $0x32] sm:$0x1]  ;;  %v1924_v30 = vld [vmem:[%s6299_s30 + $0x3a] sm:$0x1] }
 0xa6f   : > { %v2009_v17 = vsel %vm810_vm2, %v2008_v34, %v2007_v29  ;;  %v2039_v34 = vpack.c.bf16 %v1921_v23, %v1921_v23  ;;  %v2041_v28 = vpack.c.bf16 %v1923_v33, %v1923_v33  ;;  %v2051_v29 = vunpack.c.l.b16 %v2035_v26 }
 0xa70   : > { %v2011_v39 = vsel %vm813_vm3, %v2010_v35, %v2009_v17  ;;  %v2040_v35 = vpack.c.bf16 %v1922_v25, %v1922_v25  ;;  %v2053_v17 = vunpack.c.l.b16 %v2037_v31 }
 0xa71   : > { %v2013_v40 = vsel %vm816_vm4, %v2012_v8, %v2011_v39  ;;  %v2042_v8 = vpack.c.bf16 %v1924_v30, %v1924_v30  ;;  %v2055_v39 = vunpack.c.l.b16 %v2039_v34 }
 0xa72   : > { %v2015_v37 = vsel %vm819_vm5, %v2014_v10, %v2013_v40  ;;  %v2052_v10 = vunpack.c.l.b16 %v2036_v27  ;;  %v2056_v40 = vunpack.c.l.b16 %v2040_v35  ;;  %v7016_v27 = vld [vmem:[%s8634_s9] ss:$0 sm:$0xff] }
 0xa73   : > { %v2017_v41 = vsel %vm822_vm6, %v2016_v49, %v2015_v37  ;;  %v2054_v49 = vunpack.c.l.b16 %v2038_v51  ;;  %v2057_v37 = vunpack.c.l.b16 %v2041_v28 }
 0xa74   : > { %v2018_v36 = vpack.c.b16 %v2017_v41, %v2017_v41  ;;  %v2059_v41 = vrot.slane %v2052_v10, 7 }
 0xa76   : > { %5492 = vmatmul.msk.bf16.vlgmr.msra.gmra.mxu0 %vm849_vm7, %v2018_v36  ;;  %v2058_v36 = vunpack.c.l.b16 %v2042_v8 }
 0xadc   : > { %v1723_v42 = vpop.xlane.xlu1 %1722 }
 0xadd   : > { %5685 = vrcp.f32 %v1723_v42  ;;  %v2061_v42 = vrot.slane %v2053_v17, 6 }
 0xae3   : > { %v5686_v43 = vpop.eup %5685 }
 0xae4   : > { %v1725_v57 = vmul.f32 %v5686_v43, %v6883_v12  ;;  %v2063_v43 = vrot.slane %v2054_v49, 5 }
 0xae6   : > { %v1726_v47 = vpack.c.bf16 %v1725_v57, %v1725_v57  ;;  %v2065_v57 = vrot.slane %v2055_v39, 4 }
 0xae8   : > { %5489 = vmatmul.msk.bf16.vlgmr.msrb.gmra.mxu1 %vm1053_vm9, %v1726_v47  ;;  %v1976_v48 = vpop.f32.mrf.mxu3  ;;  %v2060_v47 = vsel %vm804_vm0, %v2059_v41, %v2051_v29  ;;  %v7046_v41 = vld [vmem:[%s8633_s5 + $0x10] sm:$0xff] }
 0xae9   : > { %2169 = vmatpush.bf16.msrb.mxu1 %v6758_v46  ;;  %v1977_v4 = vadd.f32 %v6833_v21, %v1976_v48 }
 0xaeb   : > { %v2090_v5 = vmul.f32 0.125, %v1977_v4 }
 0xaed   : > { %2170 = vmatpush.bf16.msrb.mxu1 %v6764_v63  ;;  %v2091_v13 = vpack.c.bf16 %v2090_v5, %v2090_v5 }
 0xaf0   : > { %v1978_v53 = vpop.f32.mrf.mxu3 }
 0xaf1   : > { %2171 = vmatpush.bf16.msrb.mxu1 %v6770_v0 }
 0xaf3   : > { %v2031_v50 = vpop.f32.mrf.mxu0 }
 0xaf4   : > { %v2032_v9 = vadd.f32 %v6825_v44, %v2031_v50  ;;  %v2062_v50 = vsel %vm807_vm1, %v2061_v42, %v2060_v47  ;;  %v7058_v42 = vld [vmem:[%s8633_s5] sm:$0xff] }
 0xaf5   : > { %2172 = vmatpush.bf16.msrb.mxu1 %v6776_v14 }
 0xaf6   : > { %v2302_v12 = vrot.slane %v2032_v9, 1  ;;  %v2303_v58 = vrot.slane %v2032_v9, 2  ;;  %v2304_v32 = vrot.slane %v2032_v9, 3  ;;  %2316 = vst.msk [vmem:[%s6402_s17 + $0x2] sm:$0x1] %vm1262_vm8, %v2032_v9  ;;  %v2305_v11 = vrot.slane %v2032_v9, 4 }
 0xaf7   : > { %v2306_v38 = vrot.slane %v2032_v9, 5  ;;  %v2092_v52 = vpack.c.bf16 %v2032_v9, %v2032_v9  ;;  %v2307_v24 = vrot.slane %v2032_v9, 6  ;;  %v2308_v54 = vrot.slane %v2032_v9, 7 }
 0xaf8   : > { %2317 = vst.msk [vmem:[%s6402_s17 + $0xa] sm:$0x1] %vm1262_vm8, %v2302_v12  ;;  %v2067_v9 = vrot.slane %v2056_v40, 3  ;;  %v6987_v12 = vld [vmem:[%s8636_s19] ss:$0 sm:$0xff] }
 0xaf9   : > { %2318 = vst.msk [vmem:[%s6402_s17 + $0x12] sm:$0x1] %vm1262_vm8, %v2303_v58  ;;  %v2098_v59 = vsel %vm849_vm7, %v2092_v52, 0  ;;  %v2071_v52 = vrot.slane %v2058_v36, 1  ;;  %v7052_v36 = vld [vmem:[%s8633_s5 + $0x8] sm:$0xff] }
 0xafa   : > { %2319 = vst.msk [vmem:[%s6402_s17 + $0x1a] sm:$0x1] %vm1262_vm8, %v2304_v32  ;;  %2107 = vmatpush.bf16.xpose.msra.mxu2 %v2098_v59  ;;  %v2064_v32 = vsel %vm810_vm2, %v2063_v43, %v2062_v50 }
 0xafb   : > { %2320 = vst.msk [vmem:[%s6402_s17 + $0x22] sm:$0x1] %vm1262_vm8, %v2305_v11  ;;  %v2033_v55 = vpop.f32.mrf.mxu0  ;;  %v2069_v11 = vrot.slane %v2057_v37, 2  ;;  %v7040_v37 = vld [vmem:[%s8633_s5 + $0x18] sm:$0xff] }
 0xafc   : > { %2321 = vst.msk [vmem:[%s6402_s17 + $0x2a] sm:$0x1] %vm1262_vm8, %v2306_v38  ;;  %v2066_v38 = vsel %vm813_vm3, %v2065_v57, %v2064_v32 }
 0xafd   : > { %2322 = vst.msk [vmem:[%s6402_s17 + $0x32] sm:$0x1] %vm1262_vm8, %v2307_v24  ;;  %v2068_v55 = vsel %vm816_vm4, %v2067_v9, %v2066_v38 }
 0xafe   : > { %2323 = vst.msk [vmem:[%s6402_s17 + $0x3a] sm:$0x1] %vm1262_vm8, %v2308_v54 }
 0xb65   : > { %v1742_v61 = vpop.f32.mrf.mxu1 }
 0xb66   : > { %v1746_v3 = vpack.c.bf16 %v1742_v61, %v1742_v61 }
 0xb68   : > { %5490 = vmatmul.msk.bf16.vlgmr.msrb.gmra.mxu2 %vm849_vm7, %v1746_v3  ;;  %v2070_v3 = vsel %vm819_vm5, %v2069_v11, %v2068_v55 }
 0xb69   : > { %2182 = vmatpush.bf16.msrb.mxu2 %v6848_v60 }
 0xb6d   : > { %v1744_v7 = vpop.f32.mrf.mxu1  ;;  %2183 = vmatpush.bf16.msrb.mxu2 %v6860_v62 }
 0xb6e   : > { %v2072_v7 = vsel %vm822_vm6, %v2071_v52, %v2070_v3 }
 0xb71   : > { %2184 = vmatpush.bf16.msrb.mxu2 %v6867_v1 }
 0xb75   : > { %2185 = vmatpush.bf16.msrb.mxu2 %v6873_v2 }
 0xb78   : > { %5494 = vmatmul.msk.bf16.vlgmr.msra.gmra.mxu2 %vm849_vm7, %v2091_v13  ;;  %v2073_v13 = vpack.c.b16 %v2072_v7, %v2072_v7 }
 0xb79   : > { %2269 = vmatpush.bf16.msra.mxu2 %v6953_v6 }
 0xb7a   : > { %5493 = vmatmul.msk.bf16.vlgmr.msra.gmra.mxu1 %vm849_vm7, %v2073_v13 }
 0xb7d   : > { %2270 = vmatpush.bf16.msra.mxu2 %v6959_v45 }
 0xb81   : > { %2271 = vmatpush.bf16.msra.mxu2 %v6965_v16 }
 0xb85   : > { %2272 = vmatpush.bf16.msra.mxu2 %v6971_v56 }
 0xbeb   : > { %v1759_v48 = vpop.f32.mrf.mxu2 }
 0xbec   : > { %v1760_v58 = vadd.f32 %v6987_v12, %v1759_v48 }
 0xbee   : > { %v1833_v24 = vrot.slane %v1760_v58, 1  ;;  %v1834_v53 = vrot.slane %v1760_v58, 2  ;;  %v1835_v54 = vrot.slane %v1760_v58, 3  ;;  %1847 = vst.msk [vmem:[%s6708_s15 + $0x1] sm:$0x1] %vm1262_vm8, %v1760_v58  ;;  %v1836_v59 = vrot.slane %v1760_v58, 4 }
 0xbef   : > { %v1837_v61 = vrot.slane %v1760_v58, 5  ;;  %v1838_v4 = vrot.slane %v1760_v58, 6  ;;  %v1839_v5 = vrot.slane %v1760_v58, 7 }
 0xbf0   : > { %1848 = vst.msk [vmem:[%s6708_s15 + $0x9] sm:$0x1] %vm1262_vm8, %v1833_v24 }
 0xbf1   : > { %1849 = vst.msk [vmem:[%s6708_s15 + $0x11] sm:$0x1] %vm1262_vm8, %v1834_v53 }
 0xbf2   : > { %1850 = vst.msk [vmem:[%s6708_s15 + $0x19] sm:$0x1] %vm1262_vm8, %v1835_v54 }
 0xbf3   : > { %1851 = vst.msk [vmem:[%s6708_s15 + $0x21] sm:$0x1] %vm1262_vm8, %v1836_v59  ;;  %v1761_v15 = vpop.f32.mrf.mxu2 }
 0xbf4   : > { %1852 = vst.msk [vmem:[%s6708_s15 + $0x29] sm:$0x1] %vm1262_vm8, %v1837_v61 }
 0xbf5   : > { %1853 = vst.msk [vmem:[%s6708_s15 + $0x31] sm:$0x1] %vm1262_vm8, %v1838_v4 }
 0xbf6   : > { %1854 = vst.msk [vmem:[%s6708_s15 + $0x39] sm:$0x1] %vm1262_vm8, %v1839_v5 }
 0xbf7   : > { %v2086_v26 = vpop.f32.mrf.mxu1 }
 0xbf8   : > { %v2087_v31 = vadd.f32 %v7016_v27, %v2086_v26 }
 0xbfa   : > { %v2325_v30 = vrot.slane %v2087_v31, 1  ;;  %v2326_v51 = vrot.slane %v2087_v31, 2  ;;  %v2327_v34 = vrot.slane %v2087_v31, 3  ;;  %2339 = vst.msk [vmem:[%s6474_s27 + $0x2] sm:$0x1] %vm1262_vm8, %v2087_v31  ;;  %v2328_v35 = vrot.slane %v2087_v31, 4 }
 0xbfb   : > { %v2109_v18 = vpop.f32.mrf.mxu2  ;;  %v2329_v28 = vrot.slane %v2087_v31, 5  ;;  %v2330_v8 = vrot.slane %v2087_v31, 6  ;;  %v2331_v29 = vrot.slane %v2087_v31, 7  ;;  %v2093_v39 = vpack.c.bf16 %v2087_v31, %v2087_v31 }
 0xbfc   : > { %v2113_v19 = vsel %vm1053_vm9, %v2109_v18, -inf  ;;  %2340 = vst.msk [vmem:[%s6474_s27 + $0xa] sm:$0x1] %vm1262_vm8, %v2325_v30 }
 0xbfd   : > { %2114 = vmax.xlane.f32.xlu2 %v2113_v19  ;;  %2341 = vst.msk [vmem:[%s6474_s27 + $0x12] sm:$0x1] %vm1262_vm8, %v2326_v51  ;;  %v2129_v40 = vsel %vm1069_vm10, %v2093_v39, 0 }
 0xbfe   : > { %2342 = vst.msk [vmem:[%s6474_s27 + $0x1a] sm:$0x1] %vm1262_vm8, %v2327_v34  ;;  %2138 = vmatpush.bf16.msrb.mxu3 %v2129_v40 }
 0xbff   : > { %2343 = vst.msk [vmem:[%s6474_s27 + $0x22] sm:$0x1] %vm1262_vm8, %v2328_v35  ;;  %v2088_v10 = vpop.f32.mrf.mxu1 }
 0xc00   : > { %2344 = vst.msk [vmem:[%s6474_s27 + $0x2a] sm:$0x1] %vm1262_vm8, %v2329_v28 }
 0xc01   : > { %2345 = vst.msk [vmem:[%s6474_s27 + $0x32] sm:$0x1] %vm1262_vm8, %v2330_v8 }
 0xc02   : > { %2346 = vst.msk [vmem:[%s6474_s27 + $0x3a] sm:$0x1] %vm1262_vm8, %v2331_v29  ;;  %2197 = vmatpush.bf16.msra.mxu3 %v7040_v37 }
 0xc03   : > { %v2111_v22 = vpop.f32.mrf.mxu2 }
 0xc06   : > { %2198 = vmatpush.bf16.msra.mxu3 %v7046_v41 }
 0xc0a   : > { %2199 = vmatpush.bf16.msra.mxu3 %v7052_v36 }
 0xc0e   : > { %2200 = vmatpush.bf16.msra.mxu3 %v7058_v42 }
 0xc70   : > { %v2115_v23 = vpop.xlane.xlu2 %2114 }
 0xc71   : > { %v2116_v25 = vsub.f32 %v2109_v18, %v2115_v23 }
 0xc73   : > { %v2117_v33 = vmul.f32 1.442695, %v2116_v25 }
 0xc75   : > { %5687 = vpow2.f32 %v2117_v33 }
 0xc7b   : > { %v5688_v17 = vpop.eup %5687 }
 0xc7c   : > { %v2119_v49 = vsel %vm1053_vm9, %v5688_v17, 0.0 }
 0xc7d   : > { %2120 = vadd.xlane.f32.xlu0 %v2119_v49 }
 0xcf0   : > { %v2121_v43 = vpop.xlane.xlu0 %2120 }
 0xcf1   : > { %5689 = vrcp.f32 %v2121_v43 }
 0xcf7   : > { %v5690_v57 = vpop.eup %5689 }
 0xcf8   : > { %v2123_v47 = vmul.f32 %v5690_v57, %v5688_v17 }
 0xcfa   : > { %v2124_v48 = vpack.c.bf16 %v2123_v47, %v2123_v47 }
 0xcfc   : > { %5495 = vmatmul.msk.bf16.vlgmr.msrb.gmra.mxu3 %vm1053_vm9, %v2124_v48 }
 0xcfd   : > { %2486 = vmatpush.bf16.msrb.mxu3 %v6758_v46 }
 0xd01   : > { %2487 = vmatpush.bf16.msrb.mxu3 %v6764_v63 }
 0xd05   : > { %2488 = vmatpush.bf16.msrb.mxu3 %v6770_v0 }
 0xd09   : > { %2489 = vmatpush.bf16.msrb.mxu3 %v6776_v14 }
 0xd0c   : > { %5499 = vmatmul.msk.bf16.vlgmr.msra.gmra.mxu3 %vm849_vm7, %v2093_v39 }
 0xd7f   : > { %v2140_v50 = vpop.f32.mrf.mxu3 }
 0xd80   : > { %v2144_v9 = vpack.c.bf16 %v2140_v50, %v2140_v50 }
 0xd82   : > { %5496 = vmatmul.msk.bf16.vlgmr.msrb.gmra.mxu0 %vm849_vm7, %v2144_v9 }
 0xd87   : > { %v2142_v58 = vpop.f32.mrf.mxu3 }
 0xd8f   : > { %v2202_v32 = vpop.f32.mrf.mxu3 }
 0xd90   : > { %v2203_v46 = vadd.f32 %v7016_v27, %v2202_v32 }
 0xd92   : > { %v2394_v11 = vrot.slane %v2203_v46, 1  ;;  %v2395_v63 = vrot.slane %v2203_v46, 2  ;;  %v2396_v0 = vrot.slane %v2203_v46, 3  ;;  %2408 = vst.msk [vmem:[%s6535_s20 + $0x2] sm:$0x1] %vm1262_vm8, %v2203_v46  ;;  %v2397_v14 = vrot.slane %v2203_v46, 4 }
 0xd93   : > { %v2209_v38 = vpack.c.bf16 %v2203_v46, %v2203_v46  ;;  %v2398_v52 = vrot.slane %v2203_v46, 5  ;;  %v2399_v24 = vrot.slane %v2203_v46, 6  ;;  %v2400_v54 = vrot.slane %v2203_v46, 7 }
 0xd94   : > { %2409 = vst.msk [vmem:[%s6535_s20 + $0xa] sm:$0x1] %vm1262_vm8, %v2394_v11  ;;  %v2417_v11 = vld [vmem:[%s6287_s25 + $0xb] sm:$0x1] }
 0xd95   : > { %2410 = vst.msk [vmem:[%s6535_s20 + $0x12] sm:$0x1] %vm1262_vm8, %v2395_v63  ;;  %v2246_v53 = vsel %vm1069_vm10, %v2209_v38, 0  ;;  %v2425_v63 = vld [vmem:[%s6291_s26 + $0xb] sm:$0x1] }
 0xd96   : > { %2411 = vst.msk [vmem:[%s6535_s20 + $0x1a] sm:$0x1] %vm1262_vm8, %v2396_v0  ;;  %2255 = vmatpush.bf16.msra.mxu1 %v2246_v53  ;;  %v2418_v0 = vld [vmem:[%s6287_s25 + $0x13] sm:$0x1] }
 0xd97   : > { %2412 = vst.msk [vmem:[%s6535_s20 + $0x22] sm:$0x1] %vm1262_vm8, %v2397_v14  ;;  %v2204_v59 = vpop.f32.mrf.mxu3  ;;  %v2441_v14 = vpack.c.bf16 %v2417_v11, %v2417_v11  ;;  %v2426_v38 = vld [vmem:[%s6291_s26 + $0x13] sm:$0x1]  ;;  %v2442_v53 = vpack.c.bf16 %v2418_v0, %v2418_v0 }
 0xd98   : > { %2413 = vst.msk [vmem:[%s6535_s20 + $0x2a] sm:$0x1] %vm1262_vm8, %v2398_v52  ;;  %v2416_v52 = vld [vmem:[%s6287_s25 + $0x3] sm:$0x1]  ;;  %v2496_v59 = vpack.c.bf16 %v2425_v63, %v2425_v63 }
 0xd99   : > { %2414 = vst.msk [vmem:[%s6535_s20 + $0x32] sm:$0x1] %vm1262_vm8, %v2399_v24  ;;  %v2419_v24 = vld [vmem:[%s6287_s25 + $0x1b] sm:$0x1] }
 0xd9a   : > { %2415 = vst.msk [vmem:[%s6535_s20 + $0x3a] sm:$0x1] %vm1262_vm8, %v2400_v54  ;;  %v2424_v54 = vld [vmem:[%s6291_s26 + $0x3] sm:$0x1] }
 0xdff   : > { %v2157_v55 = vpop.f32.mrf.mxu0 }
 0xe00   : > { %v2158_v61 = vadd.f32 %v6987_v12, %v2157_v55  ;;  %v2497_v55 = vpack.c.bf16 %v2426_v38, %v2426_v38 }
 0xe02   : > { %v2279_v3 = vrot.slane %v2158_v61, 1  ;;  %v2280_v4 = vrot.slane %v2158_v61, 2  ;;  %v2281_v7 = vrot.slane %v2158_v61, 3  ;;  %2293 = vst.msk [vmem:[%s6561_s13 + $0x2] sm:$0x1] %vm1262_vm8, %v2158_v61  ;;  %v2282_v5 = vrot.slane %v2158_v61, 4 }
 0xe03   : > { %v2161_v13 = vpack.c.bf16 %v2158_v61, %v2158_v61  ;;  %v2283_v15 = vrot.slane %v2158_v61, 5  ;;  %v2284_v18 = vrot.slane %v2158_v61, 6  ;;  %v2285_v19 = vrot.slane %v2158_v61, 7  ;;  %v2420_v61 = vld [vmem:[%s6287_s25 + $0x23] sm:$0x1] }
 0xe04   : > { %2294 = vst.msk [vmem:[%s6561_s13 + $0xa] sm:$0x1] %vm1262_vm8, %v2279_v3  ;;  %v2440_v3 = vpack.c.bf16 %v2416_v52, %v2416_v52  ;;  %v2512_v52 = vunpack.c.l.b16 %v2496_v59 }
 0xe05   : > { %2295 = vst.msk [vmem:[%s6561_s13 + $0x12] sm:$0x1] %vm1262_vm8, %v2280_v4  ;;  %5497 = vmatmul.msk.bf16.vlgmr.msrb.gmra.mxu1 %vm849_vm7, %v2161_v13  ;;  %5498 = vmatmul.msk.bf16.vlgmr.msrb.gmra.mxu2 %vm849_vm7, %v2161_v13  ;;  %v2443_v4 = vpack.c.bf16 %v2419_v24, %v2419_v24  ;;  %v2428_v13 = vld [vmem:[%s6291_s26 + $0x23] sm:$0x1] }
 0xe06   : > { %2296 = vst.msk [vmem:[%s6561_s13 + $0x1a] sm:$0x1] %vm1262_vm8, %v2281_v7  ;;  %2596 = vmatpush.bf16.msrb.mxu1 %v7040_v37  ;;  %v2457_v7 = vunpack.c.l.b16 %v2441_v14 }
 0xe07   : > { %2297 = vst.msk [vmem:[%s6561_s13 + $0x22] sm:$0x1] %vm1262_vm8, %v2282_v5  ;;  %v2159_v22 = vpop.f32.mrf.mxu0  ;;  %v2427_v5 = vld [vmem:[%s6291_s26 + $0x1b] sm:$0x1] }
 0xe08   : > { %2298 = vst.msk [vmem:[%s6561_s13 + $0x2a] sm:$0x1] %vm1262_vm8, %v2283_v15  ;;  %v2495_v15 = vpack.c.bf16 %v2424_v54, %v2424_v54  ;;  %v2458_v22 = vunpack.c.l.b16 %v2442_v53  ;;  %v2513_v54 = vunpack.c.l.b16 %v2497_v55 }
 0xe09   : > { %2299 = vst.msk [vmem:[%s6561_s13 + $0x32] sm:$0x1] %vm1262_vm8, %v2284_v18  ;;  %v2421_v18 = vld [vmem:[%s6287_s25 + $0x2b] sm:$0x1] }
 0xe0a   : > { %2300 = vst.msk [vmem:[%s6561_s13 + $0x3a] sm:$0x1] %vm1262_vm8, %v2285_v19  ;;  %2597 = vmatpush.bf16.msrb.mxu1 %v7046_v41  ;;  %v2444_v19 = vpack.c.bf16 %v2420_v61, %v2420_v61  ;;  %v2511_v38 = vunpack.c.l.b16 %v2495_v15 }
 0xe0e   : > { %2598 = vmatpush.bf16.msrb.mxu1 %v7052_v36 }
 0xe12   : > { %2599 = vmatpush.bf16.msrb.mxu1 %v7058_v42 }
 0xe82   : > { %v2174_v23 = vpop.f32.mrf.mxu1 }
 0xe83   : > { %v2175_v34 = vadd.f32 %v6833_v21, %v2174_v23  ;;  %v2429_v23 = vld [vmem:[%s6291_s26 + $0x2b] sm:$0x1] }
 0xe85   : > { %v2206_v49 = vmul.f32 0.125, %v2175_v34  ;;  %v2464_v34 = vrot.slane %v2457_v7, 7 }
 0xe87   : > { %v2207_v40 = vpack.c.bf16 %v2206_v49, %v2206_v49  ;;  %v2500_v49 = vpack.c.bf16 %v2429_v23, %v2429_v23 }
 0xe88   : > { %v2187_v25 = vpop.f32.mrf.mxu2 }
 0xe89   : > { %v2188_v26 = vadd.f32 %v6825_v44, %v2187_v25  ;;  %v2498_v25 = vpack.c.bf16 %v2427_v5, %v2427_v5  ;;  %v2516_v7 = vunpack.c.l.b16 %v2500_v49 }
 0xe8a   : > { %v2176_v31 = vpop.f32.mrf.mxu1 }
 0xe8b   : > { %v2371_v33 = vrot.slane %v2188_v26, 1  ;;  %v2372_v30 = vrot.slane %v2188_v26, 2  ;;  %v2373_v51 = vrot.slane %v2188_v26, 3  ;;  %2385 = vst.msk [vmem:[%s6587_s0 + $0x2] sm:$0x1] %vm1262_vm8, %v2188_v26  ;;  %v2374_v35 = vrot.slane %v2188_v26, 4 }
 0xe8c   : > { %v2208_v28 = vpack.c.bf16 %v2188_v26, %v2188_v26  ;;  %v2375_v8 = vrot.slane %v2188_v26, 5  ;;  %v2376_v29 = vrot.slane %v2188_v26, 6  ;;  %v2377_v17 = vrot.slane %v2188_v26, 7  ;;  %v2422_v31 = vld [vmem:[%s6287_s25 + $0x33] sm:$0x1] }
 0xe8d   : > { %2386 = vst.msk [vmem:[%s6587_s0 + $0xa] sm:$0x1] %vm1262_vm8, %v2371_v33  ;;  %v2499_v26 = vpack.c.bf16 %v2428_v13, %v2428_v13  ;;  %v2445_v33 = vpack.c.bf16 %v2421_v18, %v2421_v18  ;;  %v2514_v61 = vunpack.c.l.b16 %v2498_v25  ;;  %v2527_v15 = vrot.slane %v2516_v7, 3  ;;  %v2435_v7 = vld [vmem:[%s6299_s30 + $0x1b] sm:$0x1] }
 0xe8e   : > { %2387 = vst.msk [vmem:[%s6587_s0 + $0x12] sm:$0x1] %vm1262_vm8, %v2372_v30  ;;  %v2214_v10 = vsel %vm849_vm7, %v2208_v28, 0  ;;  %v2456_v30 = vunpack.c.l.b16 %v2440_v3  ;;  %v2423_v28 = vld [vmem:[%s6287_s25 + $0x3b] sm:$0x1] }
 0xe8f   : > { %2388 = vst.msk [vmem:[%s6587_s0 + $0x1a] sm:$0x1] %vm1262_vm8, %v2373_v51  ;;  %2223 = vmatpush.bf16.xpose.msra.mxu0 %v2214_v10  ;;  %v2459_v51 = vunpack.c.l.b16 %v2443_v4  ;;  %v2466_v10 = vrot.slane %v2458_v22, 6  ;;  %v2515_v4 = vunpack.c.l.b16 %v2499_v26  ;;  %v2521_v22 = vrot.slane %v2513_v54, 6 }
 0xe90   : > { %2389 = vst.msk [vmem:[%s6587_s0 + $0x22] sm:$0x1] %vm1262_vm8, %v2374_v35  ;;  %v2189_v39 = vpop.f32.mrf.mxu2  ;;  %v2430_v35 = vld [vmem:[%s6291_s26 + $0x33] sm:$0x1] }
 0xe91   : > { %2390 = vst.msk [vmem:[%s6587_s0 + $0x2a] sm:$0x1] %vm1262_vm8, %v2375_v8  ;;  %v2446_v8 = vpack.c.bf16 %v2422_v31, %v2422_v31  ;;  %v2447_v39 = vpack.c.bf16 %v2423_v28, %v2423_v28  ;;  %v2523_v31 = vrot.slane %v2514_v61, 5 }
 0xe92   : > { %2391 = vst.msk [vmem:[%s6587_s0 + $0x32] sm:$0x1] %vm1262_vm8, %v2376_v29  ;;  %v2460_v29 = vunpack.c.l.b16 %v2444_v19  ;;  %v2519_v19 = vrot.slane %v2512_v52, 7 }
 0xe93   : > { %2392 = vst.msk [vmem:[%s6587_s0 + $0x3a] sm:$0x1] %vm1262_vm8, %v2377_v17  ;;  %v2431_v17 = vld [vmem:[%s6291_s26 + $0x3b] sm:$0x1] }
 0xe94   : > { %v2502_v63 = vpack.c.bf16 %v2431_v17, %v2431_v17  ;;  %v2520_v59 = vsel %vm804_vm0, %v2519_v19, %v2511_v38  ;;  %v2438_v19 = vld [vmem:[%s6299_s30 + $0x33] sm:$0x1] }
 0xe95   : > { %v2522_v55 = vsel %vm807_vm1, %v2521_v22, %v2520_v59  ;;  %v2439_v22 = vld [vmem:[%s6299_s30 + $0x3b] sm:$0x1] }
 0xe96   : > { %5500 = vmatmul.msk.bf16.vlgmr.msra.gmra.mxu0 %vm849_vm7, %v2207_v40  ;;  %v2461_v40 = vunpack.c.l.b16 %v2445_v33  ;;  %v2518_v18 = vunpack.c.l.b16 %v2502_v63  ;;  %v2525_v33 = vrot.slane %v2515_v4, 4  ;;  %v2524_v26 = vsel %vm810_vm2, %v2523_v31, %v2522_v55 }
 0xe97   : > { %2541 = vmatpush.bf16.msrb.mxu0 %v6848_v60 }
 0xe98   : > { %v2472_v11 = vrot.slane %v2461_v40, 3  ;;  %v7187_v40 = vld [vmem:[%s8629_s3 + $0x10] sm:$0xff] }
 0xe9b   : > { %2542 = vmatpush.bf16.msrb.mxu0 %v6860_v62 }
 0xe9f   : > { %2543 = vmatpush.bf16.msrb.mxu0 %v6867_v1 }
 0xea3   : > { %2544 = vmatpush.bf16.msrb.mxu0 %v6873_v2 }
 0xea7   : > { %2667 = vmatpush.bf16.msra.mxu0 %v6953_v6 }
 0xeab   : > { %2668 = vmatpush.bf16.msra.mxu0 %v6959_v45 }
 0xeaf   : > { %2669 = vmatpush.bf16.msra.mxu0 %v6965_v16 }
 0xeb3   : > { %2670 = vmatpush.bf16.msra.mxu0 %v6971_v56 }
 0xf13   : > { %v2225_v43 = vpop.f32.mrf.mxu0 }
 0xf14   : > { %v2229_v57 = vsel %vm6616_vm11, %v2225_v43, -1e+30  ;;  %v2465_v43 = vsel %vm804_vm0, %v2464_v34, %v2456_v30  ;;  %v2531_v30 = vrot.slane %v2518_v18, 1 }
 0xf15   : > { %v2230_v47 = vsel %vm1053_vm9, %v2229_v57, -inf }
 0xf16   : > { %2231 = vmax.xlane.f32.xlu1 %v2230_v47  ;;  %v2462_v47 = vunpack.c.l.b16 %v2446_v8 }
 0xf18   : > { %v2474_v14 = vrot.slane %v2462_v47, 2 }
 0xf1b   : > { %v2227_v48 = vpop.f32.mrf.mxu0 }
 0xf1c   : > { %v2467_v48 = vsel %vm807_vm1, %v2466_v10, %v2465_v43  ;;  %v7199_v43 = vld [vmem:[%s8629_s3] sm:$0xff] }
 0xf89   : > { %v2232_v50 = vpop.xlane.xlu1 %2231 }
 0xf8a   : > { %v2233_v9 = vsub.f32 %v2229_v57, %v2232_v50  ;;  %v2468_v57 = vrot.slane %v2459_v51, 5  ;;  %v2470_v50 = vrot.slane %v2460_v29, 4  ;;  %v2526_v51 = vsel %vm813_vm3, %v2525_v33, %v2524_v26 }
 0xf8b   : > { %v2528_v34 = vsel %vm816_vm4, %v2527_v15, %v2526_v51  ;;  %v2556_v33 = vpack.c.bf16 %v2438_v19, %v2438_v19 }
 0xf8c   : > { %v2234_v58 = vmul.f32 1.442695, %v2233_v9  ;;  %v2501_v9 = vpack.c.bf16 %v2430_v35, %v2430_v35 }
 0xf8d   : > { %v2572_v26 = vunpack.c.l.b16 %v2556_v33 }
 0xf8e   : > { %5691 = vpow2.f32 %v2234_v58  ;;  %v2463_v58 = vunpack.c.l.b16 %v2447_v39  ;;  %v2517_v5 = vunpack.c.l.b16 %v2501_v9  ;;  %v7181_v39 = vld [vmem:[%s8629_s3 + $0x18] sm:$0xff] }
 0xf90   : > { %v2476_v53 = vrot.slane %v2463_v58, 1  ;;  %v2529_v25 = vrot.slane %v2517_v5, 2  ;;  %v2437_v5 = vld [vmem:[%s6299_s30 + $0x2b] sm:$0x1] }
 0xf92   : > { %v2530_v35 = vsel %vm819_vm5, %v2529_v25, %v2528_v34 }
 0xf93   : > { %v2532_v28 = vsel %vm822_vm6, %v2531_v30, %v2530_v35 }
 0xf94   : > { %v7140_v32 = vpop.eup %5691  ;;  %v2533_v8 = vpack.c.b16 %v2532_v28, %v2532_v28 }
 0xf95   : > { %v2236_v46 = vsel %vm1053_vm9, %v7140_v32, 0.0 }
 0xf96   : > { %2237 = vadd.xlane.f32.xlu2 %v2236_v46  ;;  %v2469_v46 = vsel %vm810_vm2, %v2468_v57, %v2467_v48  ;;  %5504 = vmatmul.msk.bf16.vlgmr.msrb.gmra.mxu0 %vm849_vm7, %v2533_v8 }
 0xf97   : > { %v2471_v0 = vsel %vm813_vm3, %v2470_v50, %v2469_v46 }
 0xf98   : > { %v2473_v24 = vsel %vm816_vm4, %v2472_v11, %v2471_v0 }
 0xf99   : > { %v2475_v3 = vsel %vm819_vm5, %v2474_v14, %v2473_v24 }
 0xf9a   : > { %v2477_v13 = vsel %vm822_vm6, %v2476_v53, %v2475_v3 }
 0xf9b   : > { %v2478_v23 = vpack.c.b16 %v2477_v13, %v2477_v13 }
 0xf9d   : > { %5503 = vmatmul.msk.bf16.vlgmr.msrb.gmra.mxu3 %vm849_vm7, %v2478_v23  ;;  %v2553_v23 = vpack.c.bf16 %v2435_v7, %v2435_v7 }
0x1009   : > { %v2238_v29 = vpop.xlane.xlu2 %2237 }
0x100a   : > { %5693 = vrcp.f32 %v2238_v29 }
0x1010   : > { %v5694_v10 = vpop.eup %5693 }
0x1011   : > { %v2240_v17 = vmul.f32 %v5694_v10, %v7140_v32  ;;  %v7193_v32 = vld [vmem:[%s8629_s3 + $0x8] sm:$0xff] }
0x1013   : > { %v2241_v49 = vpack.c.bf16 %v2240_v17, %v2240_v17  ;;  %v2546_v47 = vpop.f32.mrf.mxu0 }
0x1014   : > { %v2547_v48 = vadd.f32 %v6825_v44, %v2546_v47  ;;  %v2584_v47 = vrot.slane %v2572_v26, 2 }
0x1015   : > { %5501 = vmatmul.msk.bf16.vlgmr.msra.gmra.mxu1 %vm1053_vm9, %v2241_v49 }
0x1016   : > { %2684 = vmatpush.bf16.msra.mxu1 %v7181_v39  ;;  %v2817_v50 = vrot.slane %v2547_v48, 1  ;;  %v2818_v9 = vrot.slane %v2547_v48, 2  ;;  %v2819_v58 = vrot.slane %v2547_v48, 3  ;;  %2831 = vst.msk [vmem:[%s6402_s17 + $0x3] sm:$0x1] %vm1262_vm8, %v2547_v48  ;;  %v2820_v46 = vrot.slane %v2547_v48, 4 }
0x1017   : > { %v2821_v11 = vrot.slane %v2547_v48, 5  ;;  %v2607_v63 = vpack.c.bf16 %v2547_v48, %v2547_v48  ;;  %v2822_v0 = vrot.slane %v2547_v48, 6  ;;  %v2823_v38 = vrot.slane %v2547_v48, 7 }
0x1018   : > { %2832 = vst.msk [vmem:[%s6402_s17 + $0xb] sm:$0x1] %vm1262_vm8, %v2817_v50 }
0x1019   : > { %2833 = vst.msk [vmem:[%s6402_s17 + $0x13] sm:$0x1] %vm1262_vm8, %v2818_v9  ;;  %v2613_v44 = vsel %vm849_vm7, %v2607_v63, 0 }
0x101a   : > { %2685 = vmatpush.bf16.msra.mxu1 %v7187_v40  ;;  %2834 = vst.msk [vmem:[%s6402_s17 + $0x1b] sm:$0x1] %vm1262_vm8, %v2819_v58  ;;  %2622 = vmatpush.bf16.xpose.msrb.mxu2 %v2613_v44 }
0x101b   : > { %2835 = vst.msk [vmem:[%s6402_s17 + $0x23] sm:$0x1] %vm1262_vm8, %v2820_v46  ;;  %v2548_v52 = vpop.f32.mrf.mxu0 }
0x101c   : > { %2836 = vst.msk [vmem:[%s6402_s17 + $0x2b] sm:$0x1] %vm1262_vm8, %v2821_v11 }
0x101d   : > { %2837 = vst.msk [vmem:[%s6402_s17 + $0x33] sm:$0x1] %vm1262_vm8, %v2822_v0 }
0x101e   : > { %2686 = vmatpush.bf16.msra.mxu1 %v7193_v32  ;;  %2838 = vst.msk [vmem:[%s6402_s17 + $0x3b] sm:$0x1] %vm1262_vm8, %v2823_v38 }
0x1020   : > { %v2491_v57 = vpop.f32.mrf.mxu3 }
0x1021   : > { %v2492_v54 = vadd.f32 %v6833_v21, %v2491_v57  ;;  %v2432_v21 = vld [vmem:[%s6299_s30 + $0x3] sm:$0x1] }
0x1022   : > { %2687 = vmatpush.bf16.msra.mxu1 %v7199_v43  ;;  %v2550_v13 = vpack.c.bf16 %v2432_v21, %v2432_v21 }
0x1023   : > { %v2605_v3 = vmul.f32 0.125, %v2492_v54 }
0x1024   : > { %v2566_v59 = vunpack.c.l.b16 %v2550_v13 }
0x1025   : > { %v2606_v4 = vpack.c.bf16 %v2605_v3, %v2605_v3 }
0x1028   : > { %v2493_v14 = vpop.f32.mrf.mxu3 }
0x1092   : > { %v2257_v24 = vpop.f32.mrf.mxu1 }
0x1093   : > { %v2261_v53 = vpack.c.bf16 %v2257_v24, %v2257_v24 }
0x1095   : > { %5502 = vmatmul.msk.bf16.vlgmr.msra.gmra.mxu2 %vm849_vm7, %v2261_v53 }
0x1096   : > { %2697 = vmatpush.bf16.msra.mxu2 %v6848_v60  ;;  %v2433_v60 = vld [vmem:[%s6299_s30 + $0xb] sm:$0x1] }
0x1097   : > { %v2551_v18 = vpack.c.bf16 %v2433_v60, %v2433_v60 }
0x109a   : > { %v2259_v61 = vpop.f32.mrf.mxu1  ;;  %2698 = vmatpush.bf16.msra.mxu2 %v6860_v62  ;;  %v2434_v62 = vld [vmem:[%s6299_s30 + $0x13] sm:$0x1] }
0x109e   : > { %2699 = vmatpush.bf16.msra.mxu2 %v6867_v1  ;;  %v2436_v1 = vld [vmem:[%s6299_s30 + $0x23] sm:$0x1] }
0x109f   : > { %v2554_v31 = vpack.c.bf16 %v2436_v1, %v2436_v1 }
0x10a1   : > { %v2570_v55 = vunpack.c.l.b16 %v2554_v31 }
0x10a2   : > { %2700 = vmatpush.bf16.msra.mxu2 %v6873_v2  ;;  %v2552_v2 = vpack.c.bf16 %v2434_v62, %v2434_v62 }
0x10a3   : > { %v2580_v28 = vrot.slane %v2570_v55, 4 }
0x10a4   : > { %v2568_v15 = vunpack.c.l.b16 %v2552_v2 }
0x10a5   : > { %5506 = vmatmul.msk.bf16.vlgmr.msrb.gmra.mxu2 %vm849_vm7, %v2606_v4 }
0x10a6   : > { %2784 = vmatpush.bf16.msrb.mxu2 %v6953_v6  ;;  %v2555_v6 = vpack.c.bf16 %v2437_v5, %v2437_v5  ;;  %v2576_v34 = vrot.slane %v2568_v15, 6 }
0x10a8   : > { %v2571_v25 = vunpack.c.l.b16 %v2555_v6 }
0x10aa   : > { %2785 = vmatpush.bf16.msrb.mxu2 %v6959_v45  ;;  %v2557_v45 = vpack.c.bf16 %v2439_v22, %v2439_v22  ;;  %v2582_v17 = vrot.slane %v2571_v25, 3 }
0x10ac   : > { %v2573_v51 = vunpack.c.l.b16 %v2557_v45 }
0x10ae   : > { %2786 = vmatpush.bf16.msrb.mxu2 %v6965_v16  ;;  %v2567_v16 = vunpack.c.l.b16 %v2551_v18  ;;  %v2586_v50 = vrot.slane %v2573_v51, 1 }
0x10b0   : > { %v2574_v30 = vrot.slane %v2567_v16, 7 }
0x10b2   : > { %2787 = vmatpush.bf16.msrb.mxu2 %v6971_v56  ;;  %v2569_v56 = vunpack.c.l.b16 %v2553_v23  ;;  %v2575_v8 = vsel %vm804_vm0, %v2574_v30, %v2566_v59 }
0x10b3   : > { %v2577_v10 = vsel %vm807_vm1, %v2576_v34, %v2575_v8 }
0x10b4   : > { %v2578_v35 = vrot.slane %v2569_v56, 5 }
0x10b6   : > { %v2579_v57 = vsel %vm810_vm2, %v2578_v35, %v2577_v10 }
0x10b7   : > { %v2581_v48 = vsel %vm813_vm3, %v2580_v28, %v2579_v57 }
0x10b8   : > { %v2583_v63 = vsel %vm816_vm4, %v2582_v17, %v2581_v48 }
0x10b9   : > { %v2585_v14 = vsel %vm819_vm5, %v2584_v47, %v2583_v63 }
0x10ba   : > { %v2587_v44 = vsel %vm822_vm6, %v2586_v50, %v2585_v14 }
0x10bb   : > { %v2588_v24 = vpack.c.b16 %v2587_v44, %v2587_v44  ;;  %v7339_v44 = vld [vmem:[%s8631_s8] ss:$0 sm:$0xff] }
0x10bd   : > { %5505 = vmatmul.msk.bf16.vlgmr.msrb.gmra.mxu1 %vm849_vm7, %v2588_v24 }
0x1118   : > { %v2274_v29 = vpop.f32.mrf.mxu2 }
0x1119   : > { %v2275_v49 = vadd.f32 %v6987_v12, %v2274_v29 }
0x111b   : > { %v2348_v9 = vrot.slane %v2275_v49, 1  ;;  %v2349_v58 = vrot.slane %v2275_v49, 2  ;;  %v2350_v46 = vrot.slane %v2275_v49, 3  ;;  %2362 = vst.msk [vmem:[%s6708_s15 + $0x2] sm:$0x1] %vm1262_vm8, %v2275_v49  ;;  %v2351_v11 = vrot.slane %v2275_v49, 4 }
0x111c   : > { %v2352_v0 = vrot.slane %v2275_v49, 5  ;;  %v2353_v38 = vrot.slane %v2275_v49, 6  ;;  %v2354_v52 = vrot.slane %v2275_v49, 7 }
0x111d   : > { %2363 = vst.msk [vmem:[%s6708_s15 + $0xa] sm:$0x1] %vm1262_vm8, %v2348_v9 }
0x111e   : > { %2364 = vst.msk [vmem:[%s6708_s15 + $0x12] sm:$0x1] %vm1262_vm8, %v2349_v58 }
0x111f   : > { %2365 = vst.msk [vmem:[%s6708_s15 + $0x1a] sm:$0x1] %vm1262_vm8, %v2350_v46 }
0x1120   : > { %2366 = vst.msk [vmem:[%s6708_s15 + $0x22] sm:$0x1] %vm1262_vm8, %v2351_v11  ;;  %v2276_v53 = vpop.f32.mrf.mxu2 }
0x1121   : > { %2367 = vst.msk [vmem:[%s6708_s15 + $0x2a] sm:$0x1] %vm1262_vm8, %v2352_v0 }
0x1122   : > { %2368 = vst.msk [vmem:[%s6708_s15 + $0x32] sm:$0x1] %vm1262_vm8, %v2353_v38 }
0x1123   : > { %2369 = vst.msk [vmem:[%s6708_s15 + $0x3a] sm:$0x1] %vm1262_vm8, %v2354_v52 }
0x1128   : > { %v2624_v54 = vpop.f32.mrf.mxu2 }
0x1129   : > { %v2628_v61 = vsel %vm1053_vm9, %v2624_v54, -inf }
0x112a   : > { %2629 = vmax.xlane.f32.xlu0 %v2628_v61 }
0x1130   : > { %v2626_v3 = vpop.f32.mrf.mxu2 }
0x113a   : > { %v2601_v60 = vpop.f32.mrf.mxu1 }
0x113b   : > { %v2602_v62 = vadd.f32 %v7016_v27, %v2601_v60 }
0x113d   : > { %v2840_v1 = vrot.slane %v2602_v62, 1  ;;  %v2841_v5 = vrot.slane %v2602_v62, 2  ;;  %v2842_v13 = vrot.slane %v2602_v62, 3  ;;  %2854 = vst.msk [vmem:[%s6474_s27 + $0x3] sm:$0x1] %vm1262_vm8, %v2602_v62  ;;  %v2843_v18 = vrot.slane %v2602_v62, 4 }
0x113e   : > { %v2844_v2 = vrot.slane %v2602_v62, 5  ;;  %v2845_v19 = vrot.slane %v2602_v62, 6  ;;  %v2846_v22 = vrot.slane %v2602_v62, 7  ;;  %v2608_v33 = vpack.c.bf16 %v2602_v62, %v2602_v62 }
0x113f   : > { %2855 = vst.msk [vmem:[%s6474_s27 + $0xb] sm:$0x1] %vm1262_vm8, %v2840_v1 }
0x1140   : > { %2856 = vst.msk [vmem:[%s6474_s27 + $0x13] sm:$0x1] %vm1262_vm8, %v2841_v5  ;;  %v2644_v45 = vsel %vm1069_vm10, %v2608_v33, 0  ;;  %v7362_v5 = vld [vmem:[%s8630_s4 + $0x18] sm:$0xff] }
0x1141   : > { %2857 = vst.msk [vmem:[%s6474_s27 + $0x1b] sm:$0x1] %vm1262_vm8, %v2842_v13  ;;  %2653 = vmatpush.bf16.msra.mxu3 %v2644_v45 }
0x1142   : > { %2858 = vst.msk [vmem:[%s6474_s27 + $0x23] sm:$0x1] %vm1262_vm8, %v2843_v18  ;;  %v2603_v23 = vpop.f32.mrf.mxu1  ;;  %v7374_v18 = vld [vmem:[%s8630_s4 + $0x10] sm:$0xff] }
0x1143   : > { %2859 = vst.msk [vmem:[%s6474_s27 + $0x2b] sm:$0x1] %vm1262_vm8, %v2844_v2  ;;  %v7381_v2 = vld [vmem:[%s8630_s4 + $0x8] sm:$0xff]  ;;  %v7399_v23 = vld [vmem:[%s8635_s6 + $0x10] sm:$0xff] }
0x1144   : > { %2860 = vst.msk [vmem:[%s6474_s27 + $0x33] sm:$0x1] %vm1262_vm8, %v2845_v19  ;;  %v7387_v19 = vld [vmem:[%s8630_s4] sm:$0xff] }
0x1145   : > { %2861 = vst.msk [vmem:[%s6474_s27 + $0x3b] sm:$0x1] %vm1262_vm8, %v2846_v22  ;;  %2712 = vmatpush.bf16.msrb.mxu3 %v7040_v37  ;;  %v7393_v22 = vld [vmem:[%s8635_s6 + $0x18] sm:$0xff] }
0x1149   : > { %2713 = vmatpush.bf16.msrb.mxu3 %v7046_v41 }
0x114d   : > { %2714 = vmatpush.bf16.msrb.mxu3 %v7052_v36 }
0x1151   : > { %2715 = vmatpush.bf16.msrb.mxu3 %v7058_v42 }
0x119d   : > { %v2630_v4 = vpop.xlane.xlu0 %2629 }
0x119e   : > { %v2631_v21 = vsub.f32 %v2624_v54, %v2630_v4 }
0x11a0   : > { %v2632_v7 = vmul.f32 1.442695, %v2631_v21 }
0x11a2   : > { %5695 = vpow2.f32 %v2632_v7 }
0x11a8   : > { %v5696_v31 = vpop.eup %5695 }
0x11a9   : > { %v2634_v6 = vsel %vm1053_vm9, %v5696_v31, 0.0 }
0x11aa   : > { %2635 = vadd.xlane.f32.xlu1 %v2634_v6  ;;  %v7411_v6 = vld [vmem:[%s8635_s6] sm:$0xff] }
0x121d   : > { %v2636_v59 = vpop.xlane.xlu1 %2635 }
0x121e   : > { %5697 = vrcp.f32 %v2636_v59 }
0x1224   : > { %v5698_v16 = vpop.eup %5697 }
0x1225   : > { %v2638_v15 = vmul.f32 %v5698_v16, %v5696_v31  ;;  %v7405_v31 = vld [vmem:[%s8635_s6 + $0x8] sm:$0xff] }
0x1227   : > { %v2639_v56 = vpack.c.bf16 %v2638_v15, %v2638_v15 }
0x1229   : > { %5507 = vmatmul.msk.bf16.vlgmr.msra.gmra.mxu3 %vm1053_vm9, %v2639_v56 }
0x122a   : > { %3001 = vmatpush.bf16.msra.mxu3 %v7181_v39 }
0x122e   : > { %3002 = vmatpush.bf16.msra.mxu3 %v7187_v40 }
0x1232   : > { %3003 = vmatpush.bf16.msra.mxu3 %v7193_v32 }
0x1236   : > { %3004 = vmatpush.bf16.msra.mxu3 %v7199_v43 }
0x1239   : > { %5511 = vmatmul.msk.bf16.vlgmr.msrb.gmra.mxu3 %vm849_vm7, %v2608_v33 }
0x12ac   : > { %v2655_v55 = vpop.f32.mrf.mxu3 }
0x12ad   : > { %v2659_v25 = vpack.c.bf16 %v2655_v55, %v2655_v55 }
0x12af   : > { %5508 = vmatmul.msk.bf16.vlgmr.msra.gmra.mxu0 %vm849_vm7, %v2659_v25 }
0x12b4   : > { %v2657_v26 = vpop.f32.mrf.mxu3 }
0x12bc   : > { %v2717_v30 = vpop.f32.mrf.mxu3 }
0x12bd   : > { %v2718_v51 = vadd.f32 %v7016_v27, %v2717_v30  ;;  %v2932_v30 = vld [vmem:[%s6287_s25 + $0xc] sm:$0x1] }
0x12bf   : > { %v2909_v34 = vrot.slane %v2718_v51, 1  ;;  %v2910_v35 = vrot.slane %v2718_v51, 2  ;;  %v2911_v28 = vrot.slane %v2718_v51, 3  ;;  %2923 = vst.msk [vmem:[%s6535_s20 + $0x3] sm:$0x1] %vm1262_vm8, %v2718_v51  ;;  %v2912_v8 = vrot.slane %v2718_v51, 4 }
0x12c0   : > { %v2724_v29 = vpack.c.bf16 %v2718_v51, %v2718_v51  ;;  %v2913_v10 = vrot.slane %v2718_v51, 5  ;;  %v2914_v17 = vrot.slane %v2718_v51, 6  ;;  %v2915_v27 = vrot.slane %v2718_v51, 7  ;;  %v2940_v51 = vld [vmem:[%s6291_s26 + $0xc] sm:$0x1] }
0x12c1   : > { %2924 = vst.msk [vmem:[%s6535_s20 + $0xb] sm:$0x1] %vm1262_vm8, %v2909_v34  ;;  %v2933_v34 = vld [vmem:[%s6287_s25 + $0x14] sm:$0x1] }
0x12c2   : > { %2925 = vst.msk [vmem:[%s6535_s20 + $0x13] sm:$0x1] %vm1262_vm8, %v2910_v35  ;;  %v2761_v49 = vsel %vm1069_vm10, %v2724_v29, 0  ;;  %v2956_v35 = vpack.c.bf16 %v2932_v30, %v2932_v30  ;;  %v2934_v29 = vld [vmem:[%s6287_s25 + $0x1c] sm:$0x1] }
0x12c3   : > { %2926 = vst.msk [vmem:[%s6535_s20 + $0x1b] sm:$0x1] %vm1262_vm8, %v2911_v28  ;;  %2770 = vmatpush.bf16.msrb.mxu1 %v2761_v49  ;;  %v2941_v28 = vld [vmem:[%s6291_s26 + $0x14] sm:$0x1]  ;;  %v3011_v49 = vpack.c.bf16 %v2940_v51, %v2940_v51 }
0x12c4   : > { %2927 = vst.msk [vmem:[%s6535_s20 + $0x23] sm:$0x1] %vm1262_vm8, %v2912_v8  ;;  %v2719_v57 = vpop.f32.mrf.mxu3  ;;  %v2931_v8 = vld [vmem:[%s6287_s25 + $0x4] sm:$0x1] }
0x12c5   : > { %2928 = vst.msk [vmem:[%s6535_s20 + $0x2b] sm:$0x1] %vm1262_vm8, %v2913_v10  ;;  %v2957_v10 = vpack.c.bf16 %v2933_v34, %v2933_v34  ;;  %v2935_v57 = vld [vmem:[%s6287_s25 + $0x24] sm:$0x1] }
0x12c6   : > { %2929 = vst.msk [vmem:[%s6535_s20 + $0x33] sm:$0x1] %vm1262_vm8, %v2914_v17  ;;  %v2939_v17 = vld [vmem:[%s6291_s26 + $0x4] sm:$0x1] }
0x12c7   : > { %2930 = vst.msk [vmem:[%s6535_s20 + $0x3b] sm:$0x1] %vm1262_vm8, %v2915_v27  ;;  %v3012_v27 = vpack.c.bf16 %v2941_v28, %v2941_v28 }
0x132c   : > { %v2672_v47 = vpop.f32.mrf.mxu0 }
0x132d   : > { %v2673_v48 = vadd.f32 %v6987_v12, %v2672_v47  ;;  %v2955_v47 = vpack.c.bf16 %v2931_v8, %v2931_v8 }
0x132f   : > { %v2794_v50 = vrot.slane %v2673_v48, 1  ;;  %v2795_v9 = vrot.slane %v2673_v48, 2  ;;  %v2796_v58 = vrot.slane %v2673_v48, 3  ;;  %2808 = vst.msk [vmem:[%s6561_s13 + $0x3] sm:$0x1] %vm1262_vm8, %v2673_v48  ;;  %v2797_v46 = vrot.slane %v2673_v48, 4 }
0x1330   : > { %v2676_v11 = vpack.c.bf16 %v2673_v48, %v2673_v48  ;;  %v2798_v63 = vrot.slane %v2673_v48, 5  ;;  %v2799_v0 = vrot.slane %v2673_v48, 6  ;;  %v2800_v12 = vrot.slane %v2673_v48, 7 }
0x1331   : > { %2809 = vst.msk [vmem:[%s6561_s13 + $0xb] sm:$0x1] %vm1262_vm8, %v2794_v50  ;;  %v2958_v48 = vpack.c.bf16 %v2934_v29, %v2934_v29  ;;  %v2972_v50 = vunpack.c.l.b16 %v2956_v35  ;;  %v3027_v35 = vunpack.c.l.b16 %v3011_v49  ;;  %v3028_v29 = vunpack.c.l.b16 %v3012_v27 }
0x1332   : > { %2810 = vst.msk [vmem:[%s6561_s13 + $0x13] sm:$0x1] %vm1262_vm8, %v2795_v9  ;;  %5509 = vmatmul.msk.bf16.vlgmr.msra.gmra.mxu1 %vm849_vm7, %v2676_v11  ;;  %5510 = vmatmul.msk.bf16.vlgmr.msra.gmra.mxu2 %vm849_vm7, %v2676_v11  ;;  %v2942_v9 = vld [vmem:[%s6291_s26 + $0x1c] sm:$0x1]  ;;  %v2936_v11 = vld [vmem:[%s6287_s25 + $0x2c] sm:$0x1] }
0x1333   : > { %2811 = vst.msk [vmem:[%s6561_s13 + $0x1b] sm:$0x1] %vm1262_vm8, %v2796_v58  ;;  %3111 = vmatpush.bf16.msra.mxu1 %v7040_v37  ;;  %v2943_v58 = vld [vmem:[%s6291_s26 + $0x24] sm:$0x1] }
0x1334   : > { %2812 = vst.msk [vmem:[%s6561_s13 + $0x23] sm:$0x1] %vm1262_vm8, %v2797_v46  ;;  %v2674_v14 = vpop.f32.mrf.mxu0  ;;  %v3010_v46 = vpack.c.bf16 %v2939_v17, %v2939_v17 }
0x1335   : > { %2813 = vst.msk [vmem:[%s6561_s13 + $0x2b] sm:$0x1] %vm1262_vm8, %v2798_v63  ;;  %v2959_v63 = vpack.c.bf16 %v2935_v57, %v2935_v57  ;;  %v3013_v14 = vpack.c.bf16 %v2942_v9, %v2942_v9 }
0x1336   : > { %2814 = vst.msk [vmem:[%s6561_s13 + $0x33] sm:$0x1] %vm1262_vm8, %v2799_v0  ;;  %v2973_v0 = vunpack.c.l.b16 %v2957_v10  ;;  %v3026_v34 = vunpack.c.l.b16 %v3010_v46 }
0x1337   : > { %2815 = vst.msk [vmem:[%s6561_s13 + $0x3b] sm:$0x1] %vm1262_vm8, %v2800_v12  ;;  %3112 = vmatpush.bf16.msra.mxu1 %v7046_v41  ;;  %v2944_v12 = vld [vmem:[%s6291_s26 + $0x2c] sm:$0x1]  ;;  %v3029_v10 = vunpack.c.l.b16 %v3013_v14 }
0x133b   : > { %3113 = vmatpush.bf16.msra.mxu1 %v7052_v36  ;;  %v7347_v36 = vld [vmem:[%s8632_s7] ss:$0 sm:$0xff] }
0x133f   : > { %3114 = vmatpush.bf16.msra.mxu1 %v7058_v42 }
0x13af   : > { %v2689_v38 = vpop.f32.mrf.mxu1 }
0x13b0   : > { %v2690_v42 = vadd.f32 %v7347_v36, %v2689_v38  ;;  %v3014_v38 = vpack.c.bf16 %v2943_v58, %v2943_v58  ;;  %v3034_v58 = vrot.slane %v3027_v35, 7 }
0x13b2   : > { %v2721_v7 = vmul.f32 0.125, %v2690_v42  ;;  %v2938_v42 = vld [vmem:[%s6287_s25 + $0x3c] sm:$0x1]  ;;  %v3030_v57 = vunpack.c.l.b16 %v3014_v38  ;;  %v3035_v49 = vsel %vm804_vm0, %v3034_v58, %v3026_v34  ;;  %v2953_v58 = vld [vmem:[%s6299_s30 + $0x34] sm:$0x1] }
0x13b4   : > { %v2722_v13 = vpack.c.bf16 %v2721_v7, %v2721_v7 }
0x13b5   : > { %v2702_v37 = vpop.f32.mrf.mxu2 }
0x13b6   : > { %v2703_v52 = vadd.f32 %v7339_v44, %v2702_v37  ;;  %v2937_v37 = vld [vmem:[%s6287_s25 + $0x34] sm:$0x1] }
0x13b7   : > { %v2691_v24 = vpop.f32.mrf.mxu1 }
0x13b8   : > { %v2886_v53 = vrot.slane %v2703_v52, 1  ;;  %v2887_v54 = vrot.slane %v2703_v52, 2  ;;  %v2888_v41 = vrot.slane %v2703_v52, 3  ;;  %2900 = vst.msk [vmem:[%s6587_s0 + $0x3] sm:$0x1] %vm1262_vm8, %v2703_v52  ;;  %v2889_v61 = vrot.slane %v2703_v52, 4 }
0x13b9   : > { %v2723_v3 = vpack.c.bf16 %v2703_v52, %v2703_v52  ;;  %v2890_v4 = vrot.slane %v2703_v52, 5  ;;  %v2891_v21 = vrot.slane %v2703_v52, 6  ;;  %v2892_v62 = vrot.slane %v2703_v52, 7 }
0x13ba   : > { %2901 = vst.msk [vmem:[%s6587_s0 + $0xb] sm:$0x1] %vm1262_vm8, %v2886_v53  ;;  %v2960_v52 = vpack.c.bf16 %v2936_v11, %v2936_v11  ;;  %v2971_v24 = vunpack.c.l.b16 %v2955_v47  ;;  %v2974_v53 = vunpack.c.l.b16 %v2958_v48  ;;  %v3036_v11 = vrot.slane %v3028_v29, 6  ;;  %v2948_v29 = vld [vmem:[%s6299_s30 + $0xc] sm:$0x1] }
0x13bb   : > { %2902 = vst.msk [vmem:[%s6587_s0 + $0x13] sm:$0x1] %vm1262_vm8, %v2887_v54  ;;  %v2729_v60 = vsel %vm849_vm7, %v2723_v3, 0  ;;  %v2979_v54 = vrot.slane %v2972_v50, 7  ;;  %v2975_v3 = vunpack.c.l.b16 %v2959_v63 }
0x13bc   : > { %2903 = vst.msk [vmem:[%s6587_s0 + $0x1b] sm:$0x1] %vm1262_vm8, %v2888_v41  ;;  %2738 = vmatpush.bf16.xpose.msrb.mxu0 %v2729_v60  ;;  %v2945_v41 = vld [vmem:[%s6291_s26 + $0x34] sm:$0x1]  ;;  %v3015_v60 = vpack.c.bf16 %v2944_v12, %v2944_v12  ;;  %v2976_v7 = vunpack.c.l.b16 %v2960_v52  ;;  %v3040_v12 = vrot.slane %v3030_v57, 4  ;;  %v3037_v27 = vsel %vm807_vm1, %v3036_v11, %v3035_v49 }
0x13bd   : > { %2904 = vst.msk [vmem:[%s6587_s0 + $0x23] sm:$0x1] %vm1262_vm8, %v2889_v61  ;;  %v2704_v1 = vpop.f32.mrf.mxu2  ;;  %v2961_v61 = vpack.c.bf16 %v2937_v37, %v2937_v37  ;;  %v2951_v57 = vld [vmem:[%s6299_s30 + $0x24] sm:$0x1]  ;;  %v2954_v11 = vld [vmem:[%s6299_s30 + $0x3c] sm:$0x1]  ;;  %v3071_v49 = vpack.c.bf16 %v2953_v58, %v2953_v58 }
0x13be   : > { %2905 = vst.msk [vmem:[%s6587_s0 + $0x2b] sm:$0x1] %vm1262_vm8, %v2890_v4  ;;  %v2981_v4 = vrot.slane %v2973_v0, 6  ;;  %v2980_v1 = vsel %vm804_vm0, %v2979_v54, %v2971_v24  ;;  %v3031_v47 = vunpack.c.l.b16 %v3015_v60  ;;  %v3038_v0 = vrot.slane %v3029_v10, 5  ;;  %v2949_v10 = vld [vmem:[%s6299_s30 + $0x14] sm:$0x1] }
0x13bf   : > { %2906 = vst.msk [vmem:[%s6587_s0 + $0x33] sm:$0x1] %vm1262_vm8, %v2891_v21  ;;  %v2946_v21 = vld [vmem:[%s6291_s26 + $0x3c] sm:$0x1] }
0x13c0   : > { %2907 = vst.msk [vmem:[%s6587_s0 + $0x3b] sm:$0x1] %vm1262_vm8, %v2892_v62  ;;  %v2962_v62 = vpack.c.bf16 %v2938_v42, %v2938_v42  ;;  %v3042_v46 = vrot.slane %v3031_v47, 3  ;;  %v3039_v38 = vsel %vm810_vm2, %v3038_v0, %v3037_v27  ;;  %v2952_v47 = vld [vmem:[%s6299_s30 + $0x2c] sm:$0x1]  ;;  %v3069_v0 = vpack.c.bf16 %v2951_v57, %v2951_v57 }
0x13c1   : > { %v3041_v52 = vsel %vm813_vm3, %v3040_v12, %v3039_v38  ;;  %v3070_v12 = vpack.c.bf16 %v2952_v47, %v2952_v47 }
0x13c2   : > { %v3043_v24 = vsel %vm816_vm4, %v3042_v46, %v3041_v52  ;;  %v3072_v46 = vpack.c.bf16 %v2954_v11, %v2954_v11  ;;  %v3085_v52 = vunpack.c.l.b16 %v3069_v0 }
0x13c3   : > { %5512 = vmatmul.msk.bf16.vlgmr.msrb.gmra.mxu0 %vm849_vm7, %v2722_v13  ;;  %v2983_v13 = vrot.slane %v2974_v53, 5 }
0x13c4   : > { %3056 = vmatpush.bf16.msra.mxu0 %v7362_v5 }
0x13c8   : > { %3057 = vmatpush.bf16.msra.mxu0 %v7374_v18 }
0x13cc   : > { %3058 = vmatpush.bf16.msra.mxu0 %v7381_v2 }
0x13d0   : > { %3059 = vmatpush.bf16.msra.mxu0 %v7387_v19 }
0x13d4   : > { %3182 = vmatpush.bf16.msrb.mxu0 %v7393_v22 }
0x13d8   : > { %3183 = vmatpush.bf16.msrb.mxu0 %v7399_v23 }
0x13dc   : > { %3184 = vmatpush.bf16.msrb.mxu0 %v7405_v31 }
0x13e0   : > { %3185 = vmatpush.bf16.msrb.mxu0 %v7411_v6 }
0x1440   : > { %v2740_v33 = vpop.f32.mrf.mxu0 }
0x1441   : > { %v2744_v45 = vsel %vm6616_vm11, %v2740_v33, -1e+30  ;;  %v2977_v33 = vunpack.c.l.b16 %v2961_v61 }
0x1442   : > { %v2745_v59 = vsel %vm1053_vm9, %v2744_v45, -inf }
0x1443   : > { %2746 = vmax.xlane.f32.xlu2 %v2745_v59  ;;  %v2985_v59 = vrot.slane %v2975_v3, 4  ;;  %v2989_v51 = vrot.slane %v2977_v33, 2 }
0x1448   : > { %v2742_v16 = vpop.f32.mrf.mxu0 }
0x1449   : > { %v3016_v16 = vpack.c.bf16 %v2945_v41, %v2945_v41 }
0x144b   : > { %v3032_v48 = vunpack.c.l.b16 %v3016_v16 }
0x144d   : > { %v3044_v14 = vrot.slane %v3032_v48, 2 }
0x144f   : > { %v3045_v53 = vsel %vm819_vm5, %v3044_v14, %v3043_v24  ;;  %v3086_v24 = vunpack.c.l.b16 %v3070_v12 }
0x14b6   : > { %v2747_v15 = vpop.xlane.xlu2 %2746 }
0x14b7   : > { %v2748_v56 = vsub.f32 %v2744_v45, %v2747_v15  ;;  %v2982_v45 = vsel %vm807_vm1, %v2981_v4, %v2980_v1  ;;  %v2978_v15 = vunpack.c.l.b16 %v2962_v62 }
0x14b9   : > { %v2749_v55 = vmul.f32 1.442695, %v2748_v56  ;;  %v2984_v56 = vsel %vm810_vm2, %v2983_v13, %v2982_v45  ;;  %v2991_v8 = vrot.slane %v2978_v15, 1 }
0x14ba   : > { %v2986_v30 = vsel %vm813_vm3, %v2985_v59, %v2984_v56 }
0x14bb   : > { %5699 = vpow2.f32 %v2749_v55  ;;  %v2987_v55 = vrot.slane %v2976_v7, 3 }
0x14bd   : > { %v2988_v28 = vsel %vm816_vm4, %v2987_v55, %v2986_v30 }
0x14be   : > { %v2990_v17 = vsel %vm819_vm5, %v2989_v51, %v2988_v28 }
0x14bf   : > { %v2992_v50 = vsel %vm822_vm6, %v2991_v8, %v2990_v17  ;;  %v2947_v8 = vld [vmem:[%s6299_s30 + $0x4] sm:$0x1]  ;;  %v2950_v17 = vld [vmem:[%s6299_s30 + $0x1c] sm:$0x1] }
0x14c0   : > { %v2993_v63 = vpack.c.b16 %v2992_v50, %v2992_v50  ;;  %v3065_v48 = vpack.c.bf16 %v2947_v8, %v2947_v8  ;;  %v3066_v50 = vpack.c.bf16 %v2948_v29, %v2948_v29 }
0x14c1   : > { %v7417_v25 = vpop.eup %5699 }
0x14c2   : > { %v2751_v26 = vsel %vm1053_vm9, %v7417_v25, 0.0  ;;  %5515 = vmatmul.msk.bf16.vlgmr.msra.gmra.mxu3 %vm849_vm7, %v2993_v63  ;;  %v3068_v63 = vpack.c.bf16 %v2950_v17, %v2950_v17  ;;  %v3081_v27 = vunpack.c.l.b16 %v3065_v48  ;;  %v3082_v14 = vunpack.c.l.b16 %v3066_v50  ;;  %v7530_v50 = vld [vmem:[%s8634_s9] ss:$0 sm:$0xff] }
0x14c3   : > { %2752 = vadd.xlane.f32.xlu0 %v2751_v26  ;;  %v3017_v26 = vpack.c.bf16 %v2946_v21, %v2946_v21 }
0x14c5   : > { %v3033_v9 = vunpack.c.l.b16 %v3017_v26 }
0x14c7   : > { %v3046_v37 = vrot.slane %v3033_v9, 1  ;;  %v3067_v9 = vpack.c.bf16 %v2949_v10, %v2949_v10 }
0x14c9   : > { %v3047_v54 = vsel %vm822_vm6, %v3046_v37, %v3045_v53  ;;  %v3083_v38 = vunpack.c.l.b16 %v3067_v9  ;;  %v3084_v37 = vunpack.c.l.b16 %v3068_v63  ;;  %v3087_v53 = vunpack.c.l.b16 %v3071_v49 }
0x14ca   : > { %v3048_v41 = vpack.c.b16 %v3047_v54, %v3047_v54  ;;  %v3089_v54 = vrot.slane %v3082_v14, 7 }
0x14cc   : > { %5516 = vmatmul.msk.bf16.vlgmr.msra.gmra.mxu0 %vm849_vm7, %v3048_v41  ;;  %v3088_v41 = vunpack.c.l.b16 %v3072_v46 }
0x1536   : > { %v2753_v42 = vpop.xlane.xlu0 %2752 }
0x1537   : > { %5701 = vrcp.f32 %v2753_v42  ;;  %v3091_v42 = vrot.slane %v3083_v38, 6 }
0x153d   : > { %v5702_v61 = vpop.eup %5701 }
0x153e   : > { %v2755_v3 = vmul.f32 %v5702_v61, %v7417_v25  ;;  %v3093_v61 = vrot.slane %v3084_v37, 5 }
0x1540   : > { %v2756_v4 = vpack.c.bf16 %v2755_v3, %v2755_v3  ;;  %v3095_v3 = vrot.slane %v3085_v52, 4 }
0x1542   : > { %5513 = vmatmul.msk.bf16.vlgmr.msrb.gmra.mxu1 %vm1053_vm9, %v2756_v4  ;;  %v3090_v4 = vsel %vm804_vm0, %v3089_v54, %v3081_v27  ;;  %v7560_v54 = vld [vmem:[%s8633_s5 + $0x10] sm:$0xff] }
0x1543   : > { %3199 = vmatpush.bf16.msrb.mxu1 %v7181_v39 }
0x1545   : > { %v3006_v21 = vpop.f32.mrf.mxu3 }
0x1546   : > { %v3007_v51 = vadd.f32 %v7347_v36, %v3006_v21 }
0x1547   : > { %3200 = vmatpush.bf16.msrb.mxu1 %v7187_v40 }
0x1548   : > { %v3120_v35 = vmul.f32 0.125, %v3007_v51 }
0x1549   : > { %v3061_v60 = vpop.f32.mrf.mxu0 }
0x154a   : > { %v3062_v62 = vadd.f32 %v7339_v44, %v3061_v60  ;;  %v3121_v28 = vpack.c.bf16 %v3120_v35, %v3120_v35  ;;  %v3092_v60 = vsel %vm807_vm1, %v3091_v42, %v3090_v4  ;;  %v7572_v42 = vld [vmem:[%s8633_s5] sm:$0xff] }
0x154b   : > { %3201 = vmatpush.bf16.msrb.mxu1 %v7193_v32 }
0x154c   : > { %v3332_v25 = vrot.slane %v3062_v62, 1  ;;  %v3333_v7 = vrot.slane %v3062_v62, 2  ;;  %v3334_v1 = vrot.slane %v3062_v62, 3  ;;  %3346 = vst.msk [vmem:[%s6402_s17 + $0x4] sm:$0x1] %vm1262_vm8, %v3062_v62  ;;  %v3335_v13 = vrot.slane %v3062_v62, 4 }
0x154d   : > { %v3336_v33 = vrot.slane %v3062_v62, 5  ;;  %v3122_v45 = vpack.c.bf16 %v3062_v62, %v3062_v62  ;;  %v3337_v59 = vrot.slane %v3062_v62, 6  ;;  %v3008_v16 = vpop.f32.mrf.mxu3  ;;  %v3338_v15 = vrot.slane %v3062_v62, 7 }
0x154e   : > { %3347 = vst.msk [vmem:[%s6402_s17 + $0xc] sm:$0x1] %vm1262_vm8, %v3332_v25  ;;  %v3097_v62 = vrot.slane %v3086_v24, 3  ;;  %v7501_v25 = vld [vmem:[%s8636_s19] ss:$0 sm:$0xff] }
0x154f   : > { %3202 = vmatpush.bf16.msrb.mxu1 %v7199_v43  ;;  %3348 = vst.msk [vmem:[%s6402_s17 + $0x14] sm:$0x1] %vm1262_vm8, %v3333_v7  ;;  %v3128_v56 = vsel %vm849_vm7, %v3122_v45, 0  ;;  %v3101_v45 = vrot.slane %v3088_v41, 1  ;;  %v7566_v41 = vld [vmem:[%s8633_s5 + $0x8] sm:$0xff] }
0x1550   : > { %3349 = vst.msk [vmem:[%s6402_s17 + $0x1c] sm:$0x1] %vm1262_vm8, %v3334_v1  ;;  %3137 = vmatpush.bf16.xpose.msra.mxu2 %v3128_v56  ;;  %v3094_v1 = vsel %vm810_vm2, %v3093_v61, %v3092_v60 }
0x1551   : > { %3350 = vst.msk [vmem:[%s6402_s17 + $0x24] sm:$0x1] %vm1262_vm8, %v3335_v13  ;;  %v3063_v55 = vpop.f32.mrf.mxu0  ;;  %v3099_v13 = vrot.slane %v3087_v53, 2  ;;  %v7554_v53 = vld [vmem:[%s8633_s5 + $0x18] sm:$0xff] }
0x1552   : > { %3351 = vst.msk [vmem:[%s6402_s17 + $0x2c] sm:$0x1] %vm1262_vm8, %v3336_v33  ;;  %v3096_v33 = vsel %vm813_vm3, %v3095_v3, %v3094_v1 }
0x1553   : > { %3352 = vst.msk [vmem:[%s6402_s17 + $0x34] sm:$0x1] %vm1262_vm8, %v3337_v59  ;;  %v3098_v55 = vsel %vm816_vm4, %v3097_v62, %v3096_v33 }
0x1554   : > { %3353 = vst.msk [vmem:[%s6402_s17 + $0x3c] sm:$0x1] %vm1262_vm8, %v3338_v15 }
0x15bf   : > { %v2772_v26 = vpop.f32.mrf.mxu1 }
0x15c0   : > { %v2776_v30 = vpack.c.bf16 %v2772_v26, %v2772_v26 }
0x15c2   : > { %5514 = vmatmul.msk.bf16.vlgmr.msrb.gmra.mxu2 %vm849_vm7, %v2776_v30  ;;  %v3100_v30 = vsel %vm819_vm5, %v3099_v13, %v3098_v55 }
0x15c3   : > { %3212 = vmatpush.bf16.msrb.mxu2 %v7362_v5 }
0x15c7   : > { %v2774_v34 = vpop.f32.mrf.mxu1  ;;  %3213 = vmatpush.bf16.msrb.mxu2 %v7374_v18 }
0x15c8   : > { %v3102_v34 = vsel %vm822_vm6, %v3101_v45, %v3100_v30 }
0x15cb   : > { %3214 = vmatpush.bf16.msrb.mxu2 %v7381_v2 }
0x15cf   : > { %3215 = vmatpush.bf16.msrb.mxu2 %v7387_v19 }
0x15d2   : > { %5518 = vmatmul.msk.bf16.vlgmr.msra.gmra.mxu2 %vm849_vm7, %v3121_v28  ;;  %v3103_v28 = vpack.c.b16 %v3102_v34, %v3102_v34 }
0x15d3   : > { %3299 = vmatpush.bf16.msra.mxu2 %v7393_v22 }
0x15d4   : > { %5517 = vmatmul.msk.bf16.vlgmr.msra.gmra.mxu1 %vm849_vm7, %v3103_v28 }
0x15d7   : > { %3300 = vmatpush.bf16.msra.mxu2 %v7399_v23 }
0x15db   : > { %3301 = vmatpush.bf16.msra.mxu2 %v7405_v31 }
0x15df   : > { %3302 = vmatpush.bf16.msra.mxu2 %v7411_v6 }
0x1645   : > { %v2789_v21 = vpop.f32.mrf.mxu2 }
0x1646   : > { %v2790_v7 = vadd.f32 %v7501_v25, %v2789_v21 }
0x1648   : > { %v2863_v59 = vrot.slane %v2790_v7, 1  ;;  %v2864_v16 = vrot.slane %v2790_v7, 2  ;;  %v2865_v15 = vrot.slane %v2790_v7, 3  ;;  %2877 = vst.msk [vmem:[%s6708_s15 + $0x3] sm:$0x1] %vm1262_vm8, %v2790_v7  ;;  %v2866_v56 = vrot.slane %v2790_v7, 4 }
0x1649   : > { %v2867_v26 = vrot.slane %v2790_v7, 5  ;;  %v2868_v51 = vrot.slane %v2790_v7, 6  ;;  %v2869_v35 = vrot.slane %v2790_v7, 7 }
0x164a   : > { %2878 = vst.msk [vmem:[%s6708_s15 + $0xb] sm:$0x1] %vm1262_vm8, %v2863_v59 }
0x164b   : > { %2879 = vst.msk [vmem:[%s6708_s15 + $0x13] sm:$0x1] %vm1262_vm8, %v2864_v16 }
0x164c   : > { %2880 = vst.msk [vmem:[%s6708_s15 + $0x1b] sm:$0x1] %vm1262_vm8, %v2865_v15 }
0x164d   : > { %2881 = vst.msk [vmem:[%s6708_s15 + $0x23] sm:$0x1] %vm1262_vm8, %v2866_v56  ;;  %v2791_v8 = vpop.f32.mrf.mxu2 }
0x164e   : > { %2882 = vst.msk [vmem:[%s6708_s15 + $0x2b] sm:$0x1] %vm1262_vm8, %v2867_v26 }
0x164f   : > { %2883 = vst.msk [vmem:[%s6708_s15 + $0x33] sm:$0x1] %vm1262_vm8, %v2868_v51 }
0x1650   : > { %2884 = vst.msk [vmem:[%s6708_s15 + $0x3b] sm:$0x1] %vm1262_vm8, %v2869_v35 }
0x1651   : > { %v3116_v48 = vpop.f32.mrf.mxu1 }
0x1652   : > { %v3117_v9 = vadd.f32 %v7530_v50, %v3116_v48 }
0x1654   : > { %v3355_v11 = vrot.slane %v3117_v9, 1  ;;  %v3356_v63 = vrot.slane %v3117_v9, 2  ;;  %v3357_v0 = vrot.slane %v3117_v9, 3  ;;  %3369 = vst.msk [vmem:[%s6474_s27 + $0x4] sm:$0x1] %vm1262_vm8, %v3117_v9  ;;  %v3358_v12 = vrot.slane %v3117_v9, 4 }
0x1655   : > { %v3139_v29 = vpop.f32.mrf.mxu2  ;;  %v3359_v49 = vrot.slane %v3117_v9, 5  ;;  %v3360_v46 = vrot.slane %v3117_v9, 6  ;;  %v3361_v27 = vrot.slane %v3117_v9, 7  ;;  %v3123_v52 = vpack.c.bf16 %v3117_v9, %v3117_v9 }
0x1656   : > { %v3143_v10 = vsel %vm1053_vm9, %v3139_v29, -inf  ;;  %3370 = vst.msk [vmem:[%s6474_s27 + $0xc] sm:$0x1] %vm1262_vm8, %v3355_v11 }
0x1657   : > { %3144 = vmax.xlane.f32.xlu1 %v3143_v10  ;;  %3371 = vst.msk [vmem:[%s6474_s27 + $0x14] sm:$0x1] %vm1262_vm8, %v3356_v63  ;;  %v3159_v24 = vsel %vm1069_vm10, %v3123_v52, 0 }
0x1658   : > { %3372 = vst.msk [vmem:[%s6474_s27 + $0x1c] sm:$0x1] %vm1262_vm8, %v3357_v0  ;;  %3168 = vmatpush.bf16.msrb.mxu3 %v3159_v24 }
0x1659   : > { %3373 = vst.msk [vmem:[%s6474_s27 + $0x24] sm:$0x1] %vm1262_vm8, %v3358_v12  ;;  %v3118_v14 = vpop.f32.mrf.mxu1 }
0x165a   : > { %3374 = vst.msk [vmem:[%s6474_s27 + $0x2c] sm:$0x1] %vm1262_vm8, %v3359_v49 }
0x165b   : > { %3375 = vst.msk [vmem:[%s6474_s27 + $0x34] sm:$0x1] %vm1262_vm8, %v3360_v46 }
0x165c   : > { %3376 = vst.msk [vmem:[%s6474_s27 + $0x3c] sm:$0x1] %vm1262_vm8, %v3361_v27  ;;  %3227 = vmatpush.bf16.msra.mxu3 %v7554_v53 }
0x165d   : > { %v3141_v17 = vpop.f32.mrf.mxu2 }
0x1660   : > { %3228 = vmatpush.bf16.msra.mxu3 %v7560_v54 }
0x1664   : > { %3229 = vmatpush.bf16.msra.mxu3 %v7566_v41 }
0x1668   : > { %3230 = vmatpush.bf16.msra.mxu3 %v7572_v42 }
0x16ca   : > { %v3145_v57 = vpop.xlane.xlu1 %3144 }
0x16cb   : > { %v3146_v47 = vsub.f32 %v3139_v29, %v3145_v57 }
0x16cd   : > { %v3147_v58 = vmul.f32 1.442695, %v3146_v47 }
0x16cf   : > { %5703 = vpow2.f32 %v3147_v58 }
0x16d5   : > { %v5704_v38 = vpop.eup %5703 }
0x16d6   : > { %v3149_v37 = vsel %vm1053_vm9, %v5704_v38, 0.0 }
0x16d7   : > { %3150 = vadd.xlane.f32.xlu2 %v3149_v37 }
0x174a   : > { %v3151_v61 = vpop.xlane.xlu2 %3150 }
0x174b   : > { %5705 = vrcp.f32 %v3151_v61 }
0x1751   : > { %v5706_v3 = vpop.eup %5705 }
0x1752   : > { %v3153_v4 = vmul.f32 %v5706_v3, %v5704_v38 }
0x1754   : > { %v3154_v21 = vpack.c.bf16 %v3153_v4, %v3153_v4 }
0x1756   : > { %5519 = vmatmul.msk.bf16.vlgmr.msrb.gmra.mxu3 %vm1053_vm9, %v3154_v21 }
0x1757   : > { %3516 = vmatpush.bf16.msrb.mxu3 %v7181_v39 }
0x175b   : > { %3517 = vmatpush.bf16.msrb.mxu3 %v7187_v40 }
0x175f   : > { %3518 = vmatpush.bf16.msrb.mxu3 %v7193_v32 }
0x1763   : > { %3519 = vmatpush.bf16.msrb.mxu3 %v7199_v43 }
0x1766   : > { %5523 = vmatmul.msk.bf16.vlgmr.msra.gmra.mxu3 %vm849_vm7, %v3123_v52 }
0x17d9   : > { %v3170_v60 = vpop.f32.mrf.mxu3 }
0x17da   : > { %v3174_v62 = vpack.c.bf16 %v3170_v60, %v3170_v60 }
0x17dc   : > { %5520 = vmatmul.msk.bf16.vlgmr.msrb.gmra.mxu0 %vm849_vm7, %v3174_v62 }
0x17e1   : > { %v3172_v7 = vpop.f32.mrf.mxu3 }
0x17e9   : > { %v3232_v1 = vpop.f32.mrf.mxu3 }
0x17ea   : > { %v3233_v39 = vadd.f32 %v7530_v50, %v3232_v1 }
0x17ec   : > { %v3424_v13 = vrot.slane %v3233_v39, 1  ;;  %v3425_v40 = vrot.slane %v3233_v39, 2  ;;  %v3426_v32 = vrot.slane %v3233_v39, 3  ;;  %3438 = vst.msk [vmem:[%s6535_s20 + $0x4] sm:$0x1] %vm1262_vm8, %v3233_v39  ;;  %v3427_v43 = vrot.slane %v3233_v39, 4 }
0x17ed   : > { %v3239_v33 = vpack.c.bf16 %v3233_v39, %v3233_v39  ;;  %v3428_v45 = vrot.slane %v3233_v39, 5  ;;  %v3429_v59 = vrot.slane %v3233_v39, 6  ;;  %v3430_v15 = vrot.slane %v3233_v39, 7 }
0x17ee   : > { %3439 = vst.msk [vmem:[%s6535_s20 + $0xc] sm:$0x1] %vm1262_vm8, %v3424_v13  ;;  %v3447_v13 = vld [vmem:[%s6287_s25 + $0xd] sm:$0x1] }
0x17ef   : > { %3440 = vst.msk [vmem:[%s6535_s20 + $0x14] sm:$0x1] %vm1262_vm8, %v3425_v40  ;;  %v3276_v16 = vsel %vm1069_vm10, %v3239_v33, 0  ;;  %v3455_v40 = vld [vmem:[%s6291_s26 + $0xd] sm:$0x1] }
0x17f0   : > { %3441 = vst.msk [vmem:[%s6535_s20 + $0x1c] sm:$0x1] %vm1262_vm8, %v3426_v32  ;;  %3285 = vmatpush.bf16.msra.mxu1 %v3276_v16  ;;  %v3448_v32 = vld [vmem:[%s6287_s25 + $0x15] sm:$0x1] }
0x17f1   : > { %3442 = vst.msk [vmem:[%s6535_s20 + $0x24] sm:$0x1] %vm1262_vm8, %v3427_v43  ;;  %v3234_v56 = vpop.f32.mrf.mxu3  ;;  %v3471_v43 = vpack.c.bf16 %v3447_v13, %v3447_v13  ;;  %v3456_v33 = vld [vmem:[%s6291_s26 + $0x15] sm:$0x1]  ;;  %v3472_v16 = vpack.c.bf16 %v3448_v32, %v3448_v32 }
0x17f2   : > { %3443 = vst.msk [vmem:[%s6535_s20 + $0x2c] sm:$0x1] %vm1262_vm8, %v3428_v45  ;;  %v3446_v45 = vld [vmem:[%s6287_s25 + $0x5] sm:$0x1]  ;;  %v3526_v56 = vpack.c.bf16 %v3455_v40, %v3455_v40 }
0x17f3   : > { %3444 = vst.msk [vmem:[%s6535_s20 + $0x34] sm:$0x1] %vm1262_vm8, %v3429_v59  ;;  %v3449_v59 = vld [vmem:[%s6287_s25 + $0x1d] sm:$0x1] }
0x17f4   : > { %3445 = vst.msk [vmem:[%s6535_s20 + $0x3c] sm:$0x1] %vm1262_vm8, %v3430_v15  ;;  %v3454_v15 = vld [vmem:[%s6291_s26 + $0x5] sm:$0x1] }
0x1859   : > { %v3187_v55 = vpop.f32.mrf.mxu0 }
0x185a   : > { %v3188_v26 = vadd.f32 %v7501_v25, %v3187_v55  ;;  %v3527_v55 = vpack.c.bf16 %v3456_v33, %v3456_v33 }
0x185c   : > { %v3309_v30 = vrot.slane %v3188_v26, 1  ;;  %v3310_v51 = vrot.slane %v3188_v26, 2  ;;  %v3311_v34 = vrot.slane %v3188_v26, 3  ;;  %3323 = vst.msk [vmem:[%s6561_s13 + $0x4] sm:$0x1] %vm1262_vm8, %v3188_v26  ;;  %v3312_v35 = vrot.slane %v3188_v26, 4 }
0x185d   : > { %v3191_v28 = vpack.c.bf16 %v3188_v26, %v3188_v26  ;;  %v3313_v8 = vrot.slane %v3188_v26, 5  ;;  %v3314_v29 = vrot.slane %v3188_v26, 6  ;;  %v3315_v10 = vrot.slane %v3188_v26, 7  ;;  %v3450_v26 = vld [vmem:[%s6287_s25 + $0x25] sm:$0x1] }
0x185e   : > { %3324 = vst.msk [vmem:[%s6561_s13 + $0xc] sm:$0x1] %vm1262_vm8, %v3309_v30  ;;  %v3470_v30 = vpack.c.bf16 %v3446_v45, %v3446_v45  ;;  %v3542_v45 = vunpack.c.l.b16 %v3526_v56 }
0x185f   : > { %3325 = vst.msk [vmem:[%s6561_s13 + $0x14] sm:$0x1] %vm1262_vm8, %v3310_v51  ;;  %5521 = vmatmul.msk.bf16.vlgmr.msrb.gmra.mxu1 %vm849_vm7, %v3191_v28  ;;  %5522 = vmatmul.msk.bf16.vlgmr.msrb.gmra.mxu2 %vm849_vm7, %v3191_v28  ;;  %v3473_v51 = vpack.c.bf16 %v3449_v59, %v3449_v59  ;;  %v3458_v28 = vld [vmem:[%s6291_s26 + $0x25] sm:$0x1] }
0x1860   : > { %3326 = vst.msk [vmem:[%s6561_s13 + $0x1c] sm:$0x1] %vm1262_vm8, %v3311_v34  ;;  %3626 = vmatpush.bf16.msrb.mxu1 %v7554_v53  ;;  %v3487_v34 = vunpack.c.l.b16 %v3471_v43 }
0x1861   : > { %3327 = vst.msk [vmem:[%s6561_s13 + $0x24] sm:$0x1] %vm1262_vm8, %v3312_v35  ;;  %v3189_v17 = vpop.f32.mrf.mxu0  ;;  %v3457_v35 = vld [vmem:[%s6291_s26 + $0x1d] sm:$0x1] }
0x1862   : > { %3328 = vst.msk [vmem:[%s6561_s13 + $0x2c] sm:$0x1] %vm1262_vm8, %v3313_v8  ;;  %v3525_v8 = vpack.c.bf16 %v3454_v15, %v3454_v15  ;;  %v3488_v17 = vunpack.c.l.b16 %v3472_v16  ;;  %v3543_v15 = vunpack.c.l.b16 %v3527_v55 }
0x1863   : > { %3329 = vst.msk [vmem:[%s6561_s13 + $0x34] sm:$0x1] %vm1262_vm8, %v3314_v29  ;;  %v3451_v29 = vld [vmem:[%s6287_s25 + $0x2d] sm:$0x1] }
0x1864   : > { %3330 = vst.msk [vmem:[%s6561_s13 + $0x3c] sm:$0x1] %vm1262_vm8, %v3315_v10  ;;  %3627 = vmatpush.bf16.msrb.mxu1 %v7560_v54  ;;  %v3474_v10 = vpack.c.bf16 %v3450_v26, %v3450_v26  ;;  %v3541_v33 = vunpack.c.l.b16 %v3525_v8 }
0x1868   : > { %3628 = vmatpush.bf16.msrb.mxu1 %v7566_v41 }
0x186c   : > { %3629 = vmatpush.bf16.msrb.mxu1 %v7572_v42 }
0x18dc   : > { %v3204_v57 = vpop.f32.mrf.mxu1 }
0x18dd   : > { %v3205_v0 = vadd.f32 %v7347_v36, %v3204_v57  ;;  %v3459_v57 = vld [vmem:[%s6291_s26 + $0x2d] sm:$0x1] }
0x18df   : > { %v3236_v37 = vmul.f32 0.125, %v3205_v0  ;;  %v3494_v0 = vrot.slane %v3487_v34, 7 }
0x18e1   : > { %v3237_v24 = vpack.c.bf16 %v3236_v37, %v3236_v37  ;;  %v3530_v37 = vpack.c.bf16 %v3459_v57, %v3459_v57 }
0x18e2   : > { %v3217_v47 = vpop.f32.mrf.mxu2 }
0x18e3   : > { %v3218_v48 = vadd.f32 %v7339_v44, %v3217_v47  ;;  %v3528_v47 = vpack.c.bf16 %v3457_v35, %v3457_v35  ;;  %v3546_v34 = vunpack.c.l.b16 %v3530_v37 }
0x18e4   : > { %v3206_v9 = vpop.f32.mrf.mxu1 }
0x18e5   : > { %v3401_v58 = vrot.slane %v3218_v48, 1  ;;  %v3402_v11 = vrot.slane %v3218_v48, 2  ;;  %v3403_v63 = vrot.slane %v3218_v48, 3  ;;  %3415 = vst.msk [vmem:[%s6587_s0 + $0x4] sm:$0x1] %vm1262_vm8, %v3218_v48  ;;  %v3404_v12 = vrot.slane %v3218_v48, 4 }
0x18e6   : > { %v3238_v49 = vpack.c.bf16 %v3218_v48, %v3218_v48  ;;  %v3405_v46 = vrot.slane %v3218_v48, 5  ;;  %v3406_v27 = vrot.slane %v3218_v48, 6  ;;  %v3407_v38 = vrot.slane %v3218_v48, 7  ;;  %v3452_v9 = vld [vmem:[%s6287_s25 + $0x35] sm:$0x1] }
0x18e7   : > { %3416 = vst.msk [vmem:[%s6587_s0 + $0xc] sm:$0x1] %vm1262_vm8, %v3401_v58  ;;  %v3529_v48 = vpack.c.bf16 %v3458_v28, %v3458_v28  ;;  %v3475_v58 = vpack.c.bf16 %v3451_v29, %v3451_v29  ;;  %v3544_v26 = vunpack.c.l.b16 %v3528_v47  ;;  %v3557_v8 = vrot.slane %v3546_v34, 3  ;;  %v3465_v34 = vld [vmem:[%s6299_s30 + $0x1d] sm:$0x1] }
0x18e8   : > { %3417 = vst.msk [vmem:[%s6587_s0 + $0x14] sm:$0x1] %vm1262_vm8, %v3402_v11  ;;  %v3244_v14 = vsel %vm849_vm7, %v3238_v49, 0  ;;  %v3486_v11 = vunpack.c.l.b16 %v3470_v30  ;;  %v3453_v49 = vld [vmem:[%s6287_s25 + $0x3d] sm:$0x1] }
0x18e9   : > { %3418 = vst.msk [vmem:[%s6587_s0 + $0x1c] sm:$0x1] %vm1262_vm8, %v3403_v63  ;;  %3253 = vmatpush.bf16.xpose.msra.mxu0 %v3244_v14  ;;  %v3489_v63 = vunpack.c.l.b16 %v3473_v51  ;;  %v3496_v14 = vrot.slane %v3488_v17, 6  ;;  %v3545_v51 = vunpack.c.l.b16 %v3529_v48  ;;  %v3551_v17 = vrot.slane %v3543_v15, 6 }
0x18ea   : > { %3419 = vst.msk [vmem:[%s6587_s0 + $0x24] sm:$0x1] %vm1262_vm8, %v3404_v12  ;;  %v3219_v52 = vpop.f32.mrf.mxu2  ;;  %v3460_v12 = vld [vmem:[%s6291_s26 + $0x35] sm:$0x1] }
0x18eb   : > { %3420 = vst.msk [vmem:[%s6587_s0 + $0x2c] sm:$0x1] %vm1262_vm8, %v3405_v46  ;;  %v3476_v46 = vpack.c.bf16 %v3452_v9, %v3452_v9  ;;  %v3477_v52 = vpack.c.bf16 %v3453_v49, %v3453_v49  ;;  %v3553_v9 = vrot.slane %v3544_v26, 5 }
0x18ec   : > { %3421 = vst.msk [vmem:[%s6587_s0 + $0x34] sm:$0x1] %vm1262_vm8, %v3406_v27  ;;  %v3490_v27 = vunpack.c.l.b16 %v3474_v10  ;;  %v3549_v10 = vrot.slane %v3542_v45, 7 }
0x18ed   : > { %3422 = vst.msk [vmem:[%s6587_s0 + $0x3c] sm:$0x1] %vm1262_vm8, %v3407_v38  ;;  %v3461_v38 = vld [vmem:[%s6291_s26 + $0x3d] sm:$0x1] }
0x18ee   : > { %v3532_v40 = vpack.c.bf16 %v3461_v38, %v3461_v38  ;;  %v3550_v56 = vsel %vm804_vm0, %v3549_v10, %v3541_v33  ;;  %v3468_v10 = vld [vmem:[%s6299_s30 + $0x35] sm:$0x1] }
0x18ef   : > { %v3552_v55 = vsel %vm807_vm1, %v3551_v17, %v3550_v56  ;;  %v3469_v17 = vld [vmem:[%s6299_s30 + $0x3d] sm:$0x1] }
0x18f0   : > { %5524 = vmatmul.msk.bf16.vlgmr.msra.gmra.mxu0 %vm849_vm7, %v3237_v24  ;;  %v3491_v24 = vunpack.c.l.b16 %v3475_v58  ;;  %v3548_v29 = vunpack.c.l.b16 %v3532_v40  ;;  %v3555_v58 = vrot.slane %v3545_v51, 4  ;;  %v3554_v48 = vsel %vm810_vm2, %v3553_v9, %v3552_v55 }
0x18f1   : > { %3571 = vmatpush.bf16.msrb.mxu0 %v7362_v5 }
0x18f2   : > { %v3502_v13 = vrot.slane %v3491_v24, 3  ;;  %v7701_v24 = vld [vmem:[%s8629_s3 + $0x10] sm:$0xff] }
0x18f5   : > { %3572 = vmatpush.bf16.msrb.mxu0 %v7374_v18 }
0x18f9   : > { %3573 = vmatpush.bf16.msrb.mxu0 %v7381_v2 }
0x18fd   : > { %3574 = vmatpush.bf16.msrb.mxu0 %v7387_v19 }
0x1901   : > { %3697 = vmatpush.bf16.msra.mxu0 %v7393_v22 }
0x1905   : > { %3698 = vmatpush.bf16.msra.mxu0 %v7399_v23 }
0x1909   : > { %3699 = vmatpush.bf16.msra.mxu0 %v7405_v31 }
0x190d   : > { %3700 = vmatpush.bf16.msra.mxu0 %v7411_v6 }
0x196d   : > { %v3255_v61 = vpop.f32.mrf.mxu0 }
0x196e   : > { %v3259_v3 = vsel %vm6616_vm11, %v3255_v61, -1e+30  ;;  %v3495_v61 = vsel %vm804_vm0, %v3494_v0, %v3486_v11  ;;  %v3561_v11 = vrot.slane %v3548_v29, 1 }
0x196f   : > { %v3260_v4 = vsel %vm1053_vm9, %v3259_v3, -inf }
0x1970   : > { %3261 = vmax.xlane.f32.xlu0 %v3260_v4  ;;  %v3492_v4 = vunpack.c.l.b16 %v3476_v46 }
0x1972   : > { %v3504_v43 = vrot.slane %v3492_v4, 2 }
0x1975   : > { %v3257_v21 = vpop.f32.mrf.mxu0 }
0x1976   : > { %v3497_v21 = vsel %vm807_vm1, %v3496_v14, %v3495_v61  ;;  %v7713_v61 = vld [vmem:[%s8629_s3] sm:$0xff] }
0x19e3   : > { %v3262_v60 = vpop.xlane.xlu0 %3261 }
0x19e4   : > { %v3263_v62 = vsub.f32 %v3259_v3, %v3262_v60  ;;  %v3498_v3 = vrot.slane %v3489_v63, 5  ;;  %v3500_v60 = vrot.slane %v3490_v27, 4  ;;  %v3556_v63 = vsel %vm813_vm3, %v3555_v58, %v3554_v48 }
0x19e5   : > { %v3558_v0 = vsel %vm816_vm4, %v3557_v8, %v3556_v63  ;;  %v3586_v58 = vpack.c.bf16 %v3468_v10, %v3468_v10 }
0x19e6   : > { %v3264_v7 = vmul.f32 1.442695, %v3263_v62  ;;  %v3531_v62 = vpack.c.bf16 %v3460_v12, %v3460_v12 }
0x19e7   : > { %v3602_v48 = vunpack.c.l.b16 %v3586_v58 }
0x19e8   : > { %5707 = vpow2.f32 %v3264_v7  ;;  %v3493_v7 = vunpack.c.l.b16 %v3477_v52  ;;  %v3547_v35 = vunpack.c.l.b16 %v3531_v62  ;;  %v7695_v52 = vld [vmem:[%s8629_s3 + $0x18] sm:$0xff] }
0x19ea   : > { %v3506_v16 = vrot.slane %v3493_v7, 1  ;;  %v3559_v47 = vrot.slane %v3547_v35, 2  ;;  %v3467_v35 = vld [vmem:[%s6299_s30 + $0x2d] sm:$0x1] }
0x19ec   : > { %v3560_v12 = vsel %vm819_vm5, %v3559_v47, %v3558_v0 }
0x19ed   : > { %v3562_v49 = vsel %vm822_vm6, %v3561_v11, %v3560_v12 }
0x19ee   : > { %v7654_v1 = vpop.eup %5707  ;;  %v3563_v46 = vpack.c.b16 %v3562_v49, %v3562_v49 }
0x19ef   : > { %v3266_v39 = vsel %vm1053_vm9, %v7654_v1, 0.0 }
0x19f0   : > { %3267 = vadd.xlane.f32.xlu1 %v3266_v39  ;;  %v3499_v39 = vsel %vm810_vm2, %v3498_v3, %v3497_v21  ;;  %5528 = vmatmul.msk.bf16.vlgmr.msrb.gmra.mxu0 %vm849_vm7, %v3563_v46 }
0x19f1   : > { %v3501_v32 = vsel %vm813_vm3, %v3500_v60, %v3499_v39 }
0x19f2   : > { %v3503_v59 = vsel %vm816_vm4, %v3502_v13, %v3501_v32 }
0x19f3   : > { %v3505_v30 = vsel %vm819_vm5, %v3504_v43, %v3503_v59 }
0x19f4   : > { %v3507_v28 = vsel %vm822_vm6, %v3506_v16, %v3505_v30 }
0x19f5   : > { %v3508_v57 = vpack.c.b16 %v3507_v28, %v3507_v28 }
0x19f7   : > { %5527 = vmatmul.msk.bf16.vlgmr.msrb.gmra.mxu3 %vm849_vm7, %v3508_v57  ;;  %v3583_v57 = vpack.c.bf16 %v3465_v34, %v3465_v34 }
0x1a63   : > { %v3268_v27 = vpop.xlane.xlu1 %3267 }
0x1a64   : > { %5709 = vrcp.f32 %v3268_v27 }
0x1a6a   : > { %v5710_v14 = vpop.eup %5709 }
0x1a6b   : > { %v3270_v38 = vmul.f32 %v5710_v14, %v7654_v1  ;;  %v7707_v1 = vld [vmem:[%s8629_s3 + $0x8] sm:$0xff] }
0x1a6d   : > { %v3271_v37 = vpack.c.bf16 %v3270_v38, %v3270_v38  ;;  %v3576_v4 = vpop.f32.mrf.mxu0 }
0x1a6e   : > { %v3577_v21 = vadd.f32 %v7339_v44, %v3576_v4  ;;  %v3614_v4 = vrot.slane %v3602_v48, 2 }
0x1a6f   : > { %5525 = vmatmul.msk.bf16.vlgmr.msra.gmra.mxu1 %vm1053_vm9, %v3271_v37 }
0x1a70   : > { %3714 = vmatpush.bf16.msra.mxu1 %v7695_v52  ;;  %v3847_v60 = vrot.slane %v3577_v21, 1  ;;  %v3848_v62 = vrot.slane %v3577_v21, 2  ;;  %v3849_v7 = vrot.slane %v3577_v21, 3  ;;  %3861 = vst.msk [vmem:[%s6402_s17 + $0x5] sm:$0x1] %vm1262_vm8, %v3577_v21  ;;  %v3850_v39 = vrot.slane %v3577_v21, 4 }
0x1a71   : > { %v3851_v13 = vrot.slane %v3577_v21, 5  ;;  %v3637_v40 = vpack.c.bf16 %v3577_v21, %v3577_v21  ;;  %v3852_v32 = vrot.slane %v3577_v21, 6  ;;  %v3853_v33 = vrot.slane %v3577_v21, 7 }
0x1a72   : > { %3862 = vst.msk [vmem:[%s6402_s17 + $0xd] sm:$0x1] %vm1262_vm8, %v3847_v60 }
0x1a73   : > { %3863 = vst.msk [vmem:[%s6402_s17 + $0x15] sm:$0x1] %vm1262_vm8, %v3848_v62  ;;  %v3643_v44 = vsel %vm849_vm7, %v3637_v40, 0 }
0x1a74   : > { %3715 = vmatpush.bf16.msra.mxu1 %v7701_v24  ;;  %3864 = vst.msk [vmem:[%s6402_s17 + $0x1d] sm:$0x1] %vm1262_vm8, %v3849_v7  ;;  %3652 = vmatpush.bf16.xpose.msrb.mxu2 %v3643_v44 }
0x1a75   : > { %3865 = vst.msk [vmem:[%s6402_s17 + $0x25] sm:$0x1] %vm1262_vm8, %v3850_v39  ;;  %v3578_v45 = vpop.f32.mrf.mxu0 }
0x1a76   : > { %3866 = vst.msk [vmem:[%s6402_s17 + $0x2d] sm:$0x1] %vm1262_vm8, %v3851_v13 }
0x1a77   : > { %3867 = vst.msk [vmem:[%s6402_s17 + $0x35] sm:$0x1] %vm1262_vm8, %v3852_v32 }
0x1a78   : > { %3716 = vmatpush.bf16.msra.mxu1 %v7707_v1  ;;  %3868 = vst.msk [vmem:[%s6402_s17 + $0x3d] sm:$0x1] %vm1262_vm8, %v3853_v33 }
0x1a7a   : > { %v3521_v3 = vpop.f32.mrf.mxu3 }
0x1a7b   : > { %v3522_v15 = vadd.f32 %v7347_v36, %v3521_v3  ;;  %v3462_v36 = vld [vmem:[%s6299_s30 + $0x5] sm:$0x1] }
0x1a7c   : > { %3717 = vmatpush.bf16.msra.mxu1 %v7713_v61  ;;  %v3580_v28 = vpack.c.bf16 %v3462_v36, %v3462_v36 }
0x1a7d   : > { %v3635_v30 = vmul.f32 0.125, %v3522_v15 }
0x1a7e   : > { %v3596_v56 = vunpack.c.l.b16 %v3580_v28 }
0x1a7f   : > { %v3636_v51 = vpack.c.bf16 %v3635_v30, %v3635_v30 }
0x1a82   : > { %v3523_v43 = vpop.f32.mrf.mxu3 }
0x1aec   : > { %v3287_v59 = vpop.f32.mrf.mxu1 }
0x1aed   : > { %v3291_v16 = vpack.c.bf16 %v3287_v59, %v3287_v59 }
0x1aef   : > { %5526 = vmatmul.msk.bf16.vlgmr.msra.gmra.mxu2 %vm849_vm7, %v3291_v16 }
0x1af0   : > { %3727 = vmatpush.bf16.msra.mxu2 %v7362_v5  ;;  %v3463_v5 = vld [vmem:[%s6299_s30 + $0xd] sm:$0x1] }
0x1af1   : > { %v3581_v29 = vpack.c.bf16 %v3463_v5, %v3463_v5 }
0x1af4   : > { %v3289_v26 = vpop.f32.mrf.mxu1  ;;  %3728 = vmatpush.bf16.msra.mxu2 %v7374_v18  ;;  %v3464_v18 = vld [vmem:[%s6299_s30 + $0x15] sm:$0x1] }
0x1af8   : > { %3729 = vmatpush.bf16.msra.mxu2 %v7381_v2  ;;  %v3466_v2 = vld [vmem:[%s6299_s30 + $0x25] sm:$0x1] }
0x1af9   : > { %v3584_v9 = vpack.c.bf16 %v3466_v2, %v3466_v2 }
0x1afb   : > { %v3600_v55 = vunpack.c.l.b16 %v3584_v9 }
0x1afc   : > { %3730 = vmatpush.bf16.msra.mxu2 %v7387_v19  ;;  %v3582_v19 = vpack.c.bf16 %v3464_v18, %v3464_v18 }
0x1afd   : > { %v3610_v49 = vrot.slane %v3600_v55, 4 }
0x1afe   : > { %v3598_v8 = vunpack.c.l.b16 %v3582_v19 }
0x1aff   : > { %5530 = vmatmul.msk.bf16.vlgmr.msrb.gmra.mxu2 %vm849_vm7, %v3636_v51 }
0x1b00   : > { %3814 = vmatpush.bf16.msrb.mxu2 %v7393_v22  ;;  %v3585_v22 = vpack.c.bf16 %v3467_v35, %v3467_v35  ;;  %v3606_v0 = vrot.slane %v3598_v8, 6 }
0x1b02   : > { %v3601_v47 = vunpack.c.l.b16 %v3585_v22 }
0x1b04   : > { %3815 = vmatpush.bf16.msrb.mxu2 %v7399_v23  ;;  %v3587_v23 = vpack.c.bf16 %v3469_v17, %v3469_v17  ;;  %v3612_v38 = vrot.slane %v3601_v47, 3 }
0x1b06   : > { %v3603_v63 = vunpack.c.l.b16 %v3587_v23 }
0x1b08   : > { %3816 = vmatpush.bf16.msrb.mxu2 %v7405_v31  ;;  %v3597_v31 = vunpack.c.l.b16 %v3581_v29  ;;  %v3616_v60 = vrot.slane %v3603_v63, 1 }
0x1b0a   : > { %v3604_v11 = vrot.slane %v3597_v31, 7 }
0x1b0c   : > { %3817 = vmatpush.bf16.msrb.mxu2 %v7411_v6  ;;  %v3599_v6 = vunpack.c.l.b16 %v3583_v57  ;;  %v3605_v46 = vsel %vm804_vm0, %v3604_v11, %v3596_v56 }
0x1b0d   : > { %v3607_v14 = vsel %vm807_vm1, %v3606_v0, %v3605_v46 }
0x1b0e   : > { %v3608_v12 = vrot.slane %v3599_v6, 5 }
0x1b10   : > { %v3609_v3 = vsel %vm810_vm2, %v3608_v12, %v3607_v14 }
0x1b11   : > { %v3611_v21 = vsel %vm813_vm3, %v3610_v49, %v3609_v3 }
0x1b12   : > { %v3613_v40 = vsel %vm816_vm4, %v3612_v38, %v3611_v21 }
0x1b13   : > { %v3615_v43 = vsel %vm819_vm5, %v3614_v4, %v3613_v40 }
0x1b14   : > { %v3617_v44 = vsel %vm822_vm6, %v3616_v60, %v3615_v43 }
0x1b15   : > { %v3618_v59 = vpack.c.b16 %v3617_v44, %v3617_v44  ;;  %v7853_v44 = vld [vmem:[%s8631_s8] ss:$0 sm:$0xff] }
0x1b17   : > { %5529 = vmatmul.msk.bf16.vlgmr.msrb.gmra.mxu1 %vm849_vm7, %v3618_v59 }
0x1b72   : > { %v3304_v27 = vpop.f32.mrf.mxu2 }
0x1b73   : > { %v3305_v37 = vadd.f32 %v7501_v25, %v3304_v27 }
0x1b75   : > { %v3378_v62 = vrot.slane %v3305_v37, 1  ;;  %v3379_v7 = vrot.slane %v3305_v37, 2  ;;  %v3380_v39 = vrot.slane %v3305_v37, 3  ;;  %3392 = vst.msk [vmem:[%s6708_s15 + $0x4] sm:$0x1] %vm1262_vm8, %v3305_v37  ;;  %v3381_v13 = vrot.slane %v3305_v37, 4 }
0x1b76   : > { %v3382_v32 = vrot.slane %v3305_v37, 5  ;;  %v3383_v33 = vrot.slane %v3305_v37, 6  ;;  %v3384_v45 = vrot.slane %v3305_v37, 7 }
0x1b77   : > { %3393 = vst.msk [vmem:[%s6708_s15 + $0xc] sm:$0x1] %vm1262_vm8, %v3378_v62 }
0x1b78   : > { %3394 = vst.msk [vmem:[%s6708_s15 + $0x14] sm:$0x1] %vm1262_vm8, %v3379_v7 }
0x1b79   : > { %3395 = vst.msk [vmem:[%s6708_s15 + $0x1c] sm:$0x1] %vm1262_vm8, %v3380_v39 }
0x1b7a   : > { %3396 = vst.msk [vmem:[%s6708_s15 + $0x24] sm:$0x1] %vm1262_vm8, %v3381_v13  ;;  %v3306_v16 = vpop.f32.mrf.mxu2 }
0x1b7b   : > { %3397 = vst.msk [vmem:[%s6708_s15 + $0x2c] sm:$0x1] %vm1262_vm8, %v3382_v32 }
0x1b7c   : > { %3398 = vst.msk [vmem:[%s6708_s15 + $0x34] sm:$0x1] %vm1262_vm8, %v3383_v33 }
0x1b7d   : > { %3399 = vst.msk [vmem:[%s6708_s15 + $0x3c] sm:$0x1] %vm1262_vm8, %v3384_v45 }
0x1b82   : > { %v3654_v15 = vpop.f32.mrf.mxu2 }
0x1b83   : > { %v3658_v26 = vsel %vm1053_vm9, %v3654_v15, -inf }
0x1b84   : > { %3659 = vmax.xlane.f32.xlu2 %v3658_v26 }
0x1b8a   : > { %v3656_v30 = vpop.f32.mrf.mxu2 }
0x1b94   : > { %v3631_v5 = vpop.f32.mrf.mxu1 }
0x1b95   : > { %v3632_v18 = vadd.f32 %v7530_v50, %v3631_v5 }
0x1b97   : > { %v3870_v2 = vrot.slane %v3632_v18, 1  ;;  %v3871_v35 = vrot.slane %v3632_v18, 2  ;;  %v3872_v28 = vrot.slane %v3632_v18, 3  ;;  %3884 = vst.msk [vmem:[%s6474_s27 + $0x5] sm:$0x1] %vm1262_vm8, %v3632_v18  ;;  %v3873_v29 = vrot.slane %v3632_v18, 4 }
0x1b98   : > { %v3874_v19 = vrot.slane %v3632_v18, 5  ;;  %v3875_v10 = vrot.slane %v3632_v18, 6  ;;  %v3876_v17 = vrot.slane %v3632_v18, 7  ;;  %v3638_v58 = vpack.c.bf16 %v3632_v18, %v3632_v18 }
0x1b99   : > { %3885 = vst.msk [vmem:[%s6474_s27 + $0xd] sm:$0x1] %vm1262_vm8, %v3870_v2 }
0x1b9a   : > { %3886 = vst.msk [vmem:[%s6474_s27 + $0x15] sm:$0x1] %vm1262_vm8, %v3871_v35  ;;  %v3674_v23 = vsel %vm1069_vm10, %v3638_v58, 0  ;;  %v7876_v35 = vld [vmem:[%s8630_s4 + $0x18] sm:$0xff] }
0x1b9b   : > { %3887 = vst.msk [vmem:[%s6474_s27 + $0x1d] sm:$0x1] %vm1262_vm8, %v3872_v28  ;;  %3683 = vmatpush.bf16.msra.mxu3 %v3674_v23 }
0x1b9c   : > { %3888 = vst.msk [vmem:[%s6474_s27 + $0x25] sm:$0x1] %vm1262_vm8, %v3873_v29  ;;  %v3633_v57 = vpop.f32.mrf.mxu1  ;;  %v7888_v29 = vld [vmem:[%s8630_s4 + $0x10] sm:$0xff] }
0x1b9d   : > { %3889 = vst.msk [vmem:[%s6474_s27 + $0x2d] sm:$0x1] %vm1262_vm8, %v3874_v19  ;;  %v7895_v19 = vld [vmem:[%s8630_s4 + $0x8] sm:$0xff]  ;;  %v7913_v57 = vld [vmem:[%s8635_s6 + $0x10] sm:$0xff] }
0x1b9e   : > { %3890 = vst.msk [vmem:[%s6474_s27 + $0x35] sm:$0x1] %vm1262_vm8, %v3875_v10  ;;  %v7901_v10 = vld [vmem:[%s8630_s4] sm:$0xff] }
0x1b9f   : > { %3891 = vst.msk [vmem:[%s6474_s27 + $0x3d] sm:$0x1] %vm1262_vm8, %v3876_v17  ;;  %3742 = vmatpush.bf16.msrb.mxu3 %v7554_v53  ;;  %v7907_v17 = vld [vmem:[%s8635_s6 + $0x18] sm:$0xff] }
0x1ba3   : > { %3743 = vmatpush.bf16.msrb.mxu3 %v7560_v54 }
0x1ba7   : > { %3744 = vmatpush.bf16.msrb.mxu3 %v7566_v41 }
0x1bab   : > { %3745 = vmatpush.bf16.msrb.mxu3 %v7572_v42 }
0x1bf7   : > { %v3660_v51 = vpop.xlane.xlu2 %3659 }
0x1bf8   : > { %v3661_v36 = vsub.f32 %v3654_v15, %v3660_v51 }
0x1bfa   : > { %v3662_v34 = vmul.f32 1.442695, %v3661_v36 }
0x1bfc   : > { %5711 = vpow2.f32 %v3662_v34 }
0x1c02   : > { %v5712_v9 = vpop.eup %5711 }
0x1c03   : > { %v3664_v22 = vsel %vm1053_vm9, %v5712_v9, 0.0 }
0x1c04   : > { %3665 = vadd.xlane.f32.xlu0 %v3664_v22  ;;  %v7925_v22 = vld [vmem:[%s8635_s6] sm:$0xff] }
0x1c77   : > { %v3666_v56 = vpop.xlane.xlu0 %3665 }
0x1c78   : > { %5713 = vrcp.f32 %v3666_v56 }
0x1c7e   : > { %v5714_v31 = vpop.eup %5713 }
0x1c7f   : > { %v3668_v8 = vmul.f32 %v5714_v31, %v5712_v9  ;;  %v7919_v9 = vld [vmem:[%s8635_s6 + $0x8] sm:$0xff] }
0x1c81   : > { %v3669_v6 = vpack.c.bf16 %v3668_v8, %v3668_v8 }
0x1c83   : > { %5531 = vmatmul.msk.bf16.vlgmr.msra.gmra.mxu3 %vm1053_vm9, %v3669_v6 }
0x1c84   : > { %4031 = vmatpush.bf16.msra.mxu3 %v7695_v52 }
0x1c88   : > { %4032 = vmatpush.bf16.msra.mxu3 %v7701_v24 }
0x1c8c   : > { %4033 = vmatpush.bf16.msra.mxu3 %v7707_v1 }
0x1c90   : > { %4034 = vmatpush.bf16.msra.mxu3 %v7713_v61 }
0x1c93   : > { %5535 = vmatmul.msk.bf16.vlgmr.msrb.gmra.mxu3 %vm849_vm7, %v3638_v58 }
0x1d06   : > { %v3685_v55 = vpop.f32.mrf.mxu3 }
0x1d07   : > { %v3689_v47 = vpack.c.bf16 %v3685_v55, %v3685_v55 }
0x1d09   : > { %5532 = vmatmul.msk.bf16.vlgmr.msra.gmra.mxu0 %vm849_vm7, %v3689_v47 }
0x1d0e   : > { %v3687_v48 = vpop.f32.mrf.mxu3 }
0x1d16   : > { %v3747_v11 = vpop.f32.mrf.mxu3 }
0x1d17   : > { %v3748_v63 = vadd.f32 %v7530_v50, %v3747_v11  ;;  %v3962_v11 = vld [vmem:[%s6287_s25 + $0xe] sm:$0x1] }
0x1d19   : > { %v3939_v0 = vrot.slane %v3748_v63, 1  ;;  %v3940_v12 = vrot.slane %v3748_v63, 2  ;;  %v3941_v49 = vrot.slane %v3748_v63, 3  ;;  %3953 = vst.msk [vmem:[%s6535_s20 + $0x5] sm:$0x1] %vm1262_vm8, %v3748_v63  ;;  %v3942_v46 = vrot.slane %v3748_v63, 4 }
0x1d1a   : > { %v3754_v27 = vpack.c.bf16 %v3748_v63, %v3748_v63  ;;  %v3943_v14 = vrot.slane %v3748_v63, 5  ;;  %v3944_v38 = vrot.slane %v3748_v63, 6  ;;  %v3945_v50 = vrot.slane %v3748_v63, 7  ;;  %v3970_v63 = vld [vmem:[%s6291_s26 + $0xe] sm:$0x1] }
0x1d1b   : > { %3954 = vst.msk [vmem:[%s6535_s20 + $0xd] sm:$0x1] %vm1262_vm8, %v3939_v0  ;;  %v3963_v0 = vld [vmem:[%s6287_s25 + $0x16] sm:$0x1] }
0x1d1c   : > { %3955 = vst.msk [vmem:[%s6535_s20 + $0x15] sm:$0x1] %vm1262_vm8, %v3940_v12  ;;  %v3791_v37 = vsel %vm1069_vm10, %v3754_v27, 0  ;;  %v3986_v12 = vpack.c.bf16 %v3962_v11, %v3962_v11  ;;  %v3964_v27 = vld [vmem:[%s6287_s25 + $0x1e] sm:$0x1] }
0x1d1d   : > { %3956 = vst.msk [vmem:[%s6535_s20 + $0x1d] sm:$0x1] %vm1262_vm8, %v3941_v49  ;;  %3800 = vmatpush.bf16.msrb.mxu1 %v3791_v37  ;;  %v3971_v49 = vld [vmem:[%s6291_s26 + $0x16] sm:$0x1]  ;;  %v4041_v37 = vpack.c.bf16 %v3970_v63, %v3970_v63 }
0x1d1e   : > { %3957 = vst.msk [vmem:[%s6535_s20 + $0x25] sm:$0x1] %vm1262_vm8, %v3942_v46  ;;  %v3749_v3 = vpop.f32.mrf.mxu3  ;;  %v3961_v46 = vld [vmem:[%s6287_s25 + $0x6] sm:$0x1] }
0x1d1f   : > { %3958 = vst.msk [vmem:[%s6535_s20 + $0x2d] sm:$0x1] %vm1262_vm8, %v3943_v14  ;;  %v3987_v14 = vpack.c.bf16 %v3963_v0, %v3963_v0  ;;  %v3965_v3 = vld [vmem:[%s6287_s25 + $0x26] sm:$0x1] }
0x1d20   : > { %3959 = vst.msk [vmem:[%s6535_s20 + $0x35] sm:$0x1] %vm1262_vm8, %v3944_v38  ;;  %v3969_v38 = vld [vmem:[%s6291_s26 + $0x6] sm:$0x1] }
0x1d21   : > { %3960 = vst.msk [vmem:[%s6535_s20 + $0x3d] sm:$0x1] %vm1262_vm8, %v3945_v50  ;;  %v4042_v50 = vpack.c.bf16 %v3971_v49, %v3971_v49 }
0x1d86   : > { %v3702_v4 = vpop.f32.mrf.mxu0 }
0x1d87   : > { %v3703_v21 = vadd.f32 %v7501_v25, %v3702_v4  ;;  %v3985_v4 = vpack.c.bf16 %v3961_v46, %v3961_v46 }
0x1d89   : > { %v3824_v60 = vrot.slane %v3703_v21, 1  ;;  %v3825_v62 = vrot.slane %v3703_v21, 2  ;;  %v3826_v7 = vrot.slane %v3703_v21, 3  ;;  %3838 = vst.msk [vmem:[%s6561_s13 + $0x5] sm:$0x1] %vm1262_vm8, %v3703_v21  ;;  %v3827_v39 = vrot.slane %v3703_v21, 4 }
0x1d8a   : > { %v3706_v13 = vpack.c.bf16 %v3703_v21, %v3703_v21  ;;  %v3828_v40 = vrot.slane %v3703_v21, 5  ;;  %v3829_v32 = vrot.slane %v3703_v21, 6  ;;  %v3830_v25 = vrot.slane %v3703_v21, 7 }
0x1d8b   : > { %3839 = vst.msk [vmem:[%s6561_s13 + $0xd] sm:$0x1] %vm1262_vm8, %v3824_v60  ;;  %v3988_v21 = vpack.c.bf16 %v3964_v27, %v3964_v27  ;;  %v4002_v60 = vunpack.c.l.b16 %v3986_v12  ;;  %v4057_v12 = vunpack.c.l.b16 %v4041_v37  ;;  %v4058_v27 = vunpack.c.l.b16 %v4042_v50 }
0x1d8c   : > { %3840 = vst.msk [vmem:[%s6561_s13 + $0x15] sm:$0x1] %vm1262_vm8, %v3825_v62  ;;  %5533 = vmatmul.msk.bf16.vlgmr.msra.gmra.mxu1 %vm849_vm7, %v3706_v13  ;;  %5534 = vmatmul.msk.bf16.vlgmr.msra.gmra.mxu2 %vm849_vm7, %v3706_v13  ;;  %v3972_v62 = vld [vmem:[%s6291_s26 + $0x1e] sm:$0x1]  ;;  %v3966_v13 = vld [vmem:[%s6287_s25 + $0x2e] sm:$0x1] }
0x1d8d   : > { %3841 = vst.msk [vmem:[%s6561_s13 + $0x1d] sm:$0x1] %vm1262_vm8, %v3826_v7  ;;  %4141 = vmatpush.bf16.msra.mxu1 %v7554_v53  ;;  %v3973_v7 = vld [vmem:[%s6291_s26 + $0x26] sm:$0x1] }
0x1d8e   : > { %3842 = vst.msk [vmem:[%s6561_s13 + $0x25] sm:$0x1] %vm1262_vm8, %v3827_v39  ;;  %v3704_v43 = vpop.f32.mrf.mxu0  ;;  %v4040_v39 = vpack.c.bf16 %v3969_v38, %v3969_v38 }
0x1d8f   : > { %3843 = vst.msk [vmem:[%s6561_s13 + $0x2d] sm:$0x1] %vm1262_vm8, %v3828_v40  ;;  %v3989_v40 = vpack.c.bf16 %v3965_v3, %v3965_v3  ;;  %v4043_v43 = vpack.c.bf16 %v3972_v62, %v3972_v62 }
0x1d90   : > { %3844 = vst.msk [vmem:[%s6561_s13 + $0x35] sm:$0x1] %vm1262_vm8, %v3829_v32  ;;  %v4003_v32 = vunpack.c.l.b16 %v3987_v14  ;;  %v4056_v0 = vunpack.c.l.b16 %v4040_v39 }
0x1d91   : > { %3845 = vst.msk [vmem:[%s6561_s13 + $0x3d] sm:$0x1] %vm1262_vm8, %v3830_v25  ;;  %4142 = vmatpush.bf16.msra.mxu1 %v7560_v54  ;;  %v3974_v25 = vld [vmem:[%s6291_s26 + $0x2e] sm:$0x1]  ;;  %v4059_v14 = vunpack.c.l.b16 %v4043_v43 }
0x1d95   : > { %4143 = vmatpush.bf16.msra.mxu1 %v7566_v41  ;;  %v7861_v41 = vld [vmem:[%s8632_s7] ss:$0 sm:$0xff] }
0x1d99   : > { %4144 = vmatpush.bf16.msra.mxu1 %v7572_v42 }
0x1e09   : > { %v3719_v33 = vpop.f32.mrf.mxu1 }
0x1e0a   : > { %v3720_v42 = vadd.f32 %v7861_v41, %v3719_v33  ;;  %v4044_v33 = vpack.c.bf16 %v3973_v7, %v3973_v7  ;;  %v4064_v7 = vrot.slane %v4057_v12, 7 }
0x1e0c   : > { %v3751_v34 = vmul.f32 0.125, %v3720_v42  ;;  %v3968_v42 = vld [vmem:[%s6287_s25 + $0x3e] sm:$0x1]  ;;  %v4060_v3 = vunpack.c.l.b16 %v4044_v33  ;;  %v4065_v37 = vsel %vm804_vm0, %v4064_v7, %v4056_v0  ;;  %v3983_v7 = vld [vmem:[%s6299_s30 + $0x36] sm:$0x1] }
0x1e0e   : > { %v3752_v28 = vpack.c.bf16 %v3751_v34, %v3751_v34 }
0x1e0f   : > { %v3732_v53 = vpop.f32.mrf.mxu2 }
0x1e10   : > { %v3733_v45 = vadd.f32 %v7853_v44, %v3732_v53  ;;  %v3967_v53 = vld [vmem:[%s6287_s25 + $0x36] sm:$0x1] }
0x1e11   : > { %v3721_v59 = vpop.f32.mrf.mxu1 }
0x1e12   : > { %v3916_v16 = vrot.slane %v3733_v45, 1  ;;  %v3917_v15 = vrot.slane %v3733_v45, 2  ;;  %v3918_v54 = vrot.slane %v3733_v45, 3  ;;  %3930 = vst.msk [vmem:[%s6587_s0 + $0x5] sm:$0x1] %vm1262_vm8, %v3733_v45  ;;  %v3919_v26 = vrot.slane %v3733_v45, 4 }
0x1e13   : > { %v3753_v30 = vpack.c.bf16 %v3733_v45, %v3733_v45  ;;  %v3920_v51 = vrot.slane %v3733_v45, 5  ;;  %v3921_v36 = vrot.slane %v3733_v45, 6  ;;  %v3922_v18 = vrot.slane %v3733_v45, 7 }
0x1e14   : > { %3931 = vst.msk [vmem:[%s6587_s0 + $0xd] sm:$0x1] %vm1262_vm8, %v3916_v16  ;;  %v3990_v45 = vpack.c.bf16 %v3966_v13, %v3966_v13  ;;  %v4001_v59 = vunpack.c.l.b16 %v3985_v4  ;;  %v4004_v16 = vunpack.c.l.b16 %v3988_v21  ;;  %v4066_v13 = vrot.slane %v4058_v27, 6  ;;  %v3978_v27 = vld [vmem:[%s6299_s30 + $0xe] sm:$0x1] }
0x1e15   : > { %3932 = vst.msk [vmem:[%s6587_s0 + $0x15] sm:$0x1] %vm1262_vm8, %v3917_v15  ;;  %v3759_v5 = vsel %vm849_vm7, %v3753_v30, 0  ;;  %v4009_v15 = vrot.slane %v4002_v60, 7  ;;  %v4005_v30 = vunpack.c.l.b16 %v3989_v40 }
0x1e16   : > { %3933 = vst.msk [vmem:[%s6587_s0 + $0x1d] sm:$0x1] %vm1262_vm8, %v3918_v54  ;;  %3768 = vmatpush.bf16.xpose.msrb.mxu0 %v3759_v5  ;;  %v3975_v54 = vld [vmem:[%s6291_s26 + $0x36] sm:$0x1]  ;;  %v4045_v5 = vpack.c.bf16 %v3974_v25, %v3974_v25  ;;  %v4006_v34 = vunpack.c.l.b16 %v3990_v45  ;;  %v4070_v25 = vrot.slane %v4060_v3, 4  ;;  %v4067_v50 = vsel %vm807_vm1, %v4066_v13, %v4065_v37 }
0x1e17   : > { %3934 = vst.msk [vmem:[%s6587_s0 + $0x25] sm:$0x1] %vm1262_vm8, %v3919_v26  ;;  %v3734_v2 = vpop.f32.mrf.mxu2  ;;  %v3991_v26 = vpack.c.bf16 %v3967_v53, %v3967_v53  ;;  %v3981_v3 = vld [vmem:[%s6299_s30 + $0x26] sm:$0x1]  ;;  %v3984_v13 = vld [vmem:[%s6299_s30 + $0x3e] sm:$0x1]  ;;  %v4101_v37 = vpack.c.bf16 %v3983_v7, %v3983_v7 }
0x1e18   : > { %3935 = vst.msk [vmem:[%s6587_s0 + $0x2d] sm:$0x1] %vm1262_vm8, %v3920_v51  ;;  %v4011_v51 = vrot.slane %v4003_v32, 6  ;;  %v4010_v2 = vsel %vm804_vm0, %v4009_v15, %v4001_v59  ;;  %v4061_v4 = vunpack.c.l.b16 %v4045_v5  ;;  %v4068_v32 = vrot.slane %v4059_v14, 5  ;;  %v3979_v14 = vld [vmem:[%s6299_s30 + $0x16] sm:$0x1] }
0x1e19   : > { %3936 = vst.msk [vmem:[%s6587_s0 + $0x35] sm:$0x1] %vm1262_vm8, %v3921_v36  ;;  %v3976_v36 = vld [vmem:[%s6291_s26 + $0x3e] sm:$0x1] }
0x1e1a   : > { %3937 = vst.msk [vmem:[%s6587_s0 + $0x3d] sm:$0x1] %vm1262_vm8, %v3922_v18  ;;  %v3992_v18 = vpack.c.bf16 %v3968_v42, %v3968_v42  ;;  %v4072_v39 = vrot.slane %v4061_v4, 3  ;;  %v4069_v33 = vsel %vm810_vm2, %v4068_v32, %v4067_v50  ;;  %v3982_v4 = vld [vmem:[%s6299_s30 + $0x2e] sm:$0x1]  ;;  %v4099_v32 = vpack.c.bf16 %v3981_v3, %v3981_v3 }
0x1e1b   : > { %v4071_v45 = vsel %vm813_vm3, %v4070_v25, %v4069_v33  ;;  %v4100_v25 = vpack.c.bf16 %v3982_v4, %v3982_v4 }
0x1e1c   : > { %v4073_v59 = vsel %vm816_vm4, %v4072_v39, %v4071_v45  ;;  %v4102_v39 = vpack.c.bf16 %v3984_v13, %v3984_v13  ;;  %v4115_v45 = vunpack.c.l.b16 %v4099_v32 }
0x1e1d   : > { %5536 = vmatmul.msk.bf16.vlgmr.msrb.gmra.mxu0 %vm849_vm7, %v3752_v28  ;;  %v4013_v28 = vrot.slane %v4004_v16, 5 }
0x1e1e   : > { %4086 = vmatpush.bf16.msra.mxu0 %v7876_v35 }
0x1e22   : > { %4087 = vmatpush.bf16.msra.mxu0 %v7888_v29 }
0x1e26   : > { %4088 = vmatpush.bf16.msra.mxu0 %v7895_v19 }
0x1e2a   : > { %4089 = vmatpush.bf16.msra.mxu0 %v7901_v10 }
0x1e2e   : > { %4212 = vmatpush.bf16.msrb.mxu0 %v7907_v17 }
0x1e32   : > { %4213 = vmatpush.bf16.msrb.mxu0 %v7913_v57 }
0x1e36   : > { %4214 = vmatpush.bf16.msrb.mxu0 %v7919_v9 }
0x1e3a   : > { %4215 = vmatpush.bf16.msrb.mxu0 %v7925_v22 }
0x1e9a   : > { %v3770_v58 = vpop.f32.mrf.mxu0 }
0x1e9b   : > { %v3774_v23 = vsel %vm6616_vm11, %v3770_v58, -1e+30  ;;  %v4007_v58 = vunpack.c.l.b16 %v3991_v26 }
0x1e9c   : > { %v3775_v56 = vsel %vm1053_vm9, %v3774_v23, -inf }
0x1e9d   : > { %3776 = vmax.xlane.f32.xlu1 %v3775_v56  ;;  %v4015_v56 = vrot.slane %v4005_v30, 4  ;;  %v4019_v63 = vrot.slane %v4007_v58, 2 }
0x1ea2   : > { %v3772_v31 = vpop.f32.mrf.mxu0 }
0x1ea3   : > { %v4046_v31 = vpack.c.bf16 %v3975_v54, %v3975_v54 }
0x1ea5   : > { %v4062_v21 = vunpack.c.l.b16 %v4046_v31 }
0x1ea7   : > { %v4074_v43 = vrot.slane %v4062_v21, 2 }
0x1ea9   : > { %v4075_v16 = vsel %vm819_vm5, %v4074_v43, %v4073_v59  ;;  %v4116_v59 = vunpack.c.l.b16 %v4100_v25 }
0x1f10   : > { %v3777_v8 = vpop.xlane.xlu1 %3776 }
0x1f11   : > { %v3778_v6 = vsub.f32 %v3774_v23, %v3777_v8  ;;  %v4012_v23 = vsel %vm807_vm1, %v4011_v51, %v4010_v2  ;;  %v4008_v8 = vunpack.c.l.b16 %v3992_v18 }
0x1f13   : > { %v3779_v55 = vmul.f32 1.442695, %v3778_v6  ;;  %v4014_v6 = vsel %vm810_vm2, %v4013_v28, %v4012_v23  ;;  %v4021_v46 = vrot.slane %v4008_v8, 1 }
0x1f14   : > { %v4016_v11 = vsel %vm813_vm3, %v4015_v56, %v4014_v6 }
0x1f15   : > { %5715 = vpow2.f32 %v3779_v55  ;;  %v4017_v55 = vrot.slane %v4006_v34, 3 }
0x1f17   : > { %v4018_v49 = vsel %vm816_vm4, %v4017_v55, %v4016_v11 }
0x1f18   : > { %v4020_v38 = vsel %vm819_vm5, %v4019_v63, %v4018_v49 }
0x1f19   : > { %v4022_v60 = vsel %vm822_vm6, %v4021_v46, %v4020_v38  ;;  %v3977_v46 = vld [vmem:[%s6299_s30 + $0x6] sm:$0x1]  ;;  %v3980_v38 = vld [vmem:[%s6299_s30 + $0x1e] sm:$0x1] }
0x1f1a   : > { %v4023_v40 = vpack.c.b16 %v4022_v60, %v4022_v60  ;;  %v4095_v21 = vpack.c.bf16 %v3977_v46, %v3977_v46  ;;  %v4096_v60 = vpack.c.bf16 %v3978_v27, %v3978_v27 }
0x1f1b   : > { %v7931_v47 = vpop.eup %5715 }
0x1f1c   : > { %v3781_v48 = vsel %vm1053_vm9, %v7931_v47, 0.0  ;;  %5539 = vmatmul.msk.bf16.vlgmr.msra.gmra.mxu3 %vm849_vm7, %v4023_v40  ;;  %v4098_v40 = vpack.c.bf16 %v3980_v38, %v3980_v38  ;;  %v4111_v50 = vunpack.c.l.b16 %v4095_v21  ;;  %v4112_v43 = vunpack.c.l.b16 %v4096_v60  ;;  %v8044_v60 = vld [vmem:[%s8634_s9] ss:$0 sm:$0xff] }
0x1f1d   : > { %3782 = vadd.xlane.f32.xlu2 %v3781_v48  ;;  %v4047_v48 = vpack.c.bf16 %v3976_v36, %v3976_v36 }
0x1f1f   : > { %v4063_v62 = vunpack.c.l.b16 %v4047_v48 }
0x1f21   : > { %v4076_v53 = vrot.slane %v4063_v62, 1  ;;  %v4097_v62 = vpack.c.bf16 %v3979_v14, %v3979_v14 }
0x1f23   : > { %v4077_v15 = vsel %vm822_vm6, %v4076_v53, %v4075_v16  ;;  %v4113_v33 = vunpack.c.l.b16 %v4097_v62  ;;  %v4114_v53 = vunpack.c.l.b16 %v4098_v40  ;;  %v4117_v16 = vunpack.c.l.b16 %v4101_v37 }
0x1f24   : > { %v4078_v54 = vpack.c.b16 %v4077_v15, %v4077_v15  ;;  %v4119_v15 = vrot.slane %v4112_v43, 7 }
0x1f26   : > { %5540 = vmatmul.msk.bf16.vlgmr.msra.gmra.mxu0 %vm849_vm7, %v4078_v54  ;;  %v4118_v54 = vunpack.c.l.b16 %v4102_v39 }
0x1f90   : > { %v3783_v42 = vpop.xlane.xlu2 %3782 }
0x1f91   : > { %5717 = vrcp.f32 %v3783_v42  ;;  %v4121_v42 = vrot.slane %v4113_v33, 6 }
0x1f97   : > { %v5718_v26 = vpop.eup %5717 }
0x1f98   : > { %v3785_v30 = vmul.f32 %v5718_v26, %v7931_v47  ;;  %v4123_v26 = vrot.slane %v4114_v53, 5 }
0x1f9a   : > { %v3786_v51 = vpack.c.bf16 %v3785_v30, %v3785_v30  ;;  %v4125_v30 = vrot.slane %v4115_v45, 4 }
0x1f9c   : > { %5537 = vmatmul.msk.bf16.vlgmr.msrb.gmra.mxu1 %vm1053_vm9, %v3786_v51  ;;  %v4120_v51 = vsel %vm804_vm0, %v4119_v15, %v4111_v50  ;;  %v8074_v15 = vld [vmem:[%s8633_s5 + $0x10] sm:$0xff] }
0x1f9d   : > { %4229 = vmatpush.bf16.msrb.mxu1 %v7695_v52 }
0x1f9f   : > { %v4036_v36 = vpop.f32.mrf.mxu3 }
0x1fa0   : > { %v4037_v63 = vadd.f32 %v7861_v41, %v4036_v36 }
0x1fa1   : > { %4230 = vmatpush.bf16.msrb.mxu1 %v7701_v24 }
0x1fa2   : > { %v4150_v12 = vmul.f32 0.125, %v4037_v63 }
0x1fa3   : > { %v4091_v5 = vpop.f32.mrf.mxu0 }
0x1fa4   : > { %v4092_v18 = vadd.f32 %v7853_v44, %v4091_v5  ;;  %v4151_v49 = vpack.c.bf16 %v4150_v12, %v4150_v12  ;;  %v4122_v5 = vsel %vm807_vm1, %v4121_v42, %v4120_v51  ;;  %v8086_v42 = vld [vmem:[%s8633_s5] sm:$0xff] }
0x1fa5   : > { %4231 = vmatpush.bf16.msrb.mxu1 %v7707_v1 }
0x1fa6   : > { %v4362_v47 = vrot.slane %v4092_v18, 1  ;;  %v4363_v34 = vrot.slane %v4092_v18, 2  ;;  %v4364_v2 = vrot.slane %v4092_v18, 3  ;;  %4376 = vst.msk [vmem:[%s6402_s17 + $0x6] sm:$0x1] %vm1262_vm8, %v4092_v18  ;;  %v4365_v28 = vrot.slane %v4092_v18, 4 }
0x1fa7   : > { %v4366_v58 = vrot.slane %v4092_v18, 5  ;;  %v4152_v23 = vpack.c.bf16 %v4092_v18, %v4092_v18  ;;  %v4367_v56 = vrot.slane %v4092_v18, 6  ;;  %v4038_v31 = vpop.f32.mrf.mxu3  ;;  %v4368_v8 = vrot.slane %v4092_v18, 7 }
0x1fa8   : > { %4377 = vst.msk [vmem:[%s6402_s17 + $0xe] sm:$0x1] %vm1262_vm8, %v4362_v47  ;;  %v4127_v18 = vrot.slane %v4116_v59, 3  ;;  %v8015_v47 = vld [vmem:[%s8636_s19] ss:$0 sm:$0xff] }
0x1fa9   : > { %4232 = vmatpush.bf16.msrb.mxu1 %v7713_v61  ;;  %4378 = vst.msk [vmem:[%s6402_s17 + $0x16] sm:$0x1] %vm1262_vm8, %v4363_v34  ;;  %v4158_v6 = vsel %vm849_vm7, %v4152_v23, 0  ;;  %v4131_v23 = vrot.slane %v4118_v54, 1  ;;  %v8080_v54 = vld [vmem:[%s8633_s5 + $0x8] sm:$0xff] }
0x1faa   : > { %4379 = vst.msk [vmem:[%s6402_s17 + $0x1e] sm:$0x1] %vm1262_vm8, %v4364_v2  ;;  %4167 = vmatpush.bf16.xpose.msra.mxu2 %v4158_v6  ;;  %v4124_v2 = vsel %vm810_vm2, %v4123_v26, %v4122_v5 }
0x1fab   : > { %4380 = vst.msk [vmem:[%s6402_s17 + $0x26] sm:$0x1] %vm1262_vm8, %v4365_v28  ;;  %v4093_v55 = vpop.f32.mrf.mxu0  ;;  %v4129_v28 = vrot.slane %v4117_v16, 2  ;;  %v8068_v16 = vld [vmem:[%s8633_s5 + $0x18] sm:$0xff] }
0x1fac   : > { %4381 = vst.msk [vmem:[%s6402_s17 + $0x2e] sm:$0x1] %vm1262_vm8, %v4366_v58  ;;  %v4126_v58 = vsel %vm813_vm3, %v4125_v30, %v4124_v2 }
0x1fad   : > { %4382 = vst.msk [vmem:[%s6402_s17 + $0x36] sm:$0x1] %vm1262_vm8, %v4367_v56  ;;  %v4128_v55 = vsel %vm816_vm4, %v4127_v18, %v4126_v58 }
0x1fae   : > { %4383 = vst.msk [vmem:[%s6402_s17 + $0x3e] sm:$0x1] %vm1262_vm8, %v4368_v8 }
0x2019   : > { %v3802_v48 = vpop.f32.mrf.mxu1 }
0x201a   : > { %v3806_v11 = vpack.c.bf16 %v3802_v48, %v3802_v48 }
0x201c   : > { %5538 = vmatmul.msk.bf16.vlgmr.msrb.gmra.mxu2 %vm849_vm7, %v3806_v11  ;;  %v4130_v11 = vsel %vm819_vm5, %v4129_v28, %v4128_v55 }
0x201d   : > { %4242 = vmatpush.bf16.msrb.mxu2 %v7876_v35 }
0x2021   : > { %v3804_v0 = vpop.f32.mrf.mxu1  ;;  %4243 = vmatpush.bf16.msrb.mxu2 %v7888_v29 }
0x2022   : > { %v4132_v0 = vsel %vm822_vm6, %v4131_v23, %v4130_v11 }
0x2025   : > { %4244 = vmatpush.bf16.msrb.mxu2 %v7895_v19 }
0x2029   : > { %4245 = vmatpush.bf16.msrb.mxu2 %v7901_v10 }
0x202c   : > { %5542 = vmatmul.msk.bf16.vlgmr.msra.gmra.mxu2 %vm849_vm7, %v4151_v49  ;;  %v4133_v49 = vpack.c.b16 %v4132_v0, %v4132_v0 }
0x202d   : > { %4329 = vmatpush.bf16.msra.mxu2 %v7907_v17 }
0x202e   : > { %5541 = vmatmul.msk.bf16.vlgmr.msra.gmra.mxu1 %vm849_vm7, %v4133_v49 }
0x2031   : > { %4330 = vmatpush.bf16.msra.mxu2 %v7913_v57 }
0x2035   : > { %4331 = vmatpush.bf16.msra.mxu2 %v7919_v9 }
0x2039   : > { %4332 = vmatpush.bf16.msra.mxu2 %v7925_v22 }
0x209f   : > { %v3819_v36 = vpop.f32.mrf.mxu2 }
0x20a0   : > { %v3820_v34 = vadd.f32 %v8015_v47, %v3819_v36 }
0x20a2   : > { %v3893_v56 = vrot.slane %v3820_v34, 1  ;;  %v3894_v31 = vrot.slane %v3820_v34, 2  ;;  %v3895_v8 = vrot.slane %v3820_v34, 3  ;;  %3907 = vst.msk [vmem:[%s6708_s15 + $0x5] sm:$0x1] %vm1262_vm8, %v3820_v34  ;;  %v3896_v6 = vrot.slane %v3820_v34, 4 }
0x20a3   : > { %v3897_v48 = vrot.slane %v3820_v34, 5  ;;  %v3898_v63 = vrot.slane %v3820_v34, 6  ;;  %v3899_v12 = vrot.slane %v3820_v34, 7 }
0x20a4   : > { %3908 = vst.msk [vmem:[%s6708_s15 + $0xd] sm:$0x1] %vm1262_vm8, %v3893_v56 }
0x20a5   : > { %3909 = vst.msk [vmem:[%s6708_s15 + $0x15] sm:$0x1] %vm1262_vm8, %v3894_v31 }
0x20a6   : > { %3910 = vst.msk [vmem:[%s6708_s15 + $0x1d] sm:$0x1] %vm1262_vm8, %v3895_v8 }
0x20a7   : > { %3911 = vst.msk [vmem:[%s6708_s15 + $0x25] sm:$0x1] %vm1262_vm8, %v3896_v6  ;;  %v3821_v46 = vpop.f32.mrf.mxu2 }
0x20a8   : > { %3912 = vst.msk [vmem:[%s6708_s15 + $0x2d] sm:$0x1] %vm1262_vm8, %v3897_v48 }
0x20a9   : > { %3913 = vst.msk [vmem:[%s6708_s15 + $0x35] sm:$0x1] %vm1262_vm8, %v3898_v63 }
0x20aa   : > { %3914 = vst.msk [vmem:[%s6708_s15 + $0x3d] sm:$0x1] %vm1262_vm8, %v3899_v12 }
0x20ab   : > { %v4146_v21 = vpop.f32.mrf.mxu1 }
0x20ac   : > { %v4147_v62 = vadd.f32 %v8044_v60, %v4146_v21 }
0x20ae   : > { %v4385_v13 = vrot.slane %v4147_v62, 1  ;;  %v4386_v40 = vrot.slane %v4147_v62, 2  ;;  %v4387_v32 = vrot.slane %v4147_v62, 3  ;;  %4399 = vst.msk [vmem:[%s6474_s27 + $0x6] sm:$0x1] %vm1262_vm8, %v4147_v62  ;;  %v4388_v25 = vrot.slane %v4147_v62, 4 }
0x20af   : > { %v4169_v27 = vpop.f32.mrf.mxu2  ;;  %v4389_v37 = vrot.slane %v4147_v62, 5  ;;  %v4390_v39 = vrot.slane %v4147_v62, 6  ;;  %v4391_v50 = vrot.slane %v4147_v62, 7  ;;  %v4153_v45 = vpack.c.bf16 %v4147_v62, %v4147_v62 }
0x20b0   : > { %v4173_v14 = vsel %vm1053_vm9, %v4169_v27, -inf  ;;  %4400 = vst.msk [vmem:[%s6474_s27 + $0xe] sm:$0x1] %vm1262_vm8, %v4385_v13 }
0x20b1   : > { %4174 = vmax.xlane.f32.xlu0 %v4173_v14  ;;  %4401 = vst.msk [vmem:[%s6474_s27 + $0x16] sm:$0x1] %vm1262_vm8, %v4386_v40  ;;  %v4189_v59 = vsel %vm1069_vm10, %v4153_v45, 0 }
0x20b2   : > { %4402 = vst.msk [vmem:[%s6474_s27 + $0x1e] sm:$0x1] %vm1262_vm8, %v4387_v32  ;;  %4198 = vmatpush.bf16.msrb.mxu3 %v4189_v59 }
0x20b3   : > { %4403 = vst.msk [vmem:[%s6474_s27 + $0x26] sm:$0x1] %vm1262_vm8, %v4388_v25  ;;  %v4148_v43 = vpop.f32.mrf.mxu1 }
0x20b4   : > { %4404 = vst.msk [vmem:[%s6474_s27 + $0x2e] sm:$0x1] %vm1262_vm8, %v4389_v37 }
0x20b5   : > { %4405 = vst.msk [vmem:[%s6474_s27 + $0x36] sm:$0x1] %vm1262_vm8, %v4390_v39 }
0x20b6   : > { %4406 = vst.msk [vmem:[%s6474_s27 + $0x3e] sm:$0x1] %vm1262_vm8, %v4391_v50  ;;  %4257 = vmatpush.bf16.msra.mxu3 %v8068_v16 }
0x20b7   : > { %v4171_v38 = vpop.f32.mrf.mxu2 }
0x20ba   : > { %4258 = vmatpush.bf16.msra.mxu3 %v8074_v15 }
0x20be   : > { %4259 = vmatpush.bf16.msra.mxu3 %v8080_v54 }
0x20c2   : > { %4260 = vmatpush.bf16.msra.mxu3 %v8086_v42 }
0x2124   : > { %v4175_v3 = vpop.xlane.xlu0 %4174 }
0x2125   : > { %v4176_v4 = vsub.f32 %v4169_v27, %v4175_v3 }
0x2127   : > { %v4177_v7 = vmul.f32 1.442695, %v4176_v4 }
0x2129   : > { %5719 = vpow2.f32 %v4177_v7 }
0x212f   : > { %v5720_v33 = vpop.eup %5719 }
0x2130   : > { %v4179_v53 = vsel %vm1053_vm9, %v5720_v33, 0.0 }
0x2131   : > { %4180 = vadd.xlane.f32.xlu1 %v4179_v53 }
0x21a4   : > { %v4181_v26 = vpop.xlane.xlu1 %4180 }
0x21a5   : > { %5721 = vrcp.f32 %v4181_v26 }
0x21ab   : > { %v5722_v30 = vpop.eup %5721 }
0x21ac   : > { %v4183_v51 = vmul.f32 %v5722_v30, %v5720_v33 }
0x21ae   : > { %v4184_v36 = vpack.c.bf16 %v4183_v51, %v4183_v51 }
0x21b0   : > { %5543 = vmatmul.msk.bf16.vlgmr.msrb.gmra.mxu3 %vm1053_vm9, %v4184_v36 }
0x21b1   : > { %4546 = vmatpush.bf16.msrb.mxu3 %v7695_v52 }
0x21b5   : > { %4547 = vmatpush.bf16.msrb.mxu3 %v7701_v24 }
0x21b9   : > { %4548 = vmatpush.bf16.msrb.mxu3 %v7707_v1 }
0x21bd   : > { %4549 = vmatpush.bf16.msrb.mxu3 %v7713_v61 }
0x21c0   : > { %5547 = vmatmul.msk.bf16.vlgmr.msra.gmra.mxu3 %vm849_vm7, %v4153_v45 }
0x2233   : > { %v4200_v5 = vpop.f32.mrf.mxu3 }
0x2234   : > { %v4204_v18 = vpack.c.bf16 %v4200_v5, %v4200_v5 }
0x2236   : > { %5544 = vmatmul.msk.bf16.vlgmr.msrb.gmra.mxu0 %vm849_vm7, %v4204_v18 }
0x223b   : > { %v4202_v34 = vpop.f32.mrf.mxu3 }
0x2243   : > { %v4262_v2 = vpop.f32.mrf.mxu3 }
0x2244   : > { %v4263_v52 = vadd.f32 %v8044_v60, %v4262_v2 }
0x2246   : > { %v4454_v28 = vrot.slane %v4263_v52, 1  ;;  %v4455_v24 = vrot.slane %v4263_v52, 2  ;;  %v4456_v1 = vrot.slane %v4263_v52, 3  ;;  %4468 = vst.msk [vmem:[%s6535_s20 + $0x6] sm:$0x1] %vm1262_vm8, %v4263_v52  ;;  %v4457_v61 = vrot.slane %v4263_v52, 4 }
0x2247   : > { %v4269_v58 = vpack.c.bf16 %v4263_v52, %v4263_v52  ;;  %v4458_v23 = vrot.slane %v4263_v52, 5  ;;  %v4459_v56 = vrot.slane %v4263_v52, 6  ;;  %v4460_v8 = vrot.slane %v4263_v52, 7 }
0x2248   : > { %4469 = vst.msk [vmem:[%s6535_s20 + $0xe] sm:$0x1] %vm1262_vm8, %v4454_v28  ;;  %v4477_v28 = vld [vmem:[%s6287_s25 + $0xf] sm:$0x1] }
0x2249   : > { %4470 = vst.msk [vmem:[%s6535_s20 + $0x16] sm:$0x1] %vm1262_vm8, %v4455_v24  ;;  %v4306_v31 = vsel %vm1069_vm10, %v4269_v58, 0  ;;  %v4485_v24 = vld [vmem:[%s6291_s26 + $0xf] sm:$0x1] }
0x224a   : > { %4471 = vst.msk [vmem:[%s6535_s20 + $0x1e] sm:$0x1] %vm1262_vm8, %v4456_v1  ;;  %4315 = vmatpush.bf16.msra.mxu1 %v4306_v31  ;;  %v4478_v1 = vld [vmem:[%s6287_s25 + $0x17] sm:$0x1] }
0x224b   : > { %4472 = vst.msk [vmem:[%s6535_s20 + $0x26] sm:$0x1] %vm1262_vm8, %v4457_v61  ;;  %v4264_v6 = vpop.f32.mrf.mxu3  ;;  %v4501_v61 = vpack.c.bf16 %v4477_v28, %v4477_v28  ;;  %v4486_v58 = vld [vmem:[%s6291_s26 + $0x17] sm:$0x1]  ;;  %v4502_v31 = vpack.c.bf16 %v4478_v1, %v4478_v1 }
0x224c   : > { %4473 = vst.msk [vmem:[%s6535_s20 + $0x2e] sm:$0x1] %vm1262_vm8, %v4458_v23  ;;  %v4476_v23 = vld [vmem:[%s6287_s25 + $0x7] sm:$0x1]  ;;  %v4556_v6 = vpack.c.bf16 %v4485_v24, %v4485_v24 }
0x224d   : > { %4474 = vst.msk [vmem:[%s6535_s20 + $0x36] sm:$0x1] %vm1262_vm8, %v4459_v56  ;;  %v4479_v56 = vld [vmem:[%s6287_s25 + $0x1f] sm:$0x1] }
0x224e   : > { %4475 = vst.msk [vmem:[%s6535_s20 + $0x3e] sm:$0x1] %vm1262_vm8, %v4460_v8  ;;  %v4484_v8 = vld [vmem:[%s6291_s26 + $0x7] sm:$0x1] }
0x22b3   : > { %v4217_v55 = vpop.f32.mrf.mxu0 }
0x22b4   : > { %v4218_v48 = vadd.f32 %v8015_v47, %v4217_v55  ;;  %v4557_v55 = vpack.c.bf16 %v4486_v58, %v4486_v58 }
0x22b6   : > { %v4339_v11 = vrot.slane %v4218_v48, 1  ;;  %v4340_v63 = vrot.slane %v4218_v48, 2  ;;  %v4341_v0 = vrot.slane %v4218_v48, 3  ;;  %4353 = vst.msk [vmem:[%s6561_s13 + $0x6] sm:$0x1] %vm1262_vm8, %v4218_v48  ;;  %v4342_v12 = vrot.slane %v4218_v48, 4 }
0x22b7   : > { %v4221_v49 = vpack.c.bf16 %v4218_v48, %v4218_v48  ;;  %v4343_v46 = vrot.slane %v4218_v48, 5  ;;  %v4344_v27 = vrot.slane %v4218_v48, 6  ;;  %v4345_v14 = vrot.slane %v4218_v48, 7  ;;  %v4480_v48 = vld [vmem:[%s6287_s25 + $0x27] sm:$0x1] }
0x22b8   : > { %4354 = vst.msk [vmem:[%s6561_s13 + $0xe] sm:$0x1] %vm1262_vm8, %v4339_v11  ;;  %v4500_v11 = vpack.c.bf16 %v4476_v23, %v4476_v23  ;;  %v4572_v23 = vunpack.c.l.b16 %v4556_v6 }
0x22b9   : > { %4355 = vst.msk [vmem:[%s6561_s13 + $0x16] sm:$0x1] %vm1262_vm8, %v4340_v63  ;;  %5545 = vmatmul.msk.bf16.vlgmr.msrb.gmra.mxu1 %vm849_vm7, %v4221_v49  ;;  %5546 = vmatmul.msk.bf16.vlgmr.msrb.gmra.mxu2 %vm849_vm7, %v4221_v49  ;;  %v4503_v63 = vpack.c.bf16 %v4479_v56, %v4479_v56  ;;  %v4488_v49 = vld [vmem:[%s6291_s26 + $0x27] sm:$0x1] }
0x22ba   : > { %4356 = vst.msk [vmem:[%s6561_s13 + $0x1e] sm:$0x1] %vm1262_vm8, %v4341_v0  ;;  %4656 = vmatpush.bf16.msrb.mxu1 %v8068_v16  ;;  %v4517_v0 = vunpack.c.l.b16 %v4501_v61 }
0x22bb   : > { %4357 = vst.msk [vmem:[%s6561_s13 + $0x26] sm:$0x1] %vm1262_vm8, %v4342_v12  ;;  %v4219_v38 = vpop.f32.mrf.mxu0  ;;  %v4487_v12 = vld [vmem:[%s6291_s26 + $0x1f] sm:$0x1] }
0x22bc   : > { %4358 = vst.msk [vmem:[%s6561_s13 + $0x2e] sm:$0x1] %vm1262_vm8, %v4343_v46  ;;  %v4555_v46 = vpack.c.bf16 %v4484_v8, %v4484_v8  ;;  %v4518_v38 = vunpack.c.l.b16 %v4502_v31  ;;  %v4573_v8 = vunpack.c.l.b16 %v4557_v55 }
0x22bd   : > { %4359 = vst.msk [vmem:[%s6561_s13 + $0x36] sm:$0x1] %vm1262_vm8, %v4344_v27  ;;  %v4481_v27 = vld [vmem:[%s6287_s25 + $0x2f] sm:$0x1] }
0x22be   : > { %4360 = vst.msk [vmem:[%s6561_s13 + $0x3e] sm:$0x1] %vm1262_vm8, %v4345_v14  ;;  %4657 = vmatpush.bf16.msrb.mxu1 %v8074_v15  ;;  %v4504_v14 = vpack.c.bf16 %v4480_v48, %v4480_v48  ;;  %v4571_v58 = vunpack.c.l.b16 %v4555_v46 }
0x22c2   : > { %4658 = vmatpush.bf16.msrb.mxu1 %v8080_v54 }
0x22c6   : > { %4659 = vmatpush.bf16.msrb.mxu1 %v8086_v42 }
0x2336   : > { %v4234_v3 = vpop.f32.mrf.mxu1 }
0x2337   : > { %v4235_v32 = vadd.f32 %v7861_v41, %v4234_v3  ;;  %v4489_v3 = vld [vmem:[%s6291_s26 + $0x2f] sm:$0x1] }
0x2339   : > { %v4266_v53 = vmul.f32 0.125, %v4235_v32  ;;  %v4524_v32 = vrot.slane %v4517_v0, 7 }
0x233b   : > { %v4267_v59 = vpack.c.bf16 %v4266_v53, %v4266_v53  ;;  %v4560_v53 = vpack.c.bf16 %v4489_v3, %v4489_v3 }
0x233c   : > { %v4247_v4 = vpop.f32.mrf.mxu2 }
0x233d   : > { %v4248_v21 = vadd.f32 %v7853_v44, %v4247_v4  ;;  %v4558_v4 = vpack.c.bf16 %v4487_v12, %v4487_v12  ;;  %v4576_v0 = vunpack.c.l.b16 %v4560_v53 }
0x233e   : > { %v4236_v62 = vpop.f32.mrf.mxu1 }
0x233f   : > { %v4431_v7 = vrot.slane %v4248_v21, 1  ;;  %v4432_v13 = vrot.slane %v4248_v21, 2  ;;  %v4433_v40 = vrot.slane %v4248_v21, 3  ;;  %4445 = vst.msk [vmem:[%s6587_s0 + $0x6] sm:$0x1] %vm1262_vm8, %v4248_v21  ;;  %v4434_v25 = vrot.slane %v4248_v21, 4 }
0x2340   : > { %v4268_v37 = vpack.c.bf16 %v4248_v21, %v4248_v21  ;;  %v4435_v39 = vrot.slane %v4248_v21, 5  ;;  %v4436_v50 = vrot.slane %v4248_v21, 6  ;;  %v4437_v33 = vrot.slane %v4248_v21, 7  ;;  %v4482_v62 = vld [vmem:[%s6287_s25 + $0x37] sm:$0x1] }
0x2341   : > { %4446 = vst.msk [vmem:[%s6587_s0 + $0xe] sm:$0x1] %vm1262_vm8, %v4431_v7  ;;  %v4559_v21 = vpack.c.bf16 %v4488_v49, %v4488_v49  ;;  %v4505_v7 = vpack.c.bf16 %v4481_v27, %v4481_v27  ;;  %v4574_v48 = vunpack.c.l.b16 %v4558_v4  ;;  %v4587_v46 = vrot.slane %v4576_v0, 3  ;;  %v4495_v0 = vld [vmem:[%s6299_s30 + $0x1f] sm:$0x1] }
0x2342   : > { %4447 = vst.msk [vmem:[%s6587_s0 + $0x16] sm:$0x1] %vm1262_vm8, %v4432_v13  ;;  %v4274_v43 = vsel %vm849_vm7, %v4268_v37, 0  ;;  %v4516_v13 = vunpack.c.l.b16 %v4500_v11  ;;  %v4483_v37 = vld [vmem:[%s6287_s25 + $0x3f] sm:$0x1] }
0x2343   : > { %4448 = vst.msk [vmem:[%s6587_s0 + $0x1e] sm:$0x1] %vm1262_vm8, %v4433_v40  ;;  %4283 = vmatpush.bf16.xpose.msra.mxu0 %v4274_v43  ;;  %v4519_v40 = vunpack.c.l.b16 %v4503_v63  ;;  %v4526_v43 = vrot.slane %v4518_v38, 6  ;;  %v4575_v63 = vunpack.c.l.b16 %v4559_v21  ;;  %v4581_v38 = vrot.slane %v4573_v8, 6 }
0x2344   : > { %4449 = vst.msk [vmem:[%s6587_s0 + $0x26] sm:$0x1] %vm1262_vm8, %v4434_v25  ;;  %v4249_v45 = vpop.f32.mrf.mxu2  ;;  %v4490_v25 = vld [vmem:[%s6291_s26 + $0x37] sm:$0x1] }
0x2345   : > { %4450 = vst.msk [vmem:[%s6587_s0 + $0x2e] sm:$0x1] %vm1262_vm8, %v4435_v39  ;;  %v4506_v39 = vpack.c.bf16 %v4482_v62, %v4482_v62  ;;  %v4507_v45 = vpack.c.bf16 %v4483_v37, %v4483_v37  ;;  %v4583_v62 = vrot.slane %v4574_v48, 5 }
0x2346   : > { %4451 = vst.msk [vmem:[%s6587_s0 + $0x36] sm:$0x1] %vm1262_vm8, %v4436_v50  ;;  %v4520_v50 = vunpack.c.l.b16 %v4504_v14  ;;  %v4579_v14 = vrot.slane %v4572_v23, 7 }
0x2347   : > { %4452 = vst.msk [vmem:[%s6587_s0 + $0x3e] sm:$0x1] %vm1262_vm8, %v4437_v33  ;;  %v4491_v33 = vld [vmem:[%s6291_s26 + $0x3f] sm:$0x1]  ;;  %s8375_s26 = sshll.u32 %s8639_s21, 3 }
0x2348   : > { %v4562_v24 = vpack.c.bf16 %v4491_v33, %v4491_v33  ;;  %v4580_v6 = vsel %vm804_vm0, %v4579_v14, %v4571_v58  ;;  %v4498_v14 = vld [vmem:[%s6299_s30 + $0x37] sm:$0x1]  ;;  %s5043_s23 = scalar_lea.hbm %s8641_s29, %s8375_s26  ;;  %s5059_s2 = scalar_lea.hbm %s8642_s14, %s8375_s26 }
0x2349   : > { %v4582_v55 = vsel %vm807_vm1, %v4581_v38, %v4580_v6  ;;  %v4499_v38 = vld [vmem:[%s6299_s30 + $0x3f] sm:$0x1] }
0x234a   : > { %5548 = vmatmul.msk.bf16.vlgmr.msra.gmra.mxu0 %vm849_vm7, %v4267_v59  ;;  %v4521_v59 = vunpack.c.l.b16 %v4505_v7  ;;  %v4578_v27 = vunpack.c.l.b16 %v4562_v24  ;;  %v4585_v7 = vrot.slane %v4575_v63, 4  ;;  %v4584_v21 = vsel %vm810_vm2, %v4583_v62, %v4582_v55 }
0x234b   : > { %4601 = vmatpush.bf16.msrb.mxu0 %v7876_v35 }
0x234c   : > { %v4532_v28 = vrot.slane %v4521_v59, 3  ;;  %v5796_v59 = vld [vmem:[%s8629_s3 + $0x10] sm:$0xff] }
0x234f   : > { %4602 = vmatpush.bf16.msrb.mxu0 %v7888_v29 }
0x2353   : > { %4603 = vmatpush.bf16.msrb.mxu0 %v7895_v19 }
0x2357   : > { %4604 = vmatpush.bf16.msrb.mxu0 %v7901_v10 }
0x235b   : > { %4727 = vmatpush.bf16.msra.mxu0 %v7907_v17 }
0x235f   : > { %4728 = vmatpush.bf16.msra.mxu0 %v7913_v57 }
0x2363   : > { %4729 = vmatpush.bf16.msra.mxu0 %v7919_v9 }
0x2367   : > { %4730 = vmatpush.bf16.msra.mxu0 %v7925_v22 }
0x23c7   : > { %v4285_v26 = vpop.f32.mrf.mxu0 }
0x23c8   : > { %v4289_v30 = vsel %vm6616_vm11, %v4285_v26, -1e+30  ;;  %v4525_v26 = vsel %vm804_vm0, %v4524_v32, %v4516_v13  ;;  %v4591_v13 = vrot.slane %v4578_v27, 1 }
0x23c9   : > { %v4290_v51 = vsel %vm1053_vm9, %v4289_v30, -inf }
0x23ca   : > { %4291 = vmax.xlane.f32.xlu2 %v4290_v51  ;;  %v4522_v51 = vunpack.c.l.b16 %v4506_v39 }
0x23cc   : > { %v4534_v61 = vrot.slane %v4522_v51, 2 }
0x23cf   : > { %v4287_v36 = vpop.f32.mrf.mxu0 }
0x23d0   : > { %v4527_v36 = vsel %vm807_vm1, %v4526_v43, %v4525_v26  ;;  %v5797_v26 = vld [vmem:[%s8629_s3 + $0x8] sm:$0xff] }
0x243d   : > { %v4292_v5 = vpop.xlane.xlu2 %4291 }
0x243e   : > { %v4293_v18 = vsub.f32 %v4289_v30, %v4292_v5  ;;  %v4528_v30 = vrot.slane %v4519_v40, 5  ;;  %v4530_v5 = vrot.slane %v4520_v50, 4  ;;  %v4586_v40 = vsel %vm813_vm3, %v4585_v7, %v4584_v21 }
0x243f   : > { %v4588_v32 = vsel %vm816_vm4, %v4587_v46, %v4586_v40  ;;  %v4616_v7 = vpack.c.bf16 %v4498_v14, %v4498_v14 }
0x2440   : > { %v4294_v34 = vmul.f32 1.442695, %v4293_v18  ;;  %v4561_v18 = vpack.c.bf16 %v4490_v25, %v4490_v25 }
0x2441   : > { %v4632_v21 = vunpack.c.l.b16 %v4616_v7 }
0x2442   : > { %5723 = vpow2.f32 %v4294_v34  ;;  %v4523_v34 = vunpack.c.l.b16 %v4507_v45  ;;  %v4577_v12 = vunpack.c.l.b16 %v4561_v18  ;;  %v5795_v45 = vld [vmem:[%s8629_s3 + $0x18] sm:$0xff] }
0x2444   : > { %v4536_v31 = vrot.slane %v4523_v34, 1  ;;  %v4589_v4 = vrot.slane %v4577_v12, 2  ;;  %v4497_v12 = vld [vmem:[%s6299_s30 + $0x2f] sm:$0x1] }
0x2446   : > { %v4590_v25 = vsel %vm819_vm5, %v4589_v4, %v4588_v32 }
0x2447   : > { %v4592_v37 = vsel %vm822_vm6, %v4591_v13, %v4590_v25 }
0x2448   : > { %v8168_v2 = vpop.eup %5723  ;;  %v4593_v39 = vpack.c.b16 %v4592_v37, %v4592_v37 }
0x2449   : > { %v4296_v52 = vsel %vm1053_vm9, %v8168_v2, 0.0 }
0x244a   : > { %4297 = vadd.xlane.f32.xlu0 %v4296_v52  ;;  %v4529_v52 = vsel %vm810_vm2, %v4528_v30, %v4527_v36  ;;  %5552 = vmatmul.msk.bf16.vlgmr.msrb.gmra.mxu0 %vm849_vm7, %v4593_v39 }
0x244b   : > { %v4531_v1 = vsel %vm813_vm3, %v4530_v5, %v4529_v52 }
0x244c   : > { %v4533_v56 = vsel %vm816_vm4, %v4532_v28, %v4531_v1 }
0x244d   : > { %v4535_v11 = vsel %vm819_vm5, %v4534_v61, %v4533_v56 }
0x244e   : > { %v4537_v49 = vsel %vm822_vm6, %v4536_v31, %v4535_v11 }
0x244f   : > { %v4538_v3 = vpack.c.b16 %v4537_v49, %v4537_v49 }
0x2451   : > { %5551 = vmatmul.msk.bf16.vlgmr.msrb.gmra.mxu3 %vm849_vm7, %v4538_v3  ;;  %v4613_v3 = vpack.c.bf16 %v4495_v0, %v4495_v0 }
0x24bd   : > { %v4298_v50 = vpop.xlane.xlu0 %4297 }
0x24be   : > { %5725 = vrcp.f32 %v4298_v50 }
0x24c4   : > { %v5726_v43 = vpop.eup %5725 }
0x24c5   : > { %v4300_v33 = vmul.f32 %v5726_v43, %v8168_v2  ;;  %v5798_v2 = vld [vmem:[%s8629_s3] sm:$0xff]  ;;  %s8389_s3 = scalar_lea.sflag [#allocation11], %s8593_s18 }
0x24c7   : > { %v4301_v53 = vpack.c.bf16 %v4300_v33, %v4300_v33  ;;  %v4606_v51 = vpop.f32.mrf.mxu0 }
0x24c8   : > { %v4607_v36 = vadd.f32 %v7853_v44, %v4606_v51 }
0x24c9   : > { %5549 = vmatmul.msk.bf16.vlgmr.msra.gmra.mxu1 %vm1053_vm9, %v4301_v53 }
0x24ca   : > { %4744 = vmatpush.bf16.msra.mxu1 %v5795_v45  ;;  %v4877_v5 = vrot.slane %v4607_v36, 1  ;;  %v4878_v18 = vrot.slane %v4607_v36, 2  ;;  %v4879_v34 = vrot.slane %v4607_v36, 3  ;;  %4891 = vst.msk [vmem:[%s6402_s17 + $0x7] sm:$0x1] %vm1262_vm8, %v4607_v36  ;;  %v4880_v52 = vrot.slane %v4607_v36, 4 }
0x24cb   : > { %v4881_v28 = vrot.slane %v4607_v36, 5  ;;  %v4667_v24 = vpack.c.bf16 %v4607_v36, %v4607_v36  ;;  %v4882_v1 = vrot.slane %v4607_v36, 6  ;;  %v4883_v58 = vrot.slane %v4607_v36, 7 }
0x24cc   : > { %4892 = vst.msk [vmem:[%s6402_s17 + $0xf] sm:$0x1] %vm1262_vm8, %v4877_v5 }
0x24cd   : > { %4893 = vst.msk [vmem:[%s6402_s17 + $0x17] sm:$0x1] %vm1262_vm8, %v4878_v18  ;;  %v4673_v44 = vsel %vm849_vm7, %v4667_v24, 0 }
0x24ce   : > { %4745 = vmatpush.bf16.msra.mxu1 %v5796_v59  ;;  %4894 = vst.msk [vmem:[%s6402_s17 + $0x1f] sm:$0x1] %vm1262_vm8, %v4879_v34  ;;  %4682 = vmatpush.bf16.xpose.msrb.mxu2 %v4673_v44  ;;  %v4644_v59 = vrot.slane %v4632_v21, 2 }
0x24cf   : > { %4895 = vst.msk [vmem:[%s6402_s17 + $0x27] sm:$0x1] %vm1262_vm8, %v4880_v52  ;;  %v4608_v23 = vpop.f32.mrf.mxu0 }
0x24d0   : > { %4896 = vst.msk [vmem:[%s6402_s17 + $0x2f] sm:$0x1] %vm1262_vm8, %v4881_v28 }
0x24d1   : > { %4897 = vst.msk [vmem:[%s6402_s17 + $0x37] sm:$0x1] %vm1262_vm8, %v4882_v1 }
0x24d2   : > { %4746 = vmatpush.bf16.msra.mxu1 %v5797_v26  ;;  %4898 = vst.msk [vmem:[%s6402_s17 + $0x3f] sm:$0x1] %vm1262_vm8, %v4883_v58  ;;  %s5878_s17 = scalar_lea.hbm %s8641_s29, 128 }
0x24d4   : > { %v4551_v30 = vpop.f32.mrf.mxu3 }
0x24d5   : > { %v4552_v8 = vadd.f32 %v7861_v41, %v4551_v30  ;;  %v4492_v41 = vld [vmem:[%s6299_s30 + $0x7] sm:$0x1] }
0x24d6   : > { %4747 = vmatpush.bf16.msra.mxu1 %v5798_v2  ;;  %v4610_v49 = vpack.c.bf16 %v4492_v41, %v4492_v41 }
0x24d7   : > { %v4665_v11 = vmul.f32 0.125, %v4552_v8 }
0x24d8   : > { %v4626_v6 = vunpack.c.l.b16 %v4610_v49 }
0x24d9   : > { %v4666_v63 = vpack.c.bf16 %v4665_v11, %v4665_v11 }
0x24dc   : > { %v4553_v61 = vpop.f32.mrf.mxu3 }
0x2546   : > { %v4317_v56 = vpop.f32.mrf.mxu1 }
0x2547   : > { %v4321_v31 = vpack.c.bf16 %v4317_v56, %v4317_v56 }
0x2549   : > { %5550 = vmatmul.msk.bf16.vlgmr.msra.gmra.mxu2 %vm849_vm7, %v4321_v31 }
0x254a   : > { %4757 = vmatpush.bf16.msra.mxu2 %v7876_v35  ;;  %v4493_v35 = vld [vmem:[%s6299_s30 + $0xf] sm:$0x1] }
0x254b   : > { %v4611_v27 = vpack.c.bf16 %v4493_v35, %v4493_v35 }
0x254e   : > { %v4319_v48 = vpop.f32.mrf.mxu1  ;;  %4758 = vmatpush.bf16.msra.mxu2 %v7888_v29  ;;  %v4494_v29 = vld [vmem:[%s6299_s30 + $0x17] sm:$0x1] }
0x2552   : > { %4759 = vmatpush.bf16.msra.mxu2 %v7895_v19  ;;  %v4496_v19 = vld [vmem:[%s6299_s30 + $0x27] sm:$0x1]  ;;  %s5046_s30 = sshll.u32 %s5043_s23, 4  ;;  %s5047_s30 = int_to_ptr.hbm [resolvable:$true] %s5046_s30 }
0x2553   : > { %v4614_v62 = vpack.c.bf16 %v4496_v19, %v4496_v19  ;;  %s5872_s4 = sshra.s32 %s5047_s30, 4  ;;  %s5873_s4 = int_to_ptr.hbm [resolvable:$true] %s5872_s4 }
0x2554   : > { %s5874_s5 = scalar_lea.hbm %s5873_s4, 64  ;;  %p5879_p12 = scmp.lt.s32.totalorder %s5873_s4, %s8641_s29 }
0x2555   : > { %v4630_v55 = vunpack.c.l.b16 %v4614_v62  ;;  %p5875_p5 = scmp.ne.s32.totalorder %s5873_s4, %s5874_s5  ;;  %p5880_p13 = scmp.lt.s32.totalorder %s5878_s17, %s5874_s5 }
0x2556   : > { %4760 = vmatpush.bf16.msra.mxu2 %v7901_v10  ;;  %v4612_v10 = vpack.c.bf16 %v4494_v29, %v4494_v29 }
0x2557   : > { %v4640_v37 = vrot.slane %v4630_v55, 4  ;;  %p5876_p6 = pnand %p5875_p5, %p6223_p9  ;;  %p5881_p0 = por %p5880_p13, %p5879_p12 }
0x2558   : > { %v4628_v46 = vunpack.c.l.b16 %v4612_v10 }
0x2559   : > { %5554 = vmatmul.msk.bf16.vlgmr.msrb.gmra.mxu2 %vm849_vm7, %v4666_v63  ;;  %p5877_p8 = pneg %p5876_p6 }
0x255a   : > { %4844 = vmatpush.bf16.msrb.mxu2 %v7907_v17  ;;  %v4615_v17 = vpack.c.bf16 %v4497_v12, %v4497_v12  ;;  %v4636_v32 = vrot.slane %v4628_v46, 6 }
0x255b   : > { %p5882_p1 = pnand %p5881_p0, %p5877_p8 }
0x255c   : > { %v4631_v4 = vunpack.c.l.b16 %v4615_v17 }
0x255e   : > { %4845 = vmatpush.bf16.msrb.mxu2 %v7913_v57  ;;  %v4617_v57 = vpack.c.bf16 %v4499_v38, %v4499_v38  ;;  %v4642_v33 = vrot.slane %v4631_v4, 3 }
0x2560   : > { %v4633_v40 = vunpack.c.l.b16 %v4617_v57 }
0x2562   : > { %4846 = vmatpush.bf16.msrb.mxu2 %v7919_v9  ;;  %v4627_v9 = vunpack.c.l.b16 %v4611_v27  ;;  %v4646_v2 = vrot.slane %v4633_v40, 1 }
0x2564   : > { %v4634_v13 = vrot.slane %v4627_v9, 7 }
0x2566   : > { %4847 = vmatpush.bf16.msrb.mxu2 %v7925_v22  ;;  %v4629_v22 = vunpack.c.l.b16 %v4613_v3  ;;  %v4635_v39 = vsel %vm804_vm0, %v4634_v13, %v4626_v6 }
0x2567   : > { %v4637_v43 = vsel %vm807_vm1, %v4636_v32, %v4635_v39 }
0x2568   : > { %v4638_v25 = vrot.slane %v4629_v22, 5 }
0x256a   : > { %v4639_v45 = vsel %vm810_vm2, %v4638_v25, %v4637_v43 }
0x256b   : > { %v4641_v26 = vsel %vm813_vm3, %v4640_v37, %v4639_v45 }
0x256c   : > { %v4643_v18 = vsel %vm816_vm4, %v4642_v33, %v4641_v26 }
0x256d   : > { %v4645_v52 = vsel %vm819_vm5, %v4644_v59, %v4643_v18 }
0x256e   : > { %v4647_v24 = vsel %vm822_vm6, %v4646_v2, %v4645_v52 }
0x256f   : > { %v4648_v61 = vpack.c.b16 %v4647_v24, %v4647_v24 }
0x2571   : > { %5553 = vmatmul.msk.bf16.vlgmr.msrb.gmra.mxu1 %vm849_vm7, %v4648_v61 }
0x25cc   : > { %v4334_v50 = vpop.f32.mrf.mxu2 }
0x25cd   : > { %v4335_v53 = vadd.f32 %v8015_v47, %v4334_v50 }
0x25cf   : > { %v4408_v30 = vrot.slane %v4335_v53, 1  ;;  %v4409_v51 = vrot.slane %v4335_v53, 2  ;;  %v4410_v36 = vrot.slane %v4335_v53, 3  ;;  %4422 = vst.msk [vmem:[%s6708_s15 + $0x6] sm:$0x1] %vm1262_vm8, %v4335_v53  ;;  %v4411_v5 = vrot.slane %v4335_v53, 4 }
0x25d0   : > { %v4412_v34 = vrot.slane %v4335_v53, 5  ;;  %v4413_v28 = vrot.slane %v4335_v53, 6  ;;  %v4414_v1 = vrot.slane %v4335_v53, 7 }
0x25d1   : > { %4423 = vst.msk [vmem:[%s6708_s15 + $0xe] sm:$0x1] %vm1262_vm8, %v4408_v30 }
0x25d2   : > { %4424 = vst.msk [vmem:[%s6708_s15 + $0x16] sm:$0x1] %vm1262_vm8, %v4409_v51  ;;  %v5799_v51 = vld [vmem:[%s8631_s8] ss:$0 sm:$0xff] }
0x25d3   : > { %4425 = vst.msk [vmem:[%s6708_s15 + $0x1e] sm:$0x1] %vm1262_vm8, %v4410_v36 }
0x25d4   : > { %4426 = vst.msk [vmem:[%s6708_s15 + $0x26] sm:$0x1] %vm1262_vm8, %v4411_v5  ;;  %v4336_v58 = vpop.f32.mrf.mxu2 }
0x25d5   : > { %4427 = vst.msk [vmem:[%s6708_s15 + $0x2e] sm:$0x1] %vm1262_vm8, %v4412_v34 }
0x25d6   : > { %4428 = vst.msk [vmem:[%s6708_s15 + $0x36] sm:$0x1] %vm1262_vm8, %v4413_v28  ;;  %v5800_v28 = vld [vmem:[%s8632_s7] ss:$0 sm:$0xff] }
0x25d7   : > { %4429 = vst.msk [vmem:[%s6708_s15 + $0x3e] sm:$0x1] %vm1262_vm8, %v4414_v1 }
0x25dc   : > { %v4684_v44 = vpop.f32.mrf.mxu2 }
0x25dd   : > { %v4688_v23 = vsel %vm1053_vm9, %v4684_v44, -inf }
0x25de   : > { %4689 = vmax.xlane.f32.xlu1 %v4688_v23 }
0x25e4   : > { %v4686_v56 = vpop.f32.mrf.mxu2 }
0x25ee   : > { %v4661_v48 = vpop.f32.mrf.mxu1 }
0x25ef   : > { %v4662_v11 = vadd.f32 %v8044_v60, %v4661_v48 }
0x25f1   : > { %v4900_v41 = vrot.slane %v4662_v11, 1  ;;  %v4901_v35 = vrot.slane %v4662_v11, 2  ;;  %v4902_v29 = vrot.slane %v4662_v11, 3  ;;  %4914 = vst.msk [vmem:[%s6474_s27 + $0x7] sm:$0x1] %vm1262_vm8, %v4662_v11  ;;  %v4903_v0 = vrot.slane %v4662_v11, 4 }
0x25f2   : > { %v4904_v19 = vrot.slane %v4662_v11, 5  ;;  %v4905_v12 = vrot.slane %v4662_v11, 6  ;;  %v4906_v49 = vrot.slane %v4662_v11, 7  ;;  %v4668_v38 = vpack.c.bf16 %v4662_v11, %v4662_v11 }
0x25f3   : > { %4915 = vst.msk [vmem:[%s6474_s27 + $0xf] sm:$0x1] %vm1262_vm8, %v4900_v41 }
0x25f4   : > { %4916 = vst.msk [vmem:[%s6474_s27 + $0x17] sm:$0x1] %vm1262_vm8, %v4901_v35  ;;  %v4704_v3 = vsel %vm1069_vm10, %v4668_v38, 0 }
0x25f5   : > { %4917 = vst.msk [vmem:[%s6474_s27 + $0x1f] sm:$0x1] %vm1262_vm8, %v4902_v29  ;;  %4713 = vmatpush.bf16.msra.mxu3 %v4704_v3 }
0x25f6   : > { %4918 = vst.msk [vmem:[%s6474_s27 + $0x27] sm:$0x1] %vm1262_vm8, %v4903_v0  ;;  %v4663_v27 = vpop.f32.mrf.mxu1 }
0x25f7   : > { %4919 = vst.msk [vmem:[%s6474_s27 + $0x2f] sm:$0x1] %vm1262_vm8, %v4904_v19 }
0x25f8   : > { %4920 = vst.msk [vmem:[%s6474_s27 + $0x37] sm:$0x1] %vm1262_vm8, %v4905_v12 }
0x25f9   : > { %4921 = vst.msk [vmem:[%s6474_s27 + $0x3f] sm:$0x1] %vm1262_vm8, %v4906_v49  ;;  %4772 = vmatpush.bf16.msrb.mxu3 %v8068_v16 }
0x25fd   : > { %4773 = vmatpush.bf16.msrb.mxu3 %v8074_v15 }
0x2601   : > { %4774 = vmatpush.bf16.msrb.mxu3 %v8080_v54 }
0x2605   : > { %4775 = vmatpush.bf16.msrb.mxu3 %v8086_v42 }
0x2651   : > { %v4690_v31 = vpop.xlane.xlu1 %4689 }
0x2652   : > { %v4691_v8 = vsub.f32 %v4684_v44, %v4690_v31 }
0x2654   : > { %v4692_v63 = vmul.f32 1.442695, %v4691_v8 }
0x2656   : > { %5727 = vpow2.f32 %v4692_v63 }
0x265c   : > { %v5728_v10 = vpop.eup %5727 }
0x265d   : > { %v4694_v14 = vsel %vm1053_vm9, %v5728_v10, 0.0 }
0x265e   : > { %4695 = vadd.xlane.f32.xlu2 %v4694_v14 }
0x26d1   : > { %v4696_v62 = vpop.xlane.xlu2 %4695 }
0x26d2   : > { %5729 = vrcp.f32 %v4696_v62 }
0x26d8   : > { %v5730_v17 = vpop.eup %5729 }
0x26d9   : > { %v4698_v7 = vmul.f32 %v5730_v17, %v5728_v10 }
0x26db   : > { %v4699_v57 = vpack.c.bf16 %v4698_v7, %v4698_v7 }
0x26dd   : > { %5555 = vmatmul.msk.bf16.vlgmr.msra.gmra.mxu3 %vm1053_vm9, %v4699_v57 }
0x26ed   : > { %5559 = vmatmul.msk.bf16.vlgmr.msrb.gmra.mxu3 %vm849_vm7, %v4668_v38 }
0x2760   : > { %v4715_v6 = vpop.f32.mrf.mxu3 }
0x2761   : > { %v4719_v16 = vpack.c.bf16 %v4715_v6, %v4715_v6 }
0x2763   : > { %5556 = vmatmul.msk.bf16.vlgmr.msra.gmra.mxu0 %vm849_vm7, %v4719_v16 }
0x2768   : > { %v4717_v15 = vpop.f32.mrf.mxu3 }
0x2770   : > { %v4777_v54 = vpop.f32.mrf.mxu3 }
0x2771   : > { %v4778_v42 = vadd.f32 %v8044_v60, %v4777_v54 }
0x2773   : > { %v4969_v9 = vrot.slane %v4778_v42, 1  ;;  %v4970_v46 = vrot.slane %v4778_v42, 2  ;;  %v4971_v22 = vrot.slane %v4778_v42, 3  ;;  %4983 = vst.msk [vmem:[%s6535_s20 + $0x7] sm:$0x1] %vm1262_vm8, %v4778_v42  ;;  %v4972_v55 = vrot.slane %v4778_v42, 4 }
0x2774   : > { %v4784_v4 = vpack.c.bf16 %v4778_v42, %v4778_v42  ;;  %v4973_v21 = vrot.slane %v4778_v42, 5  ;;  %v4974_v13 = vrot.slane %v4778_v42, 6  ;;  %v4975_v60 = vrot.slane %v4778_v42, 7 }
0x2775   : > { %4984 = vst.msk [vmem:[%s6535_s20 + $0xf] sm:$0x1] %vm1262_vm8, %v4969_v9 }
0x2776   : > { %4985 = vst.msk [vmem:[%s6535_s20 + $0x17] sm:$0x1] %vm1262_vm8, %v4970_v46  ;;  %v4821_v40 = vsel %vm1069_vm10, %v4784_v4, 0 }
0x2777   : > { %4986 = vst.msk [vmem:[%s6535_s20 + $0x1f] sm:$0x1] %vm1262_vm8, %v4971_v22  ;;  %4830 = vmatpush.bf16.msrb.mxu1 %v4821_v40 }
0x2778   : > { %4987 = vst.msk [vmem:[%s6535_s20 + $0x27] sm:$0x1] %vm1262_vm8, %v4972_v55  ;;  %v4779_v32 = vpop.f32.mrf.mxu3 }
0x2779   : > { %4988 = vst.msk [vmem:[%s6535_s20 + $0x2f] sm:$0x1] %vm1262_vm8, %v4973_v21 }
0x277a   : > { %4989 = vst.msk [vmem:[%s6535_s20 + $0x37] sm:$0x1] %vm1262_vm8, %v4974_v13 }
0x277b   : > { %4990 = vst.msk [vmem:[%s6535_s20 + $0x3f] sm:$0x1] %vm1262_vm8, %v4975_v60 }
0x27e0   : > { %v4732_v25 = vpop.f32.mrf.mxu0 }
0x27e1   : > { %v4733_v37 = vadd.f32 %v8015_v47, %v4732_v25 }
0x27e3   : > { %v4854_v39 = vrot.slane %v4733_v37, 1  ;;  %v4855_v50 = vrot.slane %v4733_v37, 2  ;;  %v4856_v43 = vrot.slane %v4733_v37, 3  ;;  %4868 = vst.msk [vmem:[%s6561_s13 + $0x7] sm:$0x1] %vm1262_vm8, %v4733_v37  ;;  %v4857_v33 = vrot.slane %v4733_v37, 4 }
0x27e4   : > { %v4736_v53 = vpack.c.bf16 %v4733_v37, %v4733_v37  ;;  %v4858_v45 = vrot.slane %v4733_v37, 5  ;;  %v4859_v59 = vrot.slane %v4733_v37, 6  ;;  %v4860_v47 = vrot.slane %v4733_v37, 7 }
0x27e5   : > { %4869 = vst.msk [vmem:[%s6561_s13 + $0xf] sm:$0x1] %vm1262_vm8, %v4854_v39 }
0x27e6   : > { %4870 = vst.msk [vmem:[%s6561_s13 + $0x17] sm:$0x1] %vm1262_vm8, %v4855_v50  ;;  %5557 = vmatmul.msk.bf16.vlgmr.msra.gmra.mxu1 %vm849_vm7, %v4736_v53  ;;  %5558 = vmatmul.msk.bf16.vlgmr.msra.gmra.mxu2 %vm849_vm7, %v4736_v53 }
0x27e7   : > { %4871 = vst.msk [vmem:[%s6561_s13 + $0x1f] sm:$0x1] %vm1262_vm8, %v4856_v43 }
0x27e8   : > { %4872 = vst.msk [vmem:[%s6561_s13 + $0x27] sm:$0x1] %vm1262_vm8, %v4857_v33  ;;  %v4734_v26 = vpop.f32.mrf.mxu0 }
0x27e9   : > { %4873 = vst.msk [vmem:[%s6561_s13 + $0x2f] sm:$0x1] %vm1262_vm8, %v4858_v45 }
0x27ea   : > { %4874 = vst.msk [vmem:[%s6561_s13 + $0x37] sm:$0x1] %vm1262_vm8, %v4859_v59 }
0x27eb   : > { %4875 = vst.msk [vmem:[%s6561_s13 + $0x3f] sm:$0x1] %vm1262_vm8, %v4860_v47 }
0x2863   : > { %v4749_v2 = vpop.f32.mrf.mxu1 }
0x2864   : > { %v4750_v24 = vadd.f32 %v5800_v28, %v4749_v2 }
0x2866   : > { %v4781_v31 = vmul.f32 0.125, %v4750_v24 }
0x2868   : > { %v4782_v48 = vpack.c.bf16 %v4781_v31, %v4781_v31 }
0x2869   : > { %v4762_v30 = vpop.f32.mrf.mxu2 }
0x286a   : > { %v4763_v36 = vadd.f32 %v5799_v51, %v4762_v30 }
0x286b   : > { %v4751_v5 = vpop.f32.mrf.mxu1 }
0x286c   : > { %v4946_v18 = vrot.slane %v4763_v36, 1  ;;  %v4947_v34 = vrot.slane %v4763_v36, 2  ;;  %v4948_v52 = vrot.slane %v4763_v36, 3  ;;  %4960 = vst.msk [vmem:[%s6587_s0 + $0x7] sm:$0x1] %vm1262_vm8, %v4763_v36  ;;  %v4949_v1 = vrot.slane %v4763_v36, 4 }
0x286d   : > { %v4783_v61 = vpack.c.bf16 %v4763_v36, %v4763_v36  ;;  %v4950_v58 = vrot.slane %v4763_v36, 5  ;;  %v4951_v44 = vrot.slane %v4763_v36, 6  ;;  %v4952_v56 = vrot.slane %v4763_v36, 7 }
0x286e   : > { %4961 = vst.msk [vmem:[%s6587_s0 + $0xf] sm:$0x1] %vm1262_vm8, %v4946_v18 }
0x286f   : > { %4962 = vst.msk [vmem:[%s6587_s0 + $0x17] sm:$0x1] %vm1262_vm8, %v4947_v34  ;;  %v4789_v23 = vsel %vm849_vm7, %v4783_v61, 0 }
0x2870   : > { %4963 = vst.msk [vmem:[%s6587_s0 + $0x1f] sm:$0x1] %vm1262_vm8, %v4948_v52  ;;  %4798 = vmatpush.bf16.xpose.msrb.mxu0 %v4789_v23 }
0x2871   : > { %4964 = vst.msk [vmem:[%s6587_s0 + $0x27] sm:$0x1] %vm1262_vm8, %v4949_v1  ;;  %v4764_v8 = vpop.f32.mrf.mxu2 }
0x2872   : > { %4965 = vst.msk [vmem:[%s6587_s0 + $0x2f] sm:$0x1] %vm1262_vm8, %v4950_v58 }
0x2873   : > { %4966 = vst.msk [vmem:[%s6587_s0 + $0x37] sm:$0x1] %vm1262_vm8, %v4951_v44 }
0x2874   : > { %4967 = vst.msk [vmem:[%s6587_s0 + $0x3f] sm:$0x1] %vm1262_vm8, %v4952_v56 }
0x2877   : > { %5560 = vmatmul.msk.bf16.vlgmr.msrb.gmra.mxu0 %vm849_vm7, %v4782_v48 }
0x28f4   : > { %v4800_v11 = vpop.f32.mrf.mxu0 }
0x28f5   : > { %v4804_v63 = vsel %vm6616_vm11, %v4800_v11, -1e+30 }
0x28f6   : > { %v4805_v41 = vsel %vm1053_vm9, %v4804_v63, -inf }
0x28f7   : > { %4806 = vmax.xlane.f32.xlu0 %v4805_v41 }
0x28fc   : > { %v4802_v35 = vpop.f32.mrf.mxu0 }
0x296a   : > { %v4807_v29 = vpop.xlane.xlu0 %4806 }
0x296b   : > { %v4808_v0 = vsub.f32 %v4804_v63, %v4807_v29 }
0x296d   : > { %v4809_v19 = vmul.f32 1.442695, %v4808_v0 }
0x296f   : > { %5731 = vpow2.f32 %v4809_v19 }
0x2975   : > { %v5732_v12 = vpop.eup %5731 }
0x2976   : > { %v4811_v49 = vsel %vm1053_vm9, %v5732_v12, 0.0 }
0x2977   : > { %4812 = vadd.xlane.f32.xlu1 %v4811_v49 }
0x29ea   : > { %v4813_v27 = vpop.xlane.xlu1 %4812 }
0x29eb   : > { %5733 = vrcp.f32 %v4813_v27 }
0x29f1   : > { %v5734_v10 = vpop.eup %5733 }
0x29f2   : > { %v4815_v20 = vmul.f32 %v5734_v10, %v5732_v12 }
0x29f4   : > { %v4816_v14 = vpack.c.bf16 %v4815_v20, %v4815_v20 }
0x29f6   : > { %5561 = vmatmul.msk.bf16.vlgmr.msrb.gmra.mxu1 %vm1053_vm9, %v4816_v14 }
0x2a73   : > { %v4832_v38 = vpop.f32.mrf.mxu1 }
0x2a74   : > { %v4836_v3 = vpack.c.bf16 %v4832_v38, %v4832_v38 }
0x2a76   : > { %5562 = vmatmul.msk.bf16.vlgmr.msrb.gmra.mxu2 %vm849_vm7, %v4836_v3 }
0x2a7b   : > { %v4834_v62 = vpop.f32.mrf.mxu1 }
0x2a7c   : > { %5885 = shalt.err (!%p5882_p1)
}
0x2a7d   : > { %s8596_s11 = smov 128   ;;  %s6086_s12 = smov 256  }
0x2a7e   : > { %s6087_s18 = smov 8   ;;  %s8405_s6 = sshll.u32 %s5059_s2, 4 }
0x2a7f   : > { %5598 = dma.vmem_to_hbm [thread:$0]  (%p6223_p9), %s5045_s16, 1024, %s5047_s30, %s8389_s3, %s8596_s11, %s6086_s12, %s6087_s18  }
0x2a80   : > { %8643 = sst [smem:[#allocation31_spill]] %s8405_s6  ;;  %s5028_s17 = sshll.u32 %s6561_s13, 4  ;;  %s5029_s17 = int_to_ptr.vmem [resolvable:$true] %s5028_s17 }
0x2a81   : > { %s8644_s1 = sld [smem:[#allocation43_spill]]  ;;  %s4992_s7 = scalar_lea.sflag [#allocation6], %s6281_s10 }
0x2a87   : > { %s5027_s28 = scalar_lea.hbm %s8644_s1, %s8375_s26  ;;  %s5906_s30 = scalar_lea.hbm %s8644_s1, 128 }
0x2a88   : > { %s5030_s23 = sshll.u32 %s5027_s28, 4  ;;  %s5031_s23 = int_to_ptr.hbm [resolvable:$true] %s5030_s23 }
0x2a89   : > { %s5900_s8 = sshra.s32 %s5031_s23, 4  ;;  %s5901_s8 = int_to_ptr.hbm [resolvable:$true] %s5900_s8 }
0x2a8a   : > { %s5902_s9 = scalar_lea.hbm %s5901_s8, 64  ;;  %p5907_p7 = scmp.lt.s32.totalorder %s5901_s8, %s8644_s1 }
0x2a8b   : > { %p5903_p2 = scmp.ne.s32.totalorder %s5901_s8, %s5902_s9  ;;  %p5908_p5 = scmp.lt.s32.totalorder %s5906_s30, %s5902_s9 }
0x2a8d   : > { %p5904_p3 = pnand %p5903_p2, %p6223_p9  ;;  %p5909_p6 = por %p5908_p5, %p5907_p7 }
0x2a8f   : > { %p5905_p4 = pneg %p5904_p3 }
0x2a91   : > { %p5910_p8 = pnand %p5909_p6, %p5905_p4 }
0x2a93   : > { %5913 = shalt.err (!%p5910_p8)
}
0x2a94   : > { %s8645_s13 = smov 128   ;;  %s8646_s4 = sld [smem:[#allocation31_spill]] }
0x2a95   : > { %5597 = dma.vmem_to_hbm [thread:$0]  (%p6223_p9), %s5029_s17, 1024, %s5031_s23, %s4992_s7, %s8645_s13, %s6086_s12, %s6087_s18  }
0x2a96   : > { %s5060_s5 = sshll.u32 %s6474_s27, 4  ;;  %s5934_s6 = scalar_lea.hbm %s8642_s14, 128  ;;  %s5061_s5 = int_to_ptr.vmem [resolvable:$true] %s5060_s5 }
0x2a9a   : > { %s8647_s28 = int_to_ptr.hbm [resolvable:$true] %s8646_s4 }
0x2a9b   : > { %s5928_s2 = sshra.s32 %s8647_s28, 4  ;;  %s5929_s2 = int_to_ptr.hbm [resolvable:$true] %s5928_s2 }
0x2a9c   : > { %s5930_s11 = scalar_lea.hbm %s5929_s2, 64  ;;  %p5935_p1 = scmp.lt.s32.totalorder %s5929_s2, %s8642_s14 }
0x2a9d   : > { %p5931_p12 = scmp.ne.s32.totalorder %s5929_s2, %s5930_s11  ;;  %p5936_p2 = scmp.lt.s32.totalorder %s5934_s6, %s5930_s11 }
0x2a9f   : > { %p5932_p13 = pnand %p5931_p12, %p6223_p9  ;;  %p5937_p3 = por %p5936_p2, %p5935_p1 }
0x2aa1   : > { %p5933_p0 = pneg %p5932_p13 }
0x2aa3   : > { %p5938_p4 = pnand %p5937_p3, %p5933_p0 }
0x2aa5   : > { %5941 = shalt.err (!%p5938_p4)
}
0x2aa6   : > { %s8648_s7 = smov %s8647_s28  ;;  %s8649_s23 = sld [smem:[#allocation48_spill]] }
0x2aa7   : > { %5599 = dma.vmem_to_hbm [thread:$0]  (%p6223_p9), %s5061_s5, 1024, %s8648_s7, %s8389_s3, %s8645_s13, %s6086_s12, %s6087_s18  }
0x2aa8   : > { %s5108_s11 = sshll.u32 %s6535_s20, 4  ;;  %s5017_s9 = scalar_lea.sflag [#allocation17], %s6281_s10  ;;  %s5109_s11 = int_to_ptr.vmem [resolvable:$true] %s5108_s11 }
0x2aac   : > { %s8650_s28 = smov %s8649_s23  ;;  %s5107_s2 = scalar_lea.hbm %s8649_s23, %s8375_s26 }
0x2aad   : > { %s5110_s8 = sshll.u32 %s5107_s2, 4  ;;  %s5962_s3 = scalar_lea.hbm %s8650_s28, 128  ;;  %s5111_s8 = int_to_ptr.hbm [resolvable:$true] %s5110_s8 }
0x2aae   : > { %s5956_s6 = sshra.s32 %s5111_s8, 4  ;;  %s5957_s6 = int_to_ptr.hbm [resolvable:$true] %s5956_s6 }
0x2aaf   : > { %s5958_s16 = scalar_lea.hbm %s5957_s6, 64  ;;  %p5963_p8 = scmp.lt.s32.totalorder %s5957_s6, %s8650_s28 }
0x2ab0   : > { %p5959_p7 = scmp.ne.s32.totalorder %s5957_s6, %s5958_s16  ;;  %p5964_p12 = scmp.lt.s32.totalorder %s5962_s3, %s5958_s16 }
0x2ab2   : > { %p5960_p5 = pnand %p5959_p7, %p6223_p9  ;;  %p5965_p13 = por %p5964_p12, %p5963_p8 }
0x2ab4   : > { %p5961_p6 = pneg %p5960_p5 }
0x2ab6   : > { %p5966_p0 = pnand %p5965_p13, %p5961_p6 }
0x2ab8   : > { %5969 = shalt.err (!%p5966_p0)
}
0x2ab9   : > { %5602 = dma.vmem_to_hbm [thread:$0]  (%p6223_p9), %s5109_s11, 1024, %s5111_s8, %s5017_s9, %s8645_s13, %s6086_s12, %s6087_s18  }
0x2aba   : > { %v5801_v7 = vld [vmem:[%s8636_s19] ss:$0 sm:$0xff]  ;;  %s8651_s23 = sld [smem:[#allocation46_spill]]  ;;  %s5076_s4 = sshll.u32 %s6708_s15, 4  ;;  %s5077_s4 = int_to_ptr.vmem [resolvable:$true] %s5076_s4 }
0x2abb   : > { %s8653_s9 = sld [smem:[#allocation47_spill]]  ;;  %s8654_s5 = sand.u32 1, %s8639_s21  }
0x2abc   : > { %s8504_s7 = scalar_lea.sflag [#allocation14], %s8654_s5 }
0x2ac0   : > { %s8652_s2 = smov %s8651_s23  ;;  %s5075_s6 = scalar_lea.hbm %s8651_s23, %s8375_s26 }
0x2ac1   : > { %s5091_s16 = scalar_lea.hbm %s8653_s9, %s8375_s26  ;;  %s8483_s30 = sshll.u32 %s5075_s6, 4  ;;  %s5079_s30 = int_to_ptr.hbm [resolvable:$true] %s8483_s30 }
0x2ac2   : > { %s8487_s3 = sshll.u32 %s5091_s16, 4  ;;  %s5092_s26 = sshll.u32 %s6587_s0, 4  ;;  %s5095_s3 = int_to_ptr.hbm [resolvable:$true] %s8487_s3  ;;  %s8498_s26 = int_to_ptr.vmem [resolvable:$true] %s5092_s26 }
0x2ac3   : > { %s5984_s10 = sshra.s32 %s5079_s30, 4  ;;  %s5990_s17 = scalar_lea.hbm %s8652_s2, 128  ;;  %s5985_s10 = int_to_ptr.hbm [resolvable:$true] %s5984_s10 }
0x2ac4   : > { %s5986_s0 = scalar_lea.hbm %s5985_s10, 64  ;;  %p5991_p4 = scmp.lt.s32.totalorder %s5985_s10, %s8652_s2 }
0x2ac5   : > { %p5987_p1 = scmp.ne.s32.totalorder %s5985_s10, %s5986_s0  ;;  %p5992_p7 = scmp.lt.s32.totalorder %s5990_s17, %s5986_s0 }
0x2ac7   : > { %p5988_p2 = pnand %p5987_p1, %p6223_p9  ;;  %p5993_p5 = por %p5992_p7, %p5991_p4 }
0x2ac9   : > { %p5989_p3 = pneg %p5988_p2 }
0x2acb   : > { %p5994_p6 = pnand %p5993_p5, %p5989_p3 }
0x2af9   : > { %v4849_v17 = vpop.f32.mrf.mxu2 }
0x2afa   : > { %v4850_v57 = vadd.f32 %v5801_v7, %v4849_v17 }
0x2afc   : > { %v4923_v6 = vrot.slane %v4850_v57, 1  ;;  %v4924_v16 = vrot.slane %v4850_v57, 2  ;;  %v4925_v15 = vrot.slane %v4850_v57, 3  ;;  %4937 = vst.msk [vmem:[%s6708_s15 + $0x7] sm:$0x1] %vm1262_vm8, %v4850_v57  ;;  %v4926_v54 = vrot.slane %v4850_v57, 4 }
0x2afd   : > { %v4927_v42 = vrot.slane %v4850_v57, 5  ;;  %v4928_v9 = vrot.slane %v4850_v57, 6  ;;  %v4929_v46 = vrot.slane %v4850_v57, 7 }
0x2afe   : > { %4938 = vst.msk [vmem:[%s6708_s15 + $0xf] sm:$0x1] %vm1262_vm8, %v4923_v6 }
0x2aff   : > { %4939 = vst.msk [vmem:[%s6708_s15 + $0x17] sm:$0x1] %vm1262_vm8, %v4924_v16 }
0x2b00   : > { %4940 = vst.msk [vmem:[%s6708_s15 + $0x1f] sm:$0x1] %vm1262_vm8, %v4925_v15 }
0x2b01   : > { %4941 = vst.msk [vmem:[%s6708_s15 + $0x27] sm:$0x1] %vm1262_vm8, %v4926_v54  ;;  %v4851_v22 = vpop.f32.mrf.mxu2 }
0x2b02   : > { %4942 = vst.msk [vmem:[%s6708_s15 + $0x2f] sm:$0x1] %vm1262_vm8, %v4927_v42 }
0x2b03   : > { %4943 = vst.msk [vmem:[%s6708_s15 + $0x37] sm:$0x1] %vm1262_vm8, %v4928_v9 }
0x2b04   : > { %4944 = vst.msk [vmem:[%s6708_s15 + $0x3f] sm:$0x1] %vm1262_vm8, %v4929_v46 }
0x2b05   : > { %5997 = shalt.err (!%p5994_p6)
}
0x2b06   : > { %5600 = dma.vmem_to_hbm [thread:$0]  (%p6223_p9), %s5077_s4, 1024, %s5079_s30, %s8504_s7, %s8645_s13, %s6086_s12, %s6087_s18  }
0x2b07   : > { %s6012_s15 = sshra.s32 %s5095_s3, 4  ;;  %s6018_s16 = scalar_lea.hbm %s8653_s9, 128  ;;  %s6013_s15 = int_to_ptr.hbm [resolvable:$true] %s6012_s15 }
0x2b08   : > { %s6014_s21 = scalar_lea.hbm %s6013_s15, 64  ;;  %p6019_p0 = scmp.lt.s32.totalorder %s6013_s15, %s8653_s9 }
0x2b09   : > { %p6015_p8 = scmp.ne.s32.totalorder %s6013_s15, %s6014_s21  ;;  %p6020_p1 = scmp.lt.s32.totalorder %s6018_s16, %s6014_s21 }
0x2b0b   : > { %p6016_p12 = pnand %p6015_p8, %p6223_p9  ;;  %p6021_p2 = por %p6020_p1, %p6019_p0 }
0x2b0d   : > { %p6017_p13 = pneg %p6016_p12 }
0x2b0f   : > { %p6022_p3 = pnand %p6021_p2, %p6017_p13 }
0x2b11   : > { %6025 = shalt.err (!%p6022_p3)
}
0x2b12   : > { %5601 = dma.vmem_to_hbm [thread:$0]  (%p6223_p9), %s8498_s26, 1024, %s5095_s3, %s8504_s7, %s8645_s13, %s6086_s12, %s6087_s18  }
0x2b13 PF: > { %s8655_s4 = sld [smem:[#allocation24_spill]]  ;;  %p5610_p4 = pnand %p5386_p11, %p6227_p10 }
0x2b15   : > { %p5611_p7 = pneg %p5610_p4 }
0x2b19   : > { %s5125_s0 = sand.u32 1, %s8655_s4  }
0x2b1a   : > { %s5126_s20 = scalar_lea.sflag [#allocation6], %s5125_s0 }
0x2b1b   : > { %6051 = dma.done.wait (%p5611_p7), %s5126_s20, 1024  }
0x2b1c   : > { %6053 = vsyncadd (%p5611_p7), %s5126_s20, 4294966272  ;;  %s8657_s25 = sadd.s32 4294967294, %s6080_s24  }
0x2b1d   : > { %s5135_s27 = sand.u32 1, %s8657_s25  }
0x2b1e   : > { %s5136_s17 = scalar_lea.sflag [#allocation11], %s5135_s27 }
0x2b1f   : > { %6055 = dma.done.wait (%p5611_p7), %s5136_s17, 2048  }
0x2b20   : > { %6057 = vsyncadd (%p5611_p7), %s5136_s17, 4294965248  ;;  %s5156_s23 = scalar_lea.sflag [#allocation14], %s5135_s27 }
0x2b21   : > { %6059 = dma.done.wait (%p5611_p7), %s5156_s23, 2048  }
0x2b22   : > { %6061 = vsyncadd (%p5611_p7), %s5156_s23, 4294965248  ;;  %s5176_s18 = scalar_lea.sflag [#allocation17], %s5125_s0 }
0x2b23   : > { %6063 = dma.done.wait (%p5611_p7), %s5176_s18, 1024  }
0x2b24   : > { %6065 = vsyncadd (%p5611_p7), %s5176_s18, 4294966272  ;;  %s8658_s24 = sld [smem:[#allocation27_spill]]  ;;  %s8661_s21 = smov %s6072_s22 }
0x2b25   : > { %s8659_s12 = sld [smem:[#allocation25_spill]] }
0x2b26   : > { %s8660_s23 = sld [smem:[#allocation28_spill]] }
0x2b2a   : > { %p42_p9 = scmp.ge.s32.totalorder %s8658_s24, 4  }
0x2b2b   : > { %s8662_s22 = smov %s8659_s12 }
0x2b2c   :  { %44 = sbr.rel (!%p42_p9) target bundleno = 31 (0x1f), region = 249 }
0x2b31   :  { %5182 = vsyncpa [#allocation5], 1 }
0x2b32   :  { %5184 = vsyncpa [#allocation5 + $0x1], 1 }
0x2b33   :  { %5185 = vsyncpa [#allocation8], 1 }
0x2b34   :  { %5187 = vsyncpa [#allocation8 + $0x1], 1 }
0x2b35   :  { %5188 = vsyncpa [#allocation6], 1 }
0x2b36   :  { %5190 = vsyncpa [#allocation6 + $0x1], 1 }
0x2b37   :  { %5191 = vsyncpa [#allocation11], 1 }
0x2b38   :  { %5193 = vsyncpa [#allocation11 + $0x1], 1 }
0x2b39   :  { %5194 = vsyncpa [#allocation14], 1 }
0x2b3a   :  { %5196 = vsyncpa [#allocation14 + $0x1], 1 }
0x2b3b   :  { %5197 = vsyncpa [#allocation17], 1 }
0x2b3c   :  { %5199 = vsyncpa [#allocation17 + $0x1], 1 }

</bundles_post_ra>
